<compile_context>
chip_gen: v7x
topology: tpu7x:2x2x1
jax: 0.10.0
libtpu: 0.0.40
codegen_flags: <defaults>
</compile_context>

<pallas_src>
import functools
import numpy as np
import jax
import jax.numpy as jnp
from jax.experimental import pallas as pl
from jax.experimental.pallas import tpu as pltpu


def _round_up(x, m):
    return ((x + m - 1) // m) * m


# ----------------------------------------------------------------------------
# Row-tiled linear kernel (hoisted input projections, MXU-friendly)
# ----------------------------------------------------------------------------

def _linear_kernel(x_ref, w_ref, b_ref, o_ref, *, activation):
    y = jnp.dot(x_ref[...], w_ref[...], preferred_element_type=jnp.float32) + b_ref[...]
    if activation == "tanh":
        y = jnp.tanh(y)
    o_ref[...] = y


def tiled_linear(x, w, b, activation=None, row_tile=512):
    """y = act(x @ w + b); rows tiled over a 'parallel' grid."""
    M, K = x.shape
    N = w.shape[1]
    tm = min(row_tile, _round_up(M, 8))
    Mp = _round_up(M, tm)
    if Mp != M:
        x = jnp.pad(x, ((0, Mp - M), (0, 0)))
    out = pl.pallas_call(
        functools.partial(_linear_kernel, activation=activation),
        out_shape=jax.ShapeDtypeStruct((Mp, N), jnp.float32),
        grid=(Mp // tm,),
        in_specs=[
            pl.BlockSpec((tm, K), lambda i: (i, 0)),
            pl.BlockSpec((K, N), lambda i: (0, 0)),
            pl.BlockSpec((1, N), lambda i: (0, 0)),
        ],
        out_specs=pl.BlockSpec((tm, N), lambda i: (i, 0)),
        compiler_params=pltpu.CompilerParams(dimension_semantics=("parallel",)),
    )(x, w, b.reshape(1, -1))
    return out[:M]


# ----------------------------------------------------------------------------
# Encoder LSTM layer: chunk of timesteps per grid step, h/c in VMEM scratch.
# Input gates x@W_ih + b are precomputed (hoisted); per step only h@W_hh stays
# on the serial critical path.
# ----------------------------------------------------------------------------

def _lstm_chunk_kernel(xg_ref, whh_ref, h_out_ref, h_st, c_st, *, tchunk):
    U = h_st.shape[1]

    @pl.when(pl.program_id(0) == 0)
    def _():
        h_st[...] = jnp.zeros_like(h_st)
        c_st[...] = jnp.zeros_like(c_st)

    h = h_st[...]
    c = c_st[...]
    for t in range(tchunk):                       # statically unrolled chunk
        gates = xg_ref[t] + jnp.dot(h, whh_ref[...],
                                    preferred_element_type=jnp.float32)   # (B, 4U)
        i_g = jax.nn.sigmoid(gates[:, 0 * U:1 * U])
        f_g = jax.nn.sigmoid(gates[:, 1 * U:2 * U])
        g_g = jnp.tanh(gates[:, 2 * U:3 * U])
        o_g = jax.nn.sigmoid(gates[:, 3 * U:4 * U])
        c = f_g * c + i_g * g_g
        h = o_g * jnp.tanh(c)
        h_out_ref[t] = h
    h_st[...] = h
    c_st[...] = c


def lstm_layer(x_gates_tbd, w_hh, tchunk=8):
    """x_gates_tbd: (T, B, 4U) = x@W_ih + b, time-major.  Returns (T, B, U)."""
    T, B, G = x_gates_tbd.shape
    U = w_hh.shape[0]
    tchunk = min(tchunk, T)
    Tp = _round_up(T, tchunk)
    if Tp != T:   # padded tail steps come after valid frames -> harmless, sliced off
        x_gates_tbd = jnp.pad(x_gates_tbd, ((0, Tp - T), (0, 0), (0, 0)))
    out = pl.pallas_call(
        functools.partial(_lstm_chunk_kernel, tchunk=tchunk),
        out_shape=jax.ShapeDtypeStruct((Tp, B, U), jnp.float32),
        grid=(Tp // tchunk,),
        in_specs=[
            pl.BlockSpec((tchunk, B, G), lambda s: (s, 0, 0)),
            pl.BlockSpec((U, G), lambda s: (0, 0)),
        ],
        out_specs=pl.BlockSpec((tchunk, B, U), lambda s: (s, 0, 0)),
        scratch_shapes=[pltpu.VMEM((B, U), jnp.float32),
                        pltpu.VMEM((B, U), jnp.float32)],
        compiler_params=pltpu.CompilerParams(dimension_semantics=("arbitrary",)),
    )(x_gates_tbd, w_hh)
    return out[:T]


# ----------------------------------------------------------------------------
# Decoder: AttDot + LSTMCell + output projection, chunk of output steps per
# grid step, (z, c) in VMEM scratch.  Attention score/context run on the MXU.
# ----------------------------------------------------------------------------

def _decoder_chunk_kernel(eyg_ref, hs_ref, pre_ref, mask_ref,
                          wdec_ref, bdec_ref, wihc_ref, whh_ref,
                          wout_ref, bout_ref,
                          logits_ref, z_st, c_st, *, lchunk):
    B, U = z_st.shape
    A = wdec_ref.shape[1]
    E = hs_ref.shape[2]

    @pl.when(pl.program_id(0) == 0)
    def _():
        z_st[...] = jnp.zeros_like(z_st)
        c_st[...] = jnp.zeros_like(c_st)

    z = z_st[...]
    c = c_st[...]
    for t in range(lchunk):                       # statically unrolled chunk
        # --- AttDot (scaling = 2.0); scores & context as MXU contractions ---
        d = jnp.tanh(jnp.dot(z, wdec_ref[...],
                             preferred_element_type=jnp.float32) + bdec_ref[...])  # (B, A)
        e = jnp.einsum('bqa,bta->bqt', d.reshape(B, 1, A), pre_ref[...],
                       preferred_element_type=jnp.float32)                         # (B, 1, T)
        e = 2.0 * e + mask_ref[...]                     # -inf at padded frames
        e = e - jnp.max(e, axis=-1, keepdims=True)
        p = jnp.exp(e)
        att_w = p * pl.reciprocal(jnp.sum(p, axis=-1, keepdims=True), approx=True)
        att_c = jnp.einsum('bqt,bte->bqe', att_w, hs_ref[...],
                           preferred_element_type=jnp.float32).reshape(B, E)       # (B, E)

        # --- LSTMCell on [embed, context]; embed@W_ih_e + bias precomputed ---
        gates = (eyg_ref[t]
                 + jnp.dot(att_c, wihc_ref[...], preferred_element_type=jnp.float32)
                 + jnp.dot(z, whh_ref[...], preferred_element_type=jnp.float32))   # (B, 4U)
        i_g = jax.nn.sigmoid(gates[:, 0 * U:1 * U])
        f_g = jax.nn.sigmoid(gates[:, 1 * U:2 * U])
        g_g = jnp.tanh(gates[:, 2 * U:3 * U])
        o_g = jax.nn.sigmoid(gates[:, 3 * U:4 * U])
        c = f_g * c + i_g * g_g
        z = o_g * jnp.tanh(c)

        # --- output projection (lane-dense: odim padded to multiple of 128) ---
        logits_ref[t] = (jnp.dot(z, wout_ref[...],
                                 preferred_element_type=jnp.float32) + bout_ref[...])
    z_st[...] = z
    c_st[...] = c


def decoder_steps(ey_gates_lb, hs_pad, pre_enc, neg_mask3,
                  w_att_dec, b_att_dec, w_ih_c, w_hh, w_out_p, b_out_p, lchunk=4):
    """ey_gates_lb: (L, B, 4U) precomputed embed@W_ih_e + bias.  Returns (L, B, odim_p)."""
    L, B, G = ey_gates_lb.shape
    dunits = w_hh.shape[0]
    _, T, eprojs = hs_pad.shape
    adim = pre_enc.shape[2]
    odim_p = w_out_p.shape[1]
    lchunk = min(lchunk, L)
    Lp = _round_up(L, lchunk)
    if Lp != L:   # padded tail steps come after real steps -> harmless, sliced off
        ey_gates_lb = jnp.pad(ey_gates_lb, ((0, Lp - L), (0, 0), (0, 0)))
    out = pl.pallas_call(
        functools.partial(_decoder_chunk_kernel, lchunk=lchunk),
        out_shape=jax.ShapeDtypeStruct((Lp, B, odim_p), jnp.float32),
        grid=(Lp // lchunk,),
        in_specs=[
            pl.BlockSpec((lchunk, B, G), lambda s: (s, 0, 0)),      # ey gate slab
            pl.BlockSpec((B, T, eprojs), lambda s: (0, 0, 0)),      # hs_pad (grid-invariant)
            pl.BlockSpec((B, T, adim), lambda s: (0, 0, 0)),        # pre_enc (grid-invariant)
            pl.BlockSpec((B, 1, T), lambda s: (0, 0, 0)),           # -inf pad mask
            pl.BlockSpec((dunits, adim), lambda s: (0, 0)),         # mlp_dec W
            pl.BlockSpec((1, adim), lambda s: (0, 0)),              # mlp_dec b
            pl.BlockSpec((eprojs, G), lambda s: (0, 0)),            # W_ih (context part)
            pl.BlockSpec((dunits, G), lambda s: (0, 0)),            # W_hh
            pl.BlockSpec((dunits, odim_p), lambda s: (0, 0)),       # output W (padded)
            pl.BlockSpec((1, odim_p), lambda s: (0, 0)),            # output b (padded)
        ],
        out_specs=pl.BlockSpec((lchunk, B, odim_p), lambda s: (s, 0, 0)),
        scratch_shapes=[pltpu.VMEM((B, dunits), jnp.float32),
                        pltpu.VMEM((B, dunits), jnp.float32)],
        compiler_params=pltpu.CompilerParams(dimension_semantics=("arbitrary",)),
    )(ey_gates_lb, hs_pad, pre_enc, neg_mask3,
      w_att_dec, b_att_dec.reshape(1, -1), w_ih_c, w_hh,
      w_out_p, b_out_p.reshape(1, -1))
    return out[:L]


# ----------------------------------------------------------------------------
# Model wrapper (glue in plain JAX)
# ----------------------------------------------------------------------------

def init_params(key, idim, odim, elayers, eunits, eprojs, adim, dunits):
    ks = iter(jax.random.split(key, 32))

    def lecun(k, shape, fan_in):
        return jax.random.normal(k, shape, jnp.float32) * (fan_in ** -0.5)

    p = {}
    # encoder stacked LSTM (weights stored transposed: (in, 4U); gate order i,f,g,o)
    p['enc_layers'] = []
    din = idim
    for _ in range(elayers):
        p['enc_layers'].append(dict(
            w_ih=lecun(next(ks), (din, 4 * eunits), din),
            w_hh=lecun(next(ks), (eunits, 4 * eunits), eunits),
            b=jnp.zeros((4 * eunits,), jnp.float32),
        ))
        din = eunits
    # encoder l_last projection
    p['enc_w_last'] = lecun(next(ks), (eunits, eprojs), eunits)
    p['enc_b_last'] = jnp.zeros((eprojs,), jnp.float32)
    # AttDot
    p['att_w_enc'] = lecun(next(ks), (eprojs, adim), eprojs)
    p['att_b_enc'] = jnp.zeros((adim,), jnp.float32)
    p['att_w_dec'] = lecun(next(ks), (dunits, adim), dunits)
    p['att_b_dec'] = jnp.zeros((adim,), jnp.float32)
    # decoder embedding ~ N(0, 1)  (chainer-style)
    p['embed'] = jax.random.normal(next(ks), (odim, dunits), jnp.float32)
    # decoder LSTMCell, input = [embed(dunits), context(eprojs)]
    p['dec_w_ih_e'] = lecun(next(ks), (dunits, 4 * dunits), dunits + eprojs)
    p['dec_w_ih_c'] = lecun(next(ks), (eprojs, 4 * dunits), dunits + eprojs)
    p['dec_w_hh'] = lecun(next(ks), (dunits, 4 * dunits), dunits)
    b = np.zeros((4 * dunits,), np.float32)
    b[dunits:2 * dunits] = 1.0          # set_forget_bias_to_one on bias_ih
    p['dec_b_lstm'] = jnp.asarray(b)
    # output projection
    p['dec_w_out'] = lecun(next(ks), (dunits, odim), dunits)
    p['dec_b_out'] = jnp.zeros((odim,), jnp.float32)
    return p


def e2e_forward(p, xs_pad, ilens, ys_in_pad, ys_out_pad, len_scale,
                asr_weight=0.0, mt_weight=0.0, tchunk=8, lchunk=4):
    B, T, _ = xs_pad.shape
    L = ys_in_pad.shape[1]
    eunits = p['enc_layers'][0]['w_hh'].shape[0]
    eprojs = p['enc_w_last'].shape[1]
    adim = p['att_w_enc'].shape[1]
    dunits = p['att_w_dec'].shape[0]
    odim = p['dec_w_out'].shape[1]
    odim_p = _round_up(odim, 128)       # lane-dense logits store

    # ---------------- Encoder ----------------
    h = jnp.transpose(xs_pad.astype(jnp.float32), (1, 0, 2))          # (T, B, idim)
    for lp in p['enc_layers']:
        din = h.shape[-1]
        # hoisted input projection: one big MXU matmul for all T
        xg = tiled_linear(h.reshape(T * B, din), lp['w_ih'], lp['b'])
        h = lstm_layer(xg.reshape(T, B, 4 * eunits), lp['w_hh'], tchunk=tchunk)
    h_proj = tiled_linear(h.reshape(T * B, eunits),
                          p['enc_w_last'], p['enc_b_last'], activation="tanh")
    h_proj = jnp.transpose(h_proj.reshape(T, B, eprojs), (1, 0, 2))   # (B, T, eprojs)
    valid = (jnp.arange(T)[None, :] < ilens[:, None])                 # (B, T)
    hs_pad = h_proj * valid[:, :, None].astype(jnp.float32)           # zero pad frames

    # ---------------- Decoder (attention CE) ----------------
    pre_enc = tiled_linear(hs_pad.reshape(B * T, eprojs),
                           p['att_w_enc'], p['att_b_enc'],
                           activation="tanh").reshape(B, T, adim)
    neg_mask3 = jnp.where(valid, 0.0, -jnp.inf).astype(jnp.float32)[:, None, :]  # (B,1,T)

    eys = p['embed'][ys_in_pad]                                       # (B, L, dunits)
    # hoisted decoder input projection (embed part of the LSTMCell gates) + bias
    ey_g = tiled_linear(eys.reshape(B * L, dunits), p['dec_w_ih_e'], p['dec_b_lstm'])
    ey_g = jnp.transpose(ey_g.reshape(B, L, 4 * dunits), (1, 0, 2))   # (L, B, 4U)

    w_out_p = jnp.pad(p['dec_w_out'], ((0, 0), (0, odim_p - odim)))
    b_out_p = jnp.pad(p['dec_b_out'], ((0, odim_p - odim),))

    logits = decoder_steps(ey_g, hs_pad, pre_enc, neg_mask3,
                           p['att_w_dec'], p['att_b_dec'],
                           p['dec_w_ih_c'], p['dec_w_hh'],
                           w_out_p, b_out_p, lchunk=lchunk)           # (L, B, odim_p)
    logits_2d = jnp.transpose(logits, (1, 0, 2)).reshape(B * L, odim_p)[:, :odim]

    targets = ys_out_pad.reshape(-1)
    tok_mask = targets != -1
    tgt = jnp.where(tok_mask, targets, 0)
    logp = jax.nn.log_softmax(logits_2d, axis=-1)
    nll = -jnp.take_along_axis(logp, tgt[:, None], axis=1)[:, 0]
    n_tok = jnp.sum(tok_mask)
    loss_ce = jnp.sum(nll * tok_mask) / n_tok                         # CE, ignore_index=-1
    loss_st = loss_ce * len_scale                                     # espnet length scaling
    pred = jnp.argmax(logits_2d, axis=-1)
    acc = jnp.sum((pred == targets) & tok_mask) / n_tok

    # asr_weight = 0, mtlalpha = 0, mt_weight = 0 -> only the ST branch survives.
    loss = (1.0 - asr_weight - mt_weight) * loss_st
    return loss, acc


# ----------------------------------------------------------------------------
# Example
# ----------------------------------------------------------------------------
if __name__ == "__main__":
    idim, odim = 16, 11
    elayers = 2
    eunits = eprojs = adim = dunits = 128     # multiples of 128: lane-aligned gates
    B, Tmax = 2, 16
    sos = eos = odim - 1
    ignore_id = -1

    key = jax.random.PRNGKey(0)
    kp, kx, ky = jax.random.split(key, 3)

    params = init_params(kp, idim, odim, elayers, eunits, eprojs, adim, dunits)

    xs_pad = jax.random.normal(kx, (B, Tmax, idim), jnp.float32)
    ilens = jnp.asarray([16, 12], jnp.int32)

    # target sequences (padded with -1), like ESPnet's ys_pad
    y_lens = [6, 4]
    Lraw = max(y_lens)
    ys_vals = np.asarray(jax.random.randint(ky, (B, Lraw), 1, odim - 1))
    ys_pad = np.full((B, Lraw), ignore_id, np.int32)
    for b in range(B):
        ys_pad[b, :y_lens[b]] = ys_vals[b, :y_lens[b]]

    # ESPnet Decoder prep: add sos/eos, pad ys_in with eos, ys_out with -1
    L = Lraw + 1
    ys_in_pad = np.full((B, L), eos, np.int32)
    ys_out_pad = np.full((B, L), ignore_id, np.int32)
    for b in range(B):
        n = y_lens[b]
        ys_in_pad[b, 0] = sos
        ys_in_pad[b, 1:1 + n] = ys_pad[b, :n]
        ys_out_pad[b, :n] = ys_pad[b, :n]
        ys_out_pad[b, n] = eos
    # espnet Decoder: self.loss *= (np.mean([len(ys_in)]) - 1)
    len_scale = float(np.mean([n + 1 for n in y_lens]) - 1.0)

    fwd = jax.jit(e2e_forward)
    loss, acc = fwd(params, xs_pad, ilens,
                    jnp.asarray(ys_in_pad), jnp.asarray(ys_out_pad), len_scale)
    loss = jax.block_until_ready(loss)
    acc = jax.block_until_ready(acc)
    assert np.isfinite(float(loss)) and np.isfinite(float(acc))
    print("KERNEL_OK")
</pallas_src>

<mosaic_0001>
module attributes {stable_mosaic.version = 11 : i64} {
  func.func @_linear_kernel(%arg0: i32, %arg1: memref<32x16xf32, #tpu.memory_space<vmem>>, %arg2: memref<16x512xf32, #tpu.memory_space<vmem>>, %arg3: memref<1x512xf32, #tpu.memory_space<vmem>>, %arg4: memref<32x512xf32, #tpu.memory_space<vmem>>) attributes {dimension_semantics = [#tpu.dimension_semantics<parallel>], iteration_bounds = array<i64: 1>, scalar_prefetch = 0 : i64, scratch_operands = 0 : i64, tpu.core_type = #tpu.core_type<tc>, window_params = [{transform_indices = @transform_0, window_bounds = array<i64: 32, 16>}, {pipeline_mode = #tpu.pipeline_mode<synchronous>, transform_indices = @transform_1, window_bounds = array<i64: 16, 512>}, {pipeline_mode = #tpu.pipeline_mode<synchronous>, transform_indices = @transform_2, window_bounds = array<i64: 1, 512>}, {transform_indices = @transform_3, window_bounds = array<i64: 32, 512>}]} {
    %c0 = arith.constant 0 : index
    %c0_0 = arith.constant 0 : index
    %0 = vector.load %arg1[%c0, %c0_0] : memref<32x16xf32, #tpu.memory_space<vmem>>, vector<32x16xf32>
    %c0_1 = arith.constant 0 : index
    %c0_2 = arith.constant 0 : index
    %1 = vector.load %arg2[%c0_1, %c0_2] : memref<16x512xf32, #tpu.memory_space<vmem>>, vector<16x512xf32>
    %cst = arith.constant dense<0.000000e+00> : vector<32x512xf32>
    %2 = tpu.matmul %0, %1, %cst {dimension_numbers = #tpu.dot_dimension_numbers<[1], [0], [0], [1], [0, 0, 1, 1], [], []>} : vector<32x16xf32>, vector<16x512xf32>, vector<32x512xf32> -> vector<32x512xf32>
    %c0_3 = arith.constant 0 : index
    %c0_4 = arith.constant 0 : index
    %3 = vector.load %arg3[%c0_3, %c0_4] : memref<1x512xf32, #tpu.memory_space<vmem>>, vector<1x512xf32>
    %4 = vector.broadcast %3 : vector<1x512xf32> to vector<32x512xf32>
    %5 = arith.addf %2, %4 : vector<32x512xf32>
    %c0_5 = arith.constant 0 : index
    %c0_6 = arith.constant 0 : index
    %6 = vector.load %arg4[%c0_5, %c0_6] : memref<32x512xf32, #tpu.memory_space<vmem>>, vector<32x512xf32>
    tpu.vector_store %arg4[%c0_5, %c0_6], %5 {strides = array<i32>} : memref<32x512xf32, #tpu.memory_space<vmem>>, vector<32x512xf32>,
    return
  }
  func.func @transform_0(%arg0: i32) -> (i32, i32) {
    %c0_i32 = arith.constant 0 : i32
    %c0_i32_0 = arith.constant 0 : i32
    return %arg0, %c0_i32 : i32, i32
  }
  func.func @transform_1(%arg0: i32) -> (i32, i32) {
    %c0_i32 = arith.constant 0 : i32
    %c0_i32_0 = arith.constant 0 : i32
    %c0_i32_1 = arith.constant 0 : i32
    return %c0_i32, %c0_i32_0 : i32, i32
  }
  func.func @transform_2(%arg0: i32) -> (i32, i32) {
    %c0_i32 = arith.constant 0 : i32
    %c0_i32_0 = arith.constant 0 : i32
    %c0_i32_1 = arith.constant 0 : i32
    return %c0_i32, %c0_i32_0 : i32, i32
  }
  func.func @transform_3(%arg0: i32) -> (i32, i32) {
    %c0_i32 = arith.constant 0 : i32
    %c0_i32_0 = arith.constant 0 : i32
    return %arg0, %c0_i32 : i32, i32
  }
}

module attributes {stable_mosaic.version = 11 : i64} {
  func.func @_lstm_chunk_kernel(%arg0: i32, %arg1: memref<8x2x512xf32, #tpu.memory_space<vmem>>, %arg2: memref<128x512xf32, #tpu.memory_space<vmem>>, %arg3: memref<8x2x128xf32, #tpu.memory_space<vmem>>, %arg4: memref<2x128xf32, #tpu.memory_space<vmem>>, %arg5: memref<2x128xf32, #tpu.memory_space<vmem>>) attributes {dimension_semantics = [#tpu.dimension_semantics<arbitrary>], iteration_bounds = array<i64: 2>, scalar_prefetch = 0 : i64, scratch_operands = 2 : i64, tpu.core_type = #tpu.core_type<tc>, window_params = [{transform_indices = @transform_0, window_bounds = array<i64: 8, 2, 512>}, {pipeline_mode = #tpu.pipeline_mode<synchronous>, transform_indices = @transform_1, window_bounds = array<i64: 128, 512>}, {transform_indices = @transform_2, window_bounds = array<i64: 8, 2, 128>}]} {
    %c0_i32 = arith.constant 0 : i32
    %0 = arith.cmpi eq, %arg0, %c0_i32 : i32
    %1 = arith.extui %0 : i1 to i32
    %c0_i32_0 = arith.constant 0 : i32
    %2 = arith.cmpi ne, %1, %c0_i32_0 : i32
    scf.if %2 {
      %cst_96 = arith.constant 0.000000e+00 : f32
      %271 = vector.broadcast %cst_96 : f32 to vector<2x128xf32>
      %c0_97 = arith.constant 0 : index
      %c0_98 = arith.constant 0 : index
      %272 = vector.load %arg4[%c0_97, %c0_98] : memref<2x128xf32, #tpu.memory_space<vmem>>, vector<2x128xf32>
      tpu.vector_store %arg4[%c0_97, %c0_98], %271 {strides = array<i32>} : memref<2x128xf32, #tpu.memory_space<vmem>>, vector<2x128xf32>,
      %cst_99 = arith.constant 0.000000e+00 : f32
      %273 = vector.broadcast %cst_99 : f32 to vector<2x128xf32>
      %c0_100 = arith.constant 0 : index
      %c0_101 = arith.constant 0 : index
      %274 = vector.load %arg5[%c0_100, %c0_101] : memref<2x128xf32, #tpu.memory_space<vmem>>, vector<2x128xf32>
      tpu.vector_store %arg5[%c0_100, %c0_101], %273 {strides = array<i32>} : memref<2x128xf32, #tpu.memory_space<vmem>>, vector<2x128xf32>,
    } else {
    }
    %c0 = arith.constant 0 : index
    %c0_1 = arith.constant 0 : index
    %3 = vector.load %arg4[%c0, %c0_1] : memref<2x128xf32, #tpu.memory_space<vmem>>, vector<2x128xf32>
    %c0_2 = arith.constant 0 : index
    %c0_3 = arith.constant 0 : index
    %4 = vector.load %arg5[%c0_2, %c0_3] : memref<2x128xf32, #tpu.memory_space<vmem>>, vector<2x128xf32>
    %c0_4 = arith.constant 0 : index
    %c0_5 = arith.constant 0 : index
    %c0_6 = arith.constant 0 : index
    %5 = vector.load %arg1[%c0_4, %c0_5, %c0_6] : memref<8x2x512xf32, #tpu.memory_space<vmem>>, vector<1x2x512xf32>
    %6 = vector.shape_cast %5 : vector<1x2x512xf32> to vector<2x512xf32>
    %c0_7 = arith.constant 0 : index
    %c0_8 = arith.constant 0 : index
    %7 = vector.load %arg2[%c0_7, %c0_8] : memref<128x512xf32, #tpu.memory_space<vmem>>, vector<128x512xf32>
    %cst = arith.constant dense<0.000000e+00> : vector<2x512xf32>
    %8 = tpu.matmul %3, %7, %cst {dimension_numbers = #tpu.dot_dimension_numbers<[1], [0], [0], [1], [0, 0, 1, 1], [], []>} : vector<2x128xf32>, vector<128x512xf32>, vector<2x512xf32> -> vector<2x512xf32>
    %9 = arith.addf %6, %8 : vector<2x512xf32>
    %10 = vector.extract_strided_slice %9 {offsets = [0, 0], sizes = [2, 128], strides = [1, 1]} : vector<2x512xf32> to vector<2x128xf32>
    %11 = arith.negf %10 : vector<2x128xf32>
    %12 = math.exp %11 : vector<2x128xf32>
    %cst_9 = arith.constant 1.000000e+00 : f32
    %13 = vector.broadcast %cst_9 : f32 to vector<2x128xf32>
    %14 = arith.addf %13, %12 : vector<2x128xf32>
    %15 = arith.divf %13, %14 : vector<2x128xf32>
    %16 = vector.extract_strided_slice %9 {offsets = [0, 128], sizes = [2, 128], strides = [1, 1]} : vector<2x512xf32> to vector<2x128xf32>
    %17 = arith.negf %16 : vector<2x128xf32>
    %18 = math.exp %17 : vector<2x128xf32>
    %cst_10 = arith.constant 1.000000e+00 : f32
    %19 = vector.broadcast %cst_10 : f32 to vector<2x128xf32>
    %20 = arith.addf %19, %18 : vector<2x128xf32>
    %21 = arith.divf %19, %20 : vector<2x128xf32>
    %22 = vector.extract_strided_slice %9 {offsets = [0, 256], sizes = [2, 128], strides = [1, 1]} : vector<2x512xf32> to vector<2x128xf32>
    %23 = math.tanh %22 : vector<2x128xf32>
    %24 = vector.extract_strided_slice %9 {offsets = [0, 384], sizes = [2, 128], strides = [1, 1]} : vector<2x512xf32> to vector<2x128xf32>
    %25 = arith.negf %24 : vector<2x128xf32>
    %26 = math.exp %25 : vector<2x128xf32>
    %cst_11 = arith.constant 1.000000e+00 : f32
    %27 = vector.broadcast %cst_11 : f32 to vector<2x128xf32>
    %28 = arith.addf %27, %26 : vector<2x128xf32>
    %29 = arith.divf %27, %28 : vector<2x128xf32>
    %30 = arith.mulf %21, %4 : vector<2x128xf32>
    %31 = arith.mulf %15, %23 : vector<2x128xf32>
    %32 = arith.addf %30, %31 : vector<2x128xf32>
    %33 = math.tanh %32 : vector<2x128xf32>
    %34 = arith.mulf %29, %33 : vector<2x128xf32>
    %c0_12 = arith.constant 0 : index
    %c0_13 = arith.constant 0 : index
    %c0_14 = arith.constant 0 : index
    %35 = vector.load %arg3[%c0_12, %c0_13, %c0_14] : memref<8x2x128xf32, #tpu.memory_space<vmem>>, vector<1x2x128xf32>
    %36 = vector.shape_cast %35 : vector<1x2x128xf32> to vector<2x128xf32>
    %37 = vector.shape_cast %34 : vector<2x128xf32> to vector<1x2x128xf32>
    tpu.vector_store %arg3[%c0_12, %c0_13, %c0_14], %37 {strides = array<i32>} : memref<8x2x128xf32, #tpu.memory_space<vmem>>, vector<1x2x128xf32>,
    %c1 = arith.constant 1 : index
    %c0_15 = arith.constant 0 : index
    %c0_16 = arith.constant 0 : index
    %38 = vector.load %arg1[%c1, %c0_15, %c0_16] : memref<8x2x512xf32, #tpu.memory_space<vmem>>, vector<1x2x512xf32>
    %39 = vector.shape_cast %38 : vector<1x2x512xf32> to vector<2x512xf32>
    %c0_17 = arith.constant 0 : index
    %c0_18 = arith.constant 0 : index
    %40 = vector.load %arg2[%c0_17, %c0_18] : memref<128x512xf32, #tpu.memory_space<vmem>>, vector<128x512xf32>
    %cst_19 = arith.constant dense<0.000000e+00> : vector<2x512xf32>
    %41 = tpu.matmul %34, %40, %cst_19 {dimension_numbers = #tpu.dot_dimension_numbers<[1], [0], [0], [1], [0, 0, 1, 1], [], []>} : vector<2x128xf32>, vector<128x512xf32>, vector<2x512xf32> -> vector<2x512xf32>
    %42 = arith.addf %39, %41 : vector<2x512xf32>
    %43 = vector.extract_strided_slice %42 {offsets = [0, 0], sizes = [2, 128], strides = [1, 1]} : vector<2x512xf32> to vector<2x128xf32>
    %44 = arith.negf %43 : vector<2x128xf32>
    %45 = math.exp %44 : vector<2x128xf32>
    %cst_20 = arith.constant 1.000000e+00 : f32
    %46 = vector.broadcast %cst_20 : f32 to vector<2x128xf32>
    %47 = arith.addf %46, %45 : vector<2x128xf32>
    %48 = arith.divf %46, %47 : vector<2x128xf32>
    %49 = vector.extract_strided_slice %42 {offsets = [0, 128], sizes = [2, 128], strides = [1, 1]} : vector<2x512xf32> to vector<2x128xf32>
    %50 = arith.negf %49 : vector<2x128xf32>
    %51 = math.exp %50 : vector<2x128xf32>
    %cst_21 = arith.constant 1.000000e+00 : f32
    %52 = vector.broadcast %cst_21 : f32 to vector<2x128xf32>
    %53 = arith.addf %52, %51 : vector<2x128xf32>
    %54 = arith.divf %52, %53 : vector<2x128xf32>
    %55 = vector.extract_strided_slice %42 {offsets = [0, 256], sizes = [2, 128], strides = [1, 1]} : vector<2x512xf32> to vector<2x128xf32>
    %56 = math.tanh %55 : vector<2x128xf32>
    %57 = vector.extract_strided_slice %42 {offsets = [0, 384], sizes = [2, 128], strides = [1, 1]} : vector<2x512xf32> to vector<2x128xf32>
    %58 = arith.negf %57 : vector<2x128xf32>
    %59 = math.exp %58 : vector<2x128xf32>
    %cst_22 = arith.constant 1.000000e+00 : f32
    %60 = vector.broadcast %cst_22 : f32 to vector<2x128xf32>
    %61 = arith.addf %60, %59 : vector<2x128xf32>
    %62 = arith.divf %60, %61 : vector<2x128xf32>
    %63 = arith.mulf %54, %32 : vector<2x128xf32>
    %64 = arith.mulf %48, %56 : vector<2x128xf32>
    %65 = arith.addf %63, %64 : vector<2x128xf32>
    %66 = math.tanh %65 : vector<2x128xf32>
    %67 = arith.mulf %62, %66 : vector<2x128xf32>
    %c1_23 = arith.constant 1 : index
    %c0_24 = arith.constant 0 : index
    %c0_25 = arith.constant 0 : index
    %68 = vector.load %arg3[%c1_23, %c0_24, %c0_25] : memref<8x2x128xf32, #tpu.memory_space<vmem>>, vector<1x2x128xf32>
    %69 = vector.shape_cast %68 : vector<1x2x128xf32> to vector<2x128xf32>
    %70 = vector.shape_cast %67 : vector<2x128xf32> to vector<1x2x128xf32>
    tpu.vector_store %arg3[%c1_23, %c0_24, %c0_25], %70 {strides = array<i32>} : memref<8x2x128xf32, #tpu.memory_space<vmem>>, vector<1x2x128xf32>,
    %c2 = arith.constant 2 : index
    %c0_26 = arith.constant 0 : index
    %c0_27 = arith.constant 0 : index
    %71 = vector.load %arg1[%c2, %c0_26, %c0_27] : memref<8x2x512xf32, #tpu.memory_space<vmem>>, vector<1x2x512xf32>
    %72 = vector.shape_cast %71 : vector<1x2x512xf32> to vector<2x512xf32>
    %c0_28 = arith.constant 0 : index
    %c0_29 = arith.constant 0 : index
    %73 = vector.load %arg2[%c0_28, %c0_29] : memref<128x512xf32, #tpu.memory_space<vmem>>, vector<128x512xf32>
    %cst_30 = arith.constant dense<0.000000e+00> : vector<2x512xf32>
    %74 = tpu.matmul %67, %73, %cst_30 {dimension_numbers = #tpu.dot_dimension_numbers<[1], [0], [0], [1], [0, 0, 1, 1], [], []>} : vector<2x128xf32>, vector<128x512xf32>, vector<2x512xf32> -> vector<2x512xf32>
    %75 = arith.addf %72, %74 : vector<2x512xf32>
    %76 = vector.extract_strided_slice %75 {offsets = [0, 0], sizes = [2, 128], strides = [1, 1]} : vector<2x512xf32> to vector<2x128xf32>
    %77 = arith.negf %76 : vector<2x128xf32>
    %78 = math.exp %77 : vector<2x128xf32>
    %cst_31 = arith.constant 1.000000e+00 : f32
    %79 = vector.broadcast %cst_31 : f32 to vector<2x128xf32>
    %80 = arith.addf %79, %78 : vector<2x128xf32>
    %81 = arith.divf %79, %80 : vector<2x128xf32>
    %82 = vector.extract_strided_slice %75 {offsets = [0, 128], sizes = [2, 128], strides = [1, 1]} : vector<2x512xf32> to vector<2x128xf32>
    %83 = arith.negf %82 : vector<2x128xf32>
    %84 = math.exp %83 : vector<2x128xf32>
    %cst_32 = arith.constant 1.000000e+00 : f32
    %85 = vector.broadcast %cst_32 : f32 to vector<2x128xf32>
    %86 = arith.addf %85, %84 : vector<2x128xf32>
    %87 = arith.divf %85, %86 : vector<2x128xf32>
    %88 = vector.extract_strided_slice %75 {offsets = [0, 256], sizes = [2, 128], strides = [1, 1]} : vector<2x512xf32> to vector<2x128xf32>
    %89 = math.tanh %88 : vector<2x128xf32>
    %90 = vector.extract_strided_slice %75 {offsets = [0, 384], sizes = [2, 128], strides = [1, 1]} : vector<2x512xf32> to vector<2x128xf32>
    %91 = arith.negf %90 : vector<2x128xf32>
    %92 = math.exp %91 : vector<2x128xf32>
    %cst_33 = arith.constant 1.000000e+00 : f32
    %93 = vector.broadcast %cst_33 : f32 to vector<2x128xf32>
    %94 = arith.addf %93, %92 : vector<2x128xf32>
    %95 = arith.divf %93, %94 : vector<2x128xf32>
    %96 = arith.mulf %87, %65 : vector<2x128xf32>
    %97 = arith.mulf %81, %89 : vector<2x128xf32>
    %98 = arith.addf %96, %97 : vector<2x128xf32>
    %99 = math.tanh %98 : vector<2x128xf32>
    %100 = arith.mulf %95, %99 : vector<2x128xf32>
    %c2_34 = arith.constant 2 : index
    %c0_35 = arith.constant 0 : index
    %c0_36 = arith.constant 0 : index
    %101 = vector.load %arg3[%c2_34, %c0_35, %c0_36] : memref<8x2x128xf32, #tpu.memory_space<vmem>>, vector<1x2x128xf32>
    %102 = vector.shape_cast %101 : vector<1x2x128xf32> to vector<2x128xf32>
    %103 = vector.shape_cast %100 : vector<2x128xf32> to vector<1x2x128xf32>
    tpu.vector_store %arg3[%c2_34, %c0_35, %c0_36], %103 {strides = array<i32>} : memref<8x2x128xf32, #tpu.memory_space<vmem>>, vector<1x2x128xf32>,
    %c3 = arith.constant 3 : index
    %c0_37 = arith.constant 0 : index
    %c0_38 = arith.constant 0 : index
    %104 = vector.load %arg1[%c3, %c0_37, %c0_38] : memref<8x2x512xf32, #tpu.memory_space<vmem>>, vector<1x2x512xf32>
    %105 = vector.shape_cast %104 : vector<1x2x512xf32> to vector<2x512xf32>
    %c0_39 = arith.constant 0 : index
    %c0_40 = arith.constant 0 : index
    %106 = vector.load %arg2[%c0_39, %c0_40] : memref<128x512xf32, #tpu.memory_space<vmem>>, vector<128x512xf32>
    %cst_41 = arith.constant dense<0.000000e+00> : vector<2x512xf32>
    %107 = tpu.matmul %100, %106, %cst_41 {dimension_numbers = #tpu.dot_dimension_numbers<[1], [0], [0], [1], [0, 0, 1, 1], [], []>} : vector<2x128xf32>, vector<128x512xf32>, vector<2x512xf32> -> vector<2x512xf32>
    %108 = arith.addf %105, %107 : vector<2x512xf32>
    %109 = vector.extract_strided_slice %108 {offsets = [0, 0], sizes = [2, 128], strides = [1, 1]} : vector<2x512xf32> to vector<2x128xf32>
    %110 = arith.negf %109 : vector<2x128xf32>
    %111 = math.exp %110 : vector<2x128xf32>
    %cst_42 = arith.constant 1.000000e+00 : f32
    %112 = vector.broadcast %cst_42 : f32 to vector<2x128xf32>
    %113 = arith.addf %112, %111 : vector<2x128xf32>
    %114 = arith.divf %112, %113 : vector<2x128xf32>
    %115 = vector.extract_strided_slice %108 {offsets = [0, 128], sizes = [2, 128], strides = [1, 1]} : vector<2x512xf32> to vector<2x128xf32>
    %116 = arith.negf %115 : vector<2x128xf32>
    %117 = math.exp %116 : vector<2x128xf32>
    %cst_43 = arith.constant 1.000000e+00 : f32
    %118 = vector.broadcast %cst_43 : f32 to vector<2x128xf32>
    %119 = arith.addf %118, %117 : vector<2x128xf32>
    %120 = arith.divf %118, %119 : vector<2x128xf32>
    %121 = vector.extract_strided_slice %108 {offsets = [0, 256], sizes = [2, 128], strides = [1, 1]} : vector<2x512xf32> to vector<2x128xf32>
    %122 = math.tanh %121 : vector<2x128xf32>
    %123 = vector.extract_strided_slice %108 {offsets = [0, 384], sizes = [2, 128], strides = [1, 1]} : vector<2x512xf32> to vector<2x128xf32>
    %124 = arith.negf %123 : vector<2x128xf32>
    %125 = math.exp %124 : vector<2x128xf32>
    %cst_44 = arith.constant 1.000000e+00 : f32
    %126 = vector.broadcast %cst_44 : f32 to vector<2x128xf32>
    %127 = arith.addf %126, %125 : vector<2x128xf32>
    %128 = arith.divf %126, %127 : vector<2x128xf32>
    %129 = arith.mulf %120, %98 : vector<2x128xf32>
    %130 = arith.mulf %114, %122 : vector<2x128xf32>
    %131 = arith.addf %129, %130 : vector<2x128xf32>
    %132 = math.tanh %131 : vector<2x128xf32>
    %133 = arith.mulf %128, %132 : vector<2x128xf32>
    %c3_45 = arith.constant 3 : index
    %c0_46 = arith.constant 0 : index
    %c0_47 = arith.constant 0 : index
    %134 = vector.load %arg3[%c3_45, %c0_46, %c0_47] : memref<8x2x128xf32, #tpu.memory_space<vmem>>, vector<1x2x128xf32>
    %135 = vector.shape_cast %134 : vector<1x2x128xf32> to vector<2x128xf32>
    %136 = vector.shape_cast %133 : vector<2x128xf32> to vector<1x2x128xf32>
    tpu.vector_store %arg3[%c3_45, %c0_46, %c0_47], %136 {strides = array<i32>} : memref<8x2x128xf32, #tpu.memory_space<vmem>>, vector<1x2x128xf32>,
    %c4 = arith.constant 4 : index
    %c0_48 = arith.constant 0 : index
    %c0_49 = arith.constant 0 : index
    %137 = vector.load %arg1[%c4, %c0_48, %c0_49] : memref<8x2x512xf32, #tpu.memory_space<vmem>>, vector<1x2x512xf32>
    %138 = vector.shape_cast %137 : vector<1x2x512xf32> to vector<2x512xf32>
    %c0_50 = arith.constant 0 : index
    %c0_51 = arith.constant 0 : index
    %139 = vector.load %arg2[%c0_50, %c0_51] : memref<128x512xf32, #tpu.memory_space<vmem>>, vector<128x512xf32>
    %cst_52 = arith.constant dense<0.000000e+00> : vector<2x512xf32>
    %140 = tpu.matmul %133, %139, %cst_52 {dimension_numbers = #tpu.dot_dimension_numbers<[1], [0], [0], [1], [0, 0, 1, 1], [], []>} : vector<2x128xf32>, vector<128x512xf32>, vector<2x512xf32> -> vector<2x512xf32>
    %141 = arith.addf %138, %140 : vector<2x512xf32>
    %142 = vector.extract_strided_slice %141 {offsets = [0, 0], sizes = [2, 128], strides = [1, 1]} : vector<2x512xf32> to vector<2x128xf32>
    %143 = arith.negf %142 : vector<2x128xf32>
    %144 = math.exp %143 : vector<2x128xf32>
    %cst_53 = arith.constant 1.000000e+00 : f32
    %145 = vector.broadcast %cst_53 : f32 to vector<2x128xf32>
    %146 = arith.addf %145, %144 : vector<2x128xf32>
    %147 = arith.divf %145, %146 : vector<2x128xf32>
    %148 = vector.extract_strided_slice %141 {offsets = [0, 128], sizes = [2, 128], strides = [1, 1]} : vector<2x512xf32> to vector<2x128xf32>
    %149 = arith.negf %148 : vector<2x128xf32>
    %150 = math.exp %149 : vector<2x128xf32>
    %cst_54 = arith.constant 1.000000e+00 : f32
    %151 = vector.broadcast %cst_54 : f32 to vector<2x128xf32>
    %152 = arith.addf %151, %150 : vector<2x128xf32>
    %153 = arith.divf %151, %152 : vector<2x128xf32>
    %154 = vector.extract_strided_slice %141 {offsets = [0, 256], sizes = [2, 128], strides = [1, 1]} : vector<2x512xf32> to vector<2x128xf32>
    %155 = math.tanh %154 : vector<2x128xf32>
    %156 = vector.extract_strided_slice %141 {offsets = [0, 384], sizes = [2, 128], strides = [1, 1]} : vector<2x512xf32> to vector<2x128xf32>
    %157 = arith.negf %156 : vector<2x128xf32>
    %158 = math.exp %157 : vector<2x128xf32>
    %cst_55 = arith.constant 1.000000e+00 : f32
    %159 = vector.broadcast %cst_55 : f32 to vector<2x128xf32>
    %160 = arith.addf %159, %158 : vector<2x128xf32>
    %161 = arith.divf %159, %160 : vector<2x128xf32>
    %162 = arith.mulf %153, %131 : vector<2x128xf32>
    %163 = arith.mulf %147, %155 : vector<2x128xf32>
    %164 = arith.addf %162, %163 : vector<2x128xf32>
    %165 = math.tanh %164 : vector<2x128xf32>
    %166 = arith.mulf %161, %165 : vector<2x128xf32>
    %c4_56 = arith.constant 4 : index
    %c0_57 = arith.constant 0 : index
    %c0_58 = arith.constant 0 : index
    %167 = vector.load %arg3[%c4_56, %c0_57, %c0_58] : memref<8x2x128xf32, #tpu.memory_space<vmem>>, vector<1x2x128xf32>
    %168 = vector.shape_cast %167 : vector<1x2x128xf32> to vector<2x128xf32>
    %169 = vector.shape_cast %166 : vector<2x128xf32> to vector<1x2x128xf32>
    tpu.vector_store %arg3[%c4_56, %c0_57, %c0_58], %169 {strides = array<i32>} : memref<8x2x128xf32, #tpu.memory_space<vmem>>, vector<1x2x128xf32>,
    %c5 = arith.constant 5 : index
    %c0_59 = arith.constant 0 : index
    %c0_60 = arith.constant 0 : index
    %170 = vector.load %arg1[%c5, %c0_59, %c0_60] : memref<8x2x512xf32, #tpu.memory_space<vmem>>, vector<1x2x512xf32>
    %171 = vector.shape_cast %170 : vector<1x2x512xf32> to vector<2x512xf32>
    %c0_61 = arith.constant 0 : index
    %c0_62 = arith.constant 0 : index
    %172 = vector.load %arg2[%c0_61, %c0_62] : memref<128x512xf32, #tpu.memory_space<vmem>>, vector<128x512xf32>
    %cst_63 = arith.constant dense<0.000000e+00> : vector<2x512xf32>
    %173 = tpu.matmul %166, %172, %cst_63 {dimension_numbers = #tpu.dot_dimension_numbers<[1], [0], [0], [1], [0, 0, 1, 1], [], []>} : vector<2x128xf32>, vector<128x512xf32>, vector<2x512xf32> -> vector<2x512xf32>
    %174 = arith.addf %171, %173 : vector<2x512xf32>
    %175 = vector.extract_strided_slice %174 {offsets = [0, 0], sizes = [2, 128], strides = [1, 1]} : vector<2x512xf32> to vector<2x128xf32>
    %176 = arith.negf %175 : vector<2x128xf32>
    %177 = math.exp %176 : vector<2x128xf32>
    %cst_64 = arith.constant 1.000000e+00 : f32
    %178 = vector.broadcast %cst_64 : f32 to vector<2x128xf32>
    %179 = arith.addf %178, %177 : vector<2x128xf32>
    %180 = arith.divf %178, %179 : vector<2x128xf32>
    %181 = vector.extract_strided_slice %174 {offsets = [0, 128], sizes = [2, 128], strides = [1, 1]} : vector<2x512xf32> to vector<2x128xf32>
    %182 = arith.negf %181 : vector<2x128xf32>
    %183 = math.exp %182 : vector<2x128xf32>
    %cst_65 = arith.constant 1.000000e+00 : f32
    %184 = vector.broadcast %cst_65 : f32 to vector<2x128xf32>
    %185 = arith.addf %184, %183 : vector<2x128xf32>
    %186 = arith.divf %184, %185 : vector<2x128xf32>
    %187 = vector.extract_strided_slice %174 {offsets = [0, 256], sizes = [2, 128], strides = [1, 1]} : vector<2x512xf32> to vector<2x128xf32>
    %188 = math.tanh %187 : vector<2x128xf32>
    %189 = vector.extract_strided_slice %174 {offsets = [0, 384], sizes = [2, 128], strides = [1, 1]} : vector<2x512xf32> to vector<2x128xf32>
    %190 = arith.negf %189 : vector<2x128xf32>
    %191 = math.exp %190 : vector<2x128xf32>
    %cst_66 = arith.constant 1.000000e+00 : f32
    %192 = vector.broadcast %cst_66 : f32 to vector<2x128xf32>
    %193 = arith.addf %192, %191 : vector<2x128xf32>
    %194 = arith.divf %192, %193 : vector<2x128xf32>
    %195 = arith.mulf %186, %164 : vector<2x128xf32>
    %196 = arith.mulf %180, %188 : vector<2x128xf32>
    %197 = arith.addf %195, %196 : vector<2x128xf32>
    %198 = math.tanh %197 : vector<2x128xf32>
    %199 = arith.mulf %194, %198 : vector<2x128xf32>
    %c5_67 = arith.constant 5 : index
    %c0_68 = arith.constant 0 : index
    %c0_69 = arith.constant 0 : index
    %200 = vector.load %arg3[%c5_67, %c0_68, %c0_69] : memref<8x2x128xf32, #tpu.memory_space<vmem>>, vector<1x2x128xf32>
    %201 = vector.shape_cast %200 : vector<1x2x128xf32> to vector<2x128xf32>
    %202 = vector.shape_cast %199 : vector<2x128xf32> to vector<1x2x128xf32>
    tpu.vector_store %arg3[%c5_67, %c0_68, %c0_69], %202 {strides = array<i32>} : memref<8x2x128xf32, #tpu.memory_space<vmem>>, vector<1x2x128xf32>,
    %c6 = arith.constant 6 : index
    %c0_70 = arith.constant 0 : index
    %c0_71 = arith.constant 0 : index
    %203 = vector.load %arg1[%c6, %c0_70, %c0_71] : memref<8x2x512xf32, #tpu.memory_space<vmem>>, vector<1x2x512xf32>
    %204 = vector.shape_cast %203 : vector<1x2x512xf32> to vector<2x512xf32>
    %c0_72 = arith.constant 0 : index
    %c0_73 = arith.constant 0 : index
    %205 = vector.load %arg2[%c0_72, %c0_73] : memref<128x512xf32, #tpu.memory_space<vmem>>, vector<128x512xf32>
    %cst_74 = arith.constant dense<0.000000e+00> : vector<2x512xf32>
    %206 = tpu.matmul %199, %205, %cst_74 {dimension_numbers = #tpu.dot_dimension_numbers<[1], [0], [0], [1], [0, 0, 1, 1], [], []>} : vector<2x128xf32>, vector<128x512xf32>, vector<2x512xf32> -> vector<2x512xf32>
    %207 = arith.addf %204, %206 : vector<2x512xf32>
    %208 = vector.extract_strided_slice %207 {offsets = [0, 0], sizes = [2, 128], strides = [1, 1]} : vector<2x512xf32> to vector<2x128xf32>
    %209 = arith.negf %208 : vector<2x128xf32>
    %210 = math.exp %209 : vector<2x128xf32>
    %cst_75 = arith.constant 1.000000e+00 : f32
    %211 = vector.broadcast %cst_75 : f32 to vector<2x128xf32>
    %212 = arith.addf %211, %210 : vector<2x128xf32>
    %213 = arith.divf %211, %212 : vector<2x128xf32>
    %214 = vector.extract_strided_slice %207 {offsets = [0, 128], sizes = [2, 128], strides = [1, 1]} : vector<2x512xf32> to vector<2x128xf32>
    %215 = arith.negf %214 : vector<2x128xf32>
    %216 = math.exp %215 : vector<2x128xf32>
    %cst_76 = arith.constant 1.000000e+00 : f32
    %217 = vector.broadcast %cst_76 : f32 to vector<2x128xf32>
    %218 = arith.addf %217, %216 : vector<2x128xf32>
    %219 = arith.divf %217, %218 : vector<2x128xf32>
    %220 = vector.extract_strided_slice %207 {offsets = [0, 256], sizes = [2, 128], strides = [1, 1]} : vector<2x512xf32> to vector<2x128xf32>
    %221 = math.tanh %220 : vector<2x128xf32>
    %222 = vector.extract_strided_slice %207 {offsets = [0, 384], sizes = [2, 128], strides = [1, 1]} : vector<2x512xf32> to vector<2x128xf32>
    %223 = arith.negf %222 : vector<2x128xf32>
    %224 = math.exp %223 : vector<2x128xf32>
    %cst_77 = arith.constant 1.000000e+00 : f32
    %225 = vector.broadcast %cst_77 : f32 to vector<2x128xf32>
    %226 = arith.addf %225, %224 : vector<2x128xf32>
    %227 = arith.divf %225, %226 : vector<2x128xf32>
    %228 = arith.mulf %219, %197 : vector<2x128xf32>
    %229 = arith.mulf %213, %221 : vector<2x128xf32>
    %230 = arith.addf %228, %229 : vector<2x128xf32>
    %231 = math.tanh %230 : vector<2x128xf32>
    %232 = arith.mulf %227, %231 : vector<2x128xf32>
    %c6_78 = arith.constant 6 : index
    %c0_79 = arith.constant 0 : index
    %c0_80 = arith.constant 0 : index
    %233 = vector.load %arg3[%c6_78, %c0_79, %c0_80] : memref<8x2x128xf32, #tpu.memory_space<vmem>>, vector<1x2x128xf32>
    %234 = vector.shape_cast %233 : vector<1x2x128xf32> to vector<2x128xf32>
    %235 = vector.shape_cast %232 : vector<2x128xf32> to vector<1x2x128xf32>
    tpu.vector_store %arg3[%c6_78, %c0_79, %c0_80], %235 {strides = array<i32>} : memref<8x2x128xf32, #tpu.memory_space<vmem>>, vector<1x2x128xf32>,
    %c7 = arith.constant 7 : index
    %c0_81 = arith.constant 0 : index
    %c0_82 = arith.constant 0 : index
    %236 = vector.load %arg1[%c7, %c0_81, %c0_82] : memref<8x2x512xf32, #tpu.memory_space<vmem>>, vector<1x2x512xf32>
    %237 = vector.shape_cast %236 : vector<1x2x512xf32> to vector<2x512xf32>
    %c0_83 = arith.constant 0 : index
    %c0_84 = arith.constant 0 : index
    %238 = vector.load %arg2[%c0_83, %c0_84] : memref<128x512xf32, #tpu.memory_space<vmem>>, vector<128x512xf32>
    %cst_85 = arith.constant dense<0.000000e+00> : vector<2x512xf32>
    %239 = tpu.matmul %232, %238, %cst_85 {dimension_numbers = #tpu.dot_dimension_numbers<[1], [0], [0], [1], [0, 0, 1, 1], [], []>} : vector<2x128xf32>, vector<128x512xf32>, vector<2x512xf32> -> vector<2x512xf32>
    %240 = arith.addf %237, %239 : vector<2x512xf32>
    %241 = vector.extract_strided_slice %240 {offsets = [0, 0], sizes = [2, 128], strides = [1, 1]} : vector<2x512xf32> to vector<2x128xf32>
    %242 = arith.negf %241 : vector<2x128xf32>
    %243 = math.exp %242 : vector<2x128xf32>
    %cst_86 = arith.constant 1.000000e+00 : f32
    %244 = vector.broadcast %cst_86 : f32 to vector<2x128xf32>
    %245 = arith.addf %244, %243 : vector<2x128xf32>
    %246 = arith.divf %244, %245 : vector<2x128xf32>
    %247 = vector.extract_strided_slice %240 {offsets = [0, 128], sizes = [2, 128], strides = [1, 1]} : vector<2x512xf32> to vector<2x128xf32>
    %248 = arith.negf %247 : vector<2x128xf32>
    %249 = math.exp %248 : vector<2x128xf32>
    %cst_87 = arith.constant 1.000000e+00 : f32
    %250 = vector.broadcast %cst_87 : f32 to vector<2x128xf32>
    %251 = arith.addf %250, %249 : vector<2x128xf32>
    %252 = arith.divf %250, %251 : vector<2x128xf32>
    %253 = vector.extract_strided_slice %240 {offsets = [0, 256], sizes = [2, 128], strides = [1, 1]} : vector<2x512xf32> to vector<2x128xf32>
    %254 = math.tanh %253 : vector<2x128xf32>
    %255 = vector.extract_strided_slice %240 {offsets = [0, 384], sizes = [2, 128], strides = [1, 1]} : vector<2x512xf32> to vector<2x128xf32>
    %256 = arith.negf %255 : vector<2x128xf32>
    %257 = math.exp %256 : vector<2x128xf32>
    %cst_88 = arith.constant 1.000000e+00 : f32
    %258 = vector.broadcast %cst_88 : f32 to vector<2x128xf32>
    %259 = arith.addf %258, %257 : vector<2x128xf32>
    %260 = arith.divf %258, %259 : vector<2x128xf32>
    %261 = arith.mulf %252, %230 : vector<2x128xf32>
    %262 = arith.mulf %246, %254 : vector<2x128xf32>
    %263 = arith.addf %261, %262 : vector<2x128xf32>
    %264 = math.tanh %263 : vector<2x128xf32>
    %265 = arith.mulf %260, %264 : vector<2x128xf32>
    %c7_89 = arith.constant 7 : index
    %c0_90 = arith.constant 0 : index
    %c0_91 = arith.constant 0 : index
    %266 = vector.load %arg3[%c7_89, %c0_90, %c0_91] : memref<8x2x128xf32, #tpu.memory_space<vmem>>, vector<1x2x128xf32>
    %267 = vector.shape_cast %266 : vector<1x2x128xf32> to vector<2x128xf32>
    %268 = vector.shape_cast %265 : vector<2x128xf32> to vector<1x2x128xf32>
    tpu.vector_store %arg3[%c7_89, %c0_90, %c0_91], %268 {strides = array<i32>} : memref<8x2x128xf32, #tpu.memory_space<vmem>>, vector<1x2x128xf32>,
    %c0_92 = arith.constant 0 : index
    %c0_93 = arith.constant 0 : index
    %269 = vector.load %arg4[%c0_92, %c0_93] : memref<2x128xf32, #tpu.memory_space<vmem>>, vector<2x128xf32>
    tpu.vector_store %arg4[%c0_92, %c0_93], %265 {strides = array<i32>} : memref<2x128xf32, #tpu.memory_space<vmem>>, vector<2x128xf32>,
    %c0_94 = arith.constant 0 : index
    %c0_95 = arith.constant 0 : index
    %270 = vector.load %arg5[%c0_94, %c0_95] : memref<2x128xf32, #tpu.memory_space<vmem>>, vector<2x128xf32>
    tpu.vector_store %arg5[%c0_94, %c0_95], %263 {strides = array<i32>} : memref<2x128xf32, #tpu.memory_space<vmem>>, vector<2x128xf32>,
    return
  }
  func.func @transform_0(%arg0: i32) -> (i32, i32, i32) {
    %c0_i32 = arith.constant 0 : i32
    %c0_i32_0 = arith.constant 0 : i32
    %c0_i32_1 = arith.constant 0 : i32
    return %arg0, %c0_i32, %c0_i32_0 : i32, i32, i32
  }
  func.func @transform_1(%arg0: i32) -> (i32, i32) {
    %c0_i32 = arith.constant 0 : i32
    %c0_i32_0 = arith.constant 0 : i32
    %c0_i32_1 = arith.constant 0 : i32
    return %c0_i32, %c0_i32_0 : i32, i32
  }
  func.func @transform_2(%arg0: i32) -> (i32, i32, i32) {
    %c0_i32 = arith.constant 0 : i32
    %c0_i32_0 = arith.constant 0 : i32
    %c0_i32_1 = arith.constant 0 : i32
    return %arg0, %c0_i32, %c0_i32_0 : i32, i32, i32
  }
}

module attributes {stable_mosaic.version = 11 : i64} {
  func.func @_linear_kernel(%arg0: i32, %arg1: memref<32x128xf32, #tpu.memory_space<vmem>>, %arg2: memref<128x512xf32, #tpu.memory_space<vmem>>, %arg3: memref<1x512xf32, #tpu.memory_space<vmem>>, %arg4: memref<32x512xf32, #tpu.memory_space<vmem>>) attributes {dimension_semantics = [#tpu.dimension_semantics<parallel>], iteration_bounds = array<i64: 1>, scalar_prefetch = 0 : i64, scratch_operands = 0 : i64, tpu.core_type = #tpu.core_type<tc>, window_params = [{transform_indices = @transform_0, window_bounds = array<i64: 32, 128>}, {pipeline_mode = #tpu.pipeline_mode<synchronous>, transform_indices = @transform_1, window_bounds = array<i64: 128, 512>}, {pipeline_mode = #tpu.pipeline_mode<synchronous>, transform_indices = @transform_2, window_bounds = array<i64: 1, 512>}, {transform_indices = @transform_3, window_bounds = array<i64: 32, 512>}]} {
    %c0 = arith.constant 0 : index
    %c0_0 = arith.constant 0 : index
    %0 = vector.load %arg1[%c0, %c0_0] : memref<32x128xf32, #tpu.memory_space<vmem>>, vector<32x128xf32>
    %c0_1 = arith.constant 0 : index
    %c0_2 = arith.constant 0 : index
    %1 = vector.load %arg2[%c0_1, %c0_2] : memref<128x512xf32, #tpu.memory_space<vmem>>, vector<128x512xf32>
    %cst = arith.constant dense<0.000000e+00> : vector<32x512xf32>
    %2 = tpu.matmul %0, %1, %cst {dimension_numbers = #tpu.dot_dimension_numbers<[1], [0], [0], [1], [0, 0, 1, 1], [], []>} : vector<32x128xf32>, vector<128x512xf32>, vector<32x512xf32> -> vector<32x512xf32>
    %c0_3 = arith.constant 0 : index
    %c0_4 = arith.constant 0 : index
    %3 = vector.load %arg3[%c0_3, %c0_4] : memref<1x512xf32, #tpu.memory_space<vmem>>, vector<1x512xf32>
    %4 = vector.broadcast %3 : vector<1x512xf32> to vector<32x512xf32>
    %5 = arith.addf %2, %4 : vector<32x512xf32>
    %c0_5 = arith.constant 0 : index
    %c0_6 = arith.constant 0 : index
    %6 = vector.load %arg4[%c0_5, %c0_6] : memref<32x512xf32, #tpu.memory_space<vmem>>, vector<32x512xf32>
    tpu.vector_store %arg4[%c0_5, %c0_6], %5 {strides = array<i32>} : memref<32x512xf32, #tpu.memory_space<vmem>>, vector<32x512xf32>,
    return
  }
  func.func @transform_0(%arg0: i32) -> (i32, i32) {
    %c0_i32 = arith.constant 0 : i32
    %c0_i32_0 = arith.constant 0 : i32
    return %arg0, %c0_i32 : i32, i32
  }
  func.func @transform_1(%arg0: i32) -> (i32, i32) {
    %c0_i32 = arith.constant 0 : i32
    %c0_i32_0 = arith.constant 0 : i32
    %c0_i32_1 = arith.constant 0 : i32
    return %c0_i32, %c0_i32_0 : i32, i32
  }
  func.func @transform_2(%arg0: i32) -> (i32, i32) {
    %c0_i32 = arith.constant 0 : i32
    %c0_i32_0 = arith.constant 0 : i32
    %c0_i32_1 = arith.constant 0 : i32
    return %c0_i32, %c0_i32_0 : i32, i32
  }
  func.func @transform_3(%arg0: i32) -> (i32, i32) {
    %c0_i32 = arith.constant 0 : i32
    %c0_i32_0 = arith.constant 0 : i32
    return %arg0, %c0_i32 : i32, i32
  }
}

module attributes {stable_mosaic.version = 11 : i64} {
  func.func @_linear_kernel(%arg0: i32, %arg1: memref<32x128xf32, #tpu.memory_space<vmem>>, %arg2: memref<128x128xf32, #tpu.memory_space<vmem>>, %arg3: memref<1x128xf32, #tpu.memory_space<vmem>>, %arg4: memref<32x128xf32, #tpu.memory_space<vmem>>) attributes {dimension_semantics = [#tpu.dimension_semantics<parallel>], iteration_bounds = array<i64: 1>, scalar_prefetch = 0 : i64, scratch_operands = 0 : i64, tpu.core_type = #tpu.core_type<tc>, window_params = [{transform_indices = @transform_0, window_bounds = array<i64: 32, 128>}, {pipeline_mode = #tpu.pipeline_mode<synchronous>, transform_indices = @transform_1, window_bounds = array<i64: 128, 128>}, {pipeline_mode = #tpu.pipeline_mode<synchronous>, transform_indices = @transform_2, window_bounds = array<i64: 1, 128>}, {transform_indices = @transform_3, window_bounds = array<i64: 32, 128>}]} {
    %c0 = arith.constant 0 : index
    %c0_0 = arith.constant 0 : index
    %0 = vector.load %arg1[%c0, %c0_0] : memref<32x128xf32, #tpu.memory_space<vmem>>, vector<32x128xf32>
    %c0_1 = arith.constant 0 : index
    %c0_2 = arith.constant 0 : index
    %1 = vector.load %arg2[%c0_1, %c0_2] : memref<128x128xf32, #tpu.memory_space<vmem>>, vector<128x128xf32>
    %cst = arith.constant dense<0.000000e+00> : vector<32x128xf32>
    %2 = tpu.matmul %0, %1, %cst {dimension_numbers = #tpu.dot_dimension_numbers<[1], [0], [0], [1], [0, 0, 1, 1], [], []>} : vector<32x128xf32>, vector<128x128xf32>, vector<32x128xf32> -> vector<32x128xf32>
    %c0_3 = arith.constant 0 : index
    %c0_4 = arith.constant 0 : index
    %3 = vector.load %arg3[%c0_3, %c0_4] : memref<1x128xf32, #tpu.memory_space<vmem>>, vector<1x128xf32>
    %4 = vector.broadcast %3 : vector<1x128xf32> to vector<32x128xf32>
    %5 = arith.addf %2, %4 : vector<32x128xf32>
    %6 = math.tanh %5 : vector<32x128xf32>
    %c0_5 = arith.constant 0 : index
    %c0_6 = arith.constant 0 : index
    %7 = vector.load %arg4[%c0_5, %c0_6] : memref<32x128xf32, #tpu.memory_space<vmem>>, vector<32x128xf32>
    tpu.vector_store %arg4[%c0_5, %c0_6], %6 {strides = array<i32>} : memref<32x128xf32, #tpu.memory_space<vmem>>, vector<32x128xf32>,
    return
  }
  func.func @transform_0(%arg0: i32) -> (i32, i32) {
    %c0_i32 = arith.constant 0 : i32
    %c0_i32_0 = arith.constant 0 : i32
    return %arg0, %c0_i32 : i32, i32
  }
  func.func @transform_1(%arg0: i32) -> (i32, i32) {
    %c0_i32 = arith.constant 0 : i32
    %c0_i32_0 = arith.constant 0 : i32
    %c0_i32_1 = arith.constant 0 : i32
    return %c0_i32, %c0_i32_0 : i32, i32
  }
  func.func @transform_2(%arg0: i32) -> (i32, i32) {
    %c0_i32 = arith.constant 0 : i32
    %c0_i32_0 = arith.constant 0 : i32
    %c0_i32_1 = arith.constant 0 : i32
    return %c0_i32, %c0_i32_0 : i32, i32
  }
  func.func @transform_3(%arg0: i32) -> (i32, i32) {
    %c0_i32 = arith.constant 0 : i32
    %c0_i32_0 = arith.constant 0 : i32
    return %arg0, %c0_i32 : i32, i32
  }
}

module attributes {stable_mosaic.version = 11 : i64} {
  func.func @_linear_kernel(%arg0: i32, %arg1: memref<16x128xf32, #tpu.memory_space<vmem>>, %arg2: memref<128x512xf32, #tpu.memory_space<vmem>>, %arg3: memref<1x512xf32, #tpu.memory_space<vmem>>, %arg4: memref<16x512xf32, #tpu.memory_space<vmem>>) attributes {dimension_semantics = [#tpu.dimension_semantics<parallel>], iteration_bounds = array<i64: 1>, scalar_prefetch = 0 : i64, scratch_operands = 0 : i64, tpu.core_type = #tpu.core_type<tc>, window_params = [{transform_indices = @transform_0, window_bounds = array<i64: 16, 128>}, {pipeline_mode = #tpu.pipeline_mode<synchronous>, transform_indices = @transform_1, window_bounds = array<i64: 128, 512>}, {pipeline_mode = #tpu.pipeline_mode<synchronous>, transform_indices = @transform_2, window_bounds = array<i64: 1, 512>}, {transform_indices = @transform_3, window_bounds = array<i64: 16, 512>}]} {
    %c0 = arith.constant 0 : index
    %c0_0 = arith.constant 0 : index
    %0 = vector.load %arg1[%c0, %c0_0] : memref<16x128xf32, #tpu.memory_space<vmem>>, vector<16x128xf32>
    %c0_1 = arith.constant 0 : index
    %c0_2 = arith.constant 0 : index
    %1 = vector.load %arg2[%c0_1, %c0_2] : memref<128x512xf32, #tpu.memory_space<vmem>>, vector<128x512xf32>
    %cst = arith.constant dense<0.000000e+00> : vector<16x512xf32>
    %2 = tpu.matmul %0, %1, %cst {dimension_numbers = #tpu.dot_dimension_numbers<[1], [0], [0], [1], [0, 0, 1, 1], [], []>} : vector<16x128xf32>, vector<128x512xf32>, vector<16x512xf32> -> vector<16x512xf32>
    %c0_3 = arith.constant 0 : index
    %c0_4 = arith.constant 0 : index
    %3 = vector.load %arg3[%c0_3, %c0_4] : memref<1x512xf32, #tpu.memory_space<vmem>>, vector<1x512xf32>
    %4 = vector.broadcast %3 : vector<1x512xf32> to vector<16x512xf32>
    %5 = arith.addf %2, %4 : vector<16x512xf32>
    %c0_5 = arith.constant 0 : index
    %c0_6 = arith.constant 0 : index
    %6 = vector.load %arg4[%c0_5, %c0_6] : memref<16x512xf32, #tpu.memory_space<vmem>>, vector<16x512xf32>
    tpu.vector_store %arg4[%c0_5, %c0_6], %5 {strides = array<i32>} : memref<16x512xf32, #tpu.memory_space<vmem>>, vector<16x512xf32>,
    return
  }
  func.func @transform_0(%arg0: i32) -> (i32, i32) {
    %c0_i32 = arith.constant 0 : i32
    %c0_i32_0 = arith.constant 0 : i32
    return %arg0, %c0_i32 : i32, i32
  }
  func.func @transform_1(%arg0: i32) -> (i32, i32) {
    %c0_i32 = arith.constant 0 : i32
    %c0_i32_0 = arith.constant 0 : i32
    %c0_i32_1 = arith.constant 0 : i32
    return %c0_i32, %c0_i32_0 : i32, i32
  }
  func.func @transform_2(%arg0: i32) -> (i32, i32) {
    %c0_i32 = arith.constant 0 : i32
    %c0_i32_0 = arith.constant 0 : i32
    %c0_i32_1 = arith.constant 0 : i32
    return %c0_i32, %c0_i32_0 : i32, i32
  }
  func.func @transform_3(%arg0: i32) -> (i32, i32) {
    %c0_i32 = arith.constant 0 : i32
    %c0_i32_0 = arith.constant 0 : i32
    return %arg0, %c0_i32 : i32, i32
  }
}

module attributes {stable_mosaic.version = 11 : i64} {
  func.func @_decoder_chunk_kernel(%arg0: i32, %arg1: memref<4x2x512xf32, #tpu.memory_space<vmem>>, %arg2: memref<2x16x128xf32, #tpu.memory_space<vmem>>, %arg3: memref<2x16x128xf32, #tpu.memory_space<vmem>>, %arg4: memref<2x1x16xf32, #tpu.memory_space<vmem>>, %arg5: memref<128x128xf32, #tpu.memory_space<vmem>>, %arg6: memref<1x128xf32, #tpu.memory_space<vmem>>, %arg7: memref<128x512xf32, #tpu.memory_space<vmem>>, %arg8: memref<128x512xf32, #tpu.memory_space<vmem>>, %arg9: memref<128x128xf32, #tpu.memory_space<vmem>>, %arg10: memref<1x128xf32, #tpu.memory_space<vmem>>, %arg11: memref<4x2x128xf32, #tpu.memory_space<vmem>>, %arg12: memref<2x128xf32, #tpu.memory_space<vmem>>, %arg13: memref<2x128xf32, #tpu.memory_space<vmem>>) attributes {dimension_semantics = [#tpu.dimension_semantics<arbitrary>], iteration_bounds = array<i64: 2>, scalar_prefetch = 0 : i64, scratch_operands = 2 : i64, tpu.core_type = #tpu.core_type<tc>, window_params = [{transform_indices = @transform_0, window_bounds = array<i64: 4, 2, 512>}, {pipeline_mode = #tpu.pipeline_mode<synchronous>, transform_indices = @transform_1, window_bounds = array<i64: 2, 16, 128>}, {pipeline_mode = #tpu.pipeline_mode<synchronous>, transform_indices = @transform_2, window_bounds = array<i64: 2, 16, 128>}, {pipeline_mode = #tpu.pipeline_mode<synchronous>, transform_indices = @transform_3, window_bounds = array<i64: 2, 1, 16>}, {pipeline_mode = #tpu.pipeline_mode<synchronous>, transform_indices = @transform_4, window_bounds = array<i64: 128, 128>}, {pipeline_mode = #tpu.pipeline_mode<synchronous>, transform_indices = @transform_5, window_bounds = array<i64: 1, 128>}, {pipeline_mode = #tpu.pipeline_mode<synchronous>, transform_indices = @transform_6, window_bounds = array<i64: 128, 512>}, {pipeline_mode = #tpu.pipeline_mode<synchronous>, transform_indices = @transform_7, window_bounds = array<i64: 128, 512>}, {pipeline_mode = #tpu.pipeline_mode<synchronous>, transform_indices = @transform_8, window_bounds = array<i64: 128, 128>}, {pipeline_mode = #tpu.pipeline_mode<synchronous>, transform_indices = @transform_9, window_bounds = array<i64: 1, 128>}, {transform_indices = @transform_10, window_bounds = array<i64: 4, 2, 128>}]} {
    %c0_i32 = arith.constant 0 : i32
    %0 = arith.cmpi eq, %arg0, %c0_i32 : i32
    %1 = arith.extui %0 : i1 to i32
    %c0_i32_0 = arith.constant 0 : i32
    %2 = arith.cmpi ne, %1, %c0_i32_0 : i32
    scf.if %2 {
      %cst_160 = arith.constant 0.000000e+00 : f32
      %275 = vector.broadcast %cst_160 : f32 to vector<2x128xf32>
      %c0_161 = arith.constant 0 : index
      %c0_162 = arith.constant 0 : index
      %276 = vector.load %arg12[%c0_161, %c0_162] : memref<2x128xf32, #tpu.memory_space<vmem>>, vector<2x128xf32>
      tpu.vector_store %arg12[%c0_161, %c0_162], %275 {strides = array<i32>} : memref<2x128xf32, #tpu.memory_space<vmem>>, vector<2x128xf32>,
      %cst_163 = arith.constant 0.000000e+00 : f32
      %277 = vector.broadcast %cst_163 : f32 to vector<2x128xf32>
      %c0_164 = arith.constant 0 : index
      %c0_165 = arith.constant 0 : index
      %278 = vector.load %arg13[%c0_164, %c0_165] : memref<2x128xf32, #tpu.memory_space<vmem>>, vector<2x128xf32>
      tpu.vector_store %arg13[%c0_164, %c0_165], %277 {strides = array<i32>} : memref<2x128xf32, #tpu.memory_space<vmem>>, vector<2x128xf32>,
    } else {
    }
    %c0 = arith.constant 0 : index
    %c0_1 = arith.constant 0 : index
    %3 = vector.load %arg12[%c0, %c0_1] : memref<2x128xf32, #tpu.memory_space<vmem>>, vector<2x128xf32>
    %c0_2 = arith.constant 0 : index
    %c0_3 = arith.constant 0 : index
    %4 = vector.load %arg13[%c0_2, %c0_3] : memref<2x128xf32, #tpu.memory_space<vmem>>, vector<2x128xf32>
    %c0_4 = arith.constant 0 : index
    %c0_5 = arith.constant 0 : index
    %5 = vector.load %arg5[%c0_4, %c0_5] : memref<128x128xf32, #tpu.memory_space<vmem>>, vector<128x128xf32>
    %cst = arith.constant dense<0.000000e+00> : vector<2x128xf32>
    %6 = tpu.matmul %3, %5, %cst {dimension_numbers = #tpu.dot_dimension_numbers<[1], [0], [0], [1], [0, 0, 1, 1], [], []>} : vector<2x128xf32>, vector<128x128xf32>, vector<2x128xf32> -> vector<2x128xf32>
    %c0_6 = arith.constant 0 : index
    %c0_7 = arith.constant 0 : index
    %7 = vector.load %arg6[%c0_6, %c0_7] : memref<1x128xf32, #tpu.memory_space<vmem>>, vector<1x128xf32>
    %8 = vector.broadcast %7 : vector<1x128xf32> to vector<2x128xf32>
    %9 = arith.addf %6, %8 : vector<2x128xf32>
    %10 = math.tanh %9 : vector<2x128xf32>
    %11 = vector.shape_cast %10 : vector<2x128xf32> to vector<2x1x128xf32>
    %c0_8 = arith.constant 0 : index
    %c0_9 = arith.constant 0 : index
    %c0_10 = arith.constant 0 : index
    %12 = vector.load %arg3[%c0_8, %c0_9, %c0_10] : memref<2x16x128xf32, #tpu.memory_space<vmem>>, vector<2x16x128xf32>
    "tpu.trace_start"() <{level = 10 : i32, message = "bqa,bta->bqt"}> : () -> ()
    %cst_11 = arith.constant dense<0.000000e+00> : vector<2x1x16xf32>
    %13 = tpu.matmul %11, %12, %cst_11 {dimension_numbers = #tpu.dot_dimension_numbers<[2], [2], [1], [1], [0, 0, 0, 1, 1, 1], [0], [0]>} : vector<2x1x128xf32>, vector<2x16x128xf32>, vector<2x1x16xf32> -> vector<2x1x16xf32>
    "tpu.trace_stop"() : () -> ()
    %cst_12 = arith.constant 2.000000e+00 : f32
    %14 = vector.broadcast %cst_12 : f32 to vector<2x1x16xf32>
    %15 = arith.mulf %14, %13 : vector<2x1x16xf32>
    %c0_13 = arith.constant 0 : index
    %c0_14 = arith.constant 0 : index
    %c0_15 = arith.constant 0 : index
    %16 = vector.load %arg4[%c0_13, %c0_14, %c0_15] : memref<2x1x16xf32, #tpu.memory_space<vmem>>, vector<2x1x16xf32>
    %17 = arith.addf %15, %16 : vector<2x1x16xf32>
    %cst_16 = arith.constant dense<0xFF800000> : vector<2x1xf32>
    %18 = vector.multi_reduction <maximumf>, %17, %cst_16 [2] : vector<2x1x16xf32> to vector<2x1xf32>
    %19 = vector.shape_cast %18 : vector<2x1xf32> to vector<2x1x1xf32>
    %20 = vector.broadcast %19 : vector<2x1x1xf32> to vector<2x1x16xf32>
    %21 = arith.subf %17, %20 : vector<2x1x16xf32>
    %22 = math.exp %21 : vector<2x1x16xf32>
    %cst_17 = arith.constant dense<0.000000e+00> : vector<2x1xf32>
    %23 = vector.multi_reduction <add>, %22, %cst_17 [2] : vector<2x1x16xf32> to vector<2x1xf32>
    %24 = vector.shape_cast %23 : vector<2x1xf32> to vector<2x1x1xf32>
    %25 = tpu.reciprocal %24 {approx = true} : vector<2x1x1xf32> -> vector<2x1x1xf32>
    %26 = vector.broadcast %25 : vector<2x1x1xf32> to vector<2x1x16xf32>
    %27 = arith.mulf %22, %26 : vector<2x1x16xf32>
    %c0_18 = arith.constant 0 : index
    %c0_19 = arith.constant 0 : index
    %c0_20 = arith.constant 0 : index
    %28 = vector.load %arg2[%c0_18, %c0_19, %c0_20] : memref<2x16x128xf32, #tpu.memory_space<vmem>>, vector<2x16x128xf32>
    "tpu.trace_start"() <{level = 10 : i32, message = "bqt,bte->bqe"}> : () -> ()
    %cst_21 = arith.constant dense<0.000000e+00> : vector<2x1x128xf32>
    %29 = tpu.matmul %27, %28, %cst_21 {dimension_numbers = #tpu.dot_dimension_numbers<[2], [1], [1], [2], [0, 0, 0, 1, 1, 2], [0], [0]>} : vector<2x1x16xf32>, vector<2x16x128xf32>, vector<2x1x128xf32> -> vector<2x1x128xf32>
    "tpu.trace_stop"() : () -> ()
    %30 = vector.shape_cast %29 : vector<2x1x128xf32> to vector<2x128xf32>
    %c0_22 = arith.constant 0 : index
    %c0_23 = arith.constant 0 : index
    %c0_24 = arith.constant 0 : index
    %31 = vector.load %arg1[%c0_22, %c0_23, %c0_24] : memref<4x2x512xf32, #tpu.memory_space<vmem>>, vector<1x2x512xf32>
    %32 = vector.shape_cast %31 : vector<1x2x512xf32> to vector<2x512xf32>
    %c0_25 = arith.constant 0 : index
    %c0_26 = arith.constant 0 : index
    %33 = vector.load %arg7[%c0_25, %c0_26] : memref<128x512xf32, #tpu.memory_space<vmem>>, vector<128x512xf32>
    %cst_27 = arith.constant dense<0.000000e+00> : vector<2x512xf32>
    %34 = tpu.matmul %30, %33, %cst_27 {dimension_numbers = #tpu.dot_dimension_numbers<[1], [0], [0], [1], [0, 0, 1, 1], [], []>} : vector<2x128xf32>, vector<128x512xf32>, vector<2x512xf32> -> vector<2x512xf32>
    %35 = arith.addf %32, %34 : vector<2x512xf32>
    %c0_28 = arith.constant 0 : index
    %c0_29 = arith.constant 0 : index
    %36 = vector.load %arg8[%c0_28, %c0_29] : memref<128x512xf32, #tpu.memory_space<vmem>>, vector<128x512xf32>
    %cst_30 = arith.constant dense<0.000000e+00> : vector<2x512xf32>
    %37 = tpu.matmul %3, %36, %cst_30 {dimension_numbers = #tpu.dot_dimension_numbers<[1], [0], [0], [1], [0, 0, 1, 1], [], []>} : vector<2x128xf32>, vector<128x512xf32>, vector<2x512xf32> -> vector<2x512xf32>
    %38 = arith.addf %35, %37 : vector<2x512xf32>
    %39 = vector.extract_strided_slice %38 {offsets = [0, 0], sizes = [2, 128], strides = [1, 1]} : vector<2x512xf32> to vector<2x128xf32>
    %40 = arith.negf %39 : vector<2x128xf32>
    %41 = math.exp %40 : vector<2x128xf32>
    %cst_31 = arith.constant 1.000000e+00 : f32
    %42 = vector.broadcast %cst_31 : f32 to vector<2x128xf32>
    %43 = arith.addf %42, %41 : vector<2x128xf32>
    %44 = arith.divf %42, %43 : vector<2x128xf32>
    %45 = vector.extract_strided_slice %38 {offsets = [0, 128], sizes = [2, 128], strides = [1, 1]} : vector<2x512xf32> to vector<2x128xf32>
    %46 = arith.negf %45 : vector<2x128xf32>
    %47 = math.exp %46 : vector<2x128xf32>
    %cst_32 = arith.constant 1.000000e+00 : f32
    %48 = vector.broadcast %cst_32 : f32 to vector<2x128xf32>
    %49 = arith.addf %48, %47 : vector<2x128xf32>
    %50 = arith.divf %48, %49 : vector<2x128xf32>
    %51 = vector.extract_strided_slice %38 {offsets = [0, 256], sizes = [2, 128], strides = [1, 1]} : vector<2x512xf32> to vector<2x128xf32>
    %52 = math.tanh %51 : vector<2x128xf32>
    %53 = vector.extract_strided_slice %38 {offsets = [0, 384], sizes = [2, 128], strides = [1, 1]} : vector<2x512xf32> to vector<2x128xf32>
    %54 = arith.negf %53 : vector<2x128xf32>
    %55 = math.exp %54 : vector<2x128xf32>
    %cst_33 = arith.constant 1.000000e+00 : f32
    %56 = vector.broadcast %cst_33 : f32 to vector<2x128xf32>
    %57 = arith.addf %56, %55 : vector<2x128xf32>
    %58 = arith.divf %56, %57 : vector<2x128xf32>
    %59 = arith.mulf %50, %4 : vector<2x128xf32>
    %60 = arith.mulf %44, %52 : vector<2x128xf32>
    %61 = arith.addf %59, %60 : vector<2x128xf32>
    %62 = math.tanh %61 : vector<2x128xf32>
    %63 = arith.mulf %58, %62 : vector<2x128xf32>
    %c0_34 = arith.constant 0 : index
    %c0_35 = arith.constant 0 : index
    %64 = vector.load %arg9[%c0_34, %c0_35] : memref<128x128xf32, #tpu.memory_space<vmem>>, vector<128x128xf32>
    %cst_36 = arith.constant dense<0.000000e+00> : vector<2x128xf32>
    %65 = tpu.matmul %63, %64, %cst_36 {dimension_numbers = #tpu.dot_dimension_numbers<[1], [0], [0], [1], [0, 0, 1, 1], [], []>} : vector<2x128xf32>, vector<128x128xf32>, vector<2x128xf32> -> vector<2x128xf32>
    %c0_37 = arith.constant 0 : index
    %c0_38 = arith.constant 0 : index
    %66 = vector.load %arg10[%c0_37, %c0_38] : memref<1x128xf32, #tpu.memory_space<vmem>>, vector<1x128xf32>
    %67 = vector.broadcast %66 : vector<1x128xf32> to vector<2x128xf32>
    %68 = arith.addf %65, %67 : vector<2x128xf32>
    %c0_39 = arith.constant 0 : index
    %c0_40 = arith.constant 0 : index
    %c0_41 = arith.constant 0 : index
    %69 = vector.load %arg11[%c0_39, %c0_40, %c0_41] : memref<4x2x128xf32, #tpu.memory_space<vmem>>, vector<1x2x128xf32>
    %70 = vector.shape_cast %69 : vector<1x2x128xf32> to vector<2x128xf32>
    %71 = vector.shape_cast %68 : vector<2x128xf32> to vector<1x2x128xf32>
    tpu.vector_store %arg11[%c0_39, %c0_40, %c0_41], %71 {strides = array<i32>} : memref<4x2x128xf32, #tpu.memory_space<vmem>>, vector<1x2x128xf32>,
    %c0_42 = arith.constant 0 : index
    %c0_43 = arith.constant 0 : index
    %72 = vector.load %arg5[%c0_42, %c0_43] : memref<128x128xf32, #tpu.memory_space<vmem>>, vector<128x128xf32>
    %cst_44 = arith.constant dense<0.000000e+00> : vector<2x128xf32>
    %73 = tpu.matmul %63, %72, %cst_44 {dimension_numbers = #tpu.dot_dimension_numbers<[1], [0], [0], [1], [0, 0, 1, 1], [], []>} : vector<2x128xf32>, vector<128x128xf32>, vector<2x128xf32> -> vector<2x128xf32>
    %c0_45 = arith.constant 0 : index
    %c0_46 = arith.constant 0 : index
    %74 = vector.load %arg6[%c0_45, %c0_46] : memref<1x128xf32, #tpu.memory_space<vmem>>, vector<1x128xf32>
    %75 = vector.broadcast %74 : vector<1x128xf32> to vector<2x128xf32>
    %76 = arith.addf %73, %75 : vector<2x128xf32>
    %77 = math.tanh %76 : vector<2x128xf32>
    %78 = vector.shape_cast %77 : vector<2x128xf32> to vector<2x1x128xf32>
    %c0_47 = arith.constant 0 : index
    %c0_48 = arith.constant 0 : index
    %c0_49 = arith.constant 0 : index
    %79 = vector.load %arg3[%c0_47, %c0_48, %c0_49] : memref<2x16x128xf32, #tpu.memory_space<vmem>>, vector<2x16x128xf32>
    "tpu.trace_start"() <{level = 10 : i32, message = "bqa,bta->bqt"}> : () -> ()
    %cst_50 = arith.constant dense<0.000000e+00> : vector<2x1x16xf32>
    %80 = tpu.matmul %78, %79, %cst_50 {dimension_numbers = #tpu.dot_dimension_numbers<[2], [2], [1], [1], [0, 0, 0, 1, 1, 1], [0], [0]>} : vector<2x1x128xf32>, vector<2x16x128xf32>, vector<2x1x16xf32> -> vector<2x1x16xf32>
    "tpu.trace_stop"() : () -> ()
    %cst_51 = arith.constant 2.000000e+00 : f32
    %81 = vector.broadcast %cst_51 : f32 to vector<2x1x16xf32>
    %82 = arith.mulf %81, %80 : vector<2x1x16xf32>
    %c0_52 = arith.constant 0 : index
    %c0_53 = arith.constant 0 : index
    %c0_54 = arith.constant 0 : index
    %83 = vector.load %arg4[%c0_52, %c0_53, %c0_54] : memref<2x1x16xf32, #tpu.memory_space<vmem>>, vector<2x1x16xf32>
    %84 = arith.addf %82, %83 : vector<2x1x16xf32>
    %cst_55 = arith.constant dense<0xFF800000> : vector<2x1xf32>
    %85 = vector.multi_reduction <maximumf>, %84, %cst_55 [2] : vector<2x1x16xf32> to vector<2x1xf32>
    %86 = vector.shape_cast %85 : vector<2x1xf32> to vector<2x1x1xf32>
    %87 = vector.broadcast %86 : vector<2x1x1xf32> to vector<2x1x16xf32>
    %88 = arith.subf %84, %87 : vector<2x1x16xf32>
    %89 = math.exp %88 : vector<2x1x16xf32>
    %cst_56 = arith.constant dense<0.000000e+00> : vector<2x1xf32>
    %90 = vector.multi_reduction <add>, %89, %cst_56 [2] : vector<2x1x16xf32> to vector<2x1xf32>
    %91 = vector.shape_cast %90 : vector<2x1xf32> to vector<2x1x1xf32>
    %92 = tpu.reciprocal %91 {approx = true} : vector<2x1x1xf32> -> vector<2x1x1xf32>
    %93 = vector.broadcast %92 : vector<2x1x1xf32> to vector<2x1x16xf32>
    %94 = arith.mulf %89, %93 : vector<2x1x16xf32>
    %c0_57 = arith.constant 0 : index
    %c0_58 = arith.constant 0 : index
    %c0_59 = arith.constant 0 : index
    %95 = vector.load %arg2[%c0_57, %c0_58, %c0_59] : memref<2x16x128xf32, #tpu.memory_space<vmem>>, vector<2x16x128xf32>
    "tpu.trace_start"() <{level = 10 : i32, message = "bqt,bte->bqe"}> : () -> ()
    %cst_60 = arith.constant dense<0.000000e+00> : vector<2x1x128xf32>
    %96 = tpu.matmul %94, %95, %cst_60 {dimension_numbers = #tpu.dot_dimension_numbers<[2], [1], [1], [2], [0, 0, 0, 1, 1, 2], [0], [0]>} : vector<2x1x16xf32>, vector<2x16x128xf32>, vector<2x1x128xf32> -> vector<2x1x128xf32>
    "tpu.trace_stop"() : () -> ()
    %97 = vector.shape_cast %96 : vector<2x1x128xf32> to vector<2x128xf32>
    %c1 = arith.constant 1 : index
    %c0_61 = arith.constant 0 : index
    %c0_62 = arith.constant 0 : index
    %98 = vector.load %arg1[%c1, %c0_61, %c0_62] : memref<4x2x512xf32, #tpu.memory_space<vmem>>, vector<1x2x512xf32>
    %99 = vector.shape_cast %98 : vector<1x2x512xf32> to vector<2x512xf32>
    %c0_63 = arith.constant 0 : index
    %c0_64 = arith.constant 0 : index
    %100 = vector.load %arg7[%c0_63, %c0_64] : memref<128x512xf32, #tpu.memory_space<vmem>>, vector<128x512xf32>
    %cst_65 = arith.constant dense<0.000000e+00> : vector<2x512xf32>
    %101 = tpu.matmul %97, %100, %cst_65 {dimension_numbers = #tpu.dot_dimension_numbers<[1], [0], [0], [1], [0, 0, 1, 1], [], []>} : vector<2x128xf32>, vector<128x512xf32>, vector<2x512xf32> -> vector<2x512xf32>
    %102 = arith.addf %99, %101 : vector<2x512xf32>
    %c0_66 = arith.constant 0 : index
    %c0_67 = arith.constant 0 : index
    %103 = vector.load %arg8[%c0_66, %c0_67] : memref<128x512xf32, #tpu.memory_space<vmem>>, vector<128x512xf32>
    %cst_68 = arith.constant dense<0.000000e+00> : vector<2x512xf32>
    %104 = tpu.matmul %63, %103, %cst_68 {dimension_numbers = #tpu.dot_dimension_numbers<[1], [0], [0], [1], [0, 0, 1, 1], [], []>} : vector<2x128xf32>, vector<128x512xf32>, vector<2x512xf32> -> vector<2x512xf32>
    %105 = arith.addf %102, %104 : vector<2x512xf32>
    %106 = vector.extract_strided_slice %105 {offsets = [0, 0], sizes = [2, 128], strides = [1, 1]} : vector<2x512xf32> to vector<2x128xf32>
    %107 = arith.negf %106 : vector<2x128xf32>
    %108 = math.exp %107 : vector<2x128xf32>
    %cst_69 = arith.constant 1.000000e+00 : f32
    %109 = vector.broadcast %cst_69 : f32 to vector<2x128xf32>
    %110 = arith.addf %109, %108 : vector<2x128xf32>
    %111 = arith.divf %109, %110 : vector<2x128xf32>
    %112 = vector.extract_strided_slice %105 {offsets = [0, 128], sizes = [2, 128], strides = [1, 1]} : vector<2x512xf32> to vector<2x128xf32>
    %113 = arith.negf %112 : vector<2x128xf32>
    %114 = math.exp %113 : vector<2x128xf32>
    %cst_70 = arith.constant 1.000000e+00 : f32
    %115 = vector.broadcast %cst_70 : f32 to vector<2x128xf32>
    %116 = arith.addf %115, %114 : vector<2x128xf32>
    %117 = arith.divf %115, %116 : vector<2x128xf32>
    %118 = vector.extract_strided_slice %105 {offsets = [0, 256], sizes = [2, 128], strides = [1, 1]} : vector<2x512xf32> to vector<2x128xf32>
    %119 = math.tanh %118 : vector<2x128xf32>
    %120 = vector.extract_strided_slice %105 {offsets = [0, 384], sizes = [2, 128], strides = [1, 1]} : vector<2x512xf32> to vector<2x128xf32>
    %121 = arith.negf %120 : vector<2x128xf32>
    %122 = math.exp %121 : vector<2x128xf32>
    %cst_71 = arith.constant 1.000000e+00 : f32
    %123 = vector.broadcast %cst_71 : f32 to vector<2x128xf32>
    %124 = arith.addf %123, %122 : vector<2x128xf32>
    %125 = arith.divf %123, %124 : vector<2x128xf32>
    %126 = arith.mulf %117, %61 : vector<2x128xf32>
    %127 = arith.mulf %111, %119 : vector<2x128xf32>
    %128 = arith.addf %126, %127 : vector<2x128xf32>
    %129 = math.tanh %128 : vector<2x128xf32>
    %130 = arith.mulf %125, %129 : vector<2x128xf32>
    %c0_72 = arith.constant 0 : index
    %c0_73 = arith.constant 0 : index
    %131 = vector.load %arg9[%c0_72, %c0_73] : memref<128x128xf32, #tpu.memory_space<vmem>>, vector<128x128xf32>
    %cst_74 = arith.constant dense<0.000000e+00> : vector<2x128xf32>
    %132 = tpu.matmul %130, %131, %cst_74 {dimension_numbers = #tpu.dot_dimension_numbers<[1], [0], [0], [1], [0, 0, 1, 1], [], []>} : vector<2x128xf32>, vector<128x128xf32>, vector<2x128xf32> -> vector<2x128xf32>
    %c0_75 = arith.constant 0 : index
    %c0_76 = arith.constant 0 : index
    %133 = vector.load %arg10[%c0_75, %c0_76] : memref<1x128xf32, #tpu.memory_space<vmem>>, vector<1x128xf32>
    %134 = vector.broadcast %133 : vector<1x128xf32> to vector<2x128xf32>
    %135 = arith.addf %132, %134 : vector<2x128xf32>
    %c1_77 = arith.constant 1 : index
    %c0_78 = arith.constant 0 : index
    %c0_79 = arith.constant 0 : index
    %136 = vector.load %arg11[%c1_77, %c0_78, %c0_79] : memref<4x2x128xf32, #tpu.memory_space<vmem>>, vector<1x2x128xf32>
    %137 = vector.shape_cast %136 : vector<1x2x128xf32> to vector<2x128xf32>
    %138 = vector.shape_cast %135 : vector<2x128xf32> to vector<1x2x128xf32>
    tpu.vector_store %arg11[%c1_77, %c0_78, %c0_79], %138 {strides = array<i32>} : memref<4x2x128xf32, #tpu.memory_space<vmem>>, vector<1x2x128xf32>,
    %c0_80 = arith.constant 0 : index
    %c0_81 = arith.constant 0 : index
    %139 = vector.load %arg5[%c0_80, %c0_81] : memref<128x128xf32, #tpu.memory_space<vmem>>, vector<128x128xf32>
    %cst_82 = arith.constant dense<0.000000e+00> : vector<2x128xf32>
    %140 = tpu.matmul %130, %139, %cst_82 {dimension_numbers = #tpu.dot_dimension_numbers<[1], [0], [0], [1], [0, 0, 1, 1], [], []>} : vector<2x128xf32>, vector<128x128xf32>, vector<2x128xf32> -> vector<2x128xf32>
    %c0_83 = arith.constant 0 : index
    %c0_84 = arith.constant 0 : index
    %141 = vector.load %arg6[%c0_83, %c0_84] : memref<1x128xf32, #tpu.memory_space<vmem>>, vector<1x128xf32>
    %142 = vector.broadcast %141 : vector<1x128xf32> to vector<2x128xf32>
    %143 = arith.addf %140, %142 : vector<2x128xf32>
    %144 = math.tanh %143 : vector<2x128xf32>
    %145 = vector.shape_cast %144 : vector<2x128xf32> to vector<2x1x128xf32>
    %c0_85 = arith.constant 0 : index
    %c0_86 = arith.constant 0 : index
    %c0_87 = arith.constant 0 : index
    %146 = vector.load %arg3[%c0_85, %c0_86, %c0_87] : memref<2x16x128xf32, #tpu.memory_space<vmem>>, vector<2x16x128xf32>
    "tpu.trace_start"() <{level = 10 : i32, message = "bqa,bta->bqt"}> : () -> ()
    %cst_88 = arith.constant dense<0.000000e+00> : vector<2x1x16xf32>
    %147 = tpu.matmul %145, %146, %cst_88 {dimension_numbers = #tpu.dot_dimension_numbers<[2], [2], [1], [1], [0, 0, 0, 1, 1, 1], [0], [0]>} : vector<2x1x128xf32>, vector<2x16x128xf32>, vector<2x1x16xf32> -> vector<2x1x16xf32>
    "tpu.trace_stop"() : () -> ()
    %cst_89 = arith.constant 2.000000e+00 : f32
    %148 = vector.broadcast %cst_89 : f32 to vector<2x1x16xf32>
    %149 = arith.mulf %148, %147 : vector<2x1x16xf32>
    %c0_90 = arith.constant 0 : index
    %c0_91 = arith.constant 0 : index
    %c0_92 = arith.constant 0 : index
    %150 = vector.load %arg4[%c0_90, %c0_91, %c0_92] : memref<2x1x16xf32, #tpu.memory_space<vmem>>, vector<2x1x16xf32>
    %151 = arith.addf %149, %150 : vector<2x1x16xf32>
    %cst_93 = arith.constant dense<0xFF800000> : vector<2x1xf32>
    %152 = vector.multi_reduction <maximumf>, %151, %cst_93 [2] : vector<2x1x16xf32> to vector<2x1xf32>
    %153 = vector.shape_cast %152 : vector<2x1xf32> to vector<2x1x1xf32>
    %154 = vector.broadcast %153 : vector<2x1x1xf32> to vector<2x1x16xf32>
    %155 = arith.subf %151, %154 : vector<2x1x16xf32>
    %156 = math.exp %155 : vector<2x1x16xf32>
    %cst_94 = arith.constant dense<0.000000e+00> : vector<2x1xf32>
    %157 = vector.multi_reduction <add>, %156, %cst_94 [2] : vector<2x1x16xf32> to vector<2x1xf32>
    %158 = vector.shape_cast %157 : vector<2x1xf32> to vector<2x1x1xf32>
    %159 = tpu.reciprocal %158 {approx = true} : vector<2x1x1xf32> -> vector<2x1x1xf32>
    %160 = vector.broadcast %159 : vector<2x1x1xf32> to vector<2x1x16xf32>
    %161 = arith.mulf %156, %160 : vector<2x1x16xf32>
    %c0_95 = arith.constant 0 : index
    %c0_96 = arith.constant 0 : index
    %c0_97 = arith.constant 0 : index
    %162 = vector.load %arg2[%c0_95, %c0_96, %c0_97] : memref<2x16x128xf32, #tpu.memory_space<vmem>>, vector<2x16x128xf32>
    "tpu.trace_start"() <{level = 10 : i32, message = "bqt,bte->bqe"}> : () -> ()
    %cst_98 = arith.constant dense<0.000000e+00> : vector<2x1x128xf32>
    %163 = tpu.matmul %161, %162, %cst_98 {dimension_numbers = #tpu.dot_dimension_numbers<[2], [1], [1], [2], [0, 0, 0, 1, 1, 2], [0], [0]>} : vector<2x1x16xf32>, vector<2x16x128xf32>, vector<2x1x128xf32> -> vector<2x1x128xf32>
    "tpu.trace_stop"() : () -> ()
    %164 = vector.shape_cast %163 : vector<2x1x128xf32> to vector<2x128xf32>
    %c2 = arith.constant 2 : index
    %c0_99 = arith.constant 0 : index
    %c0_100 = arith.constant 0 : index
    %165 = vector.load %arg1[%c2, %c0_99, %c0_100] : memref<4x2x512xf32, #tpu.memory_space<vmem>>, vector<1x2x512xf32>
    %166 = vector.shape_cast %165 : vector<1x2x512xf32> to vector<2x512xf32>
    %c0_101 = arith.constant 0 : index
    %c0_102 = arith.constant 0 : index
    %167 = vector.load %arg7[%c0_101, %c0_102] : memref<128x512xf32, #tpu.memory_space<vmem>>, vector<128x512xf32>
    %cst_103 = arith.constant dense<0.000000e+00> : vector<2x512xf32>
    %168 = tpu.matmul %164, %167, %cst_103 {dimension_numbers = #tpu.dot_dimension_numbers<[1], [0], [0], [1], [0, 0, 1, 1], [], []>} : vector<2x128xf32>, vector<128x512xf32>, vector<2x512xf32> -> vector<2x512xf32>
    %169 = arith.addf %166, %168 : vector<2x512xf32>
    %c0_104 = arith.constant 0 : index
    %c0_105 = arith.constant 0 : index
    %170 = vector.load %arg8[%c0_104, %c0_105] : memref<128x512xf32, #tpu.memory_space<vmem>>, vector<128x512xf32>
    %cst_106 = arith.constant dense<0.000000e+00> : vector<2x512xf32>
    %171 = tpu.matmul %130, %170, %cst_106 {dimension_numbers = #tpu.dot_dimension_numbers<[1], [0], [0], [1], [0, 0, 1, 1], [], []>} : vector<2x128xf32>, vector<128x512xf32>, vector<2x512xf32> -> vector<2x512xf32>
    %172 = arith.addf %169, %171 : vector<2x512xf32>
    %173 = vector.extract_strided_slice %172 {offsets = [0, 0], sizes = [2, 128], strides = [1, 1]} : vector<2x512xf32> to vector<2x128xf32>
    %174 = arith.negf %173 : vector<2x128xf32>
    %175 = math.exp %174 : vector<2x128xf32>
    %cst_107 = arith.constant 1.000000e+00 : f32
    %176 = vector.broadcast %cst_107 : f32 to vector<2x128xf32>
    %177 = arith.addf %176, %175 : vector<2x128xf32>
    %178 = arith.divf %176, %177 : vector<2x128xf32>
    %179 = vector.extract_strided_slice %172 {offsets = [0, 128], sizes = [2, 128], strides = [1, 1]} : vector<2x512xf32> to vector<2x128xf32>
    %180 = arith.negf %179 : vector<2x128xf32>
    %181 = math.exp %180 : vector<2x128xf32>
    %cst_108 = arith.constant 1.000000e+00 : f32
    %182 = vector.broadcast %cst_108 : f32 to vector<2x128xf32>
    %183 = arith.addf %182, %181 : vector<2x128xf32>
    %184 = arith.divf %182, %183 : vector<2x128xf32>
    %185 = vector.extract_strided_slice %172 {offsets = [0, 256], sizes = [2, 128], strides = [1, 1]} : vector<2x512xf32> to vector<2x128xf32>
    %186 = math.tanh %185 : vector<2x128xf32>
    %187 = vector.extract_strided_slice %172 {offsets = [0, 384], sizes = [2, 128], strides = [1, 1]} : vector<2x512xf32> to vector<2x128xf32>
    %188 = arith.negf %187 : vector<2x128xf32>
    %189 = math.exp %188 : vector<2x128xf32>
    %cst_109 = arith.constant 1.000000e+00 : f32
    %190 = vector.broadcast %cst_109 : f32 to vector<2x128xf32>
    %191 = arith.addf %190, %189 : vector<2x128xf32>
    %192 = arith.divf %190, %191 : vector<2x128xf32>
    %193 = arith.mulf %184, %128 : vector<2x128xf32>
    %194 = arith.mulf %178, %186 : vector<2x128xf32>
    %195 = arith.addf %193, %194 : vector<2x128xf32>
    %196 = math.tanh %195 : vector<2x128xf32>
    %197 = arith.mulf %192, %196 : vector<2x128xf32>
    %c0_110 = arith.constant 0 : index
    %c0_111 = arith.constant 0 : index
    %198 = vector.load %arg9[%c0_110, %c0_111] : memref<128x128xf32, #tpu.memory_space<vmem>>, vector<128x128xf32>
    %cst_112 = arith.constant dense<0.000000e+00> : vector<2x128xf32>
    %199 = tpu.matmul %197, %198, %cst_112 {dimension_numbers = #tpu.dot_dimension_numbers<[1], [0], [0], [1], [0, 0, 1, 1], [], []>} : vector<2x128xf32>, vector<128x128xf32>, vector<2x128xf32> -> vector<2x128xf32>
    %c0_113 = arith.constant 0 : index
    %c0_114 = arith.constant 0 : index
    %200 = vector.load %arg10[%c0_113, %c0_114] : memref<1x128xf32, #tpu.memory_space<vmem>>, vector<1x128xf32>
    %201 = vector.broadcast %200 : vector<1x128xf32> to vector<2x128xf32>
    %202 = arith.addf %199, %201 : vector<2x128xf32>
    %c2_115 = arith.constant 2 : index
    %c0_116 = arith.constant 0 : index
    %c0_117 = arith.constant 0 : index
    %203 = vector.load %arg11[%c2_115, %c0_116, %c0_117] : memref<4x2x128xf32, #tpu.memory_space<vmem>>, vector<1x2x128xf32>
    %204 = vector.shape_cast %203 : vector<1x2x128xf32> to vector<2x128xf32>
    %205 = vector.shape_cast %202 : vector<2x128xf32> to vector<1x2x128xf32>
    tpu.vector_store %arg11[%c2_115, %c0_116, %c0_117], %205 {strides = array<i32>} : memref<4x2x128xf32, #tpu.memory_space<vmem>>, vector<1x2x128xf32>,
    %c0_118 = arith.constant 0 : index
    %c0_119 = arith.constant 0 : index
    %206 = vector.load %arg5[%c0_118, %c0_119] : memref<128x128xf32, #tpu.memory_space<vmem>>, vector<128x128xf32>
    %cst_120 = arith.constant dense<0.000000e+00> : vector<2x128xf32>
    %207 = tpu.matmul %197, %206, %cst_120 {dimension_numbers = #tpu.dot_dimension_numbers<[1], [0], [0], [1], [0, 0, 1, 1], [], []>} : vector<2x128xf32>, vector<128x128xf32>, vector<2x128xf32> -> vector<2x128xf32>
    %c0_121 = arith.constant 0 : index
    %c0_122 = arith.constant 0 : index
    %208 = vector.load %arg6[%c0_121, %c0_122] : memref<1x128xf32, #tpu.memory_space<vmem>>, vector<1x128xf32>
    %209 = vector.broadcast %208 : vector<1x128xf32> to vector<2x128xf32>
    %210 = arith.addf %207, %209 : vector<2x128xf32>
    %211 = math.tanh %210 : vector<2x128xf32>
    %212 = vector.shape_cast %211 : vector<2x128xf32> to vector<2x1x128xf32>
    %c0_123 = arith.constant 0 : index
    %c0_124 = arith.constant 0 : index
    %c0_125 = arith.constant 0 : index
    %213 = vector.load %arg3[%c0_123, %c0_124, %c0_125] : memref<2x16x128xf32, #tpu.memory_space<vmem>>, vector<2x16x128xf32>
    "tpu.trace_start"() <{level = 10 : i32, message = "bqa,bta->bqt"}> : () -> ()
    %cst_126 = arith.constant dense<0.000000e+00> : vector<2x1x16xf32>
    %214 = tpu.matmul %212, %213, %cst_126 {dimension_numbers = #tpu.dot_dimension_numbers<[2], [2], [1], [1], [0, 0, 0, 1, 1, 1], [0], [0]>} : vector<2x1x128xf32>, vector<2x16x128xf32>, vector<2x1x16xf32> -> vector<2x1x16xf32>
    "tpu.trace_stop"() : () -> ()
    %cst_127 = arith.constant 2.000000e+00 : f32
    %215 = vector.broadcast %cst_127 : f32 to vector<2x1x16xf32>
    %216 = arith.mulf %215, %214 : vector<2x1x16xf32>
    %c0_128 = arith.constant 0 : index
    %c0_129 = arith.constant 0 : index
    %c0_130 = arith.constant 0 : index
    %217 = vector.load %arg4[%c0_128, %c0_129, %c0_130] : memref<2x1x16xf32, #tpu.memory_space<vmem>>, vector<2x1x16xf32>
    %218 = arith.addf %216, %217 : vector<2x1x16xf32>
    %cst_131 = arith.constant dense<0xFF800000> : vector<2x1xf32>
    %219 = vector.multi_reduction <maximumf>, %218, %cst_131 [2] : vector<2x1x16xf32> to vector<2x1xf32>
    %220 = vector.shape_cast %219 : vector<2x1xf32> to vector<2x1x1xf32>
    %221 = vector.broadcast %220 : vector<2x1x1xf32> to vector<2x1x16xf32>
    %222 = arith.subf %218, %221 : vector<2x1x16xf32>
    %223 = math.exp %222 : vector<2x1x16xf32>
    %cst_132 = arith.constant dense<0.000000e+00> : vector<2x1xf32>
    %224 = vector.multi_reduction <add>, %223, %cst_132 [2] : vector<2x1x16xf32> to vector<2x1xf32>
    %225 = vector.shape_cast %224 : vector<2x1xf32> to vector<2x1x1xf32>
    %226 = tpu.reciprocal %225 {approx = true} : vector<2x1x1xf32> -> vector<2x1x1xf32>
    %227 = vector.broadcast %226 : vector<2x1x1xf32> to vector<2x1x16xf32>
    %228 = arith.mulf %223, %227 : vector<2x1x16xf32>
    %c0_133 = arith.constant 0 : index
    %c0_134 = arith.constant 0 : index
    %c0_135 = arith.constant 0 : index
    %229 = vector.load %arg2[%c0_133, %c0_134, %c0_135] : memref<2x16x128xf32, #tpu.memory_space<vmem>>, vector<2x16x128xf32>
    "tpu.trace_start"() <{level = 10 : i32, message = "bqt,bte->bqe"}> : () -> ()
    %cst_136 = arith.constant dense<0.000000e+00> : vector<2x1x128xf32>
    %230 = tpu.matmul %228, %229, %cst_136 {dimension_numbers = #tpu.dot_dimension_numbers<[2], [1], [1], [2], [0, 0, 0, 1, 1, 2], [0], [0]>} : vector<2x1x16xf32>, vector<2x16x128xf32>, vector<2x1x128xf32> -> vector<2x1x128xf32>
    "tpu.trace_stop"() : () -> ()
    %231 = vector.shape_cast %230 : vector<2x1x128xf32> to vector<2x128xf32>
    %c3 = arith.constant 3 : index
    %c0_137 = arith.constant 0 : index
    %c0_138 = arith.constant 0 : index
    %232 = vector.load %arg1[%c3, %c0_137, %c0_138] : memref<4x2x512xf32, #tpu.memory_space<vmem>>, vector<1x2x512xf32>
    %233 = vector.shape_cast %232 : vector<1x2x512xf32> to vector<2x512xf32>
    %c0_139 = arith.constant 0 : index
    %c0_140 = arith.constant 0 : index
    %234 = vector.load %arg7[%c0_139, %c0_140] : memref<128x512xf32, #tpu.memory_space<vmem>>, vector<128x512xf32>
    %cst_141 = arith.constant dense<0.000000e+00> : vector<2x512xf32>
    %235 = tpu.matmul %231, %234, %cst_141 {dimension_numbers = #tpu.dot_dimension_numbers<[1], [0], [0], [1], [0, 0, 1, 1], [], []>} : vector<2x128xf32>, vector<128x512xf32>, vector<2x512xf32> -> vector<2x512xf32>
    %236 = arith.addf %233, %235 : vector<2x512xf32>
    %c0_142 = arith.constant 0 : index
    %c0_143 = arith.constant 0 : index
    %237 = vector.load %arg8[%c0_142, %c0_143] : memref<128x512xf32, #tpu.memory_space<vmem>>, vector<128x512xf32>
    %cst_144 = arith.constant dense<0.000000e+00> : vector<2x512xf32>
    %238 = tpu.matmul %197, %237, %cst_144 {dimension_numbers = #tpu.dot_dimension_numbers<[1], [0], [0], [1], [0, 0, 1, 1], [], []>} : vector<2x128xf32>, vector<128x512xf32>, vector<2x512xf32> -> vector<2x512xf32>
    %239 = arith.addf %236, %238 : vector<2x512xf32>
    %240 = vector.extract_strided_slice %239 {offsets = [0, 0], sizes = [2, 128], strides = [1, 1]} : vector<2x512xf32> to vector<2x128xf32>
    %241 = arith.negf %240 : vector<2x128xf32>
    %242 = math.exp %241 : vector<2x128xf32>
    %cst_145 = arith.constant 1.000000e+00 : f32
    %243 = vector.broadcast %cst_145 : f32 to vector<2x128xf32>
    %244 = arith.addf %243, %242 : vector<2x128xf32>
    %245 = arith.divf %243, %244 : vector<2x128xf32>
    %246 = vector.extract_strided_slice %239 {offsets = [0, 128], sizes = [2, 128], strides = [1, 1]} : vector<2x512xf32> to vector<2x128xf32>
    %247 = arith.negf %246 : vector<2x128xf32>
    %248 = math.exp %247 : vector<2x128xf32>
    %cst_146 = arith.constant 1.000000e+00 : f32
    %249 = vector.broadcast %cst_146 : f32 to vector<2x128xf32>
    %250 = arith.addf %249, %248 : vector<2x128xf32>
    %251 = arith.divf %249, %250 : vector<2x128xf32>
    %252 = vector.extract_strided_slice %239 {offsets = [0, 256], sizes = [2, 128], strides = [1, 1]} : vector<2x512xf32> to vector<2x128xf32>
    %253 = math.tanh %252 : vector<2x128xf32>
    %254 = vector.extract_strided_slice %239 {offsets = [0, 384], sizes = [2, 128], strides = [1, 1]} : vector<2x512xf32> to vector<2x128xf32>
    %255 = arith.negf %254 : vector<2x128xf32>
    %256 = math.exp %255 : vector<2x128xf32>
    %cst_147 = arith.constant 1.000000e+00 : f32
    %257 = vector.broadcast %cst_147 : f32 to vector<2x128xf32>
    %258 = arith.addf %257, %256 : vector<2x128xf32>
    %259 = arith.divf %257, %258 : vector<2x128xf32>
    %260 = arith.mulf %251, %195 : vector<2x128xf32>
    %261 = arith.mulf %245, %253 : vector<2x128xf32>
    %262 = arith.addf %260, %261 : vector<2x128xf32>
    %263 = math.tanh %262 : vector<2x128xf32>
    %264 = arith.mulf %259, %263 : vector<2x128xf32>
    %c0_148 = arith.constant 0 : index
    %c0_149 = arith.constant 0 : index
    %265 = vector.load %arg9[%c0_148, %c0_149] : memref<128x128xf32, #tpu.memory_space<vmem>>, vector<128x128xf32>
    %cst_150 = arith.constant dense<0.000000e+00> : vector<2x128xf32>
    %266 = tpu.matmul %264, %265, %cst_150 {dimension_numbers = #tpu.dot_dimension_numbers<[1], [0], [0], [1], [0, 0, 1, 1], [], []>} : vector<2x128xf32>, vector<128x128xf32>, vector<2x128xf32> -> vector<2x128xf32>
    %c0_151 = arith.constant 0 : index
    %c0_152 = arith.constant 0 : index
    %267 = vector.load %arg10[%c0_151, %c0_152] : memref<1x128xf32, #tpu.memory_space<vmem>>, vector<1x128xf32>
    %268 = vector.broadcast %267 : vector<1x128xf32> to vector<2x128xf32>
    %269 = arith.addf %266, %268 : vector<2x128xf32>
    %c3_153 = arith.constant 3 : index
    %c0_154 = arith.constant 0 : index
    %c0_155 = arith.constant 0 : index
    %270 = vector.load %arg11[%c3_153, %c0_154, %c0_155] : memref<4x2x128xf32, #tpu.memory_space<vmem>>, vector<1x2x128xf32>
    %271 = vector.shape_cast %270 : vector<1x2x128xf32> to vector<2x128xf32>
    %272 = vector.shape_cast %269 : vector<2x128xf32> to vector<1x2x128xf32>
    tpu.vector_store %arg11[%c3_153, %c0_154, %c0_155], %272 {strides = array<i32>} : memref<4x2x128xf32, #tpu.memory_space<vmem>>, vector<1x2x128xf32>,
    %c0_156 = arith.constant 0 : index
    %c0_157 = arith.constant 0 : index
    %273 = vector.load %arg12[%c0_156, %c0_157] : memref<2x128xf32, #tpu.memory_space<vmem>>, vector<2x128xf32>
    tpu.vector_store %arg12[%c0_156, %c0_157], %264 {strides = array<i32>} : memref<2x128xf32, #tpu.memory_space<vmem>>, vector<2x128xf32>,
    %c0_158 = arith.constant 0 : index
    %c0_159 = arith.constant 0 : index
    %274 = vector.load %arg13[%c0_158, %c0_159] : memref<2x128xf32, #tpu.memory_space<vmem>>, vector<2x128xf32>
    tpu.vector_store %arg13[%c0_158, %c0_159], %262 {strides = array<i32>} : memref<2x128xf32, #tpu.memory_space<vmem>>, vector<2x128xf32>,
    return
  }
  func.func @transform_0(%arg0: i32) -> (i32, i32, i32) {
    %c0_i32 = arith.constant 0 : i32
    %c0_i32_0 = arith.constant 0 : i32
    %c0_i32_1 = arith.constant 0 : i32
    return %arg0, %c0_i32, %c0_i32_0 : i32, i32, i32
  }
  func.func @transform_1(%arg0: i32) -> (i32, i32, i32) {
    %c0_i32 = arith.constant 0 : i32
    %c0_i32_0 = arith.constant 0 : i32
    %c0_i32_1 = arith.constant 0 : i32
    %c0_i32_2 = arith.constant 0 : i32
    return %c0_i32, %c0_i32_0, %c0_i32_1 : i32, i32, i32
  }
  func.func @transform_2(%arg0: i32) -> (i32, i32, i32) {
    %c0_i32 = arith.constant 0 : i32
    %c0_i32_0 = arith.constant 0 : i32
    %c0_i32_1 = arith.constant 0 : i32
    %c0_i32_2 = arith.constant 0 : i32
    return %c0_i32, %c0_i32_0, %c0_i32_1 : i32, i32, i32
  }
  func.func @transform_3(%arg0: i32) -> (i32, i32, i32) {
    %c0_i32 = arith.constant 0 : i32
    %c0_i32_0 = arith.constant 0 : i32
    %c0_i32_1 = arith.constant 0 : i32
    %c0_i32_2 = arith.constant 0 : i32
    return %c0_i32, %c0_i32_0, %c0_i32_1 : i32, i32, i32
  }
  func.func @transform_4(%arg0: i32) -> (i32, i32) {
    %c0_i32 = arith.constant 0 : i32
    %c0_i32_0 = arith.constant 0 : i32
    %c0_i32_1 = arith.constant 0 : i32
    return %c0_i32, %c0_i32_0 : i32, i32
  }
  func.func @transform_5(%arg0: i32) -> (i32, i32) {
    %c0_i32 = arith.constant 0 : i32
    %c0_i32_0 = arith.constant 0 : i32
    %c0_i32_1 = arith.constant 0 : i32
    return %c0_i32, %c0_i32_0 : i32, i32
  }
  func.func @transform_6(%arg0: i32) -> (i32, i32) {
    %c0_i32 = arith.constant 0 : i32
    %c0_i32_0 = arith.constant 0 : i32
    %c0_i32_1 = arith.constant 0 : i32
    return %c0_i32, %c0_i32_0 : i32, i32
  }
  func.func @transform_7(%arg0: i32) -> (i32, i32) {
    %c0_i32 = arith.constant 0 : i32
    %c0_i32_0 = arith.constant 0 : i32
    %c0_i32_1 = arith.constant 0 : i32
    return %c0_i32, %c0_i32_0 : i32, i32
  }
  func.func @transform_8(%arg0: i32) -> (i32, i32) {
    %c0_i32 = arith.constant 0 : i32
    %c0_i32_0 = arith.constant 0 : i32
    %c0_i32_1 = arith.constant 0 : i32
    return %c0_i32, %c0_i32_0 : i32, i32
  }
  func.func @transform_9(%arg0: i32) -> (i32, i32) {
    %c0_i32 = arith.constant 0 : i32
    %c0_i32_0 = arith.constant 0 : i32
    %c0_i32_1 = arith.constant 0 : i32
    return %c0_i32, %c0_i32_0 : i32, i32
  }
  func.func @transform_10(%arg0: i32) -> (i32, i32, i32) {
    %c0_i32 = arith.constant 0 : i32
    %c0_i32_0 = arith.constant 0 : i32
    %c0_i32_1 = arith.constant 0 : i32
    return %arg0, %c0_i32, %c0_i32_0 : i32, i32, i32
  }
}

</mosaic_0001>

<bundles_post_ra>
// kernel: e2e_forward.8
= control target key start
LH: loop header
LB: loop body
LE: loop exit
PB: predicated region body
PF: predicated region fallthrough
CT: control target
= control target key end

     0   :  { %v276_v3 = vmov 0.0   ;;  %vm48_vm0 = vcmask 130048   ;;  %v28_v17 = vlaneseq  ;;  %s392_s1 = inlined_call_operand.vmem [shape: f32[16,512], index: 1, kind: input, shape index: {}]   ;;  %s393_s0 = inlined_call_operand.vmem [shape: f32[32,16], index: 0, kind: input, shape index: {}]   ;;  %s394_s2 = inlined_call_operand.vmem [shape: f32[1,512], index: 2, kind: input, shape index: {}]   ;;  %s395_s3 = inlined_call_operand.vmem [shape: f32[32,512], index: 3, kind: output, shape index: {}]  }
   0x1   :  { %v19_v0 = vld [vmem:[%s392_s1 + $0x8] sm:$0xff]  ;;  %v21_v2 = vld [vmem:[%s392_s1 + $0x18] sm:$0xff]  ;;  %125 = vmatprep.mubr.f32.mxu0 %v276_v3  ;;  %214 = vmatprep.mubr.f32.mxu1 %v276_v3  ;;  %v18_v6 = vld [vmem:[%s392_s1] sm:$0xff] }
   0x2   :  { %v23_v1 = vld [vmem:[%s392_s1 + $0x28] sm:$0xff]  ;;  %v25_v5 = vld [vmem:[%s392_s1 + $0x38] sm:$0xff]  ;;  %v22_v7 = vld [vmem:[%s392_s1 + $0x20] sm:$0xff]  ;;  %v29_v18 = vshrl.u32 %v28_v17, 7 }
   0x3   :  { %v267_v4 = vpack.c.bf16 %v23_v1, %v19_v0  ;;  %v271_v8 = vpack.c.bf16 %v25_v5, %v21_v2  ;;  %v269_v9 = vpack.c.bf16 %v22_v7, %v18_v6  ;;  %v20_v10 = vld [vmem:[%s392_s1 + $0x10] sm:$0xff]  ;;  %v14_v13 = vld [vmem:[%s393_s0] sm:$0xff]  ;;  %v15_v14 = vld [vmem:[%s393_s0 + $0x8] sm:$0xff] }
   0x4   :  { %v24_v11 = vld [vmem:[%s392_s1 + $0x30] sm:$0xff]  ;;  %v17_v16 = vld [vmem:[%s393_s0 + $0x18] sm:$0xff]  ;;  %v30_v19 = vsub.s32 0, %v29_v18  ;;  %v26_v20 = vld [vmem:[%s394_s2] sm:$0xf]  ;;  %v38_v21 = vsub.s32 2, %v29_v18 }
   0x5   :  { %268 = vmatprep.subr.bf16.mxu0 %v267_v4  ;;  %v273_v12 = vpack.c.bf16 %v24_v11, %v20_v10  ;;  %272 = vmatprep.subr.bf16.mxu1 %v271_v8  ;;  %v16_v15 = vld [vmem:[%s393_s0 + $0x10] sm:$0xff]  ;;  %v34_v22 = vsub.s32 1, %v29_v18  ;;  %v42_v23 = vsub.s32 3, %v29_v18 }
   0x6   :  { %270 = vmatpush1.bf16.msra.mxu0 %v269_v9  ;;  %v31_v24 = vrot.slane %v26_v20, %v30_v19  ;;  %v39_v25 = vrot.slane %v26_v20, %v38_v21 }
   0x7   :  { %274 = vmatpush1.bf16.msra.mxu1 %v273_v12  ;;  %v35_v26 = vrot.slane %v26_v20, %v34_v22  ;;  %v43_v27 = vrot.slane %v26_v20, %v42_v23 }
   0x9   :  { %259 = vmatmul.mubr.msk.f32.vlgmr.msra.gmra.mrb[0].mxu0 %vm48_vm0, %v14_v13 }
   0xa   :  { %263 = vmatmul.mubr.msk.f32.vlgmr.msra.gmra.mrb[0].mxu1 %vm48_vm0, %v14_v13  ;;  %131 = vmatprep.mubr.f32.mxu0 %v276_v3 }
   0xb   :  { %220 = vmatprep.mubr.f32.mxu1 %v276_v3 }
   0xd   :  { %260 = vmatmul.mubr.msk.f32.gmra.mrb[2].mxu0 %vm48_vm0, %v15_v14 }
   0xe   :  { %264 = vmatmul.mubr.msk.f32.gmra.mrb[2].mxu1 %vm48_vm0, %v15_v14  ;;  %137 = vmatprep.mubr.f32.mxu0 %v276_v3 }
   0xf   :  { %226 = vmatprep.mubr.f32.mxu1 %v276_v3 }
  0x11   :  { %261 = vmatmul.mubr.msk.f32.gmra.mrb[4].mxu0 %vm48_vm0, %v16_v15 }
  0x12   :  { %265 = vmatmul.mubr.msk.f32.gmra.mrb[4].mxu1 %vm48_vm0, %v16_v15  ;;  %143 = vmatprep.mubr.f32.mxu0 %v276_v3 }
  0x13   :  { %232 = vmatprep.mubr.f32.mxu1 %v276_v3 }
  0x15   :  { %262 = vmatmul.mubr.msk.f32.gmra.mrb[6].mxu0 %vm48_vm0, %v17_v16 }
  0x16   :  { %266 = vmatmul.mubr.msk.f32.gmra.mrb[6].mxu1 %vm48_vm0, %v17_v16 }
  0xdc   :  { %v127_v28 = vpop.f32.mrb[0].mxu0 }
  0xdd   :  { %v128_v29 = vadd.f32 %v127_v28, %v31_v24  ;;  %v216_v30 = vpop.f32.mrb[0].mxu1  ;;  %v129_v31 = vpop.f32.mrb[1].mxu0 }
  0xde   :  { %v217_v32 = vadd.f32 %v216_v30, %v39_v25  ;;  %v130_v33 = vadd.f32 %v129_v31, %v35_v26  ;;  %v218_v34 = vpop.f32.mrb[1].mxu1 }
  0xdf   :  { %239 = vst [vmem:[%s395_s3] sm:$0xff] %v128_v29  ;;  %v219_v35 = vadd.f32 %v218_v34, %v43_v27 }
  0xe0   :  { %241 = vst [vmem:[%s395_s3 + $0x10] sm:$0xff] %v217_v32  ;;  %240 = vst [vmem:[%s395_s3 + $0x8] sm:$0xff] %v130_v33  ;;  %v133_v36 = vpop.f32.mrb[2].mxu0 }
  0xe1   :  { %242 = vst [vmem:[%s395_s3 + $0x18] sm:$0xff] %v219_v35  ;;  %v134_v37 = vadd.f32 %v133_v36, %v31_v24  ;;  %v222_v38 = vpop.f32.mrb[2].mxu1  ;;  %v135_v39 = vpop.f32.mrb[3].mxu0 }
  0xe2   :  { %v223_v40 = vadd.f32 %v222_v38, %v39_v25  ;;  %v136_v41 = vadd.f32 %v135_v39, %v35_v26  ;;  %v224_v42 = vpop.f32.mrb[3].mxu1 }
  0xe3   :  { %243 = vst [vmem:[%s395_s3 + $0x20] sm:$0xff] %v134_v37  ;;  %v225_v43 = vadd.f32 %v224_v42, %v43_v27 }
  0xe4   :  { %245 = vst [vmem:[%s395_s3 + $0x30] sm:$0xff] %v223_v40  ;;  %244 = vst [vmem:[%s395_s3 + $0x28] sm:$0xff] %v136_v41  ;;  %v139_v44 = vpop.f32.mrb[4].mxu0 }
  0xe5   :  { %246 = vst [vmem:[%s395_s3 + $0x38] sm:$0xff] %v225_v43  ;;  %v140_v45 = vadd.f32 %v139_v44, %v31_v24  ;;  %v228_v46 = vpop.f32.mrb[4].mxu1  ;;  %v141_v47 = vpop.f32.mrb[5].mxu0 }
  0xe6   :  { %v229_v48 = vadd.f32 %v228_v46, %v39_v25  ;;  %v142_v49 = vadd.f32 %v141_v47, %v35_v26  ;;  %v230_v50 = vpop.f32.mrb[5].mxu1 }
  0xe7   :  { %247 = vst [vmem:[%s395_s3 + $0x40] sm:$0xff] %v140_v45  ;;  %v231_v51 = vadd.f32 %v230_v50, %v43_v27 }
  0xe8   :  { %249 = vst [vmem:[%s395_s3 + $0x50] sm:$0xff] %v229_v48  ;;  %248 = vst [vmem:[%s395_s3 + $0x48] sm:$0xff] %v142_v49  ;;  %v145_v52 = vpop.f32.mrb[6].mxu0 }
  0xe9   :  { %250 = vst [vmem:[%s395_s3 + $0x58] sm:$0xff] %v231_v51  ;;  %v146_v53 = vadd.f32 %v145_v52, %v31_v24  ;;  %v234_v54 = vpop.f32.mrb[6].mxu1  ;;  %v147_v55 = vpop.f32.mrb[7].mxu0 }
  0xea   :  { %v235_v56 = vadd.f32 %v234_v54, %v39_v25  ;;  %v148_v57 = vadd.f32 %v147_v55, %v35_v26  ;;  %v236_v58 = vpop.f32.mrb[7].mxu1 }
  0xeb   :  { %251 = vst [vmem:[%s395_s3 + $0x60] sm:$0xff] %v146_v53  ;;  %v237_v59 = vadd.f32 %v236_v58, %v43_v27 }
  0xec   :  { %253 = vst [vmem:[%s395_s3 + $0x70] sm:$0xff] %v235_v56  ;;  %252 = vst [vmem:[%s395_s3 + $0x68] sm:$0xff] %v148_v57 }
  0xed   :  { %254 = vst [vmem:[%s395_s3 + $0x78] sm:$0xff] %v237_v59 }

// kernel: e2e_forward.12
= control target key start
LH: loop header
LB: loop body
LE: loop exit
PB: predicated region body
PF: predicated region fallthrough
CT: control target
= control target key end

     0   :  { %s348_s1 = inlined_call_operand.vmem [shape: f32[128,128], index: 1, kind: input, shape index: {}]   ;;  %s349_s0 = inlined_call_operand.vmem [shape: f32[32,128], index: 0, kind: input, shape index: {}]   ;;  %s350_s2 = inlined_call_operand.vmem [shape: f32[1,128], index: 2, kind: input, shape index: {}]   ;;  %s351_s3 = inlined_call_operand.vmem [shape: f32[32,128], index: 3, kind: output, shape index: {}]  }
   0x1   :  { %v18_v0 = vld [vmem:[%s348_s1] sm:$0xff]  ;;  %v19_v1 = vld [vmem:[%s348_s1 + $0x8] sm:$0xff]  ;;  %v20_v2 = vld [vmem:[%s348_s1 + $0x10] sm:$0xff] }
   0x2   :  { %v197_v3 = vpack.c.bf16 %v19_v1, %v18_v0  ;;  %v21_v4 = vld [vmem:[%s348_s1 + $0x18] sm:$0xff]  ;;  %v22_v6 = vld [vmem:[%s348_s1 + $0x20] sm:$0xff]  ;;  %v23_v7 = vld [vmem:[%s348_s1 + $0x28] sm:$0xff] }
   0x3   :  { %v201_v5 = vpack.c.bf16 %v21_v4, %v20_v2  ;;  %v205_v8 = vpack.c.bf16 %v23_v7, %v22_v6  ;;  %v14_v9 = vld [vmem:[%s349_s0] sm:$0xff]  ;;  %v16_v10 = vld [vmem:[%s349_s0 + $0x10] sm:$0xff]  ;;  %v25_v12 = vld [vmem:[%s348_s1 + $0x38] sm:$0xff] }
   0x4   :  { %198 = vmatprep.subr.bf16.mxu0 %v197_v3  ;;  %229 = vmatprep.subr.bf16.mxu1 %v197_v3  ;;  %v24_v11 = vld [vmem:[%s348_s1 + $0x30] sm:$0xff]  ;;  %v26_v14 = vld [vmem:[%s348_s1 + $0x40] sm:$0xff]  ;;  %v27_v15 = vld [vmem:[%s348_s1 + $0x48] sm:$0xff] }
   0x5   :  { %200 = vmatpush3.bf16.msra.mxu0 %v197_v3  ;;  %237 = vmatpush3.bf16.msra.mxu1 %v197_v3  ;;  %v209_v13 = vpack.c.bf16 %v25_v12, %v24_v11  ;;  %v213_v16 = vpack.c.bf16 %v27_v15, %v26_v14  ;;  %v28_v17 = vld [vmem:[%s348_s1 + $0x50] sm:$0xff]  ;;  %v29_v18 = vld [vmem:[%s348_s1 + $0x58] sm:$0xff]  ;;  %v30_v20 = vld [vmem:[%s348_s1 + $0x60] sm:$0xff] }
   0x6   :  { %202 = vmatprep.subr.bf16.mxu0 %v201_v5  ;;  %230 = vmatprep.subr.bf16.mxu1 %v201_v5  ;;  %v217_v19 = vpack.c.bf16 %v29_v18, %v28_v17  ;;  %v31_v21 = vld [vmem:[%s348_s1 + $0x68] sm:$0xff]  ;;  %v32_v23 = vld [vmem:[%s348_s1 + $0x70] sm:$0xff]  ;;  %v33_v24 = vld [vmem:[%s348_s1 + $0x78] sm:$0xff] }
   0x7   :  { %191 = vmatprep.mubr.f32.mxu0 %v14_v9  ;;  %194 = vmatprep.mubr.f32.mxu1 %v16_v10  ;;  %v221_v22 = vpack.c.bf16 %v31_v21, %v30_v20  ;;  %v225_v25 = vpack.c.bf16 %v33_v24, %v32_v23  ;;  %v15_v26 = vld [vmem:[%s349_s0 + $0x8] sm:$0xff]  ;;  %v17_v27 = vld [vmem:[%s349_s0 + $0x18] sm:$0xff]  ;;  %v138_v28 = vld [vmem:[%s350_s2] ss:$0 sm:$0xff] }
   0x9   :  { %204 = vmatpush3.bf16.msra.mxu0 %v201_v5  ;;  %238 = vmatpush3.bf16.msra.mxu1 %v201_v5 }
   0xa   :  { %206 = vmatprep.subr.bf16.mxu0 %v205_v8  ;;  %231 = vmatprep.subr.bf16.mxu1 %v205_v8 }
   0xd   :  { %208 = vmatpush3.bf16.msra.mxu0 %v205_v8  ;;  %239 = vmatpush3.bf16.msra.mxu1 %v205_v8 }
   0xe   :  { %210 = vmatprep.subr.bf16.mxu0 %v209_v13  ;;  %232 = vmatprep.subr.bf16.mxu1 %v209_v13 }
  0x11   :  { %212 = vmatpush3.bf16.msra.mxu0 %v209_v13  ;;  %240 = vmatpush3.bf16.msra.mxu1 %v209_v13 }
  0x12   :  { %214 = vmatprep.subr.bf16.mxu0 %v213_v16  ;;  %233 = vmatprep.subr.bf16.mxu1 %v213_v16 }
  0x15   :  { %216 = vmatpush3.bf16.msra.mxu0 %v213_v16  ;;  %241 = vmatpush3.bf16.msra.mxu1 %v213_v16 }
  0x16   :  { %218 = vmatprep.subr.bf16.mxu0 %v217_v19  ;;  %234 = vmatprep.subr.bf16.mxu1 %v217_v19 }
  0x19   :  { %220 = vmatpush3.bf16.msra.mxu0 %v217_v19  ;;  %242 = vmatpush3.bf16.msra.mxu1 %v217_v19 }
  0x1a   :  { %222 = vmatprep.subr.bf16.mxu0 %v221_v22  ;;  %235 = vmatprep.subr.bf16.mxu1 %v221_v22 }
  0x1d   :  { %224 = vmatpush3.bf16.msra.mxu0 %v221_v22  ;;  %243 = vmatpush3.bf16.msra.mxu1 %v221_v22 }
  0x1e   :  { %226 = vmatprep.subr.bf16.mxu0 %v225_v25  ;;  %236 = vmatprep.subr.bf16.mxu1 %v225_v25 }
  0x21   :  { %228 = vmatpush3.bf16.msra.mxu0 %v225_v25  ;;  %244 = vmatpush3.bf16.msra.mxu1 %v225_v25 }
  0x24   :  { %192 = vmatmul.mubr.f32.vlgmr.msra.gmra.mrb[0].mxu0 %v15_v26  ;;  %195 = vmatmul.mubr.f32.vlgmr.msra.gmra.mrb[0].mxu1 %v17_v27 }
  0xf7   :  { %v193_v29 = vpop.f32.mrb[0].mxu0  ;;  %v196_v30 = vpop.f32.mrb[0].mxu1 }
  0xf8   :  { %v113_v31 = vadd.f32 %v193_v29, %v138_v28  ;;  %v123_v32 = vadd.f32 %v196_v30, %v138_v28  ;;  %v107_v33 = vpop.f32.mrb[1].mxu0  ;;  %v117_v34 = vpop.f32.mrb[1].mxu1 }
  0xf9   :  { %v108_v35 = vadd.f32 %v138_v28, %v107_v33  ;;  %v118_v36 = vadd.f32 %v138_v28, %v117_v34 }
  0xfa   :  { %245 = vtanh.f32 %v113_v31 }
  0xfb   :  { %247 = vtanh.f32 %v123_v32 }
  0xfc   :  { %249 = vtanh.f32 %v108_v35 }
  0xfd   :  { %251 = vtanh.f32 %v118_v36 }
 0x104   :  { %v246_v37 = vpop.eup %245 }
 0x105   :  { %v248_v38 = vpop.eup %247  ;;  %131 = vst [vmem:[%s351_s3 + $0x8] sm:$0xff] %v246_v37 }
 0x106   :  { %v250_v39 = vpop.eup %249  ;;  %133 = vst [vmem:[%s351_s3 + $0x18] sm:$0xff] %v248_v38 }
 0x107   :  { %v252_v40 = vpop.eup %251  ;;  %130 = vst [vmem:[%s351_s3] sm:$0xff] %v250_v39 }
 0x108   :  { %132 = vst [vmem:[%s351_s3 + $0x10] sm:$0xff] %v252_v40 }

// kernel: e2e_forward.10
= control target key start
LH: loop header
LB: loop body
LE: loop exit
PB: predicated region body
PF: predicated region fallthrough
CT: control target
= control target key end

     0   :  { %v367_v3 = vmov 0.0   ;;  %s651_s1 = inlined_call_operand.vmem [shape: f32[128,512], index: 1, kind: input, shape index: {}]   ;;  %s652_s0 = inlined_call_operand.vmem [shape: f32[32,128], index: 0, kind: input, shape index: {}]   ;;  %s653_s2 = inlined_call_operand.vmem [shape: f32[1,512], index: 2, kind: input, shape index: {}]   ;;  %s654_s3 = inlined_call_operand.vmem [shape: f32[32,512], index: 3, kind: output, shape index: {}]  }
   0x1   :  { %v19_v0 = vld [vmem:[%s651_s1 + $0x8] sm:$0xff]  ;;  %v21_v2 = vld [vmem:[%s651_s1 + $0x18] sm:$0xff]  ;;  %168 = vmatprep.mubr.f32.mxu0 %v367_v3  ;;  %257 = vmatprep.mubr.f32.mxu1 %v367_v3  ;;  %v18_v6 = vld [vmem:[%s651_s1] sm:$0xff] }
   0x2   :  { %v23_v1 = vld [vmem:[%s651_s1 + $0x28] sm:$0xff]  ;;  %v25_v5 = vld [vmem:[%s651_s1 + $0x38] sm:$0xff]  ;;  %v22_v7 = vld [vmem:[%s651_s1 + $0x20] sm:$0xff] }
   0x3   :  { %v302_v4 = vpack.c.bf16 %v23_v1, %v19_v0  ;;  %v334_v8 = vpack.c.bf16 %v25_v5, %v21_v2  ;;  %v304_v9 = vpack.c.bf16 %v22_v7, %v18_v6  ;;  %v20_v10 = vld [vmem:[%s651_s1 + $0x10] sm:$0xff]  ;;  %v27_v12 = vld [vmem:[%s651_s1 + $0x48] sm:$0xff]  ;;  %v29_v15 = vld [vmem:[%s651_s1 + $0x58] sm:$0xff] }
   0x4   :  { %v24_v11 = vld [vmem:[%s651_s1 + $0x30] sm:$0xff]  ;;  %v31_v14 = vld [vmem:[%s651_s1 + $0x68] sm:$0xff]  ;;  %v33_v16 = vld [vmem:[%s651_s1 + $0x78] sm:$0xff] }
   0x5   :  { %303 = vmatprep.subr.bf16.mxu0 %v302_v4  ;;  %v336_v13 = vpack.c.bf16 %v24_v11, %v20_v10  ;;  %335 = vmatprep.subr.bf16.mxu1 %v334_v8  ;;  %v306_v17 = vpack.c.bf16 %v31_v14, %v27_v12  ;;  %v338_v18 = vpack.c.bf16 %v33_v16, %v29_v15  ;;  %v26_v19 = vld [vmem:[%s651_s1 + $0x40] sm:$0xff]  ;;  %v28_v21 = vld [vmem:[%s651_s1 + $0x50] sm:$0xff]  ;;  %v35_v24 = vld [vmem:[%s651_s1 + $0x88] sm:$0xff] }
   0x6   :  { %305 = vmatpush1.bf16.msra.mxu0 %v304_v9  ;;  %v30_v20 = vld [vmem:[%s651_s1 + $0x60] sm:$0xff]  ;;  %v32_v23 = vld [vmem:[%s651_s1 + $0x70] sm:$0xff]  ;;  %v39_v25 = vld [vmem:[%s651_s1 + $0xa8] sm:$0xff] }
   0x7   :  { %337 = vmatpush1.bf16.msra.mxu1 %v336_v13  ;;  %v308_v22 = vpack.c.bf16 %v30_v20, %v26_v19  ;;  %307 = vmatprep.subr.bf16.mxu0 %v306_v17  ;;  %v340_v26 = vpack.c.bf16 %v32_v23, %v28_v21  ;;  %v310_v27 = vpack.c.bf16 %v39_v25, %v35_v24  ;;  %v37_v28 = vld [vmem:[%s651_s1 + $0x98] sm:$0xff]  ;;  %v34_v30 = vld [vmem:[%s651_s1 + $0x80] sm:$0xff]  ;;  %v36_v33 = vld [vmem:[%s651_s1 + $0x90] sm:$0xff] }
   0x8   :  { %339 = vmatprep.subr.bf16.mxu1 %v338_v18  ;;  %v41_v29 = vld [vmem:[%s651_s1 + $0xb8] sm:$0xff]  ;;  %v38_v32 = vld [vmem:[%s651_s1 + $0xa0] sm:$0xff]  ;;  %v40_v34 = vld [vmem:[%s651_s1 + $0xb0] sm:$0xff] }
   0x9   :  { %v342_v31 = vpack.c.bf16 %v41_v29, %v37_v28  ;;  %v312_v35 = vpack.c.bf16 %v38_v32, %v34_v30  ;;  %v43_v36 = vld [vmem:[%s651_s1 + $0xc8] sm:$0xff]  ;;  %v45_v38 = vld [vmem:[%s651_s1 + $0xd8] sm:$0xff]  ;;  %v344_v39 = vpack.c.bf16 %v40_v34, %v36_v33  ;;  %v42_v42 = vld [vmem:[%s651_s1 + $0xc0] sm:$0xff] }
   0xa   :  { %309 = vmatpush1.bf16.msra.mxu0 %v308_v22  ;;  %v47_v37 = vld [vmem:[%s651_s1 + $0xe8] sm:$0xff]  ;;  %v49_v41 = vld [vmem:[%s651_s1 + $0xf8] sm:$0xff]  ;;  %v46_v43 = vld [vmem:[%s651_s1 + $0xe0] sm:$0xff] }
   0xb   :  { %341 = vmatpush1.bf16.msra.mxu1 %v340_v26  ;;  %311 = vmatprep.subr.bf16.mxu0 %v310_v27  ;;  %v314_v40 = vpack.c.bf16 %v47_v37, %v43_v36  ;;  %v346_v44 = vpack.c.bf16 %v49_v41, %v45_v38  ;;  %v44_v45 = vld [vmem:[%s651_s1 + $0xd0] sm:$0xff]  ;;  %v51_v47 = vld [vmem:[%s651_s1 + $0x108] sm:$0xff]  ;;  %v53_v49 = vld [vmem:[%s651_s1 + $0x118] sm:$0xff]  ;;  %v316_v51 = vpack.c.bf16 %v46_v43, %v42_v42  ;;  %v84_v38 = vlaneseq }
   0xc   :  { %343 = vmatprep.subr.bf16.mxu1 %v342_v31  ;;  %v48_v46 = vld [vmem:[%s651_s1 + $0xf0] sm:$0xff]  ;;  %v55_v48 = vld [vmem:[%s651_s1 + $0x128] sm:$0xff]  ;;  %v57_v50 = vld [vmem:[%s651_s1 + $0x138] sm:$0xff] }
   0xd   :  { %v348_v52 = vpack.c.bf16 %v48_v46, %v44_v45  ;;  %v318_v53 = vpack.c.bf16 %v55_v48, %v51_v47  ;;  %v50_v54 = vld [vmem:[%s651_s1 + $0x100] sm:$0xff]  ;;  %v52_v56 = vld [vmem:[%s651_s1 + $0x110] sm:$0xff]  ;;  %v350_v57 = vpack.c.bf16 %v57_v50, %v53_v49  ;;  %v59_v59 = vld [vmem:[%s651_s1 + $0x148] sm:$0xff] }
   0xe   :  { %313 = vmatpush1.bf16.msra.mxu0 %v312_v35  ;;  %v54_v55 = vld [vmem:[%s651_s1 + $0x120] sm:$0xff]  ;;  %v56_v58 = vld [vmem:[%s651_s1 + $0x130] sm:$0xff]  ;;  %v63_v60 = vld [vmem:[%s651_s1 + $0x168] sm:$0xff] }
   0xf   :  { %345 = vmatpush1.bf16.msra.mxu1 %v344_v39  ;;  %315 = vmatprep.subr.bf16.mxu0 %v314_v40  ;;  %v61_v61 = vld [vmem:[%s651_s1 + $0x158] sm:$0xff]  ;;  %v320_v63 = vpack.c.bf16 %v54_v55, %v50_v54  ;;  %v352_v0 = vpack.c.bf16 %v56_v58, %v52_v56  ;;  %v322_v1 = vpack.c.bf16 %v63_v60, %v59_v59  ;;  %v58_v2 = vld [vmem:[%s651_s1 + $0x140] sm:$0xff]  ;;  %v60_v5 = vld [vmem:[%s651_s1 + $0x150] sm:$0xff]  ;;  %v85_v39 = vshrl.u32 %v84_v38, 7 }
  0x10   :  { %347 = vmatprep.subr.bf16.mxu1 %v346_v44  ;;  %v65_v62 = vld [vmem:[%s651_s1 + $0x178] sm:$0xff]  ;;  %v62_v4 = vld [vmem:[%s651_s1 + $0x160] sm:$0xff]  ;;  %v64_v7 = vld [vmem:[%s651_s1 + $0x170] sm:$0xff] }
  0x11   :  { %v354_v6 = vpack.c.bf16 %v65_v62, %v61_v61  ;;  %v67_v8 = vld [vmem:[%s651_s1 + $0x188] sm:$0xff]  ;;  %v69_v10 = vld [vmem:[%s651_s1 + $0x198] sm:$0xff]  ;;  %v324_v12 = vpack.c.bf16 %v62_v4, %v58_v2  ;;  %v356_v13 = vpack.c.bf16 %v64_v7, %v60_v5  ;;  %v66_v15 = vld [vmem:[%s651_s1 + $0x180] sm:$0xff]  ;;  %v86_v40 = vsub.s32 0, %v85_v39 }
  0x12   :  { %317 = vmatpush1.bf16.msra.mxu0 %v316_v51  ;;  %v71_v9 = vld [vmem:[%s651_s1 + $0x1a8] sm:$0xff]  ;;  %v73_v11 = vld [vmem:[%s651_s1 + $0x1b8] sm:$0xff]  ;;  %v70_v16 = vld [vmem:[%s651_s1 + $0x1a0] sm:$0xff]  ;;  %v94_v42 = vsub.s32 2, %v85_v39  ;;  %v90_v43 = vsub.s32 1, %v85_v39  ;;  %v98_v44 = vsub.s32 3, %v85_v39 }
  0x13   :  { %349 = vmatpush1.bf16.msra.mxu1 %v348_v52  ;;  %319 = vmatprep.subr.bf16.mxu0 %v318_v53  ;;  %v326_v14 = vpack.c.bf16 %v71_v9, %v67_v8  ;;  %v68_v17 = vld [vmem:[%s651_s1 + $0x190] sm:$0xff]  ;;  %v358_v18 = vpack.c.bf16 %v73_v11, %v69_v10  ;;  %v75_v20 = vld [vmem:[%s651_s1 + $0x1c8] sm:$0xff]  ;;  %v77_v22 = vld [vmem:[%s651_s1 + $0x1d8] sm:$0xff]  ;;  %v328_v24 = vpack.c.bf16 %v70_v16, %v66_v15 }
  0x14   :  { %351 = vmatprep.subr.bf16.mxu1 %v350_v57  ;;  %v72_v19 = vld [vmem:[%s651_s1 + $0x1b0] sm:$0xff]  ;;  %v79_v21 = vld [vmem:[%s651_s1 + $0x1e8] sm:$0xff]  ;;  %v81_v23 = vld [vmem:[%s651_s1 + $0x1f8] sm:$0xff] }
  0x15   :  { %v360_v25 = vpack.c.bf16 %v72_v19, %v68_v17  ;;  %v330_v26 = vpack.c.bf16 %v79_v21, %v75_v20  ;;  %v74_v27 = vld [vmem:[%s651_s1 + $0x1c0] sm:$0xff]  ;;  %v362_v29 = vpack.c.bf16 %v81_v23, %v77_v22  ;;  %v76_v30 = vld [vmem:[%s651_s1 + $0x1d0] sm:$0xff]  ;;  %v15_v35 = vld [vmem:[%s652_s0 + $0x8] sm:$0xff] }
  0x16   :  { %321 = vmatpush1.bf16.msra.mxu0 %v320_v63  ;;  %v78_v28 = vld [vmem:[%s651_s1 + $0x1e0] sm:$0xff]  ;;  %v80_v31 = vld [vmem:[%s651_s1 + $0x1f0] sm:$0xff]  ;;  %v17_v37 = vld [vmem:[%s652_s0 + $0x18] sm:$0xff] }
  0x17   :  { %353 = vmatpush1.bf16.msra.mxu1 %v352_v0  ;;  %323 = vmatprep.subr.bf16.mxu0 %v322_v1  ;;  %v332_v32 = vpack.c.bf16 %v78_v28, %v74_v27  ;;  %v364_v33 = vpack.c.bf16 %v80_v31, %v76_v30  ;;  %v14_v34 = vld [vmem:[%s652_s0] sm:$0xff]  ;;  %v16_v36 = vld [vmem:[%s652_s0 + $0x10] sm:$0xff] }
  0x18   :  { %355 = vmatprep.subr.bf16.mxu1 %v354_v6  ;;  %v82_v41 = vld [vmem:[%s653_s2] sm:$0xf] }
  0x19   :  { %v87_v45 = vrot.slane %v82_v41, %v86_v40  ;;  %v95_v46 = vrot.slane %v82_v41, %v94_v42  ;;  %v91_v47 = vrot.slane %v82_v41, %v90_v43  ;;  %v99_v48 = vrot.slane %v82_v41, %v98_v44 }
  0x1a   :  { %325 = vmatpush1.bf16.msra.mxu0 %v324_v12 }
  0x1b   :  { %357 = vmatpush1.bf16.msra.mxu1 %v356_v13  ;;  %327 = vmatprep.subr.bf16.mxu0 %v326_v14 }
  0x1c   :  { %359 = vmatprep.subr.bf16.mxu1 %v358_v18 }
  0x1e   :  { %329 = vmatpush1.bf16.msra.mxu0 %v328_v24 }
  0x1f   :  { %361 = vmatpush1.bf16.msra.mxu1 %v360_v25  ;;  %331 = vmatprep.subr.bf16.mxu0 %v330_v26 }
  0x20   :  { %363 = vmatprep.subr.bf16.mxu1 %v362_v29 }
  0x22   :  { %333 = vmatpush1.bf16.msra.mxu0 %v332_v32 }
  0x23   :  { %365 = vmatpush1.bf16.msra.mxu1 %v364_v33 }
  0x25   :  { %169 = vmatmul.mubr.f32.vlgmr.msra.gmra.mrb[0].mxu0 %v14_v34 }
  0x26   :  { %258 = vmatmul.mubr.f32.vlgmr.msra.gmra.mrb[0].mxu1 %v14_v34  ;;  %174 = vmatprep.mubr.f32.mxu0 %v367_v3 }
  0x27   :  { %263 = vmatprep.mubr.f32.mxu1 %v367_v3 }
  0x29   :  { %175 = vmatmul.mubr.f32.gmra.mrb[2].mxu0 %v15_v35 }
  0x2a   :  { %264 = vmatmul.mubr.f32.gmra.mrb[2].mxu1 %v15_v35  ;;  %180 = vmatprep.mubr.f32.mxu0 %v367_v3 }
  0x2b   :  { %269 = vmatprep.mubr.f32.mxu1 %v367_v3 }
  0x2d   :  { %181 = vmatmul.mubr.f32.gmra.mrb[4].mxu0 %v16_v36 }
  0x2e   :  { %270 = vmatmul.mubr.f32.gmra.mrb[4].mxu1 %v16_v36  ;;  %186 = vmatprep.mubr.f32.mxu0 %v367_v3 }
  0x2f   :  { %275 = vmatprep.mubr.f32.mxu1 %v367_v3 }
  0x31   :  { %187 = vmatmul.mubr.f32.gmra.mrb[6].mxu0 %v17_v37 }
  0x32   :  { %276 = vmatmul.mubr.f32.gmra.mrb[6].mxu1 %v17_v37 }
  0xf8   :  { %v170_v49 = vpop.f32.mrb[0].mxu0 }
  0xf9   :  { %v171_v50 = vadd.f32 %v170_v49, %v87_v45  ;;  %v259_v51 = vpop.f32.mrb[0].mxu1  ;;  %v172_v3 = vpop.f32.mrb[1].mxu0 }
  0xfa   :  { %v260_v52 = vadd.f32 %v259_v51, %v95_v46  ;;  %v173_v53 = vadd.f32 %v172_v3, %v91_v47  ;;  %v261_v54 = vpop.f32.mrb[1].mxu1 }
  0xfb   :  { %282 = vst [vmem:[%s654_s3] sm:$0xff] %v171_v50  ;;  %v262_v55 = vadd.f32 %v261_v54, %v99_v48 }
  0xfc   :  { %284 = vst [vmem:[%s654_s3 + $0x10] sm:$0xff] %v260_v52  ;;  %283 = vst [vmem:[%s654_s3 + $0x8] sm:$0xff] %v173_v53  ;;  %v176_v56 = vpop.f32.mrb[2].mxu0 }
  0xfd   :  { %285 = vst [vmem:[%s654_s3 + $0x18] sm:$0xff] %v262_v55  ;;  %v177_v57 = vadd.f32 %v176_v56, %v87_v45  ;;  %v265_v58 = vpop.f32.mrb[2].mxu1  ;;  %v178_v59 = vpop.f32.mrb[3].mxu0 }
  0xfe   :  { %v266_v60 = vadd.f32 %v265_v58, %v95_v46  ;;  %v179_v61 = vadd.f32 %v178_v59, %v91_v47  ;;  %v267_v62 = vpop.f32.mrb[3].mxu1 }
  0xff   :  { %286 = vst [vmem:[%s654_s3 + $0x20] sm:$0xff] %v177_v57  ;;  %v268_v63 = vadd.f32 %v267_v62, %v99_v48 }
 0x100   :  { %288 = vst [vmem:[%s654_s3 + $0x30] sm:$0xff] %v266_v60  ;;  %287 = vst [vmem:[%s654_s3 + $0x28] sm:$0xff] %v179_v61  ;;  %v182_v0 = vpop.f32.mrb[4].mxu0 }
 0x101   :  { %289 = vst [vmem:[%s654_s3 + $0x38] sm:$0xff] %v268_v63  ;;  %v183_v1 = vadd.f32 %v182_v0, %v87_v45  ;;  %v271_v2 = vpop.f32.mrb[4].mxu1  ;;  %v184_v4 = vpop.f32.mrb[5].mxu0 }
 0x102   :  { %v272_v5 = vadd.f32 %v271_v2, %v95_v46  ;;  %v185_v6 = vadd.f32 %v184_v4, %v91_v47  ;;  %v273_v7 = vpop.f32.mrb[5].mxu1 }
 0x103   :  { %290 = vst [vmem:[%s654_s3 + $0x40] sm:$0xff] %v183_v1  ;;  %v274_v8 = vadd.f32 %v273_v7, %v99_v48 }
 0x104   :  { %292 = vst [vmem:[%s654_s3 + $0x50] sm:$0xff] %v272_v5  ;;  %291 = vst [vmem:[%s654_s3 + $0x48] sm:$0xff] %v185_v6  ;;  %v188_v9 = vpop.f32.mrb[6].mxu0 }
 0x105   :  { %293 = vst [vmem:[%s654_s3 + $0x58] sm:$0xff] %v274_v8  ;;  %v189_v10 = vadd.f32 %v188_v9, %v87_v45  ;;  %v277_v11 = vpop.f32.mrb[6].mxu1  ;;  %v190_v12 = vpop.f32.mrb[7].mxu0 }
 0x106   :  { %v278_v13 = vadd.f32 %v277_v11, %v95_v46  ;;  %v191_v14 = vadd.f32 %v190_v12, %v91_v47  ;;  %v279_v15 = vpop.f32.mrb[7].mxu1 }
 0x107   :  { %294 = vst [vmem:[%s654_s3 + $0x60] sm:$0xff] %v189_v10  ;;  %v280_v16 = vadd.f32 %v279_v15, %v99_v48 }
 0x108   :  { %296 = vst [vmem:[%s654_s3 + $0x70] sm:$0xff] %v278_v13  ;;  %295 = vst [vmem:[%s654_s3 + $0x68] sm:$0xff] %v191_v14 }
 0x109   :  { %297 = vst [vmem:[%s654_s3 + $0x78] sm:$0xff] %v280_v16 }

// kernel: e2e_forward.14
= control target key start
LH: loop header
LB: loop body
LE: loop exit
PB: predicated region body
PF: predicated region fallthrough
CT: control target
= control target key end

     0   :  { %v333_v3 = vmov 0.0   ;;  %s583_s1 = inlined_call_operand.vmem [shape: f32[128,512], index: 1, kind: input, shape index: {}]   ;;  %s584_s0 = inlined_call_operand.vmem [shape: f32[16,128], index: 0, kind: input, shape index: {}]   ;;  %s585_s2 = inlined_call_operand.vmem [shape: f32[1,512], index: 2, kind: input, shape index: {}]   ;;  %s586_s3 = inlined_call_operand.vmem [shape: f32[16,512], index: 3, kind: output, shape index: {}]  }
   0x1   :  { %v17_v0 = vld [vmem:[%s583_s1 + $0x8] sm:$0xff]  ;;  %v19_v2 = vld [vmem:[%s583_s1 + $0x18] sm:$0xff]  ;;  %166 = vmatprep.mubr.f32.mxu0 %v333_v3  ;;  %243 = vmatprep.mubr.f32.mxu1 %v333_v3  ;;  %v16_v6 = vld [vmem:[%s583_s1] sm:$0xff] }
   0x2   :  { %v21_v1 = vld [vmem:[%s583_s1 + $0x28] sm:$0xff]  ;;  %v23_v5 = vld [vmem:[%s583_s1 + $0x38] sm:$0xff]  ;;  %v20_v7 = vld [vmem:[%s583_s1 + $0x20] sm:$0xff] }
   0x3   :  { %v268_v4 = vpack.c.bf16 %v21_v1, %v17_v0  ;;  %v300_v8 = vpack.c.bf16 %v23_v5, %v19_v2  ;;  %v270_v9 = vpack.c.bf16 %v20_v7, %v16_v6  ;;  %v18_v10 = vld [vmem:[%s583_s1 + $0x10] sm:$0xff]  ;;  %v25_v12 = vld [vmem:[%s583_s1 + $0x48] sm:$0xff]  ;;  %v27_v15 = vld [vmem:[%s583_s1 + $0x58] sm:$0xff] }
   0x4   :  { %v22_v11 = vld [vmem:[%s583_s1 + $0x30] sm:$0xff]  ;;  %v29_v14 = vld [vmem:[%s583_s1 + $0x68] sm:$0xff]  ;;  %v31_v16 = vld [vmem:[%s583_s1 + $0x78] sm:$0xff] }
   0x5   :  { %269 = vmatprep.subr.bf16.mxu0 %v268_v4  ;;  %v302_v13 = vpack.c.bf16 %v22_v11, %v18_v10  ;;  %301 = vmatprep.subr.bf16.mxu1 %v300_v8  ;;  %v272_v17 = vpack.c.bf16 %v29_v14, %v25_v12  ;;  %v304_v18 = vpack.c.bf16 %v31_v16, %v27_v15  ;;  %v24_v19 = vld [vmem:[%s583_s1 + $0x40] sm:$0xff]  ;;  %v26_v21 = vld [vmem:[%s583_s1 + $0x50] sm:$0xff]  ;;  %v33_v24 = vld [vmem:[%s583_s1 + $0x88] sm:$0xff] }
   0x6   :  { %271 = vmatpush1.bf16.msra.mxu0 %v270_v9  ;;  %v28_v20 = vld [vmem:[%s583_s1 + $0x60] sm:$0xff]  ;;  %v30_v23 = vld [vmem:[%s583_s1 + $0x70] sm:$0xff]  ;;  %v37_v25 = vld [vmem:[%s583_s1 + $0xa8] sm:$0xff] }
   0x7   :  { %303 = vmatpush1.bf16.msra.mxu1 %v302_v13  ;;  %v274_v22 = vpack.c.bf16 %v28_v20, %v24_v19  ;;  %273 = vmatprep.subr.bf16.mxu0 %v272_v17  ;;  %v306_v26 = vpack.c.bf16 %v30_v23, %v26_v21  ;;  %v276_v27 = vpack.c.bf16 %v37_v25, %v33_v24  ;;  %v35_v28 = vld [vmem:[%s583_s1 + $0x98] sm:$0xff]  ;;  %v32_v30 = vld [vmem:[%s583_s1 + $0x80] sm:$0xff]  ;;  %v34_v33 = vld [vmem:[%s583_s1 + $0x90] sm:$0xff] }
   0x8   :  { %305 = vmatprep.subr.bf16.mxu1 %v304_v18  ;;  %v39_v29 = vld [vmem:[%s583_s1 + $0xb8] sm:$0xff]  ;;  %v36_v32 = vld [vmem:[%s583_s1 + $0xa0] sm:$0xff]  ;;  %v38_v34 = vld [vmem:[%s583_s1 + $0xb0] sm:$0xff] }
   0x9   :  { %v308_v31 = vpack.c.bf16 %v39_v29, %v35_v28  ;;  %v278_v35 = vpack.c.bf16 %v36_v32, %v32_v30  ;;  %v41_v36 = vld [vmem:[%s583_s1 + $0xc8] sm:$0xff]  ;;  %v43_v38 = vld [vmem:[%s583_s1 + $0xd8] sm:$0xff]  ;;  %v310_v39 = vpack.c.bf16 %v38_v34, %v34_v33  ;;  %v40_v42 = vld [vmem:[%s583_s1 + $0xc0] sm:$0xff] }
   0xa   :  { %275 = vmatpush1.bf16.msra.mxu0 %v274_v22  ;;  %v45_v37 = vld [vmem:[%s583_s1 + $0xe8] sm:$0xff]  ;;  %v47_v41 = vld [vmem:[%s583_s1 + $0xf8] sm:$0xff]  ;;  %v44_v43 = vld [vmem:[%s583_s1 + $0xe0] sm:$0xff] }
   0xb   :  { %307 = vmatpush1.bf16.msra.mxu1 %v306_v26  ;;  %277 = vmatprep.subr.bf16.mxu0 %v276_v27  ;;  %v280_v40 = vpack.c.bf16 %v45_v37, %v41_v36  ;;  %v312_v44 = vpack.c.bf16 %v47_v41, %v43_v38  ;;  %v42_v45 = vld [vmem:[%s583_s1 + $0xd0] sm:$0xff]  ;;  %v49_v47 = vld [vmem:[%s583_s1 + $0x108] sm:$0xff]  ;;  %v51_v49 = vld [vmem:[%s583_s1 + $0x118] sm:$0xff]  ;;  %v282_v51 = vpack.c.bf16 %v44_v43, %v40_v42  ;;  %v82_v36 = vlaneseq }
   0xc   :  { %309 = vmatprep.subr.bf16.mxu1 %v308_v31  ;;  %v46_v46 = vld [vmem:[%s583_s1 + $0xf0] sm:$0xff]  ;;  %v53_v48 = vld [vmem:[%s583_s1 + $0x128] sm:$0xff]  ;;  %v55_v50 = vld [vmem:[%s583_s1 + $0x138] sm:$0xff] }
   0xd   :  { %v314_v52 = vpack.c.bf16 %v46_v46, %v42_v45  ;;  %v284_v53 = vpack.c.bf16 %v53_v48, %v49_v47  ;;  %v48_v54 = vld [vmem:[%s583_s1 + $0x100] sm:$0xff]  ;;  %v50_v56 = vld [vmem:[%s583_s1 + $0x110] sm:$0xff]  ;;  %v316_v57 = vpack.c.bf16 %v55_v50, %v51_v49  ;;  %v57_v59 = vld [vmem:[%s583_s1 + $0x148] sm:$0xff]  ;;  %v83_v37 = vshrl.u32 %v82_v36, 7 }
   0xe   :  { %279 = vmatpush1.bf16.msra.mxu0 %v278_v35  ;;  %v52_v55 = vld [vmem:[%s583_s1 + $0x120] sm:$0xff]  ;;  %v54_v58 = vld [vmem:[%s583_s1 + $0x130] sm:$0xff]  ;;  %v61_v60 = vld [vmem:[%s583_s1 + $0x168] sm:$0xff] }
   0xf   :  { %311 = vmatpush1.bf16.msra.mxu1 %v310_v39  ;;  %281 = vmatprep.subr.bf16.mxu0 %v280_v40  ;;  %v59_v61 = vld [vmem:[%s583_s1 + $0x158] sm:$0xff]  ;;  %v286_v63 = vpack.c.bf16 %v52_v55, %v48_v54  ;;  %v318_v0 = vpack.c.bf16 %v54_v58, %v50_v56  ;;  %v288_v1 = vpack.c.bf16 %v61_v60, %v57_v59  ;;  %v56_v2 = vld [vmem:[%s583_s1 + $0x140] sm:$0xff]  ;;  %v58_v5 = vld [vmem:[%s583_s1 + $0x150] sm:$0xff]  ;;  %v84_v38 = vsub.s32 0, %v83_v37 }
  0x10   :  { %313 = vmatprep.subr.bf16.mxu1 %v312_v44  ;;  %v63_v62 = vld [vmem:[%s583_s1 + $0x178] sm:$0xff]  ;;  %v60_v4 = vld [vmem:[%s583_s1 + $0x160] sm:$0xff]  ;;  %v62_v7 = vld [vmem:[%s583_s1 + $0x170] sm:$0xff]  ;;  %v92_v40 = vsub.s32 2, %v83_v37  ;;  %v88_v41 = vsub.s32 1, %v83_v37  ;;  %v96_v42 = vsub.s32 3, %v83_v37 }
  0x11   :  { %v320_v6 = vpack.c.bf16 %v63_v62, %v59_v61  ;;  %v65_v8 = vld [vmem:[%s583_s1 + $0x188] sm:$0xff]  ;;  %v67_v10 = vld [vmem:[%s583_s1 + $0x198] sm:$0xff]  ;;  %v290_v12 = vpack.c.bf16 %v60_v4, %v56_v2  ;;  %v322_v13 = vpack.c.bf16 %v62_v7, %v58_v5  ;;  %v64_v15 = vld [vmem:[%s583_s1 + $0x180] sm:$0xff] }
  0x12   :  { %283 = vmatpush1.bf16.msra.mxu0 %v282_v51  ;;  %v69_v9 = vld [vmem:[%s583_s1 + $0x1a8] sm:$0xff]  ;;  %v71_v11 = vld [vmem:[%s583_s1 + $0x1b8] sm:$0xff]  ;;  %v68_v16 = vld [vmem:[%s583_s1 + $0x1a0] sm:$0xff] }
  0x13   :  { %315 = vmatpush1.bf16.msra.mxu1 %v314_v52  ;;  %285 = vmatprep.subr.bf16.mxu0 %v284_v53  ;;  %v292_v14 = vpack.c.bf16 %v69_v9, %v65_v8  ;;  %v66_v17 = vld [vmem:[%s583_s1 + $0x190] sm:$0xff]  ;;  %v324_v18 = vpack.c.bf16 %v71_v11, %v67_v10  ;;  %v73_v20 = vld [vmem:[%s583_s1 + $0x1c8] sm:$0xff]  ;;  %v75_v22 = vld [vmem:[%s583_s1 + $0x1d8] sm:$0xff]  ;;  %v294_v24 = vpack.c.bf16 %v68_v16, %v64_v15 }
  0x14   :  { %317 = vmatprep.subr.bf16.mxu1 %v316_v57  ;;  %v70_v19 = vld [vmem:[%s583_s1 + $0x1b0] sm:$0xff]  ;;  %v77_v21 = vld [vmem:[%s583_s1 + $0x1e8] sm:$0xff]  ;;  %v79_v23 = vld [vmem:[%s583_s1 + $0x1f8] sm:$0xff] }
  0x15   :  { %v326_v25 = vpack.c.bf16 %v70_v19, %v66_v17  ;;  %v296_v26 = vpack.c.bf16 %v77_v21, %v73_v20  ;;  %v72_v27 = vld [vmem:[%s583_s1 + $0x1c0] sm:$0xff]  ;;  %v328_v29 = vpack.c.bf16 %v79_v23, %v75_v22  ;;  %v74_v30 = vld [vmem:[%s583_s1 + $0x1d0] sm:$0xff]  ;;  %v15_v35 = vld [vmem:[%s584_s0 + $0x8] sm:$0xff] }
  0x16   :  { %287 = vmatpush1.bf16.msra.mxu0 %v286_v63  ;;  %v76_v28 = vld [vmem:[%s583_s1 + $0x1e0] sm:$0xff]  ;;  %v78_v31 = vld [vmem:[%s583_s1 + $0x1f0] sm:$0xff] }
  0x17   :  { %319 = vmatpush1.bf16.msra.mxu1 %v318_v0  ;;  %289 = vmatprep.subr.bf16.mxu0 %v288_v1  ;;  %v298_v32 = vpack.c.bf16 %v76_v28, %v72_v27  ;;  %v330_v33 = vpack.c.bf16 %v78_v31, %v74_v30  ;;  %v14_v34 = vld [vmem:[%s584_s0] sm:$0xff] }
  0x18   :  { %321 = vmatprep.subr.bf16.mxu1 %v320_v6  ;;  %v80_v39 = vld [vmem:[%s585_s2] sm:$0xf] }
  0x19   :  { %v85_v43 = vrot.slane %v80_v39, %v84_v38  ;;  %v93_v44 = vrot.slane %v80_v39, %v92_v40  ;;  %v89_v45 = vrot.slane %v80_v39, %v88_v41  ;;  %v97_v46 = vrot.slane %v80_v39, %v96_v42 }
  0x1a   :  { %291 = vmatpush1.bf16.msra.mxu0 %v290_v12 }
  0x1b   :  { %323 = vmatpush1.bf16.msra.mxu1 %v322_v13  ;;  %293 = vmatprep.subr.bf16.mxu0 %v292_v14 }
  0x1c   :  { %325 = vmatprep.subr.bf16.mxu1 %v324_v18 }
  0x1e   :  { %295 = vmatpush1.bf16.msra.mxu0 %v294_v24 }
  0x1f   :  { %327 = vmatpush1.bf16.msra.mxu1 %v326_v25  ;;  %297 = vmatprep.subr.bf16.mxu0 %v296_v26 }
  0x20   :  { %329 = vmatprep.subr.bf16.mxu1 %v328_v29 }
  0x22   :  { %299 = vmatpush1.bf16.msra.mxu0 %v298_v32 }
  0x23   :  { %331 = vmatpush1.bf16.msra.mxu1 %v330_v33 }
  0x25   :  { %167 = vmatmul.mubr.f32.vlgmr.msra.gmra.mrb[0].mxu0 %v14_v34 }
  0x26   :  { %244 = vmatmul.mubr.f32.vlgmr.msra.gmra.mrb[0].mxu1 %v14_v34  ;;  %172 = vmatprep.mubr.f32.mxu0 %v333_v3 }
  0x27   :  { %249 = vmatprep.mubr.f32.mxu1 %v333_v3 }
  0x29   :  { %173 = vmatmul.mubr.f32.gmra.mrb[2].mxu0 %v15_v35 }
  0x2a   :  { %250 = vmatmul.mubr.f32.gmra.mrb[2].mxu1 %v15_v35 }
  0xf8   :  { %v168_v47 = vpop.f32.mrb[0].mxu0 }
  0xf9   :  { %v169_v48 = vadd.f32 %v168_v47, %v85_v43  ;;  %v245_v49 = vpop.f32.mrb[0].mxu1  ;;  %v170_v3 = vpop.f32.mrb[1].mxu0 }
  0xfa   :  { %v246_v50 = vadd.f32 %v245_v49, %v93_v44  ;;  %v171_v51 = vadd.f32 %v170_v3, %v89_v45  ;;  %v247_v52 = vpop.f32.mrb[1].mxu1 }
  0xfb   :  { %256 = vst [vmem:[%s586_s3] sm:$0xff] %v169_v48  ;;  %v248_v53 = vadd.f32 %v247_v52, %v97_v46 }
  0xfc   :  { %258 = vst [vmem:[%s586_s3 + $0x10] sm:$0xff] %v246_v50  ;;  %257 = vst [vmem:[%s586_s3 + $0x8] sm:$0xff] %v171_v51  ;;  %v174_v54 = vpop.f32.mrb[2].mxu0 }
  0xfd   :  { %259 = vst [vmem:[%s586_s3 + $0x18] sm:$0xff] %v248_v53  ;;  %v175_v55 = vadd.f32 %v174_v54, %v85_v43  ;;  %v251_v56 = vpop.f32.mrb[2].mxu1  ;;  %v176_v57 = vpop.f32.mrb[3].mxu0 }
  0xfe   :  { %v252_v58 = vadd.f32 %v251_v56, %v93_v44  ;;  %v177_v59 = vadd.f32 %v176_v57, %v89_v45  ;;  %v253_v60 = vpop.f32.mrb[3].mxu1 }
  0xff   :  { %260 = vst [vmem:[%s586_s3 + $0x20] sm:$0xff] %v175_v55  ;;  %v254_v61 = vadd.f32 %v253_v60, %v97_v46 }
 0x100   :  { %262 = vst [vmem:[%s586_s3 + $0x30] sm:$0xff] %v252_v58  ;;  %261 = vst [vmem:[%s586_s3 + $0x28] sm:$0xff] %v177_v59 }
 0x101   :  { %263 = vst [vmem:[%s586_s3 + $0x38] sm:$0xff] %v254_v61 }

// kernel: e2e_forward.9
= control target key start
LH: loop header
LB: loop body
LE: loop exit
PB: predicated region body
PF: predicated region fallthrough
CT: control target
= control target key end

     0   :  { %s3055_s9 = smov 0   ;;  %s3918_s0 = inlined_call_operand.vmem [shape: f32[16,2,512], index: 0, kind: input, shape index: {}]   ;;  %s3919_s1 = inlined_call_operand.vmem [shape: f32[128,512], index: 1, kind: input, shape index: {}]   ;;  %s3920_s2 = inlined_call_operand.vmem [shape: f32[16,2,128], index: 2, kind: output, shape index: {}]  }
   0x1 LB: > { %s2326_s10 = sadd.s32 4294967295, %s3035_s9   ;;  %p2330_p0 = scmp.ge.s32.totalorder %s3035_s9, 1  ;;  %s3035_s9 = sphi %s3055_s9, %s12_s9  }
   0x2   : > { %p114_p1 = scmp.lt.s32.totalorder %s3035_s9, 3 }
   0x4   : > { %p115_p2 = pnand %p2330_p0, %p114_p1 }
   0x5   : > { %s2331_s11 = sshll.u32 (!%p115_p2), %s2326_s10, 3  ;;  %p2336_p4 = scmp.ne.s32.totalorder (!%p115_p2), %s2326_s10, 0 }
   0x6   : > { %118 = sbr.rel (%p115_p2) target bundleno = 2186 (0x88a), region = 28  ;;  %p138_p3 = scmp.lt.s32.totalorder (!%p115_p2), %s2331_s11, 15 }
   0xd   : > { %s3922_s11 = smov (!%p138_p3, %s2331_s11), 15  ;;  %153 = sbr.rel (%p2336_p4) target bundleno = 20 (0x14), region = 32 }
   0xe   : > { %s2377_s12 = sshll.u32 %s3922_s11, 3  ;;  %s2335_s13 = sshll.u32 %s3922_s11, 1  ;;  %v3037_v0 = vmov (!%p2336_p4), 0.0  }
   0xf   : > { %s3066_s16 = scalar_lea.vmem %s3918_s0, %s2377_s12  ;;  %s3071_s19 = scalar_lea.vmem %s3920_s2, %s2335_s13  ;;  %154 = vst [vmem:[#allocation2] sm:$0x3] (!%p2336_p4), %v3037_v0  ;;  %155 = vst [vmem:[#allocation3] sm:$0x3] (!%p2336_p4), %v3037_v0 }
  0x14 PF: > { %v160_v1 = vld [vmem:[%s3919_s1 + $0x8] sm:$0xff]  ;;  %v162_v3 = vld [vmem:[%s3919_s1 + $0x18] sm:$0xff]  ;;  %v159_v6 = vld [vmem:[%s3919_s1] sm:$0xff]  ;;  %v3038_v8 = vmov 0.0  }
  0x15   : > { %v164_v2 = vld [vmem:[%s3919_s1 + $0x28] sm:$0xff]  ;;  %v166_v5 = vld [vmem:[%s3919_s1 + $0x38] sm:$0xff]  ;;  %v163_v7 = vld [vmem:[%s3919_s1 + $0x20] sm:$0xff]  ;;  %287 = vmatprep.mubr.f32.mxu0 %v3038_v8  ;;  %358 = vmatprep.mubr.f32.mxu1 %v3038_v8 }
  0x16   : > { %v3082_v4 = vpack.c.bf16 %v164_v2, %v160_v1  ;;  %v3095_v9 = vpack.c.bf16 %v166_v5, %v162_v3  ;;  %v3097_v10 = vpack.c.bf16 %v163_v7, %v159_v6  ;;  %v161_v11 = vld [vmem:[%s3919_s1 + $0x10] sm:$0xff]  ;;  %v168_v13 = vld [vmem:[%s3919_s1 + $0x48] sm:$0xff]  ;;  %v170_v16 = vld [vmem:[%s3919_s1 + $0x58] sm:$0xff] }
  0x17   : > { %v165_v12 = vld [vmem:[%s3919_s1 + $0x30] sm:$0xff]  ;;  %v172_v15 = vld [vmem:[%s3919_s1 + $0x68] sm:$0xff]  ;;  %v174_v17 = vld [vmem:[%s3919_s1 + $0x78] sm:$0xff] }
  0x18   : > { %2379 = vmatprep.subr.bf16.mxu0 %v3082_v4  ;;  %v3109_v14 = vpack.c.bf16 %v165_v12, %v161_v11  ;;  %2411 = vmatprep.subr.bf16.mxu1 %v3095_v9  ;;  %v3122_v18 = vpack.c.bf16 %v172_v15, %v168_v13  ;;  %v3124_v19 = vpack.c.bf16 %v174_v17, %v170_v16  ;;  %v167_v20 = vld [vmem:[%s3919_s1 + $0x40] sm:$0xff]  ;;  %v169_v22 = vld [vmem:[%s3919_s1 + $0x50] sm:$0xff]  ;;  %v176_v25 = vld [vmem:[%s3919_s1 + $0x88] sm:$0xff] }
  0x19   : > { %2381 = vmatpush1.bf16.msra.mxu0 %v3097_v10  ;;  %v171_v21 = vld [vmem:[%s3919_s1 + $0x60] sm:$0xff]  ;;  %v173_v24 = vld [vmem:[%s3919_s1 + $0x70] sm:$0xff]  ;;  %v180_v26 = vld [vmem:[%s3919_s1 + $0xa8] sm:$0xff] }
  0x1a   : > { %2413 = vmatpush1.bf16.msra.mxu1 %v3109_v14  ;;  %v3136_v23 = vpack.c.bf16 %v171_v21, %v167_v20  ;;  %2383 = vmatprep.subr.bf16.mxu0 %v3122_v18  ;;  %v3149_v27 = vpack.c.bf16 %v173_v24, %v169_v22  ;;  %v3151_v28 = vpack.c.bf16 %v180_v26, %v176_v25  ;;  %v178_v29 = vld [vmem:[%s3919_s1 + $0x98] sm:$0xff]  ;;  %v175_v31 = vld [vmem:[%s3919_s1 + $0x80] sm:$0xff]  ;;  %v177_v34 = vld [vmem:[%s3919_s1 + $0x90] sm:$0xff] }
  0x1b   : > { %2415 = vmatprep.subr.bf16.mxu1 %v3124_v19  ;;  %v182_v30 = vld [vmem:[%s3919_s1 + $0xb8] sm:$0xff]  ;;  %v179_v33 = vld [vmem:[%s3919_s1 + $0xa0] sm:$0xff]  ;;  %v181_v35 = vld [vmem:[%s3919_s1 + $0xb0] sm:$0xff] }
  0x1c   : > { %v3162_v32 = vpack.c.bf16 %v182_v30, %v178_v29  ;;  %v3174_v36 = vpack.c.bf16 %v179_v33, %v175_v31  ;;  %v184_v37 = vld [vmem:[%s3919_s1 + $0xc8] sm:$0xff]  ;;  %v186_v39 = vld [vmem:[%s3919_s1 + $0xd8] sm:$0xff]  ;;  %v3187_v40 = vpack.c.bf16 %v181_v35, %v177_v34  ;;  %v183_v43 = vld [vmem:[%s3919_s1 + $0xc0] sm:$0xff] }
  0x1d   : > { %2385 = vmatpush1.bf16.msra.mxu0 %v3136_v23  ;;  %v188_v38 = vld [vmem:[%s3919_s1 + $0xe8] sm:$0xff]  ;;  %v190_v42 = vld [vmem:[%s3919_s1 + $0xf8] sm:$0xff]  ;;  %v187_v44 = vld [vmem:[%s3919_s1 + $0xe0] sm:$0xff] }
  0x1e   : > { %2417 = vmatpush1.bf16.msra.mxu1 %v3149_v27  ;;  %2387 = vmatprep.subr.bf16.mxu0 %v3151_v28  ;;  %v3189_v41 = vpack.c.bf16 %v188_v38, %v184_v37  ;;  %v3201_v45 = vpack.c.bf16 %v190_v42, %v186_v39  ;;  %v185_v46 = vld [vmem:[%s3919_s1 + $0xd0] sm:$0xff]  ;;  %v192_v48 = vld [vmem:[%s3919_s1 + $0x108] sm:$0xff]  ;;  %v194_v50 = vld [vmem:[%s3919_s1 + $0x118] sm:$0xff]  ;;  %v3222_v52 = vpack.c.bf16 %v187_v44, %v183_v43 }
  0x1f   : > { %2419 = vmatprep.subr.bf16.mxu1 %v3162_v32  ;;  %v189_v47 = vld [vmem:[%s3919_s1 + $0xf0] sm:$0xff]  ;;  %v196_v49 = vld [vmem:[%s3919_s1 + $0x128] sm:$0xff]  ;;  %v198_v51 = vld [vmem:[%s3919_s1 + $0x138] sm:$0xff] }
  0x20   : > { %v3226_v53 = vpack.c.bf16 %v189_v47, %v185_v46  ;;  %v3228_v54 = vpack.c.bf16 %v196_v49, %v192_v48  ;;  %v191_v55 = vld [vmem:[%s3919_s1 + $0x100] sm:$0xff]  ;;  %v193_v57 = vld [vmem:[%s3919_s1 + $0x110] sm:$0xff]  ;;  %v3240_v58 = vpack.c.bf16 %v198_v51, %v194_v50  ;;  %v200_v60 = vld [vmem:[%s3919_s1 + $0x148] sm:$0xff]  ;;  %v3039_v50 = vmov 1983009808  }
  0x21   : > { %2389 = vmatpush1.bf16.msra.mxu0 %v3174_v36  ;;  %v195_v56 = vld [vmem:[%s3919_s1 + $0x120] sm:$0xff]  ;;  %v197_v59 = vld [vmem:[%s3919_s1 + $0x130] sm:$0xff]  ;;  %v204_v61 = vld [vmem:[%s3919_s1 + $0x168] sm:$0xff]  ;;  %v372_v51 = vunpack.c.l.s4 %v3039_v50 }
  0x22   : > { %2421 = vmatpush1.bf16.msra.mxu1 %v3187_v40  ;;  %2391 = vmatprep.subr.bf16.mxu0 %v3189_v41  ;;  %v202_v62 = vld [vmem:[%s3919_s1 + $0x158] sm:$0xff]  ;;  %v3258_v0 = vpack.c.bf16 %v195_v56, %v191_v55  ;;  %v3262_v1 = vpack.c.bf16 %v197_v59, %v193_v57  ;;  %v3264_v2 = vpack.c.bf16 %v204_v61, %v200_v60  ;;  %v199_v3 = vld [vmem:[%s3919_s1 + $0x140] sm:$0xff]  ;;  %v201_v6 = vld [vmem:[%s3919_s1 + $0x150] sm:$0xff]  ;;  %v374_v55 = vlaneseq }
  0x23   : > { %2423 = vmatprep.subr.bf16.mxu1 %v3201_v45  ;;  %v206_v63 = vld [vmem:[%s3919_s1 + $0x178] sm:$0xff]  ;;  %v203_v5 = vld [vmem:[%s3919_s1 + $0x160] sm:$0xff]  ;;  %v205_v11 = vld [vmem:[%s3919_s1 + $0x170] sm:$0xff]  ;;  %v373_v56 = vunpack.c.0.s8 %v372_v51 }
  0x24   : > { %v3276_v7 = vpack.c.bf16 %v206_v63, %v202_v62  ;;  %v208_v12 = vld [vmem:[%s3919_s1 + $0x188] sm:$0xff]  ;;  %v210_v15 = vld [vmem:[%s3919_s1 + $0x198] sm:$0xff]  ;;  %v3294_v17 = vpack.c.bf16 %v203_v5, %v199_v3  ;;  %v3298_v20 = vpack.c.bf16 %v205_v11, %v201_v6  ;;  %v207_v22 = vld [vmem:[%s3919_s1 + $0x180] sm:$0xff]  ;;  %v375_v57 = vshrl.u32 %v374_v55, 7 }
  0x25   : > { %2393 = vmatpush1.bf16.msra.mxu0 %v3222_v52  ;;  %v212_v13 = vld [vmem:[%s3919_s1 + $0x1a8] sm:$0xff]  ;;  %v214_v16 = vld [vmem:[%s3919_s1 + $0x1b8] sm:$0xff]  ;;  %v211_v24 = vld [vmem:[%s3919_s1 + $0x1a0] sm:$0xff] }
  0x26   : > { %2425 = vmatpush1.bf16.msra.mxu1 %v3226_v53  ;;  %2395 = vmatprep.subr.bf16.mxu0 %v3228_v54  ;;  %v3300_v21 = vpack.c.bf16 %v212_v13, %v208_v12  ;;  %v209_v25 = vld [vmem:[%s3919_s1 + $0x190] sm:$0xff]  ;;  %v3312_v26 = vpack.c.bf16 %v214_v16, %v210_v15  ;;  %v216_v30 = vld [vmem:[%s3919_s1 + $0x1c8] sm:$0xff]  ;;  %v218_v33 = vld [vmem:[%s3919_s1 + $0x1d8] sm:$0xff]  ;;  %v3330_v35 = vpack.c.bf16 %v211_v24, %v207_v22 }
  0x27   : > { %2427 = vmatprep.subr.bf16.mxu1 %v3240_v58  ;;  %v213_v29 = vld [vmem:[%s3919_s1 + $0x1b0] sm:$0xff]  ;;  %v220_v31 = vld [vmem:[%s3919_s1 + $0x1e8] sm:$0xff]  ;;  %v222_v34 = vld [vmem:[%s3919_s1 + $0x1f8] sm:$0xff]  ;;  %v3399_v60 = vsub.s32 %v373_v56, %v375_v57 }
  0x28   : > { %v3334_v37 = vpack.c.bf16 %v213_v29, %v209_v25  ;;  %v3336_v38 = vpack.c.bf16 %v220_v31, %v216_v30  ;;  %v215_v39 = vld [vmem:[%s3919_s1 + $0x1c0] sm:$0xff]  ;;  %v3345_v43 = vpack.c.bf16 %v222_v34, %v218_v33  ;;  %v217_v44 = vld [vmem:[%s3919_s1 + $0x1d0] sm:$0xff] }
  0x29   : > { %2397 = vmatpush1.bf16.msra.mxu0 %v3258_v0  ;;  %v219_v42 = vld [vmem:[%s3919_s1 + $0x1e0] sm:$0xff]  ;;  %v221_v46 = vld [vmem:[%s3919_s1 + $0x1f0] sm:$0xff] }
  0x2a   : > { %2429 = vmatpush1.bf16.msra.mxu1 %v3262_v1  ;;  %2399 = vmatprep.subr.bf16.mxu0 %v3264_v2  ;;  %v3354_v47 = vpack.c.bf16 %v219_v42, %v215_v39  ;;  %v3358_v48 = vpack.c.bf16 %v221_v46, %v217_v44  ;;  %v156_v49 = vld [vmem:[#allocation2] sm:$0x3]  ;;  %v157_v46 = vld [vmem:[#allocation3] sm:$0x3] }
  0x2b   : > { %2431 = vmatprep.subr.bf16.mxu1 %v3276_v7  ;;  %v158_v12 = vld [vmem:[%s3066_s16] sm:$0xff] }
  0x2d   : > { %2401 = vmatpush1.bf16.msra.mxu0 %v3294_v17 }
  0x2e   : > { %2433 = vmatpush1.bf16.msra.mxu1 %v3298_v20  ;;  %2403 = vmatprep.subr.bf16.mxu0 %v3300_v21 }
  0x2f   : > { %2435 = vmatprep.subr.bf16.mxu1 %v3312_v26 }
  0x31   : > { %2405 = vmatpush1.bf16.msra.mxu0 %v3330_v35 }
  0x32   : > { %2437 = vmatpush1.bf16.msra.mxu1 %v3334_v37  ;;  %2407 = vmatprep.subr.bf16.mxu0 %v3336_v38 }
  0x33   : > { %2439 = vmatprep.subr.bf16.mxu1 %v3345_v43 }
  0x35   : > { %2409 = vmatpush1.bf16.msra.mxu0 %v3354_v47 }
  0x36   : > { %2441 = vmatpush1.bf16.msra.mxu1 %v3358_v48  ;;  %2443 = vmatprep.subr.bf16.mxu0 %v3082_v4 }
  0x37   : > { %2475 = vmatprep.subr.bf16.mxu1 %v3095_v9 }
  0x38   : > { %288 = vmatmul.mubr.f32.vlgmr.msra.gmra.mrb[0].mxu0 %v156_v49 }
  0x39   : > { %359 = vmatmul.mubr.f32.vlgmr.msra.gmra.mrb[0].mxu1 %v156_v49  ;;  %2445 = vmatpush1.bf16.msra.mxu0 %v3097_v10 }
  0x3a   : > { %2477 = vmatpush1.bf16.msra.mxu1 %v3109_v14  ;;  %2447 = vmatprep.subr.bf16.mxu0 %v3122_v18 }
  0x3b   : > { %2479 = vmatprep.subr.bf16.mxu1 %v3124_v19  ;;  %550 = vmatprep.mubr.f32.mxu0 %v3038_v8 }
  0x3c   : > { %621 = vmatprep.mubr.f32.mxu1 %v3038_v8 }
  0x3d   : > { %2449 = vmatpush1.bf16.msra.mxu0 %v3136_v23 }
  0x3e   : > { %2481 = vmatpush1.bf16.msra.mxu1 %v3149_v27  ;;  %2451 = vmatprep.subr.bf16.mxu0 %v3151_v28 }
  0x3f   : > { %2483 = vmatprep.subr.bf16.mxu1 %v3162_v32 }
  0x41   : > { %2453 = vmatpush1.bf16.msra.mxu0 %v3174_v36 }
  0x42   : > { %2485 = vmatpush1.bf16.msra.mxu1 %v3187_v40  ;;  %2455 = vmatprep.subr.bf16.mxu0 %v3189_v41 }
  0x43   : > { %2487 = vmatprep.subr.bf16.mxu1 %v3201_v45 }
  0x45   : > { %2457 = vmatpush1.bf16.msra.mxu0 %v3222_v52 }
  0x46   : > { %2489 = vmatpush1.bf16.msra.mxu1 %v3226_v53  ;;  %2459 = vmatprep.subr.bf16.mxu0 %v3228_v54 }
  0x47   : > { %2491 = vmatprep.subr.bf16.mxu1 %v3240_v58 }
  0x49   : > { %2461 = vmatpush1.bf16.msra.mxu0 %v3258_v0 }
  0x4a   : > { %2493 = vmatpush1.bf16.msra.mxu1 %v3262_v1  ;;  %2463 = vmatprep.subr.bf16.mxu0 %v3264_v2 }
  0x4b   : > { %2495 = vmatprep.subr.bf16.mxu1 %v3276_v7 }
  0x4d   : > { %2465 = vmatpush1.bf16.msra.mxu0 %v3294_v17 }
  0x4e   : > { %2497 = vmatpush1.bf16.msra.mxu1 %v3298_v20  ;;  %2467 = vmatprep.subr.bf16.mxu0 %v3300_v21 }
  0x4f   : > { %2499 = vmatprep.subr.bf16.mxu1 %v3312_v26 }
  0x51   : > { %2469 = vmatpush1.bf16.msra.mxu0 %v3330_v35 }
  0x52   : > { %2501 = vmatpush1.bf16.msra.mxu1 %v3334_v37  ;;  %2471 = vmatprep.subr.bf16.mxu0 %v3336_v38 }
  0x53   : > { %2503 = vmatprep.subr.bf16.mxu1 %v3345_v43 }
  0x55   : > { %2473 = vmatpush1.bf16.msra.mxu0 %v3354_v47 }
  0x56   : > { %2505 = vmatpush1.bf16.msra.mxu1 %v3358_v48  ;;  %2507 = vmatprep.subr.bf16.mxu0 %v3082_v4 }
  0x57   : > { %2539 = vmatprep.subr.bf16.mxu1 %v3095_v9 }
 0x10b   : > { %v289_v59 = vpop.f32.mrb[0].mxu0 }
 0x10c   : > { %v360_v61 = vpop.f32.mrb[0].mxu1  ;;  %v291_v62 = vpop.f32.mrb[1].mxu0 }
 0x10d   : > { %v369_v63 = vcombine.low %v289_v59, %v291_v62  ;;  %v362_v3 = vpop.f32.mrb[1].mxu1 }
 0x10e   : > { %v370_v5 = vcombine.low %v360_v61, %v362_v3 }
 0x10f   : > { %v377_v6 = vrot.slane %v369_v63, %v3399_v60 }
 0x110   : > { %v384_v11 = vrot.slane %v370_v5, %v3399_v60 }
 0x112   : > { %v385_v13 = vcombine.low %v377_v6, %v384_v11 }
 0x114   : > { %v387_v15 = vadd.f32 %v385_v13, %v158_v12 }
 0x116   : > { %v2337_v16 = vmul.f32 -1.442695, %v387_v15  ;;  %v395_v22 = vrot.slane %v387_v15, 2  ;;  %v406_v25 = vrot.slane %v387_v15, 6  ;;  %v403_v31 = vrot.slane %v387_v15, 4 }
 0x118   : > { %2901 = vpow2.f32 %v2337_v16  ;;  %v2338_v24 = vmul.f32 -1.442695, %v395_v22  ;;  %v2339_v29 = vmul.f32 -1.442695, %v406_v25  ;;  %v2340_v16 = vld [vmem:[%s3066_s16 + $0x8] sm:$0xff] }
 0x11a   : > { %2903 = vpow2.f32 %v2338_v24 }
 0x11b   : > { %2905 = vpow2.f32 %v2339_v29 }
 0x122   : > { %v2902_v30 = vpop.eup %2901 }
 0x123   : > { %v391_v33 = vadd.f32 1.0, %v2902_v30 }
 0x124   : > { %v2904_v34 = vpop.eup %2903 }
 0x125   : > { %2907 = vrcp.f32 %v391_v33  ;;  %v400_v39 = vadd.f32 1.0, %v2904_v34  ;;  %v2906_v42 = vpop.eup %2905 }
 0x126   : > { %2909 = vtanh.f32 %v403_v31  ;;  %v411_v51 = vadd.f32 1.0, %v2906_v42 }
 0x127   : > { %2911 = vrcp.f32 %v400_v39 }
 0x128   : > { %2913 = vrcp.f32 %v411_v51 }
 0x12f   : > { %v2908_v44 = vpop.eup %2907 }
 0x130   : > { %v2910_v49 = vpop.eup %2909 }
 0x131   : > { %v2912_v50 = vpop.eup %2911  ;;  %v415_v56 = vmul.f32 %v2910_v49, %v2908_v44 }
 0x132   : > { %v414_v55 = vmul.f32 %v2912_v50, %v157_v46  ;;  %v2914_v59 = vpop.eup %2913 }
 0x134   : > { %v3404_v57 = vadd.f32 %v415_v56, %v414_v55 }
 0x136   : > { %2915 = vtanh.f32 %v3404_v57 }
 0x140   : > { %v2916_v61 = vpop.eup %2915 }
 0x141   : > { %v418_v62 = vmul.f32 %v2916_v61, %v2914_v59 }
 0x143   : > { %419 = vst [vmem:[%s3071_s19] sm:$0x3] %v418_v62  ;;  %551 = vmatmul.mubr.f32.vlgmr.msra.gmra.mrb[2].mxu0 %v418_v62  ;;  %622 = vmatmul.mubr.f32.vlgmr.msra.gmra.mrb[2].mxu1 %v418_v62 }
 0x144   : > { %2509 = vmatpush1.bf16.msra.mxu0 %v3097_v10  ;;  %2541 = vmatpush1.bf16.msra.mxu1 %v3109_v14 }
 0x145   : > { %2511 = vmatprep.subr.bf16.mxu0 %v3122_v18  ;;  %2543 = vmatprep.subr.bf16.mxu1 %v3124_v19 }
 0x146   : > { %814 = vmatprep.mubr.f32.mxu0 %v3038_v8  ;;  %885 = vmatprep.mubr.f32.mxu1 %v3038_v8 }
 0x148   : > { %2513 = vmatpush1.bf16.msra.mxu0 %v3136_v23  ;;  %2545 = vmatpush1.bf16.msra.mxu1 %v3149_v27 }
 0x149   : > { %2515 = vmatprep.subr.bf16.mxu0 %v3151_v28  ;;  %2547 = vmatprep.subr.bf16.mxu1 %v3162_v32 }
 0x14c   : > { %2517 = vmatpush1.bf16.msra.mxu0 %v3174_v36  ;;  %2549 = vmatpush1.bf16.msra.mxu1 %v3187_v40 }
 0x14d   : > { %2519 = vmatprep.subr.bf16.mxu0 %v3189_v41  ;;  %2551 = vmatprep.subr.bf16.mxu1 %v3201_v45 }
 0x150   : > { %2521 = vmatpush1.bf16.msra.mxu0 %v3222_v52  ;;  %2553 = vmatpush1.bf16.msra.mxu1 %v3226_v53 }
 0x151   : > { %2523 = vmatprep.subr.bf16.mxu0 %v3228_v54  ;;  %2555 = vmatprep.subr.bf16.mxu1 %v3240_v58 }
 0x154   : > { %2525 = vmatpush1.bf16.msra.mxu0 %v3258_v0  ;;  %2557 = vmatpush1.bf16.msra.mxu1 %v3262_v1 }
 0x155   : > { %2527 = vmatprep.subr.bf16.mxu0 %v3264_v2  ;;  %2559 = vmatprep.subr.bf16.mxu1 %v3276_v7 }
 0x158   : > { %2529 = vmatpush1.bf16.msra.mxu0 %v3294_v17  ;;  %2561 = vmatpush1.bf16.msra.mxu1 %v3298_v20 }
 0x159   : > { %2531 = vmatprep.subr.bf16.mxu0 %v3300_v21  ;;  %2563 = vmatprep.subr.bf16.mxu1 %v3312_v26 }
 0x15c   : > { %2533 = vmatpush1.bf16.msra.mxu0 %v3330_v35  ;;  %2565 = vmatpush1.bf16.msra.mxu1 %v3334_v37 }
 0x15d   : > { %2535 = vmatprep.subr.bf16.mxu0 %v3336_v38  ;;  %2567 = vmatprep.subr.bf16.mxu1 %v3345_v43 }
 0x160   : > { %2537 = vmatpush1.bf16.msra.mxu0 %v3354_v47  ;;  %2569 = vmatpush1.bf16.msra.mxu1 %v3358_v48 }
 0x161   : > { %2571 = vmatprep.subr.bf16.mxu0 %v3082_v4  ;;  %2603 = vmatprep.subr.bf16.mxu1 %v3095_v9 }
 0x216   : > { %v552_v63 = vpop.f32.mrb[2].mxu0  ;;  %v623_v3 = vpop.f32.mrb[2].mxu1 }
 0x217   : > { %v554_v5 = vpop.f32.mrb[3].mxu0  ;;  %v625_v6 = vpop.f32.mrb[3].mxu1 }
 0x218   : > { %v632_v11 = vcombine.low %v552_v63, %v554_v5  ;;  %v633_v12 = vcombine.low %v623_v3, %v625_v6  ;;  %v1215_v5 = vld [vmem:[%s3919_s1 + $0x8] sm:$0xff] }
 0x219   : > { %v1219_v6 = vld [vmem:[%s3919_s1 + $0x28] sm:$0xff] }
 0x21a   : > { %v640_v13 = vrot.slane %v632_v11, %v3399_v60  ;;  %v647_v15 = vrot.slane %v633_v12, %v3399_v60  ;;  %v1217_v11 = vld [vmem:[%s3919_s1 + $0x18] sm:$0xff]  ;;  %v3501_v12 = vpack.c.bf16 %v1219_v6, %v1215_v5 }
 0x21b   : > { %v1261_v5 = vld [vmem:[%s3919_s1 + $0x178] sm:$0xff] }
 0x21c   : > { %v648_v22 = vcombine.low %v640_v13, %v647_v15  ;;  %v1221_v13 = vld [vmem:[%s3919_s1 + $0x38] sm:$0xff]  ;;  %v1214_v15 = vld [vmem:[%s3919_s1] sm:$0xff] }
 0x21e   : > { %v650_v24 = vadd.f32 %v2340_v16, %v648_v22  ;;  %v1218_v16 = vld [vmem:[%s3919_s1 + $0x20] sm:$0xff]  ;;  %v3512_v22 = vpack.c.bf16 %v1221_v13, %v1217_v11 }
 0x220   : > { %v2341_v25 = vmul.f32 -1.442695, %v650_v24  ;;  %v658_v29 = vrot.slane %v650_v24, 2  ;;  %v669_v4 = vrot.slane %v650_v24, 6  ;;  %v666_v33 = vrot.slane %v650_v24, 4 }
 0x221   : > { %v3514_v24 = vpack.c.bf16 %v1218_v16, %v1214_v15  ;;  %v1254_v15 = vld [vmem:[%s3919_s1 + $0x140] sm:$0xff] }
 0x222   : > { %2917 = vpow2.f32 %v2341_v25  ;;  %v2342_v30 = vmul.f32 -1.442695, %v658_v29  ;;  %v2343_v9 = vmul.f32 -1.442695, %v669_v4  ;;  %v1216_v25 = vld [vmem:[%s3919_s1 + $0x10] sm:$0xff]  ;;  %v1223_v4 = vld [vmem:[%s3919_s1 + $0x48] sm:$0xff] }
 0x223   : > { %v1220_v29 = vld [vmem:[%s3919_s1 + $0x30] sm:$0xff]  ;;  %v1258_v16 = vld [vmem:[%s3919_s1 + $0x160] sm:$0xff] }
 0x224   : > { %2919 = vpow2.f32 %v2342_v30  ;;  %v3523_v30 = vpack.c.bf16 %v1220_v29, %v1216_v25  ;;  %v1256_v25 = vld [vmem:[%s3919_s1 + $0x150] sm:$0xff] }
 0x225   : > { %2921 = vpow2.f32 %v2343_v9  ;;  %v1227_v9 = vld [vmem:[%s3919_s1 + $0x68] sm:$0xff] }
 0x22c   : > { %v2918_v31 = vpop.eup %2917 }
 0x22d   : > { %v654_v34 = vadd.f32 1.0, %v2918_v31  ;;  %v1225_v31 = vld [vmem:[%s3919_s1 + $0x58] sm:$0xff] }
 0x22e   : > { %v2920_v39 = vpop.eup %2919 }
 0x22f   : > { %2923 = vrcp.f32 %v654_v34  ;;  %v663_v42 = vadd.f32 1.0, %v2920_v39  ;;  %v2922_v44 = vpop.eup %2921  ;;  %v1229_v34 = vld [vmem:[%s3919_s1 + $0x78] sm:$0xff]  ;;  %v1222_v39 = vld [vmem:[%s3919_s1 + $0x40] sm:$0xff] }
 0x230   : > { %2925 = vtanh.f32 %v666_v33  ;;  %v674_v51 = vadd.f32 1.0, %v2922_v44  ;;  %v3537_v33 = vpack.c.bf16 %v1227_v9, %v1223_v4  ;;  %v3548_v44 = vpack.c.bf16 %v1229_v34, %v1225_v31  ;;  %v1260_v4 = vld [vmem:[%s3919_s1 + $0x170] sm:$0xff]  ;;  %v1263_v9 = vld [vmem:[%s3919_s1 + $0x188] sm:$0xff]  ;;  %v1265_v34 = vld [vmem:[%s3919_s1 + $0x198] sm:$0xff] }
 0x231   : > { %2927 = vrcp.f32 %v663_v42  ;;  %v1226_v42 = vld [vmem:[%s3919_s1 + $0x60] sm:$0xff]  ;;  %v1267_v31 = vld [vmem:[%s3919_s1 + $0x1a8] sm:$0xff] }
 0x232   : > { %2929 = vrcp.f32 %v674_v51  ;;  %v1231_v51 = vld [vmem:[%s3919_s1 + $0x88] sm:$0xff] }
 0x239   : > { %v2924_v46 = vpop.eup %2923 }
 0x23a   : > { %v2926_v49 = vpop.eup %2925 }
 0x23b   : > { %v2928_v50 = vpop.eup %2927  ;;  %v678_v56 = vmul.f32 %v2926_v49, %v2924_v46  ;;  %v3550_v46 = vpack.c.bf16 %v1226_v42, %v1222_v39  ;;  %v1224_v49 = vld [vmem:[%s3919_s1 + $0x50] sm:$0xff]  ;;  %v1269_v39 = vld [vmem:[%s3919_s1 + $0x1b8] sm:$0xff]  ;;  %v3711_v42 = vpack.c.bf16 %v1258_v16, %v1254_v15 }
 0x23c   : > { %v677_v55 = vmul.f32 %v2928_v50, %v3404_v57  ;;  %v2930_v61 = vpop.eup %2929  ;;  %v1228_v50 = vld [vmem:[%s3919_s1 + $0x70] sm:$0xff] }
 0x23e   : > { %v3446_v59 = vadd.f32 %v678_v56, %v677_v55  ;;  %v3562_v55 = vpack.c.bf16 %v1228_v50, %v1224_v49  ;;  %v1235_v56 = vld [vmem:[%s3919_s1 + $0xa8] sm:$0xff]  ;;  %v3715_v49 = vpack.c.bf16 %v1260_v4, %v1256_v25  ;;  %v3717_v50 = vpack.c.bf16 %v1267_v31, %v1263_v9 }
 0x240   : > { %2931 = vtanh.f32 %v3446_v59 }
 0x24a   : > { %v2932_v62 = vpop.eup %2931 }
 0x24b   : > { %v681_v63 = vmul.f32 %v2932_v62, %v2930_v61  ;;  %v1237_v61 = vld [vmem:[%s3919_s1 + $0xb8] sm:$0xff]  ;;  %v3575_v62 = vpack.c.bf16 %v1235_v56, %v1231_v51  ;;  %v1262_v51 = vld [vmem:[%s3919_s1 + $0x180] sm:$0xff] }
 0x24c   : > { %v1266_v56 = vld [vmem:[%s3919_s1 + $0x1a0] sm:$0xff] }
 0x24d   : > { %2344 = vst [vmem:[%s3071_s19 + $0x2] sm:$0x3] %v681_v63  ;;  %815 = vmatmul.mubr.f32.vlgmr.msra.gmra.mrb[4].mxu0 %v681_v63  ;;  %886 = vmatmul.mubr.f32.vlgmr.msra.gmra.mrb[4].mxu1 %v681_v63 }
 0x24e   : > { %2573 = vmatpush1.bf16.msra.mxu0 %v3097_v10  ;;  %2605 = vmatpush1.bf16.msra.mxu1 %v3109_v14 }
 0x24f   : > { %2575 = vmatprep.subr.bf16.mxu0 %v3122_v18  ;;  %2607 = vmatprep.subr.bf16.mxu1 %v3124_v19 }
 0x250   : > { %1078 = vmatprep.mubr.f32.mxu0 %v3038_v8  ;;  %1149 = vmatprep.mubr.f32.mxu1 %v3038_v8 }
 0x252   : > { %2577 = vmatpush1.bf16.msra.mxu0 %v3136_v23  ;;  %2609 = vmatpush1.bf16.msra.mxu1 %v3149_v27 }
 0x253   : > { %2579 = vmatprep.subr.bf16.mxu0 %v3151_v28  ;;  %2611 = vmatprep.subr.bf16.mxu1 %v3162_v32 }
 0x256   : > { %2581 = vmatpush1.bf16.msra.mxu0 %v3174_v36  ;;  %2613 = vmatpush1.bf16.msra.mxu1 %v3187_v40  ;;  %v2345_v36 = vld [vmem:[%s3066_s16 + $0x10] sm:$0xff] }
 0x257   : > { %2583 = vmatprep.subr.bf16.mxu0 %v3189_v41  ;;  %2615 = vmatprep.subr.bf16.mxu1 %v3201_v45 }
 0x25a   : > { %2585 = vmatpush1.bf16.msra.mxu0 %v3222_v52  ;;  %2617 = vmatpush1.bf16.msra.mxu1 %v3226_v53 }
 0x25b   : > { %2587 = vmatprep.subr.bf16.mxu0 %v3228_v54  ;;  %2619 = vmatprep.subr.bf16.mxu1 %v3240_v58 }
 0x25e   : > { %2589 = vmatpush1.bf16.msra.mxu0 %v3258_v0  ;;  %2621 = vmatpush1.bf16.msra.mxu1 %v3262_v1 }
 0x25f   : > { %2591 = vmatprep.subr.bf16.mxu0 %v3264_v2  ;;  %2623 = vmatprep.subr.bf16.mxu1 %v3276_v7 }
 0x262   : > { %2593 = vmatpush1.bf16.msra.mxu0 %v3294_v17  ;;  %2625 = vmatpush1.bf16.msra.mxu1 %v3298_v20 }
 0x263   : > { %2595 = vmatprep.subr.bf16.mxu0 %v3300_v21  ;;  %2627 = vmatprep.subr.bf16.mxu1 %v3312_v26 }
 0x266   : > { %2597 = vmatpush1.bf16.msra.mxu0 %v3330_v35  ;;  %2629 = vmatpush1.bf16.msra.mxu1 %v3334_v37 }
 0x267   : > { %2599 = vmatprep.subr.bf16.mxu0 %v3336_v38  ;;  %2631 = vmatprep.subr.bf16.mxu1 %v3345_v43 }
 0x26a   : > { %2601 = vmatpush1.bf16.msra.mxu0 %v3354_v47  ;;  %2633 = vmatpush1.bf16.msra.mxu1 %v3358_v48 }
 0x26b   : > { %2635 = vmatprep.subr.bf16.mxu0 %v3501_v12  ;;  %2667 = vmatprep.subr.bf16.mxu1 %v3512_v22 }
 0x320   : > { %v816_v10 = vpop.f32.mrb[4].mxu0  ;;  %v887_v14 = vpop.f32.mrb[4].mxu1 }
 0x321   : > { %v818_v18 = vpop.f32.mrb[5].mxu0  ;;  %v889_v19 = vpop.f32.mrb[5].mxu1 }
 0x322   : > { %v896_v23 = vcombine.low %v816_v10, %v818_v18  ;;  %v897_v27 = vcombine.low %v887_v14, %v889_v19  ;;  %v1230_v10 = vld [vmem:[%s3919_s1 + $0x80] sm:$0xff]  ;;  %v1232_v18 = vld [vmem:[%s3919_s1 + $0x90] sm:$0xff] }
 0x323   : > { %v1234_v14 = vld [vmem:[%s3919_s1 + $0xa0] sm:$0xff] }
 0x324   : > { %v904_v28 = vrot.slane %v896_v23, %v3399_v60  ;;  %v911_v32 = vrot.slane %v897_v27, %v3399_v60  ;;  %v3589_v19 = vpack.c.bf16 %v1234_v14, %v1230_v10  ;;  %v1236_v23 = vld [vmem:[%s3919_s1 + $0xb0] sm:$0xff]  ;;  %v1239_v27 = vld [vmem:[%s3919_s1 + $0xc8] sm:$0xff] }
 0x325   : > { %v1268_v10 = vld [vmem:[%s3919_s1 + $0x1b0] sm:$0xff]  ;;  %v1271_v14 = vld [vmem:[%s3919_s1 + $0x1c8] sm:$0xff] }
 0x326   : > { %v912_v40 = vcombine.low %v904_v28, %v911_v32  ;;  %v1243_v28 = vld [vmem:[%s3919_s1 + $0xe8] sm:$0xff]  ;;  %v3602_v32 = vpack.c.bf16 %v1236_v23, %v1232_v18  ;;  %v1273_v23 = vld [vmem:[%s3919_s1 + $0x1d8] sm:$0xff] }
 0x327   : > { %v1275_v18 = vld [vmem:[%s3919_s1 + $0x1e8] sm:$0xff] }
 0x328   : > { %v914_v41 = vadd.f32 %v2345_v36, %v912_v40  ;;  %v3604_v36 = vpack.c.bf16 %v1243_v28, %v1239_v27  ;;  %v1241_v40 = vld [vmem:[%s3919_s1 + $0xd8] sm:$0xff]  ;;  %v3747_v28 = vpack.c.bf16 %v1266_v56, %v1262_v51 }
 0x329   : > { %v1277_v27 = vld [vmem:[%s3919_s1 + $0x1f8] sm:$0xff] }
 0x32a   : > { %v2346_v45 = vmul.f32 -1.442695, %v914_v41  ;;  %v922_v52 = vrot.slane %v914_v41, 2  ;;  %v933_v54 = vrot.slane %v914_v41, 6  ;;  %v930_v1 = vrot.slane %v914_v41, 4  ;;  %v1245_v41 = vld [vmem:[%s3919_s1 + $0xf8] sm:$0xff] }
 0x32c   : > { %2933 = vpow2.f32 %v2346_v45  ;;  %v2347_v53 = vmul.f32 -1.442695, %v922_v52  ;;  %v2348_v58 = vmul.f32 -1.442695, %v933_v54  ;;  %v1238_v45 = vld [vmem:[%s3919_s1 + $0xc0] sm:$0xff]  ;;  %v3615_v52 = vpack.c.bf16 %v1245_v41, %v1241_v40  ;;  %v1240_v54 = vld [vmem:[%s3919_s1 + $0xd0] sm:$0xff] }
 0x32d   : > { %v3753_v41 = vpack.c.bf16 %v1275_v18, %v1271_v14 }
 0x32e   : > { %2935 = vpow2.f32 %v2347_v53  ;;  %v1242_v53 = vld [vmem:[%s3919_s1 + $0xe0] sm:$0xff] }
 0x32f   : > { %2937 = vpow2.f32 %v2348_v58  ;;  %v1244_v58 = vld [vmem:[%s3919_s1 + $0xf0] sm:$0xff] }
 0x336   : > { %v2934_v0 = vpop.eup %2933 }
 0x337   : > { %v918_v2 = vadd.f32 1.0, %v2934_v0  ;;  %v3627_v0 = vpack.c.bf16 %v1242_v53, %v1238_v45  ;;  %v1270_v45 = vld [vmem:[%s3919_s1 + $0x1c0] sm:$0xff] }
 0x338   : > { %v2936_v7 = vpop.eup %2935  ;;  %v1274_v53 = vld [vmem:[%s3919_s1 + $0x1e0] sm:$0xff] }
 0x339   : > { %2939 = vrcp.f32 %v918_v2  ;;  %v927_v17 = vadd.f32 1.0, %v2936_v7  ;;  %v2938_v20 = vpop.eup %2937  ;;  %v1251_v2 = vld [vmem:[%s3919_s1 + $0x128] sm:$0xff]  ;;  %v1249_v7 = vld [vmem:[%s3919_s1 + $0x118] sm:$0xff] }
 0x33a   : > { %2941 = vtanh.f32 %v930_v1  ;;  %v938_v37 = vadd.f32 1.0, %v2938_v20  ;;  %v1247_v1 = vld [vmem:[%s3919_s1 + $0x108] sm:$0xff] }
 0x33b   : > { %2943 = vrcp.f32 %v927_v17  ;;  %v3640_v17 = vpack.c.bf16 %v1244_v58, %v1240_v54  ;;  %v3642_v20 = vpack.c.bf16 %v1251_v2, %v1247_v1  ;;  %v3762_v54 = vpack.c.bf16 %v1277_v27, %v1273_v23  ;;  %v1272_v58 = vld [vmem:[%s3919_s1 + $0x1d0] sm:$0xff] }
 0x33c   : > { %2945 = vrcp.f32 %v938_v37  ;;  %v1276_v1 = vld [vmem:[%s3919_s1 + $0x1f0] sm:$0xff]  ;;  %v3771_v2 = vpack.c.bf16 %v1274_v53, %v1270_v45 }
 0x343   : > { %v2940_v21 = vpop.eup %2939 }
 0x344   : > { %v2942_v26 = vpop.eup %2941 }
 0x345   : > { %v2944_v35 = vpop.eup %2943  ;;  %v942_v43 = vmul.f32 %v2942_v26, %v2940_v21  ;;  %v1253_v21 = vld [vmem:[%s3919_s1 + $0x138] sm:$0xff]  ;;  %v1246_v26 = vld [vmem:[%s3919_s1 + $0x100] sm:$0xff] }
 0x346   : > { %v941_v38 = vmul.f32 %v2944_v35, %v3446_v59  ;;  %v2946_v48 = vpop.eup %2945  ;;  %v1233_v59 = vld [vmem:[%s3919_s1 + $0x98] sm:$0xff]  ;;  %v1250_v35 = vld [vmem:[%s3919_s1 + $0x120] sm:$0xff]  ;;  %v3654_v37 = vpack.c.bf16 %v1253_v21, %v1249_v7  ;;  %v3775_v7 = vpack.c.bf16 %v1276_v1, %v1272_v58 }
 0x347   : > { %v3577_v63 = vpack.c.bf16 %v1237_v61, %v1233_v59  ;;  %v3675_v6 = vpack.c.bf16 %v1250_v35, %v1246_v26  ;;  %v1264_v59 = vld [vmem:[%s3919_s1 + $0x190] sm:$0xff]  ;;  %v3729_v61 = vpack.c.bf16 %v1269_v39, %v1265_v34 }
 0x348   : > { %v3486_v47 = vadd.f32 %v942_v43, %v941_v38  ;;  %v1248_v38 = vld [vmem:[%s3919_s1 + $0x110] sm:$0xff]  ;;  %v3751_v40 = vpack.c.bf16 %v1268_v10, %v1264_v59 }
 0x349   : > { %v1252_v43 = vld [vmem:[%s3919_s1 + $0x130] sm:$0xff] }
 0x34a   : > { %2947 = vtanh.f32 %v3486_v47  ;;  %v3679_v11 = vpack.c.bf16 %v1252_v43, %v1248_v38 }
 0x354   : > { %v2948_v57 = vpop.eup %2947 }
 0x355   : > { %v945_v3 = vmul.f32 %v2948_v57, %v2946_v48  ;;  %v1255_v48 = vld [vmem:[%s3919_s1 + $0x148] sm:$0xff] }
 0x356   : > { %v1259_v57 = vld [vmem:[%s3919_s1 + $0x168] sm:$0xff] }
 0x357   : > { %2349 = vst [vmem:[%s3071_s19 + $0x4] sm:$0x3] %v945_v3  ;;  %1079 = vmatmul.mubr.f32.vlgmr.msra.gmra.mrb[6].mxu0 %v945_v3  ;;  %1150 = vmatmul.mubr.f32.vlgmr.msra.gmra.mrb[6].mxu1 %v945_v3  ;;  %v1257_v3 = vld [vmem:[%s3919_s1 + $0x158] sm:$0xff]  ;;  %v3681_v13 = vpack.c.bf16 %v1259_v57, %v1255_v48 }
 0x358   : > { %1342 = vmatprep.mubr.f32.mxu0 %v3038_v8  ;;  %1413 = vmatprep.mubr.f32.mxu1 %v3038_v8  ;;  %v3693_v29 = vpack.c.bf16 %v1261_v5, %v1257_v3  ;;  %v2350_v5 = vld [vmem:[%s3066_s16 + $0x18] sm:$0xff] }
 0x359   : > { %2637 = vmatpush1.bf16.msra.mxu0 %v3514_v24  ;;  %2669 = vmatpush1.bf16.msra.mxu1 %v3523_v30 }
 0x35a   : > { %2639 = vmatprep.subr.bf16.mxu0 %v3537_v33  ;;  %2671 = vmatprep.subr.bf16.mxu1 %v3548_v44 }
 0x35d   : > { %2641 = vmatpush1.bf16.msra.mxu0 %v3550_v46  ;;  %2673 = vmatpush1.bf16.msra.mxu1 %v3562_v55 }
 0x35e   : > { %2643 = vmatprep.subr.bf16.mxu0 %v3575_v62  ;;  %2675 = vmatprep.subr.bf16.mxu1 %v3577_v63 }
 0x361   : > { %2645 = vmatpush1.bf16.msra.mxu0 %v3589_v19  ;;  %2677 = vmatpush1.bf16.msra.mxu1 %v3602_v32 }
 0x362   : > { %2647 = vmatprep.subr.bf16.mxu0 %v3604_v36  ;;  %2679 = vmatprep.subr.bf16.mxu1 %v3615_v52 }
 0x365   : > { %2649 = vmatpush1.bf16.msra.mxu0 %v3627_v0  ;;  %2681 = vmatpush1.bf16.msra.mxu1 %v3640_v17 }
 0x366   : > { %2651 = vmatprep.subr.bf16.mxu0 %v3642_v20  ;;  %2683 = vmatprep.subr.bf16.mxu1 %v3654_v37 }
 0x369   : > { %2653 = vmatpush1.bf16.msra.mxu0 %v3675_v6  ;;  %2685 = vmatpush1.bf16.msra.mxu1 %v3679_v11 }
 0x36a   : > { %2655 = vmatprep.subr.bf16.mxu0 %v3681_v13  ;;  %2687 = vmatprep.subr.bf16.mxu1 %v3693_v29 }
 0x36d   : > { %2657 = vmatpush1.bf16.msra.mxu0 %v3711_v42  ;;  %2689 = vmatpush1.bf16.msra.mxu1 %v3715_v49 }
 0x36e   : > { %2659 = vmatprep.subr.bf16.mxu0 %v3717_v50  ;;  %2691 = vmatprep.subr.bf16.mxu1 %v3729_v61 }
 0x371   : > { %2661 = vmatpush1.bf16.msra.mxu0 %v3747_v28  ;;  %2693 = vmatpush1.bf16.msra.mxu1 %v3751_v40 }
 0x372   : > { %2663 = vmatprep.subr.bf16.mxu0 %v3753_v41  ;;  %2695 = vmatprep.subr.bf16.mxu1 %v3762_v54 }
 0x375   : > { %2665 = vmatpush1.bf16.msra.mxu0 %v3771_v2  ;;  %2697 = vmatpush1.bf16.msra.mxu1 %v3775_v7 }
 0x376   : > { %2699 = vmatprep.subr.bf16.mxu0 %v3501_v12  ;;  %2731 = vmatprep.subr.bf16.mxu1 %v3512_v22 }
 0x42a   : > { %v1080_v21 = vpop.f32.mrb[6].mxu0  ;;  %v1151_v26 = vpop.f32.mrb[6].mxu1 }
 0x42b   : > { %v1082_v35 = vpop.f32.mrb[7].mxu0  ;;  %v1153_v38 = vpop.f32.mrb[7].mxu1 }
 0x42c   : > { %v1160_v43 = vcombine.low %v1080_v21, %v1082_v35  ;;  %v1161_v48 = vcombine.low %v1151_v26, %v1153_v38 }
 0x42e   : > { %v1168_v57 = vrot.slane %v1160_v43, %v3399_v60  ;;  %v1175_v3 = vrot.slane %v1161_v48, %v3399_v60 }
 0x430   : > { %v1176_v15 = vcombine.low %v1168_v57, %v1175_v3 }
 0x432   : > { %v1178_v16 = vadd.f32 %v2350_v5, %v1176_v15 }
 0x434   : > { %v2351_v25 = vmul.f32 -1.442695, %v1178_v16  ;;  %v1186_v4 = vrot.slane %v1178_v16, 2  ;;  %v1197_v31 = vrot.slane %v1178_v16, 6  ;;  %v1194_v51 = vrot.slane %v1178_v16, 4  ;;  %v2355_v16 = vld [vmem:[%s3066_s16 + $0x20] sm:$0xff] }
 0x436   : > { %2949 = vpow2.f32 %v2351_v25  ;;  %v2352_v9 = vmul.f32 -1.442695, %v1186_v4  ;;  %v2353_v34 = vmul.f32 -1.442695, %v1197_v31 }
 0x438   : > { %2951 = vpow2.f32 %v2352_v9 }
 0x439   : > { %2953 = vpow2.f32 %v2353_v34 }
 0x440   : > { %v2950_v39 = vpop.eup %2949 }
 0x441   : > { %v1182_v56 = vadd.f32 1.0, %v2950_v39 }
 0x442   : > { %v2952_v59 = vpop.eup %2951 }
 0x443   : > { %2955 = vrcp.f32 %v1182_v56  ;;  %v1191_v10 = vadd.f32 1.0, %v2952_v59  ;;  %v2954_v14 = vpop.eup %2953 }
 0x444   : > { %2957 = vtanh.f32 %v1194_v51  ;;  %v1202_v45 = vadd.f32 1.0, %v2954_v14 }
 0x445   : > { %2959 = vrcp.f32 %v1191_v10 }
 0x446   : > { %2961 = vrcp.f32 %v1202_v45 }
 0x44d   : > { %v2956_v18 = vpop.eup %2955 }
 0x44e   : > { %v2958_v23 = vpop.eup %2957 }
 0x44f   : > { %v2960_v27 = vpop.eup %2959  ;;  %v1206_v58 = vmul.f32 %v2958_v23, %v2956_v18 }
 0x450   : > { %v1205_v53 = vmul.f32 %v2960_v27, %v3486_v47  ;;  %v2962_v21 = vpop.eup %2961 }
 0x452   : > { %v3786_v1 = vadd.f32 %v1206_v58, %v1205_v53 }
 0x454   : > { %2963 = vtanh.f32 %v3786_v1 }
 0x45e   : > { %v2964_v26 = vpop.eup %2963 }
 0x45f   : > { %v1209_v35 = vmul.f32 %v2964_v26, %v2962_v21 }
 0x461   : > { %2354 = vst [vmem:[%s3071_s19 + $0x6] sm:$0x3] %v1209_v35  ;;  %1343 = vmatmul.mubr.f32.vlgmr.msra.gmra.mrb[8].mxu0 %v1209_v35  ;;  %1414 = vmatmul.mubr.f32.vlgmr.msra.gmra.mrb[8].mxu1 %v1209_v35 }
 0x462   : > { %2701 = vmatpush1.bf16.msra.mxu0 %v3514_v24  ;;  %2733 = vmatpush1.bf16.msra.mxu1 %v3523_v30 }
 0x463   : > { %2703 = vmatprep.subr.bf16.mxu0 %v3537_v33  ;;  %2735 = vmatprep.subr.bf16.mxu1 %v3548_v44 }
 0x464   : > { %1606 = vmatprep.mubr.f32.mxu0 %v3038_v8  ;;  %1677 = vmatprep.mubr.f32.mxu1 %v3038_v8 }
 0x466   : > { %2705 = vmatpush1.bf16.msra.mxu0 %v3550_v46  ;;  %2737 = vmatpush1.bf16.msra.mxu1 %v3562_v55 }
 0x467   : > { %2707 = vmatprep.subr.bf16.mxu0 %v3575_v62  ;;  %2739 = vmatprep.subr.bf16.mxu1 %v3577_v63 }
 0x46a   : > { %2709 = vmatpush1.bf16.msra.mxu0 %v3589_v19  ;;  %2741 = vmatpush1.bf16.msra.mxu1 %v3602_v32 }
 0x46b   : > { %2711 = vmatprep.subr.bf16.mxu0 %v3604_v36  ;;  %2743 = vmatprep.subr.bf16.mxu1 %v3615_v52 }
 0x46e   : > { %2713 = vmatpush1.bf16.msra.mxu0 %v3627_v0  ;;  %2745 = vmatpush1.bf16.msra.mxu1 %v3640_v17 }
 0x46f   : > { %2715 = vmatprep.subr.bf16.mxu0 %v3642_v20  ;;  %2747 = vmatprep.subr.bf16.mxu1 %v3654_v37 }
 0x472   : > { %2717 = vmatpush1.bf16.msra.mxu0 %v3675_v6  ;;  %2749 = vmatpush1.bf16.msra.mxu1 %v3679_v11 }
 0x473   : > { %2719 = vmatprep.subr.bf16.mxu0 %v3681_v13  ;;  %2751 = vmatprep.subr.bf16.mxu1 %v3693_v29 }
 0x476   : > { %2721 = vmatpush1.bf16.msra.mxu0 %v3711_v42  ;;  %2753 = vmatpush1.bf16.msra.mxu1 %v3715_v49 }
 0x477   : > { %2723 = vmatprep.subr.bf16.mxu0 %v3717_v50  ;;  %2755 = vmatprep.subr.bf16.mxu1 %v3729_v61 }
 0x47a   : > { %2725 = vmatpush1.bf16.msra.mxu0 %v3747_v28  ;;  %2757 = vmatpush1.bf16.msra.mxu1 %v3751_v40 }
 0x47b   : > { %2727 = vmatprep.subr.bf16.mxu0 %v3753_v41  ;;  %2759 = vmatprep.subr.bf16.mxu1 %v3762_v54 }
 0x47e   : > { %2729 = vmatpush1.bf16.msra.mxu0 %v3771_v2  ;;  %2761 = vmatpush1.bf16.msra.mxu1 %v3775_v7 }
 0x47f   : > { %2763 = vmatprep.subr.bf16.mxu0 %v3501_v12  ;;  %2795 = vmatprep.subr.bf16.mxu1 %v3512_v22 }
 0x534   : > { %v1344_v47 = vpop.f32.mrb[8].mxu0  ;;  %v1415_v38 = vpop.f32.mrb[8].mxu1 }
 0x535   : > { %v1346_v43 = vpop.f32.mrb[9].mxu0  ;;  %v1417_v48 = vpop.f32.mrb[9].mxu1 }
 0x536   : > { %v1424_v57 = vcombine.low %v1344_v47, %v1346_v43  ;;  %v1425_v3 = vcombine.low %v1415_v38, %v1417_v48 }
 0x538   : > { %v1432_v5 = vrot.slane %v1424_v57, %v3399_v60  ;;  %v1439_v15 = vrot.slane %v1425_v3, %v3399_v60 }
 0x53a   : > { %v1440_v25 = vcombine.low %v1432_v5, %v1439_v15 }
 0x53c   : > { %v1442_v4 = vadd.f32 %v2355_v16, %v1440_v25 }
 0x53e   : > { %v2356_v9 = vmul.f32 -1.442695, %v1442_v4  ;;  %v1450_v31 = vrot.slane %v1442_v4, 2  ;;  %v1461_v39 = vrot.slane %v1442_v4, 6  ;;  %v1458_v59 = vrot.slane %v1442_v4, 4  ;;  %v2360_v4 = vld [vmem:[%s3066_s16 + $0x28] sm:$0xff] }
 0x540   : > { %2965 = vpow2.f32 %v2356_v9  ;;  %v2357_v34 = vmul.f32 -1.442695, %v1450_v31  ;;  %v2358_v51 = vmul.f32 -1.442695, %v1461_v39 }
 0x542   : > { %2967 = vpow2.f32 %v2357_v34 }
 0x543   : > { %2969 = vpow2.f32 %v2358_v51 }
 0x54a   : > { %v2966_v56 = vpop.eup %2965 }
 0x54b   : > { %v1446_v10 = vadd.f32 1.0, %v2966_v56 }
 0x54c   : > { %v2968_v14 = vpop.eup %2967 }
 0x54d   : > { %2971 = vrcp.f32 %v1446_v10  ;;  %v1455_v18 = vadd.f32 1.0, %v2968_v14  ;;  %v2970_v23 = vpop.eup %2969 }
 0x54e   : > { %2973 = vtanh.f32 %v1458_v59  ;;  %v1466_v58 = vadd.f32 1.0, %v2970_v23 }
 0x54f   : > { %2975 = vrcp.f32 %v1455_v18 }
 0x550   : > { %2977 = vrcp.f32 %v1466_v58 }
 0x557   : > { %v2972_v27 = vpop.eup %2971 }
 0x558   : > { %v2974_v45 = vpop.eup %2973 }
 0x559   : > { %v2976_v53 = vpop.eup %2975  ;;  %v1470_v26 = vmul.f32 %v2974_v45, %v2972_v27 }
 0x55a   : > { %v1469_v21 = vmul.f32 %v2976_v53, %v3786_v1  ;;  %v2978_v47 = vpop.eup %2977 }
 0x55c   : > { %v3828_v35 = vadd.f32 %v1470_v26, %v1469_v21 }
 0x55e   : > { %2979 = vtanh.f32 %v3828_v35 }
 0x568   : > { %v2980_v38 = vpop.eup %2979 }
 0x569   : > { %v1473_v43 = vmul.f32 %v2980_v38, %v2978_v47 }
 0x56b   : > { %2359 = vst [vmem:[%s3071_s19 + $0x8] sm:$0x3] %v1473_v43  ;;  %1607 = vmatmul.mubr.f32.vlgmr.msra.gmra.mrb[10].mxu0 %v1473_v43  ;;  %1678 = vmatmul.mubr.f32.vlgmr.msra.gmra.mrb[10].mxu1 %v1473_v43 }
 0x56c   : > { %2765 = vmatpush1.bf16.msra.mxu0 %v3514_v24  ;;  %2797 = vmatpush1.bf16.msra.mxu1 %v3523_v30 }
 0x56d   : > { %2767 = vmatprep.subr.bf16.mxu0 %v3537_v33  ;;  %2799 = vmatprep.subr.bf16.mxu1 %v3548_v44 }
 0x56e   : > { %1870 = vmatprep.mubr.f32.mxu0 %v3038_v8  ;;  %1941 = vmatprep.mubr.f32.mxu1 %v3038_v8 }
 0x570   : > { %2769 = vmatpush1.bf16.msra.mxu0 %v3550_v46  ;;  %2801 = vmatpush1.bf16.msra.mxu1 %v3562_v55 }
 0x571   : > { %2771 = vmatprep.subr.bf16.mxu0 %v3575_v62  ;;  %2803 = vmatprep.subr.bf16.mxu1 %v3577_v63 }
 0x574   : > { %2773 = vmatpush1.bf16.msra.mxu0 %v3589_v19  ;;  %2805 = vmatpush1.bf16.msra.mxu1 %v3602_v32 }
 0x575   : > { %2775 = vmatprep.subr.bf16.mxu0 %v3604_v36  ;;  %2807 = vmatprep.subr.bf16.mxu1 %v3615_v52 }
 0x578   : > { %2777 = vmatpush1.bf16.msra.mxu0 %v3627_v0  ;;  %2809 = vmatpush1.bf16.msra.mxu1 %v3640_v17 }
 0x579   : > { %2779 = vmatprep.subr.bf16.mxu0 %v3642_v20  ;;  %2811 = vmatprep.subr.bf16.mxu1 %v3654_v37 }
 0x57c   : > { %2781 = vmatpush1.bf16.msra.mxu0 %v3675_v6  ;;  %2813 = vmatpush1.bf16.msra.mxu1 %v3679_v11 }
 0x57d   : > { %2783 = vmatprep.subr.bf16.mxu0 %v3681_v13  ;;  %2815 = vmatprep.subr.bf16.mxu1 %v3693_v29 }
 0x580   : > { %2785 = vmatpush1.bf16.msra.mxu0 %v3711_v42  ;;  %2817 = vmatpush1.bf16.msra.mxu1 %v3715_v49 }
 0x581   : > { %2787 = vmatprep.subr.bf16.mxu0 %v3717_v50  ;;  %2819 = vmatprep.subr.bf16.mxu1 %v3729_v61 }
 0x584   : > { %2789 = vmatpush1.bf16.msra.mxu0 %v3747_v28  ;;  %2821 = vmatpush1.bf16.msra.mxu1 %v3751_v40 }
 0x585   : > { %2791 = vmatprep.subr.bf16.mxu0 %v3753_v41  ;;  %2823 = vmatprep.subr.bf16.mxu1 %v3762_v54 }
 0x588   : > { %2793 = vmatpush1.bf16.msra.mxu0 %v3771_v2  ;;  %2825 = vmatpush1.bf16.msra.mxu1 %v3775_v7 }
 0x589   : > { %2827 = vmatprep.subr.bf16.mxu0 %v3501_v12  ;;  %2859 = vmatprep.subr.bf16.mxu1 %v3512_v22 }
 0x63e   : > { %v1608_v1 = vpop.f32.mrb[10].mxu0  ;;  %v1679_v48 = vpop.f32.mrb[10].mxu1 }
 0x63f   : > { %v1610_v57 = vpop.f32.mrb[11].mxu0  ;;  %v1681_v3 = vpop.f32.mrb[11].mxu1 }
 0x640   : > { %v1688_v5 = vcombine.low %v1608_v1, %v1610_v57  ;;  %v1689_v15 = vcombine.low %v1679_v48, %v1681_v3 }
 0x642   : > { %v1696_v16 = vrot.slane %v1688_v5, %v3399_v60  ;;  %v1703_v25 = vrot.slane %v1689_v15, %v3399_v60 }
 0x644   : > { %v1704_v9 = vcombine.low %v1696_v16, %v1703_v25 }
 0x646   : > { %v1706_v31 = vadd.f32 %v2360_v4, %v1704_v9  ;;  %v2370_v9 = vld [vmem:[%s3066_s16 + $0x38] sm:$0xff] }
 0x648   : > { %v2361_v34 = vmul.f32 -1.442695, %v1706_v31  ;;  %v1714_v39 = vrot.slane %v1706_v31, 2  ;;  %v1725_v12 = vrot.slane %v1706_v31, 6  ;;  %v1722_v59 = vrot.slane %v1706_v31, 4 }
 0x64a   : > { %2981 = vpow2.f32 %v2361_v34  ;;  %v2362_v51 = vmul.f32 -1.442695, %v1714_v39  ;;  %v2363_v22 = vmul.f32 -1.442695, %v1725_v12 }
 0x64c   : > { %2983 = vpow2.f32 %v2362_v51 }
 0x64d   : > { %2985 = vpow2.f32 %v2363_v22 }
 0x654   : > { %v2982_v56 = vpop.eup %2981 }
 0x655   : > { %v1710_v10 = vadd.f32 1.0, %v2982_v56 }
 0x656   : > { %v2984_v14 = vpop.eup %2983 }
 0x657   : > { %2987 = vrcp.f32 %v1710_v10  ;;  %v1719_v18 = vadd.f32 1.0, %v2984_v14  ;;  %v2986_v23 = vpop.eup %2985 }
 0x658   : > { %2989 = vtanh.f32 %v1722_v59  ;;  %v1730_v58 = vadd.f32 1.0, %v2986_v23 }
 0x659   : > { %2991 = vrcp.f32 %v1719_v18 }
 0x65a   : > { %2993 = vrcp.f32 %v1730_v58 }
 0x661   : > { %v2988_v27 = vpop.eup %2987 }
 0x662   : > { %v2990_v45 = vpop.eup %2989 }
 0x663   : > { %v2992_v53 = vpop.eup %2991  ;;  %v1734_v26 = vmul.f32 %v2990_v45, %v2988_v27 }
 0x664   : > { %v1733_v21 = vmul.f32 %v2992_v53, %v3828_v35  ;;  %v2994_v38 = vpop.eup %2993 }
 0x666   : > { %v3870_v47 = vadd.f32 %v1734_v26, %v1733_v21 }
 0x668   : > { %2995 = vtanh.f32 %v3870_v47 }
 0x672   : > { %v2996_v43 = vpop.eup %2995 }
 0x673   : > { %v1737_v1 = vmul.f32 %v2996_v43, %v2994_v38 }
 0x675   : > { %2364 = vst [vmem:[%s3071_s19 + $0xa] sm:$0x3] %v1737_v1  ;;  %1871 = vmatmul.mubr.f32.vlgmr.msra.gmra.mrb[12].mxu0 %v1737_v1  ;;  %1942 = vmatmul.mubr.f32.vlgmr.msra.gmra.mrb[12].mxu1 %v1737_v1 }
 0x676   : > { %2829 = vmatpush1.bf16.msra.mxu0 %v3514_v24  ;;  %2861 = vmatpush1.bf16.msra.mxu1 %v3523_v30 }
 0x677   : > { %2831 = vmatprep.subr.bf16.mxu0 %v3537_v33  ;;  %2863 = vmatprep.subr.bf16.mxu1 %v3548_v44 }
 0x678   : > { %2134 = vmatprep.mubr.f32.mxu0 %v3038_v8  ;;  %2205 = vmatprep.mubr.f32.mxu1 %v3038_v8 }
 0x67a   : > { %2833 = vmatpush1.bf16.msra.mxu0 %v3550_v46  ;;  %2865 = vmatpush1.bf16.msra.mxu1 %v3562_v55 }
 0x67b   : > { %2835 = vmatprep.subr.bf16.mxu0 %v3575_v62  ;;  %2867 = vmatprep.subr.bf16.mxu1 %v3577_v63  ;;  %v2365_v63 = vld [vmem:[%s3066_s16 + $0x30] sm:$0xff] }
 0x67e   : > { %2837 = vmatpush1.bf16.msra.mxu0 %v3589_v19  ;;  %2869 = vmatpush1.bf16.msra.mxu1 %v3602_v32 }
 0x67f   : > { %2839 = vmatprep.subr.bf16.mxu0 %v3604_v36  ;;  %2871 = vmatprep.subr.bf16.mxu1 %v3615_v52 }
 0x682   : > { %2841 = vmatpush1.bf16.msra.mxu0 %v3627_v0  ;;  %2873 = vmatpush1.bf16.msra.mxu1 %v3640_v17 }
 0x683   : > { %2843 = vmatprep.subr.bf16.mxu0 %v3642_v20  ;;  %2875 = vmatprep.subr.bf16.mxu1 %v3654_v37 }
 0x686   : > { %2845 = vmatpush1.bf16.msra.mxu0 %v3675_v6  ;;  %2877 = vmatpush1.bf16.msra.mxu1 %v3679_v11 }
 0x687   : > { %2847 = vmatprep.subr.bf16.mxu0 %v3681_v13  ;;  %2879 = vmatprep.subr.bf16.mxu1 %v3693_v29 }
 0x68a   : > { %2849 = vmatpush1.bf16.msra.mxu0 %v3711_v42  ;;  %2881 = vmatpush1.bf16.msra.mxu1 %v3715_v49 }
 0x68b   : > { %2851 = vmatprep.subr.bf16.mxu0 %v3717_v50  ;;  %2883 = vmatprep.subr.bf16.mxu1 %v3729_v61 }
 0x68e   : > { %2853 = vmatpush1.bf16.msra.mxu0 %v3747_v28  ;;  %2885 = vmatpush1.bf16.msra.mxu1 %v3751_v40 }
 0x68f   : > { %2855 = vmatprep.subr.bf16.mxu0 %v3753_v41  ;;  %2887 = vmatprep.subr.bf16.mxu1 %v3762_v54 }
 0x692   : > { %2857 = vmatpush1.bf16.msra.mxu0 %v3771_v2  ;;  %2889 = vmatpush1.bf16.msra.mxu1 %v3775_v7 }
 0x748   : > { %v1872_v8 = vpop.f32.mrb[12].mxu0  ;;  %v1943_v24 = vpop.f32.mrb[12].mxu1 }
 0x749   : > { %v1874_v30 = vpop.f32.mrb[13].mxu0  ;;  %v1945_v33 = vpop.f32.mrb[13].mxu1 }
 0x74a   : > { %v1952_v44 = vcombine.low %v1872_v8, %v1874_v30  ;;  %v1953_v46 = vcombine.low %v1943_v24, %v1945_v33 }
 0x74c   : > { %v1960_v55 = vrot.slane %v1952_v44, %v3399_v60  ;;  %v1967_v62 = vrot.slane %v1953_v46, %v3399_v60 }
 0x74e   : > { %v1968_v19 = vcombine.low %v1960_v55, %v1967_v62 }
 0x750   : > { %v1970_v32 = vadd.f32 %v2365_v63, %v1968_v19 }
 0x752   : > { %v2366_v36 = vmul.f32 -1.442695, %v1970_v32  ;;  %v1978_v52 = vrot.slane %v1970_v32, 2  ;;  %v1989_v17 = vrot.slane %v1970_v32, 6  ;;  %v1986_v6 = vrot.slane %v1970_v32, 4 }
 0x754   : > { %2997 = vpow2.f32 %v2366_v36  ;;  %v2367_v0 = vmul.f32 -1.442695, %v1978_v52  ;;  %v2368_v20 = vmul.f32 -1.442695, %v1989_v17 }
 0x756   : > { %2999 = vpow2.f32 %v2367_v0 }
 0x757   : > { %3001 = vpow2.f32 %v2368_v20 }
 0x75e   : > { %v2998_v37 = vpop.eup %2997 }
 0x75f   : > { %v1974_v11 = vadd.f32 1.0, %v2998_v37 }
 0x760   : > { %v3000_v13 = vpop.eup %2999 }
 0x761   : > { %3003 = vrcp.f32 %v1974_v11  ;;  %v1983_v29 = vadd.f32 1.0, %v3000_v13  ;;  %v3002_v42 = vpop.eup %3001 }
 0x762   : > { %3005 = vtanh.f32 %v1986_v6  ;;  %v1994_v28 = vadd.f32 1.0, %v3002_v42 }
 0x763   : > { %3007 = vrcp.f32 %v1983_v29 }
 0x764   : > { %3009 = vrcp.f32 %v1994_v28 }
 0x76b   : > { %v3004_v49 = vpop.eup %3003 }
 0x76c   : > { %v3006_v50 = vpop.eup %3005 }
 0x76d   : > { %v3008_v61 = vpop.eup %3007  ;;  %v1998_v41 = vmul.f32 %v3006_v50, %v3004_v49 }
 0x76e   : > { %v1997_v40 = vmul.f32 %v3008_v61, %v3870_v47  ;;  %v3010_v2 = vpop.eup %3009 }
 0x770   : > { %v1999_v54 = vadd.f32 %v1998_v41, %v1997_v40 }
 0x772   : > { %3011 = vtanh.f32 %v1999_v54 }
 0x77c   : > { %v3012_v7 = vpop.eup %3011 }
 0x77d   : > { %v2001_v35 = vmul.f32 %v3012_v7, %v3010_v2 }
 0x77f   : > { %2369 = vst [vmem:[%s3071_s19 + $0xc] sm:$0x3] %v2001_v35  ;;  %2135 = vmatmul.mubr.f32.vlgmr.msra.gmra.mrb[14].mxu0 %v2001_v35  ;;  %2206 = vmatmul.mubr.f32.vlgmr.msra.gmra.mrb[14].mxu1 %v2001_v35 }
 0x852   : > { %v2136_v48 = vpop.f32.mrb[14].mxu0  ;;  %v2207_v57 = vpop.f32.mrb[14].mxu1 }
 0x853   : > { %v2138_v3 = vpop.f32.mrb[15].mxu0  ;;  %v2209_v5 = vpop.f32.mrb[15].mxu1 }
 0x854   : > { %v2216_v15 = vcombine.low %v2136_v48, %v2138_v3  ;;  %v2217_v16 = vcombine.low %v2207_v57, %v2209_v5 }
 0x856   : > { %v2224_v25 = vrot.slane %v2216_v15, %v3399_v60  ;;  %v2231_v4 = vrot.slane %v2217_v16, %v3399_v60 }
 0x858   : > { %v2232_v31 = vcombine.low %v2224_v25, %v2231_v4 }
 0x85a   : > { %v2234_v34 = vadd.f32 %v2370_v9, %v2232_v31 }
 0x85c   : > { %v2371_v39 = vmul.f32 -1.442695, %v2234_v34  ;;  %v2242_v51 = vrot.slane %v2234_v34, 2  ;;  %v2253_v22 = vrot.slane %v2234_v34, 6  ;;  %v2250_v10 = vrot.slane %v2234_v34, 4 }
 0x85e   : > { %3013 = vpow2.f32 %v2371_v39  ;;  %v2372_v12 = vmul.f32 -1.442695, %v2242_v51  ;;  %v2373_v56 = vmul.f32 -1.442695, %v2253_v22 }
 0x860   : > { %3015 = vpow2.f32 %v2372_v12 }
 0x861   : > { %3017 = vpow2.f32 %v2373_v56 }
 0x868   : > { %v3014_v59 = vpop.eup %3013 }
 0x869   : > { %v2238_v14 = vadd.f32 1.0, %v3014_v59 }
 0x86a   : > { %v3016_v18 = vpop.eup %3015 }
 0x86b   : > { %3019 = vrcp.f32 %v2238_v14  ;;  %v2247_v23 = vadd.f32 1.0, %v3016_v18  ;;  %v3018_v60 = vpop.eup %3017 }
 0x86c   : > { %3021 = vtanh.f32 %v2250_v10  ;;  %v2258_v58 = vadd.f32 1.0, %v3018_v60 }
 0x86d   : > { %3023 = vrcp.f32 %v2247_v23 }
 0x86e   : > { %3025 = vrcp.f32 %v2258_v58 }
 0x875   : > { %v3020_v27 = vpop.eup %3019 }
 0x876   : > { %v3022_v45 = vpop.eup %3021 }
 0x877   : > { %v3024_v53 = vpop.eup %3023  ;;  %v2262_v26 = vmul.f32 %v3022_v45, %v3020_v27 }
 0x878   : > { %v2261_v21 = vmul.f32 %v3024_v53, %v1999_v54  ;;  %v3026_v38 = vpop.eup %3025 }
 0x87a   : > { %v2263_v47 = vadd.f32 %v2262_v26, %v2261_v21 }
 0x87c   : > { %3027 = vtanh.f32 %v2263_v47  ;;  %2269 = vst [vmem:[#allocation3] sm:$0x3] %v2263_v47 }
 0x886   : > { %v3028_v43 = vpop.eup %3027 }
 0x887   : > { %v2265_v1 = vmul.f32 %v3028_v43, %v3026_v38 }
 0x889   : > { %2374 = vst [vmem:[%s3071_s19 + $0xe] sm:$0x3] %v2265_v1  ;;  %2268 = vst [vmem:[#allocation2] sm:$0x3] %v2265_v1 }
 0x88a PF: > { %s12_s9 = sadd.s32 1, %s3035_s9  }
 0x88b   : > { %p9_p5 = scmp.ge.s32.totalorder %s12_s9, 4  }
 0x88d   :  { %11 = sbr.rel (!%p9_p5) target bundleno = 1 (0x1), region = 76 }

// kernel: e2e_forward.15
= control target key start
LH: loop header
LB: loop body
LE: loop exit
PB: predicated region body
PF: predicated region fallthrough
CT: control target
= control target key end

     0   :  { %s6124_s13 = smov 0   ;;  %s8136_s0 = inlined_call_operand.vmem [shape: f32[8,2,512], index: 0, kind: input, shape index: {}]   ;;  %s8137_s1 = inlined_call_operand.vmem [shape: f32[2,16,128], index: 1, kind: input, shape index: {}]   ;;  %s8138_s2 = inlined_call_operand.vmem [shape: f32[2,16,128], index: 2, kind: input, shape index: {}]   ;;  %s8139_s3 = inlined_call_operand.vmem [shape: f32[2,1,16], index: 3, kind: input, shape index: {}]   ;;  %s8140_s4 = inlined_call_operand.vmem [shape: f32[128,128], index: 4, kind: input, shape index: {}]   ;;  %s8141_s5 = inlined_call_operand.vmem [shape: f32[1,128], index: 5, kind: input, shape index: {}]   ;;  %s8142_s6 = inlined_call_operand.vmem [shape: f32[128,512], index: 6, kind: input, shape index: {}]   ;;  %s8143_s7 = inlined_call_operand.vmem [shape: f32[128,512], index: 7, kind: input, shape index: {}]   ;;  %s8144_s8 = inlined_call_operand.vmem [shape: f32[128,128], index: 8, kind: input, shape index: {}]   ;;  %s8145_s9 = inlined_call_operand.vmem [shape: f32[1,128], index: 9, kind: input, shape index: {}]   ;;  %s8146_s10 = inlined_call_operand.vmem [shape: f32[8,2,128], index: 10, kind: output, shape index: {}]  }
   0x1 LB: > { %s4561_s14 = sadd.s32 4294967295, %s6061_s13   ;;  %p4565_p0 = scmp.ge.s32.totalorder %s6061_s13, 1  ;;  %s6061_s13 = sphi %s6124_s13, %s20_s13  }
   0x2   : > { %p314_p1 = scmp.lt.s32.totalorder %s6061_s13, 3 }
   0x4   : > { %p315_p2 = pnand %p4565_p0, %p314_p1 }
   0x6   : > { %318 = sbr.rel (%p315_p2) target bundleno = 5385 (0x1509), region = 60 }
   0xd   : > { %s4566_s15 = sshll.u32 %s4561_s14, 2  ;;  %p4571_p4 = scmp.ne.s32.totalorder %s4561_s14, 0 }
   0xe   : > { %p354_p3 = scmp.lt.s32.totalorder %s4566_s15, 7  ;;  %v6063_v0 = vmov (!%p4571_p4), 0.0  }
   0xf   : > { %369 = sbr.rel (%p4571_p4) target bundleno = 22 (0x16), region = 64  ;;  %370 = vst [vmem:[#allocation2] sm:$0x3] (!%p4571_p4), %v6063_v0  ;;  %371 = vst [vmem:[#allocation3] sm:$0x3] (!%p4571_p4), %v6063_v0 }
  0x10   : > { %s8382_s15 = smov (!%p354_p3, %s4566_s15), 7 }
  0x11   : > { %s4608_s16 = sshll.u32 %s8382_s15, 3  ;;  %s4570_s17 = sshll.u32 %s8382_s15, 1 }
  0x12   : > { %s6135_s20 = scalar_lea.vmem %s8136_s0, %s4608_s16  ;;  %s6140_s23 = scalar_lea.vmem %s8146_s10, %s4570_s17 }
  0x16 PF: > { %v374_v1 = vld [vmem:[%s8140_s4] sm:$0xff]  ;;  %v375_v2 = vld [vmem:[%s8140_s4 + $0x8] sm:$0xff]  ;;  %v376_v3 = vld [vmem:[%s8140_s4 + $0x10] sm:$0xff]  ;;  %v8147_v4 = vmov 0.0|0.0   ;;  %vm6065_vm0 = vmmov 0   ;;  %v8149_v7 = vmov 0.0   ;;  %v472_v37 = vlaneseq }
  0x17   : > { %5185 = vmatprep.subr.bf16.mxu0 %v8147_v4  ;;  %v6152_v5 = vpack.c.bf16 %v375_v2, %v374_v1  ;;  %v377_v6 = vld [vmem:[%s8140_s4 + $0x18] sm:$0xff]  ;;  %4825 = vmatprep.mubr.msk.f32.mxu0 %vm6065_vm0, %v8149_v7  ;;  %v378_v9 = vld [vmem:[%s8140_s4 + $0x20] sm:$0xff]  ;;  %v379_v10 = vld [vmem:[%s8140_s4 + $0x28] sm:$0xff]  ;;  %v6067_v35 = vmov 1966171168   ;;  %vm643_vm1 = vcmask 122880  }
  0x18   : > { %5209 = vmatprep.subr.bf16.mxu1 %v8147_v4  ;;  %4832 = vmatprep.mubr.msk.f32.mxu1 %vm6065_vm0, %v8149_v7  ;;  %v6163_v8 = vpack.c.bf16 %v377_v6, %v376_v3  ;;  %v6173_v11 = vpack.c.bf16 %v379_v10, %v378_v9  ;;  %v380_v12 = vld [vmem:[%s8140_s4 + $0x30] sm:$0xff]  ;;  %v381_v13 = vld [vmem:[%s8140_s4 + $0x38] sm:$0xff]  ;;  %v382_v15 = vld [vmem:[%s8140_s4 + $0x40] sm:$0xff]  ;;  %v470_v36 = vunpack.c.l.s4 %v6067_v35  ;;  %v6247_v39 = vshrl.u32 %v472_v37, 7 }
  0x19   : > { %5187 = vmatpush3.bf16.msra.mxu0 %v6152_v5  ;;  %v6183_v14 = vpack.c.bf16 %v381_v13, %v380_v12  ;;  %v383_v16 = vld [vmem:[%s8140_s4 + $0x48] sm:$0xff]  ;;  %v384_v18 = vld [vmem:[%s8140_s4 + $0x50] sm:$0xff]  ;;  %v385_v19 = vld [vmem:[%s8140_s4 + $0x58] sm:$0xff]  ;;  %vm670_vm2 = vcmask 130048   ;;  %vm885_vm3 = vcmask 1041409  }
  0x1a   : > { %5188 = vmatprep.subr.bf16.mxu0 %v8147_v4  ;;  %v6193_v17 = vpack.c.bf16 %v383_v16, %v382_v15  ;;  %v6203_v20 = vpack.c.bf16 %v385_v19, %v384_v18  ;;  %v386_v21 = vld [vmem:[%s8140_s4 + $0x60] sm:$0xff]  ;;  %v387_v22 = vld [vmem:[%s8140_s4 + $0x68] sm:$0xff]  ;;  %v388_v24 = vld [vmem:[%s8140_s4 + $0x70] sm:$0xff]  ;;  %v471_v38 = vunpack.c.0.s8 %v470_v36 }
  0x1b   : > { %v6213_v23 = vpack.c.bf16 %v387_v22, %v386_v21  ;;  %v389_v25 = vld [vmem:[%s8140_s4 + $0x78] sm:$0xff]  ;;  %v6227_v27 = vld [vmem:[#allocation2] sm:$0x3]  ;;  %v494_v29 = vld [vmem:[%s8138_s2 + $0x8] sm:$0xff] }
  0x1c   : > { %v6223_v26 = vpack.c.bf16 %v389_v25, %v388_v24  ;;  %v493_v28 = vld [vmem:[%s8138_s2] sm:$0xff]  ;;  %v6250_v40 = vsub.s32 %v471_v38, %v6247_v39  ;;  %v495_v41 = vld [vmem:[%s8138_s2 + $0x10] sm:$0xff]  ;;  %v496_v42 = vld [vmem:[%s8138_s2 + $0x18] sm:$0xff] }
  0x1d   : > { %5190 = vmatpush3.bf16.msra.mxu0 %v6163_v8  ;;  %v6237_v30 = vpack.c.bf16 %v494_v29, %v493_v28  ;;  %v6244_v31 = vld [vmem:[%s8141_s5] ss:$0 sm:$0xff]  ;;  %v6259_v45 = vpack.c.bf16 %v496_v42, %v495_v41  ;;  %v640_v56 = vld [vmem:[%s8139_s3 + $0x1] sm:$0x1]  ;;  %v667_v13 = vld [vmem:[%s8137_s1 + $0x8] sm:$0xff] }
  0x1e   : > { %5191 = vmatprep.subr.bf16.mxu0 %v8147_v4  ;;  %v639_v50 = vld [vmem:[%s8139_s3] sm:$0x1]  ;;  %v821_v16 = vld [vmem:[%s8142_s6 + $0x18] sm:$0xff]  ;;  %v820_v21 = vld [vmem:[%s8142_s6 + $0x10] sm:$0xff] }
  0x1f   : > { %5211 = vmatpush3.bf16.xpose.msra.mxu1 %v6237_v30  ;;  %v666_v12 = vld [vmem:[%s8137_s1] sm:$0xff]  ;;  %v825_v18 = vld [vmem:[%s8142_s6 + $0x38] sm:$0xff]  ;;  %v824_v22 = vld [vmem:[%s8142_s6 + $0x30] sm:$0xff] }
  0x20   : > { %5212 = vmatprep.subr.bf16.mxu1 %v8147_v4  ;;  %v6291_v15 = vpack.c.bf16 %v667_v13, %v666_v12  ;;  %v6301_v19 = vpack.c.bf16 %v825_v18, %v821_v16  ;;  %v6309_v24 = vpack.c.bf16 %v824_v22, %v820_v21  ;;  %v829_v25 = vld [vmem:[%s8142_s6 + $0x58] sm:$0xff]  ;;  %v836_v38 = vld [vmem:[%s8142_s6 + $0x90] sm:$0xff]  ;;  %v818_v18 = vld [vmem:[%s8142_s6] sm:$0xff] }
  0x21   : > { %5193 = vmatpush3.bf16.msra.mxu0 %v6173_v11  ;;  %v833_v28 = vld [vmem:[%s8142_s6 + $0x78] sm:$0xff]  ;;  %v840_v41 = vld [vmem:[%s8142_s6 + $0xb0] sm:$0xff]  ;;  %v822_v21 = vld [vmem:[%s8142_s6 + $0x20] sm:$0xff] }
  0x22   : > { %5194 = vmatprep.subr.bf16.mxu0 %v8147_v4  ;;  %v6318_v29 = vpack.c.bf16 %v833_v28, %v829_v25  ;;  %v837_v35 = vld [vmem:[%s8142_s6 + $0x98] sm:$0xff]  ;;  %v6346_v42 = vpack.c.bf16 %v840_v41, %v836_v38  ;;  %v831_v22 = vld [vmem:[%s8142_s6 + $0x68] sm:$0xff]  ;;  %v6437_v28 = vpack.c.bf16 %v822_v21, %v818_v18  ;;  %v862_v18 = vld [vmem:[%s8142_s6 + $0x160] sm:$0xff] }
  0x23   : > { %v841_v36 = vld [vmem:[%s8142_s6 + $0xb8] sm:$0xff]  ;;  %v835_v38 = vld [vmem:[%s8142_s6 + $0x88] sm:$0xff] }
  0x24   : > { %v6336_v37 = vpack.c.bf16 %v841_v36, %v837_v35  ;;  %v826_v35 = vld [vmem:[%s8142_s6 + $0x40] sm:$0xff]  ;;  %v839_v41 = vld [vmem:[%s8142_s6 + $0xa8] sm:$0xff] }
  0x25   : > { %5196 = vmatpush3.bf16.msra.mxu0 %v6183_v14  ;;  %v830_v36 = vld [vmem:[%s8142_s6 + $0x60] sm:$0xff] }
  0x26   : > { %5197 = vmatprep.subr.bf16.mxu0 %v8147_v4 }
  0x29   : > { %5199 = vmatpush3.bf16.msra.mxu0 %v6193_v17 }
  0x2a   : > { %5200 = vmatprep.subr.bf16.mxu0 %v8147_v4 }
  0x2d   : > { %5202 = vmatpush3.bf16.msra.mxu0 %v6203_v20 }
  0x2e   : > { %5203 = vmatprep.subr.bf16.mxu0 %v8147_v4 }
  0x31   : > { %5205 = vmatpush3.bf16.msra.mxu0 %v6213_v23 }
  0x32   : > { %5206 = vmatprep.subr.bf16.mxu0 %v8147_v4 }
  0x35   : > { %5208 = vmatpush3.bf16.msra.mxu0 %v6223_v26 }
  0x36   : > { %5254 = vmatprep.subr.bf16.mxu0 %v6301_v19 }
  0x38   : > { %4826 = vmatmul.mubr.f32.vlgmr.msra.gmra.mrb[0].mxu0 %v6227_v27 }
  0x39   : > { %1023 = vmatprep.mubr.f32.mxu0 %v8149_v7  ;;  %5256 = vmatpush1.bf16.msra.mxu0 %v6309_v24 }
  0x3a   : > { %5258 = vmatprep.subr.bf16.mxu0 %v6318_v29 }
 0x10b   : > { %v463_v32 = vpop.f32.mrb[0].mxu0 }
 0x10c   : > { %v464_v33 = vadd.f32 %v6244_v31, %v463_v32  ;;  %v4827_v34 = vpop.f32.mrb[1].mxu0  ;;  %v828_v32 = vld [vmem:[%s8142_s6 + $0x50] sm:$0xff] }
 0x10e   : > { %5951 = vtanh.f32 %v464_v33  ;;  %v832_v33 = vld [vmem:[%s8142_s6 + $0x70] sm:$0xff] }
 0x10f   : > { %v6328_v34 = vpack.c.bf16 %v832_v33, %v828_v32 }
 0x111   : > { %5260 = vmatpush1.bf16.msra.mxu0 %v6328_v34 }
 0x112   : > { %5262 = vmatprep.subr.bf16.mxu0 %v6336_v37 }
 0x115   : > { %5264 = vmatpush1.bf16.msra.mxu0 %v6346_v42 }
 0x118   : > { %v5952_v43 = vpop.eup %5951 }
 0x119   : > { %v475_v44 = vrot.slane %v5952_v43, %v6250_v40  ;;  %v845_v43 = vld [vmem:[%s8142_s6 + $0xd8] sm:$0xff] }
 0x11b   : > { %v483_v46 = vrot.slane %v475_v44, %v6250_v40  ;;  %v476_v47 = vcombine.high %v475_v44, %v475_v44  ;;  %v849_v44 = vld [vmem:[%s8142_s6 + $0xf8] sm:$0xff] }
 0x11d   : > { %4833 = vmatmul.mubr.f32.vlgmr.msra.gmra.mrb[0].mxu1 %v483_v46  ;;  %v490_v48 = vrot.slane %v476_v47, %v6250_v40  ;;  %v6354_v46 = vpack.c.bf16 %v849_v44, %v845_v43  ;;  %v844_v47 = vld [vmem:[%s8142_s6 + $0xd0] sm:$0xff]  ;;  %v6460_v43 = vpack.c.bf16 %v839_v41, %v835_v38  ;;  %v834_v44 = vld [vmem:[%s8142_s6 + $0x80] sm:$0xff] }
 0x11e   : > { %5214 = vmatpush3.bf16.xpose.msra.mxu1 %v6259_v45  ;;  %4839 = vmatprep.mubr.msk.f32.mxu1 %vm6065_vm0, %v8149_v7  ;;  %v870_v38 = vld [vmem:[%s8142_s6 + $0x1a0] sm:$0xff] }
 0x11f   : > { %5215 = vmatprep.subr.bf16.mxu1 %v8147_v4  ;;  %5266 = vmatprep.subr.bf16.mxu0 %v6354_v46 }
 0x125   : > { %4840 = vmatmul.mubr.f32.vlgmr.msra.gmra.mrb[2].mxu1 %v490_v48  ;;  %v848_v48 = vld [vmem:[%s8142_s6 + $0xf0] sm:$0xff] }
 0x126   : > { %4846 = vmatprep.mubr.msk.f32.mxu1 %vm6065_vm0, %v8149_v7  ;;  %5217 = vmatpush3.bf16.msra.mxu1 %v6291_v15 }
 0x127   : > { %5218 = vmatprep.subr.bf16.mxu1 %v8147_v4 }
 0x1f0   : > { %v563_v49 = vpop.f32.mrb[0].mxu1 }
 0x1f1   : > { %v637_v51 = vmul.f32 2.0, %v563_v49  ;;  %v4834_v52 = vpop.f32.mrb[1].mxu1  ;;  %v6364_v49 = vpack.c.bf16 %v848_v48, %v844_v47  ;;  %v838_v47 = vld [vmem:[%s8142_s6 + $0xa0] sm:$0xff]  ;;  %v843_v48 = vld [vmem:[%s8142_s6 + $0xc8] sm:$0xff] }
 0x1f3   : > { %v641_v53 = vadd.f32 %v639_v50, %v637_v51  ;;  %v853_v50 = vld [vmem:[%s8142_s6 + $0x118] sm:$0xff]  ;;  %5268 = vmatpush1.bf16.msra.mxu0 %v6364_v49 }
 0x1f4   : > { %v857_v51 = vld [vmem:[%s8142_s6 + $0x138] sm:$0xff] }
 0x1f5   : > { %v644_v54 = vsel %vm643_vm1, %v641_v53, -inf  ;;  %v6372_v52 = vpack.c.bf16 %v857_v51, %v853_v50  ;;  %v847_v50 = vld [vmem:[%s8142_s6 + $0xe8] sm:$0xff]  ;;  %v6475_v51 = vpack.c.bf16 %v838_v47, %v834_v44  ;;  %v868_v47 = vld [vmem:[%s8142_s6 + $0x190] sm:$0xff] }
 0x1f6   : > { %645 = vmax.xlane.f32.xlu0 %v644_v54  ;;  %v856_v54 = vld [vmem:[%s8142_s6 + $0x130] sm:$0xff] }
 0x1f7   : > { %5270 = vmatprep.subr.bf16.mxu0 %v6372_v52 }
 0x1f8   : > { %v633_v55 = vpop.f32.mrb[2].mxu1 }
 0x1f9   : > { %v638_v57 = vmul.f32 2.0, %v633_v55  ;;  %v4841_v58 = vpop.f32.mrb[3].mxu1 }
 0x1fb   : > { %v642_v59 = vadd.f32 %v640_v56, %v638_v57  ;;  %v861_v56 = vld [vmem:[%s8142_s6 + $0x158] sm:$0xff] }
 0x1fc   : > { %v865_v57 = vld [vmem:[%s8142_s6 + $0x178] sm:$0xff] }
 0x1fd   : > { %v647_v60 = vsel %vm643_vm1, %v642_v59, -inf  ;;  %v6390_v58 = vpack.c.bf16 %v865_v57, %v861_v56  ;;  %v846_v56 = vld [vmem:[%s8142_s6 + $0xe0] sm:$0xff]  ;;  %v851_v57 = vld [vmem:[%s8142_s6 + $0x108] sm:$0xff] }
 0x1fe   : > { %648 = vmax.xlane.f32.xlu0 %v647_v60  ;;  %v864_v60 = vld [vmem:[%s8142_s6 + $0x170] sm:$0xff] }
 0x283   : > { %v646_v61 = vpop.xlane.xlu0 %645 }
 0x284   : > { %v650_v62 = vsub.f32 %v641_v53, %v646_v61  ;;  %v852_v53 = vld [vmem:[%s8142_s6 + $0x110] sm:$0xff] }
 0x285   : > { %v6382_v55 = vpack.c.bf16 %v856_v54, %v852_v53  ;;  %v6478_v53 = vpack.c.bf16 %v847_v50, %v843_v48  ;;  %v842_v54 = vld [vmem:[%s8142_s6 + $0xc0] sm:$0xff]  ;;  %v872_v48 = vld [vmem:[%s8142_s6 + $0x1b0] sm:$0xff]  ;;  %v875_v50 = vld [vmem:[%s8142_s6 + $0x1c8] sm:$0xff] }
 0x286   : > { %v652_v63 = vmul.f32 1.442695, %v650_v62 }
 0x287   : > { %5272 = vmatpush1.bf16.msra.mxu0 %v6382_v55 }
 0x288   : > { %5953 = vpow2.f32 %v652_v63  ;;  %5274 = vmatprep.subr.bf16.mxu0 %v6390_v58 }
 0x28b   : > { %v649_v0 = vpop.xlane.xlu0 %648 }
 0x28c   : > { %v651_v1 = vsub.f32 %v642_v59, %v649_v0  ;;  %v860_v59 = vld [vmem:[%s8142_s6 + $0x150] sm:$0xff] }
 0x28d   : > { %v6400_v61 = vpack.c.bf16 %v864_v60, %v860_v59  ;;  %v668_v0 = vld [vmem:[%s8137_s1 + $0x10] sm:$0xff]  ;;  %v855_v59 = vld [vmem:[%s8142_s6 + $0x128] sm:$0xff]  ;;  %v6493_v60 = vpack.c.bf16 %v846_v56, %v842_v54  ;;  %v6561_v54 = vpack.c.bf16 %v872_v48, %v868_v47  ;;  %v1060_v47 = vld [vmem:[%s8143_s7 + $0x38] sm:$0xff] }
 0x28e   : > { %v654_v2 = vmul.f32 1.442695, %v651_v1  ;;  %v669_v1 = vld [vmem:[%s8137_s1 + $0x18] sm:$0xff]  ;;  %v879_v56 = vld [vmem:[%s8142_s6 + $0x1e8] sm:$0xff] }
 0x28f   : > { %5276 = vmatpush1.bf16.msra.mxu0 %v6400_v61  ;;  %v6415_v12 = vpack.c.bf16 %v669_v1, %v668_v0  ;;  %v854_v0 = vld [vmem:[%s8142_s6 + $0x120] sm:$0xff]  ;;  %v859_v1 = vld [vmem:[%s8142_s6 + $0x148] sm:$0xff]  ;;  %8227 = vst [vmem:[#allocation4_spill] sm:$0xff] %v6561_v54 }
 0x290   : > { %5955 = vpow2.f32 %v654_v2  ;;  %v819_v2 = vld [vmem:[%s8142_s6 + $0x8] sm:$0xff] }
 0x292   : > { %v6277_v3 = vpop.eup %5953 }
 0x293   : > { %v656_v6 = vsel %vm643_vm1, %v6277_v3, 0.0 }
 0x294   : > { %657 = vadd.xlane.f32.xlu1 %v656_v6  ;;  %v823_v6 = vld [vmem:[%s8142_s6 + $0x28] sm:$0xff] }
 0x295   : > { %v6418_v16 = vpack.c.bf16 %v823_v6, %v819_v2  ;;  %v863_v2 = vld [vmem:[%s8142_s6 + $0x168] sm:$0xff] }
 0x29a   : > { %v6281_v9 = vpop.eup %5955 }
 0x29b   : > { %v659_v10 = vsel %vm643_vm1, %v6281_v9, 0.0 }
 0x29c   : > { %660 = vadd.xlane.f32.xlu1 %v659_v10 }
 0x321   : > { %v658_v62 = vpop.xlane.xlu1 %657 }
 0x322   : > { %5957 = vrcp.f32 %v658_v62  ;;  %v6496_v62 = vpack.c.bf16 %v855_v59, %v851_v57  ;;  %v877_v57 = vld [vmem:[%s8142_s6 + $0x1d8] sm:$0xff] }
 0x323   : > { %v881_v59 = vld [vmem:[%s8142_s6 + $0x1f8] sm:$0xff] }
 0x329   : > { %v661_v63 = vpop.xlane.xlu1 %660 }
 0x32a   : > { %5959 = vrcp.f32 %v661_v63  ;;  %v850_v63 = vld [vmem:[%s8142_s6 + $0x100] sm:$0xff] }
 0x32b   : > { %v6511_v6 = vpack.c.bf16 %v854_v0, %v850_v63  ;;  %v6574_v63 = vpack.c.bf16 %v879_v56, %v875_v50  ;;  %v6576_v0 = vpack.c.bf16 %v881_v59, %v877_v57  ;;  %v1053_v57 = vld [vmem:[%s8143_s7] sm:$0xff] }
 0x32c   : > { %v5958_v10 = vpop.eup %5957  ;;  %v1057_v59 = vld [vmem:[%s8143_s7 + $0x20] sm:$0xff] }
 0x32d   : > { %v664_v13 = vmul.f32 %v5958_v10, %v6277_v3  ;;  %v827_v3 = vld [vmem:[%s8142_s6 + $0x48] sm:$0xff]  ;;  %v6514_v10 = vpack.c.bf16 %v863_v2, %v859_v1  ;;  %8228 = vst [vmem:[#allocation5_spill] sm:$0xff] %v6576_v0  ;;  %v874_v1 = vld [vmem:[%s8142_s6 + $0x1c0] sm:$0xff]  ;;  %v6641_v4 = vpack.c.bf16 %v1057_v59, %v1053_v57  ;;  %v1067_v57 = vld [vmem:[%s8143_s7 + $0x70] sm:$0xff] }
 0x32e   : > { %v6440_v33 = vpack.c.bf16 %v831_v22, %v827_v3  ;;  %v867_v3 = vld [vmem:[%s8142_s6 + $0x188] sm:$0xff]  ;;  %v878_v2 = vld [vmem:[%s8142_s6 + $0x1e0] sm:$0xff] }
 0x32f   : > { %4847 = vmatmul.mubr.msk.f32.vlgmr.msra.gmra.mrb[4].mxu1 %vm670_vm2, %v664_v13  ;;  %v858_v13 = vld [vmem:[%s8142_s6 + $0x140] sm:$0xff]  ;;  %v871_v22 = vld [vmem:[%s8142_s6 + $0x1a8] sm:$0xff]  ;;  %8231 = vst [vmem:[#allocation8_spill] sm:$0xff] %v6641_v4 }
 0x330   : > { %5220 = vmatpush3.bf16.msra.mxu1 %v6415_v12  ;;  %4853 = vmatprep.mubr.msk.f32.mxu1 %vm6065_vm0, %v8149_v7  ;;  %v6523_v21 = vpack.c.bf16 %v862_v18, %v858_v13  ;;  %v876_v13 = vld [vmem:[%s8142_s6 + $0x1d0] sm:$0xff]  ;;  %v6590_v18 = vpack.c.bf16 %v878_v2, %v874_v1  ;;  %v1070_v59 = vld [vmem:[%s8143_s7 + $0x88] sm:$0xff] }
 0x331   : > { %5222 = vmatprep.subr.bf16.mxu1 %v6418_v16  ;;  %v1055_v1 = vld [vmem:[%s8143_s7 + $0x10] sm:$0xff] }
 0x332   : > { %v1059_v2 = vld [vmem:[%s8143_s7 + $0x30] sm:$0xff] }
 0x334   : > { %v5960_v25 = vpop.eup %5959 }
 0x335   : > { %v665_v32 = vmul.f32 %v5960_v25, %v6281_v9  ;;  %v6456_v9 = vpack.c.bf16 %v830_v36, %v826_v35  ;;  %v869_v25 = vld [vmem:[%s8142_s6 + $0x198] sm:$0xff]  ;;  %v866_v36 = vld [vmem:[%s8142_s6 + $0x180] sm:$0xff] }
 0x336   : > { %v873_v35 = vld [vmem:[%s8142_s6 + $0x1b8] sm:$0xff]  ;;  %v6549_v44 = vpack.c.bf16 %v870_v38, %v866_v36 }
 0x337   : > { %4854 = vmatmul.mubr.msk.f32.vlgmr.msra.gmra.mrb[6].mxu1 %vm670_vm2, %v665_v32  ;;  %v6536_v32 = vpack.c.bf16 %v871_v22, %v867_v3  ;;  %v6547_v41 = vpack.c.bf16 %v873_v35, %v869_v25  ;;  %v880_v3 = vld [vmem:[%s8142_s6 + $0x1f0] sm:$0xff]  ;;  %v1054_v25 = vld [vmem:[%s8143_s7 + $0x8] sm:$0xff]  ;;  %v1056_v36 = vld [vmem:[%s8143_s7 + $0x18] sm:$0xff] }
 0x338   : > { %5224 = vmatpush1.bf16.msra.mxu1 %v6437_v28  ;;  %952 = vmatprep.mubr.f32.mxu1 %v8149_v7  ;;  %v6595_v22 = vpack.c.bf16 %v880_v3, %v876_v13  ;;  %v1058_v35 = vld [vmem:[%s8143_s7 + $0x28] sm:$0xff]  ;;  %v6613_v48 = vpack.c.bf16 %v1060_v47, %v1056_v36  ;;  %v6643_v7 = vpack.c.bf16 %v1059_v2, %v1055_v1 }
 0x339   : > { %5226 = vmatprep.subr.bf16.mxu1 %v6440_v33  ;;  %5278 = vmatprep.subr.bf16.mxu0 %v6547_v41  ;;  %v6608_v38 = vpack.c.bf16 %v1058_v35, %v1054_v25  ;;  %v1062_v13 = vld [vmem:[%s8143_s7 + $0x48] sm:$0xff]  ;;  %v1064_v25 = vld [vmem:[%s8143_s7 + $0x58] sm:$0xff] }
 0x33a   : > { %5280 = vmatpush1.bf16.msra.mxu0 %v6561_v54  ;;  %8229 = vst [vmem:[#allocation6_spill] sm:$0xff] %v6595_v22  ;;  %8230 = vst [vmem:[#allocation7_spill] sm:$0xff] %v6613_v48  ;;  %v1066_v3 = vld [vmem:[%s8143_s7 + $0x68] sm:$0xff]  ;;  %v1068_v35 = vld [vmem:[%s8143_s7 + $0x78] sm:$0xff] }
 0x33b   : > { %5282 = vmatprep.subr.bf16.mxu0 %v6576_v0  ;;  %8232 = vst [vmem:[#allocation9_spill] sm:$0xff] %v6643_v7  ;;  %v6651_v0 = vpack.c.bf16 %v1066_v3, %v1062_v13  ;;  %v6653_v54 = vpack.c.bf16 %v1068_v35, %v1064_v25  ;;  %v1074_v2 = vld [vmem:[%s8143_s7 + $0xa8] sm:$0xff]  ;;  %v1072_v13 = vld [vmem:[%s8143_s7 + $0x98] sm:$0xff]  ;;  %v1069_v35 = vld [vmem:[%s8143_s7 + $0x80] sm:$0xff] }
 0x33c   : > { %5228 = vmatpush1.bf16.msra.mxu1 %v6456_v9  ;;  %v1076_v3 = vld [vmem:[%s8143_s7 + $0xb8] sm:$0xff] }
 0x33d   : > { %5230 = vmatprep.subr.bf16.mxu1 %v6460_v43  ;;  %8233 = vst [vmem:[#allocation10_spill] sm:$0xff] %v6651_v0  ;;  %8234 = vst [vmem:[#allocation11_spill] sm:$0xff] %v6653_v54 }
 0x33e   : > { %5284 = vmatpush1.bf16.msra.mxu0 %v6595_v22  ;;  %v1065_v22 = vld [vmem:[%s8143_s7 + $0x60] sm:$0xff] }
 0x33f   : > { %5318 = vmatprep.subr.bf16.mxu0 %v6613_v48  ;;  %v1061_v48 = vld [vmem:[%s8143_s7 + $0x40] sm:$0xff] }
 0x340   : > { %5232 = vmatpush1.bf16.msra.mxu1 %v6475_v51  ;;  %v6676_v25 = vpack.c.bf16 %v1065_v22, %v1061_v48  ;;  %v1071_v22 = vld [vmem:[%s8143_s7 + $0x90] sm:$0xff] }
 0x341   : > { %5234 = vmatprep.subr.bf16.mxu1 %v6478_v53  ;;  %v1075_v48 = vld [vmem:[%s8143_s7 + $0xb0] sm:$0xff] }
 0x342   : > { %8235 = vst [vmem:[#allocation12_spill] sm:$0xff] %v6676_v25 }
 0x344   : > { %5236 = vmatpush1.bf16.msra.mxu1 %v6493_v60 }
 0x345   : > { %5238 = vmatprep.subr.bf16.mxu1 %v6496_v62 }
 0x348   : > { %5240 = vmatpush1.bf16.msra.mxu1 %v6511_v6 }
 0x349   : > { %5242 = vmatprep.subr.bf16.mxu1 %v6514_v10 }
 0x34c   : > { %5244 = vmatpush1.bf16.msra.mxu1 %v6523_v21 }
 0x34d   : > { %5246 = vmatprep.subr.bf16.mxu1 %v6536_v32 }
 0x350   : > { %5248 = vmatpush1.bf16.msra.mxu1 %v6549_v44 }
 0x351   : > { %5250 = vmatprep.subr.bf16.mxu1 %v6574_v63 }
 0x354   : > { %5252 = vmatpush1.bf16.msra.mxu1 %v6590_v18 }
 0x355   : > { %5286 = vmatprep.subr.bf16.mxu1 %v6608_v38 }
 0x402   : > { %v740_v50 = vpop.f32.mrb[4].mxu1 }
 0x403   : > { %v4848_v56 = vpop.f32.mrb[5].mxu1 }
 0x40a   : > { %v813_v36 = vpop.f32.mrb[6].mxu1 }
 0x40b   : > { %v884_v47 = vrot.slane %v813_v36, 7  ;;  %v4855_v56 = vpop.f32.mrb[7].mxu1  ;;  %v1063_v36 = vld [vmem:[%s8143_s7 + $0x50] sm:$0xff] }
 0x40c   : > { %v6688_v56 = vpack.c.bf16 %v1074_v2, %v1070_v59  ;;  %v1080_v59 = vld [vmem:[%s8143_s7 + $0xd8] sm:$0xff] }
 0x40d   : > { %v886_v1 = vsel %vm885_vm3, %v884_v47, %v740_v50  ;;  %v6678_v50 = vpack.c.bf16 %v1067_v57, %v1063_v36  ;;  %v1073_v47 = vld [vmem:[%s8143_s7 + $0xa0] sm:$0xff]  ;;  %v1078_v36 = vld [vmem:[%s8143_s7 + $0xc8] sm:$0xff]  ;;  %v1084_v2 = vld [vmem:[%s8143_s7 + $0xf8] sm:$0xff] }
 0x40e   : > { %953 = vmatmul.mubr.f32.vlgmr.msra.gmra.mrb[8].mxu1 %v886_v1  ;;  %1024 = vmatmul.mubr.f32.vlgmr.msra.gmra.mrb[2].mxu0 %v886_v1  ;;  %8237 = vst [vmem:[#allocation14_spill] sm:$0xff] %v6688_v56  ;;  %v6690_v1 = vpack.c.bf16 %v1076_v3, %v1072_v13  ;;  %v1082_v57 = vld [vmem:[%s8143_s7 + $0xe8] sm:$0xff]  ;;  %v8239_v13 = vmov 0.0   ;;  %v6714_v3 = vpack.c.bf16 %v1073_v47, %v1069_v35  ;;  %v1079_v35 = vld [vmem:[%s8143_s7 + $0xd0] sm:$0xff] }
 0x40f   : > { %5288 = vmatpush1.bf16.msra.mxu1 %v6641_v4  ;;  %5320 = vmatpush1.bf16.msra.mxu0 %v6643_v7  ;;  %8236 = vst [vmem:[#allocation13_spill] sm:$0xff] %v6678_v50  ;;  %v1081_v7 = vld [vmem:[%s8143_s7 + $0xe0] sm:$0xff]  ;;  %v6726_v4 = vpack.c.bf16 %v1082_v57, %v1078_v36  ;;  %v1083_v47 = vld [vmem:[%s8143_s7 + $0xf0] sm:$0xff]  ;;  %v1088_v36 = vld [vmem:[%s8143_s7 + $0x118] sm:$0xff] }
 0x410   : > { %5290 = vmatprep.subr.bf16.mxu1 %v6651_v0  ;;  %5322 = vmatprep.subr.bf16.mxu0 %v6653_v54  ;;  %8238 = vst [vmem:[#allocation15_spill] sm:$0xff] %v6690_v1  ;;  %8240 = vst [vmem:[#allocation16_spill] sm:$0xff] %v6714_v3  ;;  %v6716_v54 = vpack.c.bf16 %v1075_v48, %v1071_v22  ;;  %v1077_v0 = vld [vmem:[%s8143_s7 + $0xc0] sm:$0xff]  ;;  %v1086_v22 = vld [vmem:[%s8143_s7 + $0x108] sm:$0xff] }
 0x411   : > { %1181 = vmatprep.mubr.f32.mxu1 %v8239_v13  ;;  %1252 = vmatprep.mubr.f32.mxu0 %v8239_v13  ;;  %8242 = vst [vmem:[#allocation18_spill] sm:$0xff] %v6726_v4  ;;  %v1090_v48 = vld [vmem:[%s8143_s7 + $0x128] sm:$0xff]  ;;  %v1092_v57 = vld [vmem:[%s8143_s7 + $0x138] sm:$0xff] }
 0x412   : > { %8241 = vst [vmem:[#allocation17_spill] sm:$0xff] %v6716_v54 }
 0x413   : > { %5292 = vmatpush1.bf16.msra.mxu1 %v6676_v25  ;;  %5324 = vmatpush1.bf16.msra.mxu0 %v6678_v50  ;;  %v6728_v25 = vpack.c.bf16 %v1084_v2, %v1080_v59  ;;  %v6750_v59 = vpack.c.bf16 %v1081_v7, %v1077_v0  ;;  %v6752_v2 = vpack.c.bf16 %v1083_v47, %v1079_v35  ;;  %v1087_v7 = vld [vmem:[%s8143_s7 + $0x110] sm:$0xff]  ;;  %v1094_v35 = vld [vmem:[%s8143_s7 + $0x148] sm:$0xff] }
 0x414   : > { %5294 = vmatprep.subr.bf16.mxu1 %v6688_v56  ;;  %5326 = vmatprep.subr.bf16.mxu0 %v6690_v1  ;;  %v1085_v1 = vld [vmem:[%s8143_s7 + $0x100] sm:$0xff]  ;;  %v6762_v50 = vpack.c.bf16 %v1090_v48, %v1086_v22  ;;  %v1091_v0 = vld [vmem:[%s8143_s7 + $0x130] sm:$0xff]  ;;  %v1098_v47 = vld [vmem:[%s8143_s7 + $0x168] sm:$0xff] }
 0x415   : > { %8243 = vst [vmem:[#allocation19_spill] sm:$0xff] %v6728_v25  ;;  %8244 = vst [vmem:[#allocation20_spill] sm:$0xff] %v6750_v59  ;;  %v1089_v56 = vld [vmem:[%s8143_s7 + $0x120] sm:$0xff]  ;;  %v1096_v22 = vld [vmem:[%s8143_s7 + $0x158] sm:$0xff] }
 0x416   : > { %8245 = vst [vmem:[#allocation21_spill] sm:$0xff] %v6752_v2  ;;  %8246 = vst [vmem:[#allocation22_spill] sm:$0xff] %v6762_v50  ;;  %v1100_v48 = vld [vmem:[%s8143_s7 + $0x178] sm:$0xff] }
 0x417   : > { %5296 = vmatpush1.bf16.msra.mxu1 %v6714_v3  ;;  %5328 = vmatpush1.bf16.msra.mxu0 %v6716_v54  ;;  %v6764_v3 = vpack.c.bf16 %v1092_v57, %v1088_v36  ;;  %v6786_v36 = vpack.c.bf16 %v1089_v56, %v1085_v1  ;;  %v6788_v57 = vpack.c.bf16 %v1091_v0, %v1087_v7  ;;  %v1095_v56 = vld [vmem:[%s8143_s7 + $0x150] sm:$0xff]  ;;  %v1102_v7 = vld [vmem:[%s8143_s7 + $0x188] sm:$0xff] }
 0x418   : > { %5298 = vmatprep.subr.bf16.mxu1 %v6726_v4  ;;  %5330 = vmatprep.subr.bf16.mxu0 %v6728_v25  ;;  %v1093_v25 = vld [vmem:[%s8143_s7 + $0x140] sm:$0xff]  ;;  %v6798_v54 = vpack.c.bf16 %v1098_v47, %v1094_v35  ;;  %v1099_v1 = vld [vmem:[%s8143_s7 + $0x170] sm:$0xff]  ;;  %v1106_v0 = vld [vmem:[%s8143_s7 + $0x1a8] sm:$0xff] }
 0x419   : > { %8247 = vst [vmem:[#allocation23_spill] sm:$0xff] %v6764_v3  ;;  %8248 = vst [vmem:[#allocation24_spill] sm:$0xff] %v6786_v36  ;;  %v1097_v4 = vld [vmem:[%s8143_s7 + $0x160] sm:$0xff]  ;;  %v1104_v35 = vld [vmem:[%s8143_s7 + $0x198] sm:$0xff] }
 0x41a   : > { %8249 = vst [vmem:[#allocation25_spill] sm:$0xff] %v6788_v57  ;;  %8250 = vst [vmem:[#allocation26_spill] sm:$0xff] %v6798_v54  ;;  %v1108_v47 = vld [vmem:[%s8143_s7 + $0x1b8] sm:$0xff] }
 0x41b   : > { %5300 = vmatpush1.bf16.msra.mxu1 %v6750_v59  ;;  %5332 = vmatpush1.bf16.msra.mxu0 %v6752_v2  ;;  %v6800_v59 = vpack.c.bf16 %v1100_v48, %v1096_v22  ;;  %v6822_v22 = vpack.c.bf16 %v1097_v4, %v1093_v25  ;;  %v6824_v48 = vpack.c.bf16 %v1099_v1, %v1095_v56  ;;  %v1103_v4 = vld [vmem:[%s8143_s7 + $0x190] sm:$0xff]  ;;  %v1110_v56 = vld [vmem:[%s8143_s7 + $0x1c8] sm:$0xff] }
 0x41c   : > { %5302 = vmatprep.subr.bf16.mxu1 %v6762_v50  ;;  %5334 = vmatprep.subr.bf16.mxu0 %v6764_v3  ;;  %v1101_v3 = vld [vmem:[%s8143_s7 + $0x180] sm:$0xff]  ;;  %v6834_v2 = vpack.c.bf16 %v1106_v0, %v1102_v7  ;;  %v1107_v25 = vld [vmem:[%s8143_s7 + $0x1b0] sm:$0xff]  ;;  %v1114_v1 = vld [vmem:[%s8143_s7 + $0x1e8] sm:$0xff] }
 0x41d   : > { %8251 = vst [vmem:[#allocation27_spill] sm:$0xff] %v6800_v59  ;;  %8252 = vst [vmem:[#allocation28_spill] sm:$0xff] %v6824_v48  ;;  %v1105_v50 = vld [vmem:[%s8143_s7 + $0x1a0] sm:$0xff]  ;;  %v1112_v7 = vld [vmem:[%s8143_s7 + $0x1d8] sm:$0xff] }
 0x41e   : > { %v1116_v0 = vld [vmem:[%s8143_s7 + $0x1f8] sm:$0xff] }
 0x41f   : > { %5304 = vmatpush1.bf16.msra.mxu1 %v6786_v36  ;;  %5336 = vmatpush1.bf16.msra.mxu0 %v6788_v57  ;;  %v6836_v36 = vpack.c.bf16 %v1108_v47, %v1104_v35  ;;  %v6858_v35 = vpack.c.bf16 %v1105_v50, %v1101_v3  ;;  %v6860_v47 = vpack.c.bf16 %v1107_v25, %v1103_v4  ;;  %v1111_v50 = vld [vmem:[%s8143_s7 + $0x1d0] sm:$0xff] }
 0x420   : > { %5306 = vmatprep.subr.bf16.mxu1 %v6798_v54  ;;  %5338 = vmatprep.subr.bf16.mxu0 %v6800_v59  ;;  %v1109_v59 = vld [vmem:[%s8143_s7 + $0x1c0] sm:$0xff]  ;;  %v6867_v54 = vpack.c.bf16 %v1114_v1, %v1110_v56  ;;  %v6869_v57 = vpack.c.bf16 %v1116_v0, %v1112_v7  ;;  %v1115_v3 = vld [vmem:[%s8143_s7 + $0x1f0] sm:$0xff]  ;;  %v8257_v56 = vmov 0.0|0.0   ;;  %v1322_v7 = vld [vmem:[%s8144_s8 + $0x48] sm:$0xff] }
 0x421   : > { %v6884_v25 = vpack.c.bf16 %v1115_v3, %v1111_v50  ;;  %v1321_v1 = vld [vmem:[%s8144_s8 + $0x40] sm:$0xff]  ;;  %v1323_v50 = vld [vmem:[%s8144_s8 + $0x50] sm:$0xff]  ;;  %v1324_v3 = vld [vmem:[%s8144_s8 + $0x58] sm:$0xff] }
 0x422   : > { %8253 = vst [vmem:[#allocation29_spill] sm:$0xff] %v6867_v54  ;;  %8254 = vst [vmem:[#allocation30_spill] sm:$0xff] %v6869_v57  ;;  %v6959_v0 = vpack.c.bf16 %v1322_v7, %v1321_v1 }
 0x423   : > { %5308 = vmatpush1.bf16.msra.mxu1 %v6822_v22  ;;  %5340 = vmatpush1.bf16.msra.mxu0 %v6824_v48  ;;  %v1113_v48 = vld [vmem:[%s8143_s7 + $0x1e0] sm:$0xff]  ;;  %8256 = vst [vmem:[#allocation32_spill] sm:$0xff] %v6884_v25 }
 0x424   : > { %5310 = vmatprep.subr.bf16.mxu1 %v6834_v2  ;;  %5342 = vmatprep.subr.bf16.mxu0 %v6836_v36  ;;  %v6882_v4 = vpack.c.bf16 %v1113_v48, %v1109_v59  ;;  %v1320_v59 = vld [vmem:[%s8144_s8 + $0x38] sm:$0xff]  ;;  %8262 = vst [vmem:[#allocation37_spill] sm:$0xff] %v6959_v0 }
 0x426   : > { %8255 = vst [vmem:[#allocation31_spill] sm:$0xff] %v6882_v4 }
 0x427   : > { %5312 = vmatpush1.bf16.msra.mxu1 %v6858_v35  ;;  %5344 = vmatpush1.bf16.msra.mxu0 %v6860_v47 }
 0x428   : > { %5314 = vmatprep.subr.bf16.mxu1 %v6867_v54  ;;  %5346 = vmatprep.subr.bf16.mxu0 %v6869_v57 }
 0x42b   : > { %5316 = vmatpush1.bf16.msra.mxu1 %v6882_v4  ;;  %5348 = vmatpush1.bf16.msra.mxu0 %v6884_v25 }
 0x42c   : > { %5349 = vmatprep.subr.bf16.mxu1 %v8257_v56  ;;  %5373 = vmatprep.subr.bf16.mxu0 %v8257_v56 }
 0x42e   : > { %1182 = vmatmul.mubr.f32.vlgmr.msra.gmra.mrb[10].mxu1 %v6227_v27  ;;  %1253 = vmatmul.mubr.f32.vlgmr.msra.gmra.mrb[4].mxu0 %v6227_v27 }
 0x42f   : > { %5375 = vmatpush3.bf16.msra.mxu0 %v6152_v5  ;;  %4888 = vmatprep.mubr.msk.f32.mxu1 %vm6065_vm0, %v8239_v13  ;;  %v1313_v5 = vld [vmem:[%s8144_s8] sm:$0xff] }
 0x430   : > { %5376 = vmatprep.subr.bf16.mxu0 %v8257_v56  ;;  %4923 = vmatprep.mubr.msk.f32.mxu0 %vm6065_vm0, %v8239_v13 }
 0x433   : > { %5378 = vmatpush3.bf16.msra.mxu0 %v6163_v8  ;;  %v1314_v8 = vld [vmem:[%s8144_s8 + $0x8] sm:$0xff] }
 0x434   : > { %5379 = vmatprep.subr.bf16.mxu0 %v8257_v56 }
 0x437   : > { %5381 = vmatpush3.bf16.msra.mxu0 %v6173_v11  ;;  %v6920_v11 = vpack.c.bf16 %v1314_v8, %v1313_v5  ;;  %v6969_v5 = vpack.c.bf16 %v1324_v3, %v1323_v50  ;;  %v1325_v8 = vld [vmem:[%s8144_s8 + $0x60] sm:$0xff] }
 0x438   : > { %5382 = vmatprep.subr.bf16.mxu0 %v8257_v56 }
 0x439   : > { %8258 = vst [vmem:[#allocation33_spill] sm:$0xff] %v6920_v11  ;;  %5351 = vmatpush3.bf16.msra.mxu1 %v6920_v11  ;;  %8263 = vst [vmem:[#allocation38_spill] sm:$0xff] %v6969_v5 }
 0x43a   : > { %5352 = vmatprep.subr.bf16.mxu1 %v8257_v56 }
 0x43b   : > { %5384 = vmatpush3.bf16.msra.mxu0 %v6183_v14  ;;  %v1315_v14 = vld [vmem:[%s8144_s8 + $0x10] sm:$0xff] }
 0x43c   : > { %5385 = vmatprep.subr.bf16.mxu0 %v8257_v56 }
 0x43f   : > { %5387 = vmatpush3.bf16.msra.mxu0 %v6193_v17  ;;  %v1316_v17 = vld [vmem:[%s8144_s8 + $0x18] sm:$0xff] }
 0x440   : > { %5388 = vmatprep.subr.bf16.mxu0 %v8257_v56 }
 0x443   : > { %5390 = vmatpush3.bf16.msra.mxu0 %v6203_v20  ;;  %v6930_v20 = vpack.c.bf16 %v1316_v17, %v1315_v14  ;;  %v1326_v14 = vld [vmem:[%s8144_s8 + $0x68] sm:$0xff] }
 0x444   : > { %5391 = vmatprep.subr.bf16.mxu0 %v8257_v56  ;;  %v6979_v17 = vpack.c.bf16 %v1326_v14, %v1325_v8 }
 0x445   : > { %8259 = vst [vmem:[#allocation34_spill] sm:$0xff] %v6930_v20  ;;  %5354 = vmatpush3.bf16.msra.mxu1 %v6930_v20 }
 0x446   : > { %5355 = vmatprep.subr.bf16.mxu1 %v8257_v56  ;;  %8264 = vst [vmem:[#allocation39_spill] sm:$0xff] %v6979_v17 }
 0x447   : > { %5393 = vmatpush3.bf16.msra.mxu0 %v6213_v23  ;;  %v1317_v23 = vld [vmem:[%s8144_s8 + $0x20] sm:$0xff] }
 0x448   : > { %5394 = vmatprep.subr.bf16.mxu0 %v8257_v56 }
 0x44b   : > { %5396 = vmatpush3.bf16.msra.mxu0 %v6223_v26  ;;  %v1318_v26 = vld [vmem:[%s8144_s8 + $0x28] sm:$0xff] }
 0x44c   : > { %5410 = vmatprep.subr.bf16.mxu0 %v6418_v16  ;;  %v6939_v27 = vpack.c.bf16 %v1318_v26, %v1317_v23  ;;  %v1319_v16 = vld [vmem:[%s8144_s8 + $0x30] sm:$0xff]  ;;  %v1328_v26 = vld [vmem:[%s8144_s8 + $0x78] sm:$0xff] }
 0x44d   : > { %v6949_v48 = vpack.c.bf16 %v1320_v59, %v1319_v16  ;;  %v1327_v23 = vld [vmem:[%s8144_s8 + $0x70] sm:$0xff]  ;;  %v6068_v59 = vmov 1983009808  }
 0x44e   : > { %8260 = vst [vmem:[#allocation35_spill] sm:$0xff] %v6939_v27  ;;  %5357 = vmatpush3.bf16.msra.mxu1 %v6939_v27  ;;  %v6989_v16 = vpack.c.bf16 %v1328_v26, %v1327_v23  ;;  %v1037_v1 = vunpack.c.l.s4 %v6068_v59 }
 0x44f   : > { %8261 = vst [vmem:[#allocation36_spill] sm:$0xff] %v6949_v48  ;;  %5358 = vmatprep.subr.bf16.mxu1 %v8257_v56 }
 0x450   : > { %8265 = vst [vmem:[#allocation40_spill] sm:$0xff] %v6989_v16  ;;  %v1038_v7 = vunpack.c.0.s8 %v1037_v1 }
 0x452   : > { %5360 = vmatpush3.bf16.msra.mxu1 %v6949_v48  ;;  %v6995_v50 = vsub.s32 %v1038_v7, %v6247_v39  ;;  %v817_v39 = vld [vmem:[%s6135_s20] sm:$0xff] }
 0x453   : > { %5361 = vmatprep.subr.bf16.mxu1 %v8257_v56 }
 0x456   : > { %5363 = vmatpush3.bf16.msra.mxu1 %v6959_v0 }
 0x457   : > { %5364 = vmatprep.subr.bf16.mxu1 %v8257_v56 }
 0x45a   : > { %5366 = vmatpush3.bf16.msra.mxu1 %v6969_v5 }
 0x45b   : > { %5367 = vmatprep.subr.bf16.mxu1 %v8257_v56 }
 0x45e   : > { %5369 = vmatpush3.bf16.msra.mxu1 %v6979_v17 }
 0x45f   : > { %5370 = vmatprep.subr.bf16.mxu1 %v8257_v56 }
 0x462   : > { %5372 = vmatpush3.bf16.msra.mxu1 %v6989_v16 }
 0x463   : > { %5397 = vmatprep.subr.bf16.mxu1 %v8257_v56 }
 0x4e1   : > { %v954_v3 = vpop.f32.mrb[8].mxu1  ;;  %v1025_v8 = vpop.f32.mrb[2].mxu0 }
 0x4e2   : > { %v956_v14 = vpop.f32.mrb[9].mxu1  ;;  %v1027_v5 = vpop.f32.mrb[3].mxu0 }
 0x4e3   : > { %v1034_v17 = vcombine.low %v954_v3, %v956_v14  ;;  %v1035_v23 = vcombine.low %v1025_v8, %v1027_v5 }
 0x4e5   : > { %v1042_v26 = vrot.slane %v1034_v17, %v6995_v50  ;;  %v1049_v0 = vrot.slane %v1035_v23, %v6995_v50 }
 0x4e7   : > { %v1050_v16 = vcombine.low %v1042_v26, %v1049_v0 }
 0x4e9   : > { %v1052_v4 = vadd.f32 %v1050_v16, %v817_v39 }
 0x501   : > { %v1183_v48 = vpop.f32.mrb[10].mxu1  ;;  %v1254_v27 = vpop.f32.mrb[4].mxu0 }
 0x502   : > { %v1185_v20 = vpop.f32.mrb[11].mxu1  ;;  %v1256_v59 = vpop.f32.mrb[5].mxu0 }
 0x503   : > { %v1263_v1 = vcombine.low %v1183_v48, %v1185_v20  ;;  %v1264_v11 = vcombine.low %v1254_v27, %v1256_v59 }
 0x505   : > { %v1271_v7 = vrot.slane %v1263_v1, %v6995_v50  ;;  %v1278_v25 = vrot.slane %v1264_v11, %v6995_v50 }
 0x507   : > { %v1279_v57 = vcombine.low %v1271_v7, %v1278_v25  ;;  %v373_v25 = vld [vmem:[#allocation3] sm:$0x3] }
 0x509   : > { %v1281_v3 = vadd.f32 %v1279_v57, %v1052_v4 }
 0x50b   : > { %v4575_v5 = vmul.f32 -1.442695, %v1281_v3  ;;  %v1289_v8 = vrot.slane %v1281_v3, 2  ;;  %v1300_v0 = vrot.slane %v1281_v3, 6  ;;  %v1297_v26 = vrot.slane %v1281_v3, 4 }
 0x50d   : > { %5961 = vpow2.f32 %v4575_v5  ;;  %v4576_v17 = vmul.f32 -1.442695, %v1289_v8  ;;  %v4577_v14 = vmul.f32 -1.442695, %v1300_v0 }
 0x50f   : > { %5963 = vpow2.f32 %v4576_v17 }
 0x510   : > { %5965 = vpow2.f32 %v4577_v14 }
 0x517   : > { %v5962_v23 = vpop.eup %5961 }
 0x518   : > { %v1285_v54 = vadd.f32 1.0, %v5962_v23 }
 0x519   : > { %v5964_v20 = vpop.eup %5963 }
 0x51a   : > { %5967 = vrcp.f32 %v1285_v54  ;;  %v1294_v27 = vadd.f32 1.0, %v5964_v20  ;;  %v5966_v11 = vpop.eup %5965 }
 0x51b   : > { %5969 = vtanh.f32 %v1297_v26  ;;  %v1305_v16 = vadd.f32 1.0, %v5966_v11 }
 0x51c   : > { %5971 = vrcp.f32 %v1294_v27 }
 0x51d   : > { %5973 = vrcp.f32 %v1305_v16 }
 0x524   : > { %v5968_v48 = vpop.eup %5967 }
 0x525   : > { %v5970_v57 = vpop.eup %5969 }
 0x526   : > { %v5972_v4 = vpop.eup %5971  ;;  %v1309_v1 = vmul.f32 %v5970_v57, %v5968_v48 }
 0x527   : > { %v1308_v59 = vmul.f32 %v5972_v4, %v373_v25  ;;  %v5974_v7 = vpop.eup %5973 }
 0x529   : > { %v7002_v39 = vadd.f32 %v1309_v1, %v1308_v59 }
 0x52b   : > { %5975 = vtanh.f32 %v7002_v39 }
 0x535   : > { %v5976_v3 = vpop.eup %5975 }
 0x536   : > { %v7005_v5 = vmul.f32 %v5976_v3, %v5974_v7 }
 0x538   : > { %4889 = vmatmul.mubr.f32.vlgmr.msra.gmra.mrb[12].mxu1 %v7005_v5  ;;  %4924 = vmatmul.mubr.f32.vlgmr.msra.gmra.mrb[6].mxu0 %v7005_v5 }
 0x539   : > { %5399 = vmatpush3.bf16.xpose.msra.mxu1 %v6237_v30  ;;  %4930 = vmatprep.mubr.msk.f32.mxu1 %vm6065_vm0, %v8239_v13  ;;  %v7033_v30 = vld [vmem:[%s8145_s9] ss:$0 sm:$0xff] }
 0x53a   : > { %5400 = vmatprep.subr.bf16.mxu1 %v8257_v56  ;;  %5412 = vmatpush1.bf16.msra.mxu0 %v6437_v28 }
 0x53b   : > { %5414 = vmatprep.subr.bf16.mxu0 %v6440_v33  ;;  %1983 = vmatprep.mubr.f32.mxu0 %v8239_v13 }
 0x53e   : > { %5416 = vmatpush1.bf16.msra.mxu0 %v6456_v9 }
 0x53f   : > { %5418 = vmatprep.subr.bf16.mxu0 %v6460_v43 }
 0x542   : > { %5420 = vmatpush1.bf16.msra.mxu0 %v6475_v51 }
 0x543   : > { %5422 = vmatprep.subr.bf16.mxu0 %v6478_v53 }
 0x546   : > { %5424 = vmatpush1.bf16.msra.mxu0 %v6493_v60 }
 0x547   : > { %5426 = vmatprep.subr.bf16.mxu0 %v6496_v62 }
 0x54a   : > { %5428 = vmatpush1.bf16.msra.mxu0 %v6511_v6 }
 0x54b   : > { %5430 = vmatprep.subr.bf16.mxu0 %v6514_v10 }
 0x54e   : > { %5432 = vmatpush1.bf16.msra.mxu0 %v6523_v21 }
 0x54f   : > { %5434 = vmatprep.subr.bf16.mxu0 %v6536_v32 }
 0x552   : > { %5436 = vmatpush1.bf16.msra.mxu0 %v6549_v44 }
 0x553   : > { %5438 = vmatprep.subr.bf16.mxu0 %v6574_v63 }
 0x556   : > { %5440 = vmatpush1.bf16.msra.mxu0 %v6590_v18 }
 0x557   : > { %5474 = vmatprep.subr.bf16.mxu0 %v6608_v38 }
 0x60b   : > { %v1402_v28 = vpop.f32.mrb[12].mxu1  ;;  %v1496_v33 = vpop.f32.mrb[6].mxu0 }
 0x60c   : > { %v1403_v9 = vadd.f32 %v7033_v30, %v1402_v28  ;;  %v1497_v43 = vadd.f32 %v6244_v31, %v1496_v33  ;;  %v4890_v51 = vpop.f32.mrb[13].mxu1  ;;  %v4925_v53 = vpop.f32.mrb[7].mxu0  ;;  %v8274_v33 = vld [vmem:[#allocation12_spill] sm:$0xff] }
 0x60d   : > { %v8277_v51 = vld [vmem:[#allocation15_spill] sm:$0xff]  ;;  %v8278_v53 = vld [vmem:[#allocation16_spill] sm:$0xff] }
 0x60e   : > { %1406 = vst [vmem:[%s6140_s23] sm:$0x3] %v1403_v9  ;;  %5977 = vtanh.f32 %v1497_v43  ;;  %v8275_v9 = vld [vmem:[#allocation13_spill] sm:$0xff]  ;;  %v8276_v43 = vld [vmem:[#allocation14_spill] sm:$0xff] }
 0x618   : > { %v5978_v60 = vpop.eup %5977 }
 0x619   : > { %v1508_v62 = vrot.slane %v5978_v60, %v6250_v40  ;;  %v8279_v60 = vld [vmem:[#allocation17_spill] sm:$0xff] }
 0x61b   : > { %v1516_v6 = vrot.slane %v1508_v62, %v6250_v40  ;;  %v1509_v10 = vcombine.high %v1508_v62, %v1508_v62  ;;  %v8280_v62 = vld [vmem:[#allocation18_spill] sm:$0xff] }
 0x61d   : > { %4931 = vmatmul.mubr.f32.vlgmr.msra.gmra.mrb[14].mxu1 %v1516_v6  ;;  %v1523_v31 = vrot.slane %v1509_v10, %v6250_v40  ;;  %v8281_v6 = vld [vmem:[#allocation19_spill] sm:$0xff]  ;;  %v8282_v10 = vld [vmem:[#allocation20_spill] sm:$0xff] }
 0x61e   : > { %5402 = vmatpush3.bf16.xpose.msra.mxu1 %v6259_v45  ;;  %4937 = vmatprep.mubr.msk.f32.mxu1 %vm6065_vm0, %v8239_v13  ;;  %v1672_v45 = vld [vmem:[%s8139_s3] sm:$0x1] }
 0x61f   : > { %5403 = vmatprep.subr.bf16.mxu1 %v8257_v56 }
 0x625   : > { %4938 = vmatmul.mubr.f32.vlgmr.msra.gmra.mrb[16].mxu1 %v1523_v31  ;;  %v8283_v31 = vld [vmem:[#allocation21_spill] sm:$0xff] }
 0x626   : > { %5405 = vmatpush3.bf16.msra.mxu1 %v6291_v15  ;;  %4944 = vmatprep.mubr.msk.f32.mxu1 %vm6065_vm0, %v8239_v13  ;;  %v1673_v15 = vld [vmem:[%s8139_s3 + $0x1] sm:$0x1] }
 0x627   : > { %5406 = vmatprep.subr.bf16.mxu1 %v8257_v56 }
 0x6f0   : > { %v1596_v21 = vpop.f32.mrb[14].mxu1 }
 0x6f1   : > { %v1670_v32 = vmul.f32 2.0, %v1596_v21  ;;  %v4932_v44 = vpop.f32.mrb[15].mxu1  ;;  %v8284_v21 = vld [vmem:[#allocation22_spill] sm:$0xff] }
 0x6f2   : > { %v8287_v44 = vld [vmem:[#allocation25_spill] sm:$0xff] }
 0x6f3   : > { %v1674_v54 = vadd.f32 %v1672_v45, %v1670_v32  ;;  %v8285_v45 = vld [vmem:[#allocation23_spill] sm:$0xff]  ;;  %v8286_v32 = vld [vmem:[#allocation24_spill] sm:$0xff] }
 0x6f5   : > { %v1676_v63 = vsel %vm643_vm1, %v1674_v54, -inf }
 0x6f6   : > { %1677 = vmax.xlane.f32.xlu0 %v1676_v63  ;;  %v8289_v63 = vld [vmem:[#allocation27_spill] sm:$0xff] }
 0x6f8   : > { %v1666_v18 = vpop.f32.mrb[16].mxu1 }
 0x6f9   : > { %v1671_v38 = vmul.f32 2.0, %v1666_v18  ;;  %v4939_v8 = vpop.f32.mrb[17].mxu1  ;;  %v8290_v18 = vld [vmem:[#allocation28_spill] sm:$0xff] }
 0x6fa   : > { %v8293_v8 = vld [vmem:[#allocation31_spill] sm:$0xff] }
 0x6fb   : > { %v1675_v17 = vadd.f32 %v1673_v15, %v1671_v38  ;;  %v8291_v15 = vld [vmem:[#allocation29_spill] sm:$0xff]  ;;  %v8292_v38 = vld [vmem:[#allocation30_spill] sm:$0xff] }
 0x6fd   : > { %v1679_v0 = vsel %vm643_vm1, %v1675_v17, -inf }
 0x6fe   : > { %1680 = vmax.xlane.f32.xlu1 %v1679_v0  ;;  %v8301_v0 = vld [vmem:[#allocation39_spill] sm:$0xff] }
 0x783   : > { %v1678_v14 = vpop.xlane.xlu0 %1677 }
 0x784   : > { %v1682_v23 = vsub.f32 %v1674_v54, %v1678_v14  ;;  %v8288_v54 = vld [vmem:[#allocation26_spill] sm:$0xff]  ;;  %v8302_v14 = vld [vmem:[#allocation40_spill] sm:$0xff] }
 0x786   : > { %v1684_v26 = vmul.f32 1.442695, %v1682_v23  ;;  %v2439_v23 = vld [vmem:[%s8140_s4] sm:$0xff] }
 0x788   : > { %5979 = vpow2.f32 %v1684_v26  ;;  %v2440_v26 = vld [vmem:[%s8140_s4 + $0x8] sm:$0xff] }
 0x78b   : > { %v1681_v20 = vpop.xlane.xlu1 %1680 }
 0x78c   : > { %v1683_v27 = vsub.f32 %v1675_v17, %v1681_v20  ;;  %v8294_v17 = vld [vmem:[#allocation32_spill] sm:$0xff]  ;;  %v7145_v20 = vpack.c.bf16 %v2440_v26, %v2439_v23 }
 0x78e   : > { %v1686_v11 = vmul.f32 1.442695, %v1683_v27  ;;  %v2441_v27 = vld [vmem:[%s8140_s4 + $0x10] sm:$0xff] }
 0x790   : > { %5981 = vpow2.f32 %v1686_v11  ;;  %v2442_v11 = vld [vmem:[%s8140_s4 + $0x18] sm:$0xff] }
 0x792   : > { %v5980_v48 = vpop.eup %5979 }
 0x793   : > { %v1688_v25 = vsel %vm643_vm1, %v5980_v48, 0.0 }
 0x794   : > { %1689 = vadd.xlane.f32.xlu0 %v1688_v25  ;;  %v2443_v25 = vld [vmem:[%s8140_s4 + $0x20] sm:$0xff] }
 0x79a   : > { %v5982_v57 = vpop.eup %5981 }
 0x79b   : > { %v1691_v4 = vsel %vm643_vm1, %v5982_v57, 0.0 }
 0x79c   : > { %1692 = vadd.xlane.f32.xlu1 %v1691_v4 }
 0x821   : > { %v1690_v16 = vpop.xlane.xlu0 %1689 }
 0x822   : > { %5983 = vrcp.f32 %v1690_v16  ;;  %v2445_v16 = vld [vmem:[%s8140_s4 + $0x30] sm:$0xff] }
 0x829   : > { %v1693_v59 = vpop.xlane.xlu1 %1692 }
 0x82a   : > { %5985 = vrcp.f32 %v1693_v59  ;;  %v2446_v59 = vld [vmem:[%s8140_s4 + $0x38] sm:$0xff] }
 0x82c   : > { %v5984_v1 = vpop.eup %5983 }
 0x82d   : > { %v1696_v7 = vmul.f32 %v5984_v1, %v5980_v48  ;;  %v7155_v48 = vpack.c.bf16 %v2442_v11, %v2441_v27  ;;  %v7174_v1 = vpack.c.bf16 %v2446_v59, %v2445_v16 }
 0x82f   : > { %4945 = vmatmul.mubr.msk.f32.vlgmr.msra.gmra.mrb[18].mxu1 %vm670_vm2, %v1696_v7  ;;  %v2447_v7 = vld [vmem:[%s8140_s4 + $0x40] sm:$0xff] }
 0x830   : > { %5408 = vmatpush3.bf16.msra.mxu1 %v6415_v12  ;;  %4951 = vmatprep.mubr.msk.f32.mxu1 %vm6065_vm0, %v8239_v13  ;;  %v8272_v12 = vld [vmem:[#allocation10_spill] sm:$0xff] }
 0x831   : > { %5442 = vmatprep.subr.bf16.mxu1 %v6301_v19  ;;  %v8266_v19 = vld [vmem:[#allocation4_spill] sm:$0xff] }
 0x834   : > { %v5986_v3 = vpop.eup %5985 }
 0x835   : > { %v1697_v28 = vmul.f32 %v5986_v3, %v5982_v57  ;;  %v2444_v57 = vld [vmem:[%s8140_s4 + $0x28] sm:$0xff] }
 0x836   : > { %v7164_v4 = vpack.c.bf16 %v2444_v57, %v2443_v25  ;;  %v2448_v3 = vld [vmem:[%s8140_s4 + $0x48] sm:$0xff] }
 0x837   : > { %4952 = vmatmul.mubr.msk.f32.vlgmr.msra.gmra.mrb[20].mxu1 %vm670_vm2, %v1697_v28  ;;  %v7184_v28 = vpack.c.bf16 %v2448_v3, %v2447_v7  ;;  %v2559_v7 = vld [vmem:[%s8138_s2 + $0x8] sm:$0xff] }
 0x838   : > { %5444 = vmatpush1.bf16.msra.mxu1 %v6309_v24  ;;  %2054 = vmatprep.mubr.f32.mxu1 %v8239_v13  ;;  %v8267_v24 = vld [vmem:[#allocation5_spill] sm:$0xff] }
 0x839   : > { %5446 = vmatprep.subr.bf16.mxu1 %v6318_v29  ;;  %v8268_v29 = vld [vmem:[#allocation6_spill] sm:$0xff] }
 0x83c   : > { %5448 = vmatpush1.bf16.msra.mxu1 %v6328_v34  ;;  %v8269_v34 = vld [vmem:[#allocation7_spill] sm:$0xff] }
 0x83d   : > { %5450 = vmatprep.subr.bf16.mxu1 %v6336_v37 }
 0x840   : > { %5452 = vmatpush1.bf16.msra.mxu1 %v6346_v42 }
 0x841   : > { %5454 = vmatprep.subr.bf16.mxu1 %v6354_v46 }
 0x844   : > { %5456 = vmatpush1.bf16.msra.mxu1 %v6364_v49 }
 0x845   : > { %5458 = vmatprep.subr.bf16.mxu1 %v6372_v52 }
 0x848   : > { %5460 = vmatpush1.bf16.msra.mxu1 %v6382_v55 }
 0x849   : > { %5462 = vmatprep.subr.bf16.mxu1 %v6390_v58  ;;  %v8270_v58 = vld [vmem:[#allocation8_spill] sm:$0xff] }
 0x84c   : > { %5464 = vmatpush1.bf16.msra.mxu1 %v6400_v61  ;;  %v8271_v61 = vld [vmem:[#allocation9_spill] sm:$0xff] }
 0x84d   : > { %5466 = vmatprep.subr.bf16.mxu1 %v6547_v41  ;;  %v8273_v41 = vld [vmem:[#allocation11_spill] sm:$0xff] }
 0x850   : > { %5468 = vmatpush1.bf16.msra.mxu1 %v8266_v19  ;;  %v2449_v19 = vld [vmem:[%s8140_s4 + $0x50] sm:$0xff] }
 0x851   : > { %5470 = vmatprep.subr.bf16.mxu1 %v8267_v24  ;;  %v2450_v24 = vld [vmem:[%s8140_s4 + $0x58] sm:$0xff] }
 0x854   : > { %5472 = vmatpush1.bf16.msra.mxu1 %v8268_v29  ;;  %v7194_v29 = vpack.c.bf16 %v2450_v24, %v2449_v19  ;;  %v7249_v19 = vld [vmem:[%s8141_s5] ss:$0 sm:$0xff] }
 0x855   : > { %5506 = vmatprep.subr.bf16.mxu1 %v8269_v34  ;;  %v2451_v34 = vld [vmem:[%s8140_s4 + $0x60] sm:$0xff] }
 0x902   : > { %v1771_v37 = vpop.f32.mrb[18].mxu1 }
 0x903   : > { %v4946_v42 = vpop.f32.mrb[19].mxu1 }
 0x90a   : > { %v1844_v46 = vpop.f32.mrb[20].mxu1 }
 0x90b   : > { %v1916_v49 = vrot.slane %v1844_v46, 7  ;;  %v4953_v52 = vpop.f32.mrb[21].mxu1  ;;  %v2453_v46 = vld [vmem:[%s8140_s4 + $0x70] sm:$0xff] }
 0x90d   : > { %v1917_v55 = vsel %vm885_vm3, %v1916_v49, %v1771_v37  ;;  %v2452_v37 = vld [vmem:[%s8140_s4 + $0x68] sm:$0xff]  ;;  %v2454_v49 = vld [vmem:[%s8140_s4 + $0x78] sm:$0xff] }
 0x90e   : > { %1984 = vmatmul.mubr.f32.vlgmr.msra.gmra.mrb[8].mxu0 %v1917_v55  ;;  %2055 = vmatmul.mubr.f32.vlgmr.msra.gmra.mrb[22].mxu1 %v1917_v55  ;;  %v7204_v42 = vpack.c.bf16 %v2452_v37, %v2451_v34  ;;  %v7214_v52 = vpack.c.bf16 %v2454_v49, %v2453_v46 }
 0x90f   : > { %5476 = vmatpush1.bf16.msra.mxu0 %v8270_v58  ;;  %5508 = vmatpush1.bf16.msra.mxu1 %v8271_v61 }
 0x910   : > { %5478 = vmatprep.subr.bf16.mxu0 %v8272_v12  ;;  %5510 = vmatprep.subr.bf16.mxu1 %v8273_v41 }
 0x911   : > { %2212 = vmatprep.mubr.f32.mxu0 %v8239_v13  ;;  %2283 = vmatprep.mubr.f32.mxu1 %v8239_v13 }
 0x913   : > { %5480 = vmatpush1.bf16.msra.mxu0 %v8274_v33  ;;  %5512 = vmatpush1.bf16.msra.mxu1 %v8275_v9 }
 0x914   : > { %5482 = vmatprep.subr.bf16.mxu0 %v8276_v43  ;;  %5514 = vmatprep.subr.bf16.mxu1 %v8277_v51 }
 0x917   : > { %5484 = vmatpush1.bf16.msra.mxu0 %v8278_v53  ;;  %5516 = vmatpush1.bf16.msra.mxu1 %v8279_v60 }
 0x918   : > { %5486 = vmatprep.subr.bf16.mxu0 %v8280_v62  ;;  %5518 = vmatprep.subr.bf16.mxu1 %v8281_v6 }
 0x91b   : > { %5488 = vmatpush1.bf16.msra.mxu0 %v8282_v10  ;;  %5520 = vmatpush1.bf16.msra.mxu1 %v8283_v31 }
 0x91c   : > { %5490 = vmatprep.subr.bf16.mxu0 %v8284_v21  ;;  %5522 = vmatprep.subr.bf16.mxu1 %v8285_v45  ;;  %v4582_v21 = vld [vmem:[%s6135_s20 + $0x8] sm:$0xff] }
 0x91f   : > { %5492 = vmatpush1.bf16.msra.mxu0 %v8286_v32  ;;  %5524 = vmatpush1.bf16.msra.mxu1 %v8287_v44 }
 0x920   : > { %5494 = vmatprep.subr.bf16.mxu0 %v8288_v54  ;;  %5526 = vmatprep.subr.bf16.mxu1 %v8289_v63 }
 0x923   : > { %5496 = vmatpush1.bf16.msra.mxu0 %v6822_v22  ;;  %5528 = vmatpush1.bf16.msra.mxu1 %v8290_v18  ;;  %v8297_v22 = vld [vmem:[#allocation35_spill] sm:$0xff] }
 0x924   : > { %5498 = vmatprep.subr.bf16.mxu0 %v6834_v2  ;;  %5530 = vmatprep.subr.bf16.mxu1 %v6836_v36  ;;  %v8295_v2 = vld [vmem:[#allocation33_spill] sm:$0xff]  ;;  %v8296_v36 = vld [vmem:[#allocation34_spill] sm:$0xff] }
 0x927   : > { %5500 = vmatpush1.bf16.msra.mxu0 %v6858_v35  ;;  %5532 = vmatpush1.bf16.msra.mxu1 %v6860_v47  ;;  %v8298_v35 = vld [vmem:[#allocation36_spill] sm:$0xff]  ;;  %v8299_v47 = vld [vmem:[#allocation37_spill] sm:$0xff] }
 0x928   : > { %5502 = vmatprep.subr.bf16.mxu0 %v8291_v15  ;;  %5534 = vmatprep.subr.bf16.mxu1 %v8292_v38 }
 0x92b   : > { %5504 = vmatpush1.bf16.msra.mxu0 %v8293_v8  ;;  %5536 = vmatpush1.bf16.msra.mxu1 %v8294_v17 }
 0x92c   : > { %5537 = vmatprep.subr.bf16.mxu0 %v8257_v56  ;;  %5561 = vmatprep.subr.bf16.mxu1 %v8257_v56 }
 0x92e   : > { %2213 = vmatmul.mubr.f32.vlgmr.msra.gmra.mrb[10].mxu0 %v7005_v5  ;;  %2284 = vmatmul.mubr.f32.vlgmr.msra.gmra.mrb[24].mxu1 %v7005_v5  ;;  %v8300_v5 = vld [vmem:[#allocation38_spill] sm:$0xff] }
 0x92f   : > { %5539 = vmatpush3.bf16.msra.mxu0 %v8295_v2  ;;  %4986 = vmatprep.mubr.msk.f32.mxu0 %vm6065_vm0, %v8239_v13 }
 0x930   : > { %5540 = vmatprep.subr.bf16.mxu0 %v8257_v56  ;;  %5021 = vmatprep.mubr.msk.f32.mxu1 %vm6065_vm0, %v8239_v13 }
 0x931   : > { %5563 = vmatpush3.bf16.msra.mxu1 %v7145_v20 }
 0x932   : > { %5564 = vmatprep.subr.bf16.mxu1 %v8257_v56 }
 0x933   : > { %5542 = vmatpush3.bf16.msra.mxu0 %v8296_v36 }
 0x934   : > { %5543 = vmatprep.subr.bf16.mxu0 %v8257_v56 }
 0x935   : > { %5566 = vmatpush3.bf16.msra.mxu1 %v7155_v48 }
 0x936   : > { %5567 = vmatprep.subr.bf16.mxu1 %v8257_v56 }
 0x937   : > { %5545 = vmatpush3.bf16.msra.mxu0 %v8297_v22 }
 0x938   : > { %5546 = vmatprep.subr.bf16.mxu0 %v8257_v56 }
 0x939   : > { %5569 = vmatpush3.bf16.msra.mxu1 %v7164_v4 }
 0x93a   : > { %5570 = vmatprep.subr.bf16.mxu1 %v8257_v56 }
 0x93b   : > { %5548 = vmatpush3.bf16.msra.mxu0 %v8298_v35 }
 0x93c   : > { %5549 = vmatprep.subr.bf16.mxu0 %v8257_v56 }
 0x93d   : > { %5572 = vmatpush3.bf16.msra.mxu1 %v7174_v1 }
 0x93e   : > { %5573 = vmatprep.subr.bf16.mxu1 %v8257_v56 }
 0x93f   : > { %5551 = vmatpush3.bf16.msra.mxu0 %v8299_v47 }
 0x940   : > { %5552 = vmatprep.subr.bf16.mxu0 %v8257_v56 }
 0x941   : > { %5575 = vmatpush3.bf16.msra.mxu1 %v7184_v28 }
 0x942   : > { %5576 = vmatprep.subr.bf16.mxu1 %v8257_v56 }
 0x943   : > { %5554 = vmatpush3.bf16.msra.mxu0 %v8300_v5 }
 0x944   : > { %5555 = vmatprep.subr.bf16.mxu0 %v8257_v56 }
 0x945   : > { %5578 = vmatpush3.bf16.msra.mxu1 %v7194_v29 }
 0x946   : > { %5579 = vmatprep.subr.bf16.mxu1 %v8257_v56 }
 0x947   : > { %5557 = vmatpush3.bf16.msra.mxu0 %v8301_v0 }
 0x948   : > { %5558 = vmatprep.subr.bf16.mxu0 %v8257_v56 }
 0x949   : > { %5581 = vmatpush3.bf16.msra.mxu1 %v7204_v42 }
 0x94a   : > { %5582 = vmatprep.subr.bf16.mxu1 %v8257_v56 }
 0x94b   : > { %5560 = vmatpush3.bf16.msra.mxu0 %v8302_v14 }
 0x94c   : > { %5591 = vmatprep.subr.bf16.mxu0 %v8257_v56 }
 0x94d   : > { %5584 = vmatpush3.bf16.msra.mxu1 %v7214_v52 }
 0x94e   : > { %5585 = vmatprep.subr.bf16.mxu1 %v8257_v56 }
 0x9e1   : > { %v1985_v55 = vpop.f32.mrb[8].mxu0  ;;  %v2056_v58 = vpop.f32.mrb[22].mxu1 }
 0x9e2   : > { %v1987_v61 = vpop.f32.mrb[9].mxu0  ;;  %v2058_v12 = vpop.f32.mrb[23].mxu1 }
 0x9e3   : > { %v2065_v41 = vcombine.low %v1985_v55, %v1987_v61  ;;  %v2066_v33 = vcombine.low %v2056_v58, %v2058_v12  ;;  %v2560_v58 = vld [vmem:[%s8138_s2 + $0x10] sm:$0xff]  ;;  %v2561_v61 = vld [vmem:[%s8138_s2 + $0x18] sm:$0xff] }
 0x9e5   : > { %v2073_v9 = vrot.slane %v2065_v41, %v6995_v50  ;;  %v2080_v43 = vrot.slane %v2066_v33, %v6995_v50  ;;  %v7261_v33 = vpack.c.bf16 %v2561_v61, %v2560_v58 }
 0x9e7   : > { %v2081_v51 = vcombine.low %v2073_v9, %v2080_v43 }
 0x9e9   : > { %v2083_v44 = vadd.f32 %v4582_v21, %v2081_v51  ;;  %v2705_v21 = vld [vmem:[%s8139_s3 + $0x1] sm:$0x1] }
 0xa01   : > { %v2214_v53 = vpop.f32.mrb[10].mxu0  ;;  %v2285_v60 = vpop.f32.mrb[24].mxu1 }
 0xa02   : > { %v2216_v62 = vpop.f32.mrb[11].mxu0  ;;  %v2287_v6 = vpop.f32.mrb[25].mxu1 }
 0xa03   : > { %v2294_v10 = vcombine.low %v2214_v53, %v2216_v62  ;;  %v2295_v31 = vcombine.low %v2285_v60, %v2287_v6  ;;  %v2704_v53 = vld [vmem:[%s8139_s3] sm:$0x1] }
 0xa05   : > { %v2302_v45 = vrot.slane %v2294_v10, %v6995_v50  ;;  %v2309_v32 = vrot.slane %v2295_v31, %v6995_v50 }
 0xa07   : > { %v2310_v54 = vcombine.low %v2302_v45, %v2309_v32 }
 0xa09   : > { %v2312_v63 = vadd.f32 %v2310_v54, %v2083_v44 }
 0xa0b   : > { %v4583_v18 = vmul.f32 -1.442695, %v2312_v63  ;;  %v2320_v15 = vrot.slane %v2312_v63, 2  ;;  %v2331_v8 = vrot.slane %v2312_v63, 6  ;;  %v2328_v36 = vrot.slane %v2312_v63, 4 }
 0xa0d   : > { %5987 = vpow2.f32 %v4583_v18  ;;  %v4584_v38 = vmul.f32 -1.442695, %v2320_v15  ;;  %v4585_v17 = vmul.f32 -1.442695, %v2331_v8 }
 0xa0f   : > { %5989 = vpow2.f32 %v4584_v38 }
 0xa10   : > { %5991 = vpow2.f32 %v4585_v17 }
 0xa17   : > { %v5988_v2 = vpop.eup %5987 }
 0xa18   : > { %v2316_v22 = vadd.f32 1.0, %v5988_v2 }
 0xa19   : > { %v5990_v35 = vpop.eup %5989 }
 0xa1a   : > { %5993 = vrcp.f32 %v2316_v22  ;;  %v2325_v47 = vadd.f32 1.0, %v5990_v35  ;;  %v5992_v5 = vpop.eup %5991 }
 0xa1b   : > { %5995 = vtanh.f32 %v2328_v36  ;;  %v2336_v26 = vadd.f32 1.0, %v5992_v5  ;;  %v2731_v5 = vld [vmem:[%s8137_s1 + $0x8] sm:$0xff] }
 0xa1c   : > { %5997 = vrcp.f32 %v2325_v47  ;;  %v2730_v47 = vld [vmem:[%s8137_s1] sm:$0xff] }
 0xa1d   : > { %5999 = vrcp.f32 %v2336_v26 }
 0xa24   : > { %v5994_v0 = vpop.eup %5993 }
 0xa25   : > { %v5996_v14 = vpop.eup %5995 }
 0xa26   : > { %v5998_v23 = vpop.eup %5997  ;;  %v2340_v11 = vmul.f32 %v5996_v14, %v5994_v0  ;;  %v7287_v0 = vpack.c.bf16 %v2731_v5, %v2730_v47  ;;  %v2732_v14 = vld [vmem:[%s8137_s1 + $0x10] sm:$0xff]  ;;  %v2910_v47 = vld [vmem:[%s8142_s6 + $0xe0] sm:$0xff]  ;;  %v2915_v5 = vld [vmem:[%s8142_s6 + $0x108] sm:$0xff] }
 0xa27   : > { %v2339_v27 = vmul.f32 %v5998_v23, %v7002_v39  ;;  %v6000_v57 = vpop.eup %5999  ;;  %v2558_v39 = vld [vmem:[%s8138_s2] sm:$0xff]  ;;  %v2733_v23 = vld [vmem:[%s8137_s1 + $0x18] sm:$0xff] }
 0xa28   : > { %v7242_v3 = vpack.c.bf16 %v2559_v7, %v2558_v39  ;;  %v7296_v26 = vpack.c.bf16 %v2733_v23, %v2732_v14  ;;  %v2889_v39 = vld [vmem:[%s8142_s6 + $0x38] sm:$0xff]  ;;  %v2919_v14 = vld [vmem:[%s8142_s6 + $0x128] sm:$0xff] }
 0xa29   : > { %v7225_v25 = vadd.f32 %v2340_v11, %v2339_v27  ;;  %v2883_v27 = vld [vmem:[%s8142_s6 + $0x8] sm:$0xff] }
 0xa2a   : > { %v2887_v11 = vld [vmem:[%s8142_s6 + $0x28] sm:$0xff] }
 0xa2b   : > { %6001 = vtanh.f32 %v7225_v25 }
 0xa35   : > { %v6002_v16 = vpop.eup %6001 }
 0xa36   : > { %v7228_v59 = vmul.f32 %v6002_v16, %v6000_v57  ;;  %v2885_v57 = vld [vmem:[%s8142_s6 + $0x18] sm:$0xff]  ;;  %v7308_v16 = vpack.c.bf16 %v2887_v11, %v2883_v27  ;;  %v2900_v27 = vld [vmem:[%s8142_s6 + $0x90] sm:$0xff] }
 0xa37   : > { %v7313_v7 = vpack.c.bf16 %v2889_v39, %v2885_v57  ;;  %v2904_v11 = vld [vmem:[%s8142_s6 + $0xb0] sm:$0xff] }
 0xa38   : > { %4987 = vmatmul.mubr.f32.vlgmr.msra.gmra.mrb[12].mxu0 %v7228_v59  ;;  %5022 = vmatmul.mubr.f32.vlgmr.msra.gmra.mrb[26].mxu1 %v7228_v59 }
 0xa39   : > { %5028 = vmatprep.mubr.msk.f32.mxu1 %vm6065_vm0, %v8239_v13  ;;  %5042 = vmatprep.mubr.msk.f32.mxu0 %vm6065_vm0, %v8239_v13 }
 0xa3a   : > { %5587 = vmatpush3.bf16.xpose.msra.mxu1 %v7242_v3  ;;  %5593 = vmatpush3.bf16.msra.mxu0 %v7287_v0 }
 0xa3b   : > { %5588 = vmatprep.subr.bf16.mxu1 %v8257_v56  ;;  %5598 = vmatprep.subr.bf16.mxu0 %v7308_v16 }
 0xb0b   : > { %v2433_v24 = vpop.f32.mrb[12].mxu0  ;;  %v2528_v34 = vpop.f32.mrb[26].mxu1 }
 0xb0c   : > { %v2434_v37 = vadd.f32 %v7033_v30, %v2433_v24  ;;  %v2529_v46 = vadd.f32 %v7249_v19, %v2528_v34  ;;  %v4988_v49 = vpop.f32.mrb[13].mxu0  ;;  %v5023_v55 = vpop.f32.mrb[27].mxu1 }
 0xb0d   : > { %v2891_v49 = vld [vmem:[%s8142_s6 + $0x48] sm:$0xff] }
 0xb0e   : > { %4587 = vst [vmem:[%s6140_s23 + $0x2] sm:$0x3] %v2434_v37  ;;  %6003 = vtanh.f32 %v2529_v46  ;;  %v2882_v37 = vld [vmem:[%s8142_s6] sm:$0xff]  ;;  %v2895_v55 = vld [vmem:[%s8142_s6 + $0x68] sm:$0xff] }
 0xb0f   : > { %v2886_v46 = vld [vmem:[%s8142_s6 + $0x20] sm:$0xff] }
 0xb10   : > { %v7329_v61 = vpack.c.bf16 %v2886_v46, %v2882_v37  ;;  %v2914_v37 = vld [vmem:[%s8142_s6 + $0x100] sm:$0xff] }
 0xb11   : > { %v2918_v46 = vld [vmem:[%s8142_s6 + $0x120] sm:$0xff] }
 0xb18   : > { %v6004_v12 = vpop.eup %6003 }
 0xb19   : > { %v2540_v41 = vrot.slane %v6004_v12, %v6250_v40 }
 0xb1b   : > { %v2548_v30 = vrot.slane %v2540_v41, %v6250_v40  ;;  %v2541_v9 = vcombine.high %v2540_v41, %v2540_v41  ;;  %v7331_v41 = vpack.c.bf16 %v2895_v55, %v2891_v49  ;;  %v2913_v49 = vld [vmem:[%s8142_s6 + $0xf8] sm:$0xff]  ;;  %v2923_v55 = vld [vmem:[%s8142_s6 + $0x148] sm:$0xff] }
 0xb1d   : > { %5029 = vmatmul.mubr.f32.vlgmr.msra.gmra.mrb[28].mxu1 %v2548_v30  ;;  %v2555_v43 = vrot.slane %v2541_v9, %v6250_v40  ;;  %v2890_v30 = vld [vmem:[%s8142_s6 + $0x40] sm:$0xff] }
 0xb1e   : > { %5590 = vmatpush3.bf16.xpose.msra.mxu1 %v7261_v33  ;;  %5035 = vmatprep.mubr.msk.f32.mxu1 %vm6065_vm0, %v8239_v13  ;;  %v2894_v9 = vld [vmem:[%s8142_s6 + $0x60] sm:$0xff] }
 0xb1f   : > { %5594 = vmatprep.subr.bf16.mxu1 %v8257_v56 }
 0xb25   : > { %5036 = vmatmul.mubr.f32.vlgmr.msra.gmra.mrb[30].mxu1 %v2555_v43  ;;  %v2899_v43 = vld [vmem:[%s8142_s6 + $0x88] sm:$0xff] }
 0xb26   : > { %5049 = vmatprep.mubr.msk.f32.mxu1 %vm6065_vm0, %v8239_v13  ;;  %5596 = vmatpush3.bf16.msra.mxu1 %v7296_v26 }
 0xb27   : > { %5630 = vmatprep.subr.bf16.mxu1 %v7313_v7 }
 0xbf0   : > { %v2628_v51 = vpop.f32.mrb[28].mxu1 }
 0xbf1   : > { %v2702_v60 = vmul.f32 2.0, %v2628_v51  ;;  %v5030_v62 = vpop.f32.mrb[29].mxu1  ;;  %v2903_v51 = vld [vmem:[%s8142_s6 + $0xa8] sm:$0xff] }
 0xbf2   : > { %v7353_v62 = vpack.c.bf16 %v2894_v9, %v2890_v30  ;;  %v2908_v30 = vld [vmem:[%s8142_s6 + $0xd0] sm:$0xff]  ;;  %v7456_v9 = vpack.c.bf16 %v2918_v46, %v2914_v37  ;;  %v2937_v37 = vld [vmem:[%s8142_s6 + $0x1b8] sm:$0xff]  ;;  %v2930_v46 = vld [vmem:[%s8142_s6 + $0x180] sm:$0xff] }
 0xbf3   : > { %v2706_v6 = vadd.f32 %v2704_v53, %v2702_v60  ;;  %v2884_v53 = vld [vmem:[%s8142_s6 + $0x10] sm:$0xff] }
 0xbf4   : > { %v2888_v60 = vld [vmem:[%s8142_s6 + $0x30] sm:$0xff] }
 0xbf5   : > { %v2708_v10 = vsel %vm643_vm1, %v2706_v6, -inf }
 0xbf6   : > { %2709 = vmax.xlane.f32.xlu1 %v2708_v10  ;;  %v7360_v10 = vpack.c.bf16 %v2903_v51, %v2899_v43  ;;  %v2912_v51 = vld [vmem:[%s8142_s6 + $0xf0] sm:$0xff] }
 0xbf8   : > { %v2698_v31 = vpop.f32.mrb[30].mxu1 }
 0xbf9   : > { %v2703_v45 = vmul.f32 2.0, %v2698_v31  ;;  %v5037_v32 = vpop.f32.mrb[31].mxu1  ;;  %v2898_v31 = vld [vmem:[%s8142_s6 + $0x80] sm:$0xff] }
 0xbfa   : > { %v2907_v32 = vld [vmem:[%s8142_s6 + $0xc8] sm:$0xff] }
 0xbfb   : > { %v2707_v44 = vadd.f32 %v2705_v21, %v2703_v45  ;;  %v2902_v21 = vld [vmem:[%s8142_s6 + $0xa0] sm:$0xff]  ;;  %v2897_v45 = vld [vmem:[%s8142_s6 + $0x78] sm:$0xff] }
 0xbfd   : > { %v2711_v54 = vsel %vm643_vm1, %v2707_v44, -inf }
 0xbfe   : > { %2712 = vmax.xlane.f32.xlu0 %v2711_v54 }
 0xc83   : > { %v2710_v63 = vpop.xlane.xlu1 %2709 }
 0xc84   : > { %v2714_v18 = vsub.f32 %v2706_v6, %v2710_v63  ;;  %v2893_v6 = vld [vmem:[%s8142_s6 + $0x58] sm:$0xff]  ;;  %v7377_v63 = vpack.c.bf16 %v2888_v60, %v2884_v53  ;;  %v2922_v60 = vld [vmem:[%s8142_s6 + $0x140] sm:$0xff] }
 0xc86   : > { %v2716_v15 = vmul.f32 1.442695, %v2714_v18  ;;  %v2892_v18 = vld [vmem:[%s8142_s6 + $0x50] sm:$0xff] }
 0xc88   : > { %6005 = vpow2.f32 %v2716_v15  ;;  %v2896_v15 = vld [vmem:[%s8142_s6 + $0x70] sm:$0xff] }
 0xc89   : > { %v7413_v23 = vpack.c.bf16 %v2896_v15, %v2892_v18  ;;  %v2920_v18 = vld [vmem:[%s8142_s6 + $0x130] sm:$0xff]  ;;  %v2925_v15 = vld [vmem:[%s8142_s6 + $0x158] sm:$0xff] }
 0xc8b   : > { %v2713_v38 = vpop.xlane.xlu0 %2712 }
 0xc8c   : > { %v2715_v8 = vsub.f32 %v2707_v44, %v2713_v38  ;;  %v2911_v44 = vld [vmem:[%s8142_s6 + $0xe8] sm:$0xff]  ;;  %v7386_v38 = vpack.c.bf16 %v2902_v21, %v2898_v31  ;;  %v2917_v31 = vld [vmem:[%s8142_s6 + $0x118] sm:$0xff] }
 0xc8d   : > { %v2921_v21 = vld [vmem:[%s8142_s6 + $0x138] sm:$0xff] }
 0xc8e   : > { %v2718_v17 = vmul.f32 1.442695, %v2715_v8 }
 0xc90   : > { %6007 = vpow2.f32 %v2718_v17  ;;  %v7388_v17 = vpack.c.bf16 %v2897_v45, %v2893_v6  ;;  %v2926_v6 = vld [vmem:[%s8142_s6 + $0x160] sm:$0xff]  ;;  %v7480_v45 = vpack.c.bf16 %v2912_v51, %v2908_v30  ;;  %v2932_v30 = vld [vmem:[%s8142_s6 + $0x190] sm:$0xff] }
 0xc91   : > { %v2936_v51 = vld [vmem:[%s8142_s6 + $0x1b0] sm:$0xff] }
 0xc92   : > { %v6006_v2 = vpop.eup %6005 }
 0xc93   : > { %v2720_v36 = vsel %vm643_vm1, %v6006_v2, 0.0 }
 0xc94   : > { %2721 = vadd.xlane.f32.xlu1 %v2720_v36  ;;  %v7394_v36 = vpack.c.bf16 %v2911_v44, %v2907_v32  ;;  %v7483_v32 = vpack.c.bf16 %v2926_v6, %v2922_v60  ;;  %v7486_v44 = vpack.c.bf16 %v2921_v21, %v2917_v31  ;;  %v2939_v60 = vld [vmem:[%s8142_s6 + $0x1c8] sm:$0xff]  ;;  %v7553_v6 = vpack.c.bf16 %v2936_v51, %v2932_v30  ;;  %v2941_v21 = vld [vmem:[%s8142_s6 + $0x1d8] sm:$0xff] }
 0xc95   : > { %v2943_v31 = vld [vmem:[%s8142_s6 + $0x1e8] sm:$0xff]  ;;  %v3123_v51 = vld [vmem:[%s8143_s7 + $0x38] sm:$0xff] }
 0xc96   : > { %8303 = vst [vmem:[#allocation4_spill] sm:$0xff] %v7553_v6 }
 0xc9a   : > { %v6008_v22 = vpop.eup %6007 }
 0xc9b   : > { %v2723_v35 = vsel %vm643_vm1, %v6008_v22, 0.0 }
 0xc9c   : > { %2724 = vadd.xlane.f32.xlu0 %v2723_v35  ;;  %v2906_v35 = vld [vmem:[%s8142_s6 + $0xc0] sm:$0xff] }
 0xc9d   : > { %v7422_v57 = vpack.c.bf16 %v2910_v47, %v2906_v35  ;;  %v2924_v47 = vld [vmem:[%s8142_s6 + $0x150] sm:$0xff] }
 0xd21   : > { %v2722_v24 = vpop.xlane.xlu1 %2721 }
 0xd22   : > { %6009 = vrcp.f32 %v2722_v24  ;;  %v2909_v24 = vld [vmem:[%s8142_s6 + $0xd8] sm:$0xff] }
 0xd23   : > { %v7459_v43 = vpack.c.bf16 %v2913_v49, %v2909_v24  ;;  %v2934_v49 = vld [vmem:[%s8142_s6 + $0x1a0] sm:$0xff] }
 0xd29   : > { %v2725_v34 = vpop.xlane.xlu0 %2724 }
 0xd2a   : > { %6011 = vrcp.f32 %v2725_v34  ;;  %v7431_v34 = vpack.c.bf16 %v2919_v14, %v2915_v5  ;;  %v2931_v14 = vld [vmem:[%s8142_s6 + $0x188] sm:$0xff] }
 0xd2c   : > { %v6010_v58 = vpop.eup %6009 }
 0xd2d   : > { %v2728_v12 = vmul.f32 %v6010_v58, %v6006_v2  ;;  %v2901_v2 = vld [vmem:[%s8142_s6 + $0x98] sm:$0xff]  ;;  %v2927_v58 = vld [vmem:[%s8142_s6 + $0x168] sm:$0xff] }
 0xd2e   : > { %v7465_v53 = vpack.c.bf16 %v2927_v58, %v2923_v55  ;;  %v7541_v58 = vpack.c.bf16 %v2934_v49, %v2930_v46  ;;  %v3121_v46 = vld [vmem:[%s8143_s7 + $0x28] sm:$0xff]  ;;  %v3119_v49 = vld [vmem:[%s8143_s7 + $0x18] sm:$0xff] }
 0xd2f   : > { %5043 = vmatmul.mubr.msk.f32.vlgmr.msra.gmra.mrb[14].mxu0 %vm670_vm2, %v2728_v12  ;;  %v7450_v12 = vpack.c.bf16 %v2904_v11, %v2900_v27  ;;  %v2935_v27 = vld [vmem:[%s8142_s6 + $0x1a8] sm:$0xff]  ;;  %v2933_v11 = vld [vmem:[%s8142_s6 + $0x198] sm:$0xff] }
 0xd30   : > { %5600 = vmatpush1.bf16.msra.mxu0 %v7329_v61  ;;  %3015 = vmatprep.mubr.f32.mxu0 %v8239_v13  ;;  %v7528_v24 = vpack.c.bf16 %v2935_v27, %v2931_v14  ;;  %v7539_v55 = vpack.c.bf16 %v2937_v37, %v2933_v11  ;;  %v2944_v27 = vld [vmem:[%s8142_s6 + $0x1f0] sm:$0xff]  ;;  %v3117_v37 = vld [vmem:[%s8143_s7 + $0x8] sm:$0xff] }
 0xd31   : > { %5602 = vmatprep.subr.bf16.mxu0 %v7331_v41  ;;  %v7600_v30 = vpack.c.bf16 %v3121_v46, %v3117_v37  ;;  %v3129_v37 = vld [vmem:[%s8143_s7 + $0x68] sm:$0xff]  ;;  %v3127_v46 = vld [vmem:[%s8143_s7 + $0x58] sm:$0xff] }
 0xd33   : > { %8308 = vst [vmem:[#allocation9_spill] sm:$0xff] %v7600_v30 }
 0xd34   : > { %v6012_v54 = vpop.eup %6011  ;;  %5604 = vmatpush1.bf16.msra.mxu0 %v7353_v62 }
 0xd35   : > { %v2729_v8 = vmul.f32 %v6012_v54, %v6008_v22  ;;  %5606 = vmatprep.subr.bf16.mxu0 %v7360_v10  ;;  %v2905_v22 = vld [vmem:[%s8142_s6 + $0xb8] sm:$0xff]  ;;  %v2916_v54 = vld [vmem:[%s8142_s6 + $0x110] sm:$0xff] }
 0xd36   : > { %v7425_v39 = vpack.c.bf16 %v2905_v22, %v2901_v2  ;;  %v7502_v2 = vpack.c.bf16 %v2920_v18, %v2916_v54  ;;  %v2928_v22 = vld [vmem:[%s8142_s6 + $0x170] sm:$0xff]  ;;  %v2945_v54 = vld [vmem:[%s8142_s6 + $0x1f8] sm:$0xff]  ;;  %v7566_v18 = vpack.c.bf16 %v2943_v31, %v2939_v60  ;;  %v7605_v60 = vpack.c.bf16 %v3123_v51, %v3119_v49 }
 0xd37   : > { %5050 = vmatmul.mubr.msk.f32.vlgmr.msra.gmra.mrb[32].mxu1 %vm670_vm2, %v2729_v8  ;;  %v2929_v8 = vld [vmem:[%s8142_s6 + $0x178] sm:$0xff]  ;;  %v7515_v5 = vpack.c.bf16 %v2928_v22, %v2924_v47  ;;  %v2942_v47 = vld [vmem:[%s8142_s6 + $0x1e0] sm:$0xff]  ;;  %v2940_v22 = vld [vmem:[%s8142_s6 + $0x1d0] sm:$0xff] }
 0xd38   : > { %5632 = vmatpush1.bf16.msra.mxu1 %v7377_v63  ;;  %5608 = vmatpush1.bf16.msra.mxu0 %v7386_v38  ;;  %v7506_v35 = vpack.c.bf16 %v2929_v8, %v2925_v15  ;;  %8304 = vst [vmem:[#allocation5_spill] sm:$0xff] %v7566_v18  ;;  %v7568_v15 = vpack.c.bf16 %v2945_v54, %v2941_v21  ;;  %v2938_v8 = vld [vmem:[%s8142_s6 + $0x1c0] sm:$0xff]  ;;  %8309 = vst [vmem:[#allocation10_spill] sm:$0xff] %v7605_v60  ;;  %v3131_v49 = vld [vmem:[%s8143_s7 + $0x78] sm:$0xff] }
 0xd39   : > { %5634 = vmatprep.subr.bf16.mxu1 %v7388_v17  ;;  %5610 = vmatprep.subr.bf16.mxu0 %v7394_v36  ;;  %v7582_v14 = vpack.c.bf16 %v2942_v47, %v2938_v8  ;;  %v7587_v11 = vpack.c.bf16 %v2944_v27, %v2940_v22  ;;  %v3116_v54 = vld [vmem:[%s8143_s7] sm:$0xff]  ;;  %v3118_v47 = vld [vmem:[%s8143_s7 + $0x10] sm:$0xff]  ;;  %v3125_v27 = vld [vmem:[%s8143_s7 + $0x48] sm:$0xff] }
 0xd3a   : > { %3086 = vmatprep.mubr.f32.mxu1 %v8239_v13  ;;  %8305 = vst [vmem:[#allocation6_spill] sm:$0xff] %v7568_v15  ;;  %v3120_v8 = vld [vmem:[%s8143_s7 + $0x20] sm:$0xff]  ;;  %v3122_v22 = vld [vmem:[%s8143_s7 + $0x30] sm:$0xff] }
 0xd3b   : > { %8306 = vst [vmem:[#allocation7_spill] sm:$0xff] %v7582_v14  ;;  %8307 = vst [vmem:[#allocation8_spill] sm:$0xff] %v7587_v11 }
 0xd3c   : > { %5636 = vmatpush1.bf16.msra.mxu1 %v7413_v23  ;;  %5612 = vmatpush1.bf16.msra.mxu0 %v7422_v57 }
 0xd3d   : > { %5638 = vmatprep.subr.bf16.mxu1 %v7425_v39  ;;  %5614 = vmatprep.subr.bf16.mxu0 %v7431_v34 }
 0xd40   : > { %5640 = vmatpush1.bf16.msra.mxu1 %v7450_v12  ;;  %5616 = vmatpush1.bf16.msra.mxu0 %v7456_v9 }
 0xd41   : > { %5642 = vmatprep.subr.bf16.mxu1 %v7459_v43  ;;  %5618 = vmatprep.subr.bf16.mxu0 %v7465_v53 }
 0xd44   : > { %5644 = vmatpush1.bf16.msra.mxu1 %v7480_v45  ;;  %5620 = vmatpush1.bf16.msra.mxu0 %v7483_v32 }
 0xd45   : > { %5646 = vmatprep.subr.bf16.mxu1 %v7486_v44  ;;  %5622 = vmatprep.subr.bf16.mxu0 %v7528_v24 }
 0xd48   : > { %5648 = vmatpush1.bf16.msra.mxu1 %v7502_v2  ;;  %5624 = vmatpush1.bf16.msra.mxu0 %v7541_v58 }
 0xd49   : > { %5650 = vmatprep.subr.bf16.mxu1 %v7506_v35  ;;  %5626 = vmatprep.subr.bf16.mxu0 %v7566_v18  ;;  %v7645_v18 = vpack.c.bf16 %v3131_v49, %v3127_v46  ;;  %v3132_v49 = vld [vmem:[%s8143_s7 + $0x80] sm:$0xff] }
 0xd4b   : > { %8312 = vst [vmem:[#allocation13_spill] sm:$0xff] %v7645_v18 }
 0xd4c   : > { %5652 = vmatpush1.bf16.msra.mxu1 %v7515_v5  ;;  %5628 = vmatpush1.bf16.msra.mxu0 %v7582_v14  ;;  %v3124_v14 = vld [vmem:[%s8143_s7 + $0x40] sm:$0xff] }
 0xd4d   : > { %5654 = vmatprep.subr.bf16.mxu1 %v7539_v55  ;;  %5662 = vmatprep.subr.bf16.mxu0 %v7600_v30  ;;  %v7635_v30 = vpack.c.bf16 %v3122_v22, %v3118_v47  ;;  %v3137_v22 = vld [vmem:[%s8143_s7 + $0xa8] sm:$0xff] }
 0xd4f   : > { %8310 = vst [vmem:[#allocation11_spill] sm:$0xff] %v7635_v30 }
 0xd50   : > { %5656 = vmatpush1.bf16.msra.mxu1 %v7553_v6  ;;  %v7643_v6 = vpack.c.bf16 %v3129_v37, %v3125_v27  ;;  %v3135_v27 = vld [vmem:[%s8143_s7 + $0x98] sm:$0xff] }
 0xd51   : > { %5658 = vmatprep.subr.bf16.mxu1 %v7568_v15  ;;  %v3128_v15 = vld [vmem:[%s8143_s7 + $0x60] sm:$0xff]  ;;  %v3139_v37 = vld [vmem:[%s8143_s7 + $0xb8] sm:$0xff] }
 0xd52   : > { %8311 = vst [vmem:[#allocation12_spill] sm:$0xff] %v7643_v6  ;;  %v7668_v46 = vpack.c.bf16 %v3128_v15, %v3124_v14  ;;  %v3134_v15 = vld [vmem:[%s8143_s7 + $0x90] sm:$0xff] }
 0xd53   : > { %v3138_v14 = vld [vmem:[%s8143_s7 + $0xb0] sm:$0xff] }
 0xd54   : > { %5660 = vmatpush1.bf16.msra.mxu1 %v7587_v11  ;;  %v7633_v11 = vpack.c.bf16 %v3120_v8, %v3116_v54  ;;  %v3130_v54 = vld [vmem:[%s8143_s7 + $0x70] sm:$0xff]  ;;  %v3133_v8 = vld [vmem:[%s8143_s7 + $0x88] sm:$0xff]  ;;  %8313 = vst [vmem:[#allocation14_spill] sm:$0xff] %v7668_v46 }
 0xd55   : > { %5694 = vmatprep.subr.bf16.mxu1 %v7605_v60 }
 0xe02   : > { %v2803_v31 = vpop.f32.mrb[14].mxu0 }
 0xe03   : > { %v5044_v21 = vpop.f32.mrb[15].mxu0 }
 0xe0a   : > { %v2876_v51 = vpop.f32.mrb[32].mxu1 }
 0xe0b   : > { %v2948_v21 = vrot.slane %v2876_v51, 7  ;;  %v5051_v60 = vpop.f32.mrb[33].mxu1  ;;  %v3136_v51 = vld [vmem:[%s8143_s7 + $0xa0] sm:$0xff] }
 0xe0c   : > { %v3126_v60 = vld [vmem:[%s8143_s7 + $0x50] sm:$0xff] }
 0xe0d   : > { %v2949_v47 = vsel %vm885_vm3, %v2948_v21, %v2803_v31  ;;  %v7670_v31 = vpack.c.bf16 %v3130_v54, %v3126_v60  ;;  %v7680_v21 = vpack.c.bf16 %v3137_v22, %v3133_v8  ;;  %v3141_v60 = vld [vmem:[%s8143_s7 + $0xc8] sm:$0xff]  ;;  %v3143_v8 = vld [vmem:[%s8143_s7 + $0xd8] sm:$0xff] }
 0xe0e   : > { %3016 = vmatmul.mubr.f32.vlgmr.msra.gmra.mrb[16].mxu0 %v2949_v47  ;;  %3087 = vmatmul.mubr.f32.vlgmr.msra.gmra.mrb[34].mxu1 %v2949_v47  ;;  %v7682_v47 = vpack.c.bf16 %v3139_v37, %v3135_v27  ;;  %v3145_v54 = vld [vmem:[%s8143_s7 + $0xe8] sm:$0xff]  ;;  %v3147_v22 = vld [vmem:[%s8143_s7 + $0xf8] sm:$0xff]  ;;  %v7706_v27 = vpack.c.bf16 %v3136_v51, %v3132_v49  ;;  %v7708_v37 = vpack.c.bf16 %v3138_v14, %v3134_v15  ;;  %v3142_v49 = vld [vmem:[%s8143_s7 + $0xd0] sm:$0xff] }
 0xe0f   : > { %5664 = vmatpush1.bf16.msra.mxu0 %v7633_v11  ;;  %5696 = vmatpush1.bf16.msra.mxu1 %v7635_v30  ;;  %8314 = vst [vmem:[#allocation15_spill] sm:$0xff] %v7670_v31  ;;  %8315 = vst [vmem:[#allocation16_spill] sm:$0xff] %v7680_v21  ;;  %v7718_v30 = vpack.c.bf16 %v3145_v54, %v3141_v60  ;;  %v3146_v51 = vld [vmem:[%s8143_s7 + $0xf0] sm:$0xff]  ;;  %v3149_v15 = vld [vmem:[%s8143_s7 + $0x108] sm:$0xff] }
 0xe10   : > { %5666 = vmatprep.subr.bf16.mxu0 %v7643_v6  ;;  %5698 = vmatprep.subr.bf16.mxu1 %v7645_v18  ;;  %8316 = vst [vmem:[#allocation17_spill] sm:$0xff] %v7682_v47  ;;  %8317 = vst [vmem:[#allocation18_spill] sm:$0xff] %v7706_v27  ;;  %v3140_v18 = vld [vmem:[%s8143_s7 + $0xc0] sm:$0xff]  ;;  %v3153_v14 = vld [vmem:[%s8143_s7 + $0x128] sm:$0xff] }
 0xe11   : > { %3244 = vmatprep.mubr.f32.mxu0 %v8239_v13  ;;  %3315 = vmatprep.mubr.f32.mxu1 %v8239_v13  ;;  %8318 = vst [vmem:[#allocation19_spill] sm:$0xff] %v7708_v37  ;;  %v3144_v6 = vld [vmem:[%s8143_s7 + $0xe0] sm:$0xff]  ;;  %8319 = vst [vmem:[#allocation20_spill] sm:$0xff] %v7718_v30  ;;  %v3151_v60 = vld [vmem:[%s8143_s7 + $0x118] sm:$0xff] }
 0xe12   : > { %v3155_v54 = vld [vmem:[%s8143_s7 + $0x138] sm:$0xff] }
 0xe13   : > { %5668 = vmatpush1.bf16.msra.mxu0 %v7668_v46  ;;  %5700 = vmatpush1.bf16.msra.mxu1 %v7670_v31  ;;  %v7720_v46 = vpack.c.bf16 %v3147_v22, %v3143_v8  ;;  %v7742_v8 = vpack.c.bf16 %v3144_v6, %v3140_v18  ;;  %v7744_v22 = vpack.c.bf16 %v3146_v51, %v3142_v49  ;;  %v3150_v6 = vld [vmem:[%s8143_s7 + $0x110] sm:$0xff]  ;;  %v3157_v49 = vld [vmem:[%s8143_s7 + $0x148] sm:$0xff] }
 0xe14   : > { %5670 = vmatprep.subr.bf16.mxu0 %v7680_v21  ;;  %5702 = vmatprep.subr.bf16.mxu1 %v7682_v47  ;;  %v3148_v47 = vld [vmem:[%s8143_s7 + $0x100] sm:$0xff]  ;;  %v7754_v31 = vpack.c.bf16 %v3153_v14, %v3149_v15  ;;  %v3154_v18 = vld [vmem:[%s8143_s7 + $0x130] sm:$0xff]  ;;  %v3161_v51 = vld [vmem:[%s8143_s7 + $0x168] sm:$0xff] }
 0xe15   : > { %8320 = vst [vmem:[#allocation21_spill] sm:$0xff] %v7720_v46  ;;  %8321 = vst [vmem:[#allocation22_spill] sm:$0xff] %v7742_v8  ;;  %v3152_v21 = vld [vmem:[%s8143_s7 + $0x120] sm:$0xff]  ;;  %v3159_v15 = vld [vmem:[%s8143_s7 + $0x158] sm:$0xff] }
 0xe16   : > { %8322 = vst [vmem:[#allocation23_spill] sm:$0xff] %v7744_v22  ;;  %8323 = vst [vmem:[#allocation24_spill] sm:$0xff] %v7754_v31  ;;  %v3163_v14 = vld [vmem:[%s8143_s7 + $0x178] sm:$0xff] }
 0xe17   : > { %5672 = vmatpush1.bf16.msra.mxu0 %v7706_v27  ;;  %5704 = vmatpush1.bf16.msra.mxu1 %v7708_v37  ;;  %v7756_v27 = vpack.c.bf16 %v3155_v54, %v3151_v60  ;;  %v7778_v60 = vpack.c.bf16 %v3152_v21, %v3148_v47  ;;  %v7780_v54 = vpack.c.bf16 %v3154_v18, %v3150_v6  ;;  %v3158_v21 = vld [vmem:[%s8143_s7 + $0x150] sm:$0xff]  ;;  %v3165_v6 = vld [vmem:[%s8143_s7 + $0x188] sm:$0xff] }
 0xe18   : > { %5674 = vmatprep.subr.bf16.mxu0 %v7718_v30  ;;  %5706 = vmatprep.subr.bf16.mxu1 %v7720_v46  ;;  %v3156_v46 = vld [vmem:[%s8143_s7 + $0x140] sm:$0xff]  ;;  %v7790_v37 = vpack.c.bf16 %v3161_v51, %v3157_v49  ;;  %v3162_v47 = vld [vmem:[%s8143_s7 + $0x170] sm:$0xff]  ;;  %v3169_v18 = vld [vmem:[%s8143_s7 + $0x1a8] sm:$0xff] }
 0xe19   : > { %8324 = vst [vmem:[#allocation25_spill] sm:$0xff] %v7756_v27  ;;  %8325 = vst [vmem:[#allocation26_spill] sm:$0xff] %v7778_v60  ;;  %v3160_v30 = vld [vmem:[%s8143_s7 + $0x160] sm:$0xff]  ;;  %v3167_v49 = vld [vmem:[%s8143_s7 + $0x198] sm:$0xff] }
 0xe1a   : > { %8326 = vst [vmem:[#allocation27_spill] sm:$0xff] %v7780_v54  ;;  %8327 = vst [vmem:[#allocation28_spill] sm:$0xff] %v7790_v37  ;;  %v3171_v51 = vld [vmem:[%s8143_s7 + $0x1b8] sm:$0xff] }
 0xe1b   : > { %5676 = vmatpush1.bf16.msra.mxu0 %v7742_v8  ;;  %5708 = vmatpush1.bf16.msra.mxu1 %v7744_v22  ;;  %v7792_v8 = vpack.c.bf16 %v3163_v14, %v3159_v15  ;;  %v7814_v15 = vpack.c.bf16 %v3160_v30, %v3156_v46  ;;  %v7816_v14 = vpack.c.bf16 %v3162_v47, %v3158_v21  ;;  %v3166_v30 = vld [vmem:[%s8143_s7 + $0x190] sm:$0xff]  ;;  %v3173_v21 = vld [vmem:[%s8143_s7 + $0x1c8] sm:$0xff] }
 0xe1c   : > { %5678 = vmatprep.subr.bf16.mxu0 %v7754_v31  ;;  %5710 = vmatprep.subr.bf16.mxu1 %v7756_v27  ;;  %v3164_v27 = vld [vmem:[%s8143_s7 + $0x180] sm:$0xff]  ;;  %v7826_v22 = vpack.c.bf16 %v3169_v18, %v3165_v6  ;;  %v3170_v46 = vld [vmem:[%s8143_s7 + $0x1b0] sm:$0xff]  ;;  %v3177_v47 = vld [vmem:[%s8143_s7 + $0x1e8] sm:$0xff] }
 0xe1d   : > { %8328 = vst [vmem:[#allocation29_spill] sm:$0xff] %v7792_v8  ;;  %8329 = vst [vmem:[#allocation30_spill] sm:$0xff] %v7816_v14  ;;  %v3168_v31 = vld [vmem:[%s8143_s7 + $0x1a0] sm:$0xff]  ;;  %v3175_v6 = vld [vmem:[%s8143_s7 + $0x1d8] sm:$0xff] }
 0xe1e   : > { %v3179_v18 = vld [vmem:[%s8143_s7 + $0x1f8] sm:$0xff] }
 0xe1f   : > { %5680 = vmatpush1.bf16.msra.mxu0 %v7778_v60  ;;  %5712 = vmatpush1.bf16.msra.mxu1 %v7780_v54  ;;  %v7828_v60 = vpack.c.bf16 %v3171_v51, %v3167_v49  ;;  %v7850_v49 = vpack.c.bf16 %v3168_v31, %v3164_v27  ;;  %v7852_v51 = vpack.c.bf16 %v3170_v46, %v3166_v30  ;;  %v3174_v31 = vld [vmem:[%s8143_s7 + $0x1d0] sm:$0xff] }
 0xe20   : > { %5682 = vmatprep.subr.bf16.mxu0 %v7790_v37  ;;  %5714 = vmatprep.subr.bf16.mxu1 %v7792_v8  ;;  %v3172_v8 = vld [vmem:[%s8143_s7 + $0x1c0] sm:$0xff]  ;;  %v7859_v37 = vpack.c.bf16 %v3177_v47, %v3173_v21  ;;  %v7861_v54 = vpack.c.bf16 %v3179_v18, %v3175_v6  ;;  %v3178_v27 = vld [vmem:[%s8143_s7 + $0x1f0] sm:$0xff]  ;;  %v3385_v6 = vld [vmem:[%s8144_s8 + $0x48] sm:$0xff] }
 0xe21   : > { %v7876_v46 = vpack.c.bf16 %v3178_v27, %v3174_v31  ;;  %v3384_v47 = vld [vmem:[%s8144_s8 + $0x40] sm:$0xff]  ;;  %v3386_v31 = vld [vmem:[%s8144_s8 + $0x50] sm:$0xff]  ;;  %v3387_v27 = vld [vmem:[%s8144_s8 + $0x58] sm:$0xff] }
 0xe22   : > { %8330 = vst [vmem:[#allocation31_spill] sm:$0xff] %v7859_v37  ;;  %8331 = vst [vmem:[#allocation32_spill] sm:$0xff] %v7861_v54  ;;  %v7951_v18 = vpack.c.bf16 %v3385_v6, %v3384_v47 }
 0xe23   : > { %5684 = vmatpush1.bf16.msra.mxu0 %v7814_v15  ;;  %5716 = vmatpush1.bf16.msra.mxu1 %v7816_v14  ;;  %v3176_v14 = vld [vmem:[%s8143_s7 + $0x1e0] sm:$0xff]  ;;  %8333 = vst [vmem:[#allocation34_spill] sm:$0xff] %v7876_v46 }
 0xe24   : > { %5686 = vmatprep.subr.bf16.mxu0 %v7826_v22  ;;  %5718 = vmatprep.subr.bf16.mxu1 %v7828_v60  ;;  %v7874_v30 = vpack.c.bf16 %v3176_v14, %v3172_v8  ;;  %v3382_v8 = vld [vmem:[%s8144_s8 + $0x30] sm:$0xff]  ;;  %v3383_v14 = vld [vmem:[%s8144_s8 + $0x38] sm:$0xff]  ;;  %8338 = vst [vmem:[#allocation39_spill] sm:$0xff] %v7951_v18 }
 0xe25   : > { %v7941_v21 = vpack.c.bf16 %v3383_v14, %v3382_v8 }
 0xe26   : > { %8332 = vst [vmem:[#allocation33_spill] sm:$0xff] %v7874_v30 }
 0xe27   : > { %5688 = vmatpush1.bf16.msra.mxu0 %v7850_v49  ;;  %5720 = vmatpush1.bf16.msra.mxu1 %v7852_v51  ;;  %8337 = vst [vmem:[#allocation38_spill] sm:$0xff] %v7941_v21 }
 0xe28   : > { %5690 = vmatprep.subr.bf16.mxu0 %v7859_v37  ;;  %5722 = vmatprep.subr.bf16.mxu1 %v7861_v54 }
 0xe2b   : > { %5692 = vmatpush1.bf16.msra.mxu0 %v7874_v30  ;;  %5724 = vmatpush1.bf16.msra.mxu1 %v7876_v46 }
 0xe2c   : > { %5725 = vmatprep.subr.bf16.mxu0 %v8257_v56  ;;  %5749 = vmatprep.subr.bf16.mxu1 %v8257_v56 }
 0xe2e   : > { %3245 = vmatmul.mubr.f32.vlgmr.msra.gmra.mrb[18].mxu0 %v7228_v59  ;;  %3316 = vmatmul.mubr.f32.vlgmr.msra.gmra.mrb[36].mxu1 %v7228_v59 }
 0xe2f   : > { %5751 = vmatpush3.bf16.msra.mxu1 %v7145_v20  ;;  %5084 = vmatprep.mubr.msk.f32.mxu0 %vm6065_vm0, %v8239_v13  ;;  %v3376_v20 = vld [vmem:[%s8144_s8] sm:$0xff] }
 0xe30   : > { %5752 = vmatprep.subr.bf16.mxu1 %v8257_v56  ;;  %5119 = vmatprep.mubr.msk.f32.mxu1 %vm6065_vm0, %v8239_v13 }
 0xe33   : > { %5754 = vmatpush3.bf16.msra.mxu1 %v7155_v48  ;;  %v3377_v48 = vld [vmem:[%s8144_s8 + $0x8] sm:$0xff] }
 0xe34   : > { %5755 = vmatprep.subr.bf16.mxu1 %v8257_v56 }
 0xe37   : > { %5757 = vmatpush3.bf16.msra.mxu1 %v7164_v4  ;;  %v7912_v4 = vpack.c.bf16 %v3377_v48, %v3376_v20  ;;  %v7961_v20 = vpack.c.bf16 %v3387_v27, %v3386_v31  ;;  %v3388_v48 = vld [vmem:[%s8144_s8 + $0x60] sm:$0xff] }
 0xe38   : > { %5758 = vmatprep.subr.bf16.mxu1 %v8257_v56 }
 0xe39   : > { %8334 = vst [vmem:[#allocation35_spill] sm:$0xff] %v7912_v4  ;;  %5727 = vmatpush3.bf16.msra.mxu0 %v7912_v4  ;;  %8339 = vst [vmem:[#allocation40_spill] sm:$0xff] %v7961_v20 }
 0xe3a   : > { %5728 = vmatprep.subr.bf16.mxu0 %v8257_v56 }
 0xe3b   : > { %5760 = vmatpush3.bf16.msra.mxu1 %v7174_v1  ;;  %v3378_v1 = vld [vmem:[%s8144_s8 + $0x10] sm:$0xff] }
 0xe3c   : > { %5761 = vmatprep.subr.bf16.mxu1 %v8257_v56 }
 0xe3f   : > { %5763 = vmatpush3.bf16.msra.mxu1 %v7184_v28  ;;  %v3379_v28 = vld [vmem:[%s8144_s8 + $0x18] sm:$0xff] }
 0xe40   : > { %5764 = vmatprep.subr.bf16.mxu1 %v8257_v56 }
 0xe43   : > { %5766 = vmatpush3.bf16.msra.mxu1 %v7194_v29  ;;  %v7922_v29 = vpack.c.bf16 %v3379_v28, %v3378_v1  ;;  %v3389_v1 = vld [vmem:[%s8144_s8 + $0x68] sm:$0xff] }
 0xe44   : > { %5767 = vmatprep.subr.bf16.mxu1 %v8257_v56  ;;  %v7971_v28 = vpack.c.bf16 %v3389_v1, %v3388_v48 }
 0xe45   : > { %8335 = vst [vmem:[#allocation36_spill] sm:$0xff] %v7922_v29  ;;  %5730 = vmatpush3.bf16.msra.mxu0 %v7922_v29  ;;  %v4591_v29 = vld [vmem:[%s6135_s20 + $0x10] sm:$0xff] }
 0xe46   : > { %5731 = vmatprep.subr.bf16.mxu0 %v8257_v56  ;;  %8340 = vst [vmem:[#allocation41_spill] sm:$0xff] %v7971_v28 }
 0xe47   : > { %5769 = vmatpush3.bf16.msra.mxu1 %v7204_v42  ;;  %v3380_v42 = vld [vmem:[%s8144_s8 + $0x20] sm:$0xff] }
 0xe48   : > { %5770 = vmatprep.subr.bf16.mxu1 %v8257_v56 }
 0xe4b   : > { %5772 = vmatpush3.bf16.msra.mxu1 %v7214_v52  ;;  %v3381_v52 = vld [vmem:[%s8144_s8 + $0x28] sm:$0xff] }
 0xe4c   : > { %5776 = vmatprep.subr.bf16.mxu1 %v8257_v56  ;;  %v7931_v59 = vpack.c.bf16 %v3381_v52, %v3380_v42  ;;  %v3390_v42 = vld [vmem:[%s8144_s8 + $0x70] sm:$0xff]  ;;  %v3391_v52 = vld [vmem:[%s8144_s8 + $0x78] sm:$0xff] }
 0xe4d   : > { %v7981_v8 = vpack.c.bf16 %v3391_v52, %v3390_v42 }
 0xe4e   : > { %8336 = vst [vmem:[#allocation37_spill] sm:$0xff] %v7931_v59  ;;  %5733 = vmatpush3.bf16.msra.mxu0 %v7931_v59 }
 0xe4f   : > { %5734 = vmatprep.subr.bf16.mxu0 %v8257_v56  ;;  %8341 = vst [vmem:[#allocation42_spill] sm:$0xff] %v7981_v8 }
 0xe52   : > { %5736 = vmatpush3.bf16.msra.mxu0 %v7941_v21 }
 0xe53   : > { %5737 = vmatprep.subr.bf16.mxu0 %v8257_v56 }
 0xe56   : > { %5739 = vmatpush3.bf16.msra.mxu0 %v7951_v18 }
 0xe57   : > { %5740 = vmatprep.subr.bf16.mxu0 %v8257_v56 }
 0xe5a   : > { %5742 = vmatpush3.bf16.msra.mxu0 %v7961_v20 }
 0xe5b   : > { %5743 = vmatprep.subr.bf16.mxu0 %v8257_v56 }
 0xe5e   : > { %5745 = vmatpush3.bf16.msra.mxu0 %v7971_v28 }
 0xe5f   : > { %5746 = vmatprep.subr.bf16.mxu0 %v8257_v56 }
 0xe62   : > { %5748 = vmatpush3.bf16.msra.mxu0 %v7981_v8 }
 0xe63   : > { %5773 = vmatprep.subr.bf16.mxu0 %v8257_v56 }
 0xee1   : > { %v3017_v14 = vpop.f32.mrb[16].mxu0  ;;  %v3088_v47 = vpop.f32.mrb[34].mxu1 }
 0xee2   : > { %v3019_v6 = vpop.f32.mrb[17].mxu0  ;;  %v3090_v31 = vpop.f32.mrb[35].mxu1 }
 0xee3   : > { %v3097_v27 = vcombine.low %v3017_v14, %v3019_v6  ;;  %v3098_v48 = vcombine.low %v3088_v47, %v3090_v31 }
 0xee5   : > { %v3105_v1 = vrot.slane %v3097_v27, %v6995_v50  ;;  %v3112_v20 = vrot.slane %v3098_v48, %v6995_v50 }
 0xee7   : > { %v3113_v28 = vcombine.low %v3105_v1, %v3112_v20 }
 0xee9   : > { %v3115_v30 = vadd.f32 %v4591_v29, %v3113_v28 }
 0xf01   : > { %v3246_v42 = vpop.f32.mrb[18].mxu0  ;;  %v3317_v52 = vpop.f32.mrb[36].mxu1 }
 0xf02   : > { %v3248_v18 = vpop.f32.mrb[19].mxu0  ;;  %v3319_v21 = vpop.f32.mrb[37].mxu1 }
 0xf03   : > { %v3326_v59 = vcombine.low %v3246_v42, %v3248_v18  ;;  %v3327_v8 = vcombine.low %v3317_v52, %v3319_v21 }
 0xf05   : > { %v3334_v4 = vrot.slane %v3326_v59, %v6995_v50  ;;  %v3341_v46 = vrot.slane %v3327_v8, %v6995_v50 }
 0xf07   : > { %v3342_v54 = vcombine.low %v3334_v4, %v3341_v46 }
 0xf09   : > { %v3344_v14 = vadd.f32 %v3342_v54, %v3115_v30 }
 0xf0b   : > { %v4592_v47 = vmul.f32 -1.442695, %v3344_v14  ;;  %v3352_v6 = vrot.slane %v3344_v14, 2  ;;  %v3363_v20 = vrot.slane %v3344_v14, 6  ;;  %v3360_v1 = vrot.slane %v3344_v14, 4 }
 0xf0d   : > { %6013 = vpow2.f32 %v4592_v47  ;;  %v4593_v31 = vmul.f32 -1.442695, %v3352_v6  ;;  %v4594_v27 = vmul.f32 -1.442695, %v3363_v20 }
 0xf0f   : > { %6015 = vpow2.f32 %v4593_v31 }
 0xf10   : > { %6017 = vpow2.f32 %v4594_v27 }
 0xf17   : > { %v6014_v48 = vpop.eup %6013 }
 0xf18   : > { %v3348_v37 = vadd.f32 1.0, %v6014_v48 }
 0xf19   : > { %v6016_v18 = vpop.eup %6015 }
 0xf1a   : > { %6019 = vrcp.f32 %v3348_v37  ;;  %v3357_v21 = vadd.f32 1.0, %v6016_v18  ;;  %v6018_v59 = vpop.eup %6017 }
 0xf1b   : > { %6021 = vtanh.f32 %v3360_v1  ;;  %v3368_v30 = vadd.f32 1.0, %v6018_v59 }
 0xf1c   : > { %6023 = vrcp.f32 %v3357_v21 }
 0xf1d   : > { %6025 = vrcp.f32 %v3368_v30 }
 0xf24   : > { %v6020_v29 = vpop.eup %6019 }
 0xf25   : > { %v6022_v46 = vpop.eup %6021 }
 0xf26   : > { %v6024_v54 = vpop.eup %6023  ;;  %v3372_v28 = vmul.f32 %v6022_v46, %v6020_v29  ;;  %v3737_v29 = vld [vmem:[%s8139_s3 + $0x1] sm:$0x1] }
 0xf27   : > { %v3371_v4 = vmul.f32 %v6024_v54, %v7225_v25  ;;  %v6026_v42 = vpop.eup %6025  ;;  %v8010_v25 = vld [vmem:[%s8145_s9] ss:$0 sm:$0xff] }
 0xf29   : > { %v7992_v8 = vadd.f32 %v3372_v28, %v3371_v4 }
 0xf2b   : > { %6027 = vtanh.f32 %v7992_v8 }
 0xf35   : > { %v6028_v52 = vpop.eup %6027 }
 0xf36   : > { %v7995_v14 = vmul.f32 %v6028_v52, %v6026_v42 }
 0xf38   : > { %5085 = vmatmul.mubr.f32.vlgmr.msra.gmra.mrb[20].mxu0 %v7995_v14  ;;  %5120 = vmatmul.mubr.f32.vlgmr.msra.gmra.mrb[38].mxu1 %v7995_v14 }
 0xf39   : > { %5775 = vmatpush3.bf16.xpose.msra.mxu0 %v7242_v3  ;;  %5778 = vmatpush3.bf16.xpose.msra.mxu1 %v7261_v33 }
 0xf3a   : > { %5126 = vmatprep.mubr.msk.f32.mxu0 %vm6065_vm0, %v8239_v13  ;;  %5133 = vmatprep.mubr.msk.f32.mxu1 %vm6065_vm0, %v8239_v13 }
 0xf3b   : > { %5779 = vmatprep.subr.bf16.mxu0 %v8257_v56  ;;  %5782 = vmatprep.subr.bf16.mxu1 %v8257_v56 }
0x100b   : > { %v3465_v37 = vpop.f32.mrb[20].mxu0  ;;  %v3560_v47 = vpop.f32.mrb[38].mxu1 }
0x100c   : > { %v3466_v3 = vadd.f32 %v8010_v25, %v3465_v37  ;;  %v3561_v33 = vadd.f32 %v7249_v19, %v3560_v47  ;;  %v5086_v6 = vpop.f32.mrb[21].mxu0  ;;  %v5121_v31 = vpop.f32.mrb[39].mxu1 }
0x100e   : > { %4596 = vst [vmem:[%s6140_s23 + $0x4] sm:$0x3] %v3466_v3  ;;  %6029 = vtanh.f32 %v3561_v33 }
0x1018   : > { %v6030_v20 = vpop.eup %6029 }
0x1019   : > { %v3572_v27 = vrot.slane %v6030_v20, %v6250_v40 }
0x101b   : > { %v3580_v48 = vrot.slane %v3572_v27, %v6250_v40  ;;  %v3573_v1 = vcombine.high %v3572_v27, %v3572_v27 }
0x101d   : > { %5127 = vmatmul.mubr.f32.vlgmr.msra.gmra.mrb[22].mxu0 %v3580_v48  ;;  %v3587_v18 = vrot.slane %v3573_v1, %v6250_v40  ;;  %v3736_v40 = vld [vmem:[%s8139_s3] sm:$0x1] }
0x101e   : > { %5781 = vmatpush3.bf16.msra.mxu0 %v7287_v0  ;;  %5140 = vmatprep.mubr.msk.f32.mxu0 %vm6065_vm0, %v8239_v13 }
0x101f   : > { %5134 = vmatmul.mubr.f32.vlgmr.msra.gmra.mrb[40].mxu1 %v3587_v18  ;;  %5786 = vmatprep.subr.bf16.mxu0 %v7308_v16 }
0x1020   : > { %5784 = vmatpush3.bf16.msra.mxu1 %v7296_v26  ;;  %5147 = vmatprep.mubr.msk.f32.mxu1 %vm6065_vm0, %v8239_v13 }
0x1021   : > { %5818 = vmatprep.subr.bf16.mxu1 %v7313_v7 }
0x10f0   : > { %v3660_v19 = vpop.f32.mrb[22].mxu0 }
0x10f1   : > { %v3734_v21 = vmul.f32 2.0, %v3660_v19  ;;  %v5128_v0 = vpop.f32.mrb[23].mxu0 }
0x10f2   : > { %v3730_v59 = vpop.f32.mrb[40].mxu1  ;;  %v8364_v0 = vld [vmem:[#allocation26_spill] sm:$0xff] }
0x10f3   : > { %v3735_v16 = vmul.f32 2.0, %v3730_v59  ;;  %v5135_v46 = vpop.f32.mrb[41].mxu1  ;;  %v3738_v26 = vadd.f32 %v3736_v40, %v3734_v21  ;;  %v8362_v40 = vld [vmem:[#allocation24_spill] sm:$0xff]  ;;  %v8363_v21 = vld [vmem:[#allocation25_spill] sm:$0xff]  ;;  %v8365_v59 = vld [vmem:[#allocation27_spill] sm:$0xff] }
0x10f4   : > { %v8368_v46 = vld [vmem:[#allocation30_spill] sm:$0xff] }
0x10f5   : > { %v3740_v54 = vsel %vm643_vm1, %v3738_v26, -inf  ;;  %v3739_v30 = vadd.f32 %v3737_v29, %v3735_v16  ;;  %v8366_v29 = vld [vmem:[#allocation28_spill] sm:$0xff]  ;;  %v8367_v16 = vld [vmem:[#allocation29_spill] sm:$0xff] }
0x10f6   : > { %3741 = vmax.xlane.f32.xlu1 %v3740_v54  ;;  %v8370_v54 = vld [vmem:[#allocation32_spill] sm:$0xff] }
0x10f7   : > { %v3743_v7 = vsel %vm643_vm1, %v3739_v30, -inf }
0x10f8   : > { %3744 = vmax.xlane.f32.xlu0 %v3743_v7  ;;  %v8372_v7 = vld [vmem:[#allocation34_spill] sm:$0xff] }
0x1183   : > { %v3742_v4 = vpop.xlane.xlu1 %3741 }
0x1184   : > { %v3746_v28 = vsub.f32 %v3738_v26, %v3742_v4  ;;  %v8369_v26 = vld [vmem:[#allocation31_spill] sm:$0xff]  ;;  %v8380_v4 = vld [vmem:[#allocation42_spill] sm:$0xff] }
0x1185   : > { %v3745_v42 = vpop.xlane.xlu0 %3744 }
0x1186   : > { %v3748_v52 = vmul.f32 1.442695, %v3746_v28  ;;  %v3747_v37 = vsub.f32 %v3739_v30, %v3745_v42  ;;  %v8371_v30 = vld [vmem:[#allocation33_spill] sm:$0xff] }
0x1188   : > { %6031 = vpow2.f32 %v3748_v52  ;;  %v3750_v47 = vmul.f32 1.442695, %v3747_v37 }
0x118a   : > { %6033 = vpow2.f32 %v3750_v47 }
0x1192   : > { %v6032_v3 = vpop.eup %6031 }
0x1193   : > { %v3752_v33 = vsel %vm643_vm1, %v6032_v3, 0.0 }
0x1194   : > { %v6034_v6 = vpop.eup %6033  ;;  %3753 = vadd.xlane.f32.xlu1 %v3752_v33 }
0x1195   : > { %v3755_v31 = vsel %vm643_vm1, %v6034_v6, 0.0 }
0x1196   : > { %3756 = vadd.xlane.f32.xlu0 %v3755_v31 }
0x1221   : > { %v3754_v20 = vpop.xlane.xlu1 %3753 }
0x1222   : > { %6035 = vrcp.f32 %v3754_v20 }
0x1223   : > { %v3757_v27 = vpop.xlane.xlu0 %3756 }
0x1224   : > { %6037 = vrcp.f32 %v3757_v27 }
0x122c   : > { %v6036_v48 = vpop.eup %6035 }
0x122d   : > { %v3760_v1 = vmul.f32 %v6036_v48, %v6032_v3 }
0x122e   : > { %v6038_v18 = vpop.eup %6037 }
0x122f   : > { %v3761_v19 = vmul.f32 %v6038_v18, %v6034_v6  ;;  %5141 = vmatmul.mubr.msk.f32.vlgmr.msra.gmra.mrb[24].mxu0 %vm670_vm2, %v3760_v1 }
0x1230   : > { %5788 = vmatpush1.bf16.msra.mxu0 %v7329_v61  ;;  %4047 = vmatprep.mubr.f32.mxu0 %v8239_v13  ;;  %v8342_v61 = vld [vmem:[#allocation5_spill] sm:$0xff] }
0x1231   : > { %5148 = vmatmul.mubr.msk.f32.vlgmr.msra.gmra.mrb[42].mxu1 %vm670_vm2, %v3761_v19  ;;  %5790 = vmatprep.subr.bf16.mxu0 %v7331_v41  ;;  %v8343_v41 = vld [vmem:[#allocation4_spill] sm:$0xff]  ;;  %v4600_v19 = vld [vmem:[%s6135_s20 + $0x18] sm:$0xff] }
0x1232   : > { %5820 = vmatpush1.bf16.msra.mxu1 %v7377_v63  ;;  %4118 = vmatprep.mubr.f32.mxu1 %v8239_v13  ;;  %v8346_v63 = vld [vmem:[#allocation9_spill] sm:$0xff] }
0x1233   : > { %5822 = vmatprep.subr.bf16.mxu1 %v7388_v17  ;;  %v8348_v17 = vld [vmem:[#allocation10_spill] sm:$0xff] }
0x1234   : > { %5792 = vmatpush1.bf16.msra.mxu0 %v7353_v62  ;;  %v8344_v62 = vld [vmem:[#allocation6_spill] sm:$0xff] }
0x1235   : > { %5794 = vmatprep.subr.bf16.mxu0 %v7360_v10  ;;  %v8345_v10 = vld [vmem:[#allocation7_spill] sm:$0xff] }
0x1236   : > { %5824 = vmatpush1.bf16.msra.mxu1 %v7413_v23 }
0x1237   : > { %5826 = vmatprep.subr.bf16.mxu1 %v7425_v39 }
0x1238   : > { %5796 = vmatpush1.bf16.msra.mxu0 %v7386_v38  ;;  %v8347_v38 = vld [vmem:[#allocation8_spill] sm:$0xff] }
0x1239   : > { %5798 = vmatprep.subr.bf16.mxu0 %v7394_v36 }
0x123a   : > { %5828 = vmatpush1.bf16.msra.mxu1 %v7450_v12 }
0x123b   : > { %5830 = vmatprep.subr.bf16.mxu1 %v7459_v43  ;;  %v8350_v43 = vld [vmem:[#allocation12_spill] sm:$0xff] }
0x123c   : > { %5800 = vmatpush1.bf16.msra.mxu0 %v7422_v57 }
0x123d   : > { %5802 = vmatprep.subr.bf16.mxu0 %v7431_v34 }
0x123e   : > { %5832 = vmatpush1.bf16.msra.mxu1 %v7480_v45  ;;  %v8352_v45 = vld [vmem:[#allocation14_spill] sm:$0xff] }
0x123f   : > { %5834 = vmatprep.subr.bf16.mxu1 %v7486_v44  ;;  %v8354_v44 = vld [vmem:[#allocation16_spill] sm:$0xff] }
0x1240   : > { %5804 = vmatpush1.bf16.msra.mxu0 %v7456_v9  ;;  %v8349_v9 = vld [vmem:[#allocation11_spill] sm:$0xff] }
0x1241   : > { %5806 = vmatprep.subr.bf16.mxu0 %v7465_v53  ;;  %v8351_v53 = vld [vmem:[#allocation13_spill] sm:$0xff] }
0x1242   : > { %5836 = vmatpush1.bf16.msra.mxu1 %v7502_v2  ;;  %v8355_v2 = vld [vmem:[#allocation17_spill] sm:$0xff] }
0x1243   : > { %5838 = vmatprep.subr.bf16.mxu1 %v7506_v35  ;;  %v8356_v35 = vld [vmem:[#allocation18_spill] sm:$0xff] }
0x1244   : > { %5808 = vmatpush1.bf16.msra.mxu0 %v7483_v32  ;;  %v8353_v32 = vld [vmem:[#allocation15_spill] sm:$0xff] }
0x1245   : > { %5810 = vmatprep.subr.bf16.mxu0 %v7528_v24  ;;  %v8358_v24 = vld [vmem:[#allocation20_spill] sm:$0xff] }
0x1246   : > { %5840 = vmatpush1.bf16.msra.mxu1 %v7515_v5  ;;  %v8357_v5 = vld [vmem:[#allocation19_spill] sm:$0xff] }
0x1247   : > { %5842 = vmatprep.subr.bf16.mxu1 %v7539_v55  ;;  %v8359_v55 = vld [vmem:[#allocation21_spill] sm:$0xff] }
0x1248   : > { %5812 = vmatpush1.bf16.msra.mxu0 %v7541_v58  ;;  %v8360_v58 = vld [vmem:[#allocation22_spill] sm:$0xff] }
0x1249   : > { %5814 = vmatprep.subr.bf16.mxu0 %v8342_v61 }
0x124a   : > { %5844 = vmatpush1.bf16.msra.mxu1 %v8343_v41 }
0x124b   : > { %5846 = vmatprep.subr.bf16.mxu1 %v8344_v62 }
0x124c   : > { %5816 = vmatpush1.bf16.msra.mxu0 %v8345_v10 }
0x124d   : > { %5850 = vmatprep.subr.bf16.mxu0 %v8346_v63 }
0x124e   : > { %5848 = vmatpush1.bf16.msra.mxu1 %v8347_v38 }
0x124f   : > { %5882 = vmatprep.subr.bf16.mxu1 %v8348_v17 }
0x1302   : > { %v3835_v36 = vpop.f32.mrb[24].mxu0 }
0x1303   : > { %v5142_v23 = vpop.f32.mrb[25].mxu0 }
0x1304   : > { %v3908_v57 = vpop.f32.mrb[42].mxu1 }
0x1305   : > { %v3980_v39 = vrot.slane %v3908_v57, 7  ;;  %v5149_v34 = vpop.f32.mrb[43].mxu1 }
0x1307   : > { %v3981_v12 = vsel %vm885_vm3, %v3980_v39, %v3835_v36 }
0x1308   : > { %4048 = vmatmul.mubr.f32.vlgmr.msra.gmra.mrb[26].mxu0 %v3981_v12  ;;  %4119 = vmatmul.mubr.f32.vlgmr.msra.gmra.mrb[44].mxu1 %v3981_v12 }
0x1309   : > { %5852 = vmatpush1.bf16.msra.mxu0 %v7633_v11  ;;  %5884 = vmatpush1.bf16.msra.mxu1 %v8349_v9  ;;  %v8361_v11 = vld [vmem:[#allocation23_spill] sm:$0xff] }
0x130a   : > { %5854 = vmatprep.subr.bf16.mxu0 %v8350_v43  ;;  %5886 = vmatprep.subr.bf16.mxu1 %v8351_v53 }
0x130b   : > { %4276 = vmatprep.mubr.f32.mxu0 %v8239_v13  ;;  %4347 = vmatprep.mubr.f32.mxu1 %v8239_v13 }
0x130d   : > { %5856 = vmatpush1.bf16.msra.mxu0 %v8352_v45  ;;  %5888 = vmatpush1.bf16.msra.mxu1 %v8353_v32 }
0x130e   : > { %5858 = vmatprep.subr.bf16.mxu0 %v8354_v44  ;;  %5890 = vmatprep.subr.bf16.mxu1 %v8355_v2 }
0x1311   : > { %5860 = vmatpush1.bf16.msra.mxu0 %v8356_v35  ;;  %5892 = vmatpush1.bf16.msra.mxu1 %v8357_v5 }
0x1312   : > { %5862 = vmatprep.subr.bf16.mxu0 %v8358_v24  ;;  %5894 = vmatprep.subr.bf16.mxu1 %v8359_v55 }
0x1315   : > { %5864 = vmatpush1.bf16.msra.mxu0 %v8360_v58  ;;  %5896 = vmatpush1.bf16.msra.mxu1 %v8361_v11 }
0x1316   : > { %5866 = vmatprep.subr.bf16.mxu0 %v8362_v40  ;;  %5898 = vmatprep.subr.bf16.mxu1 %v8363_v21 }
0x1319   : > { %5868 = vmatpush1.bf16.msra.mxu0 %v8364_v0  ;;  %5900 = vmatpush1.bf16.msra.mxu1 %v8365_v59 }
0x131a   : > { %5870 = vmatprep.subr.bf16.mxu0 %v8366_v29  ;;  %5902 = vmatprep.subr.bf16.mxu1 %v8367_v16 }
0x131d   : > { %5872 = vmatpush1.bf16.msra.mxu0 %v7814_v15  ;;  %5904 = vmatpush1.bf16.msra.mxu1 %v8368_v46  ;;  %v8375_v15 = vld [vmem:[#allocation37_spill] sm:$0xff] }
0x131e   : > { %5874 = vmatprep.subr.bf16.mxu0 %v7826_v22  ;;  %5906 = vmatprep.subr.bf16.mxu1 %v7828_v60  ;;  %v8373_v22 = vld [vmem:[#allocation35_spill] sm:$0xff]  ;;  %v8374_v60 = vld [vmem:[#allocation36_spill] sm:$0xff] }
0x1321   : > { %5876 = vmatpush1.bf16.msra.mxu0 %v7850_v49  ;;  %5908 = vmatpush1.bf16.msra.mxu1 %v7852_v51  ;;  %v8376_v49 = vld [vmem:[#allocation38_spill] sm:$0xff]  ;;  %v8377_v51 = vld [vmem:[#allocation39_spill] sm:$0xff] }
0x1322   : > { %5878 = vmatprep.subr.bf16.mxu0 %v8369_v26  ;;  %5910 = vmatprep.subr.bf16.mxu1 %v8370_v54 }
0x1325   : > { %5880 = vmatpush1.bf16.msra.mxu0 %v8371_v30  ;;  %5912 = vmatpush1.bf16.msra.mxu1 %v8372_v7 }
0x1326   : > { %5913 = vmatprep.subr.bf16.mxu0 %v8257_v56 }
0x1328   : > { %4277 = vmatmul.mubr.f32.vlgmr.msra.gmra.mrb[28].mxu0 %v7995_v14  ;;  %4348 = vmatmul.mubr.f32.vlgmr.msra.gmra.mrb[46].mxu1 %v7995_v14  ;;  %v8378_v14 = vld [vmem:[#allocation40_spill] sm:$0xff] }
0x1329   : > { %5915 = vmatpush3.bf16.msra.mxu0 %v8373_v22  ;;  %5182 = vmatprep.mubr.msk.f32.mxu0 %vm6065_vm0, %v8239_v13  ;;  %v8379_v13 = vld [vmem:[#allocation41_spill] sm:$0xff] }
0x132a   : > { %5916 = vmatprep.subr.bf16.mxu0 %v8257_v56 }
0x132d   : > { %5918 = vmatpush3.bf16.msra.mxu0 %v8374_v60 }
0x132e   : > { %5919 = vmatprep.subr.bf16.mxu0 %v8257_v56 }
0x1331   : > { %5921 = vmatpush3.bf16.msra.mxu0 %v8375_v15 }
0x1332   : > { %5922 = vmatprep.subr.bf16.mxu0 %v8257_v56 }
0x1335   : > { %5924 = vmatpush3.bf16.msra.mxu0 %v8376_v49 }
0x1336   : > { %5925 = vmatprep.subr.bf16.mxu0 %v8257_v56 }
0x1339   : > { %5927 = vmatpush3.bf16.msra.mxu0 %v8377_v51 }
0x133a   : > { %5928 = vmatprep.subr.bf16.mxu0 %v8257_v56 }
0x133d   : > { %5930 = vmatpush3.bf16.msra.mxu0 %v8378_v14 }
0x133e   : > { %5931 = vmatprep.subr.bf16.mxu0 %v8257_v56 }
0x1341   : > { %5933 = vmatpush3.bf16.msra.mxu0 %v8379_v13 }
0x1342   : > { %5934 = vmatprep.subr.bf16.mxu0 %v8257_v56 }
0x1345   : > { %5936 = vmatpush3.bf16.msra.mxu0 %v8380_v4 }
0x13db   : > { %v4049_v28 = vpop.f32.mrb[26].mxu0  ;;  %v4120_v42 = vpop.f32.mrb[44].mxu1 }
0x13dc   : > { %v4051_v52 = vpop.f32.mrb[27].mxu0  ;;  %v4122_v37 = vpop.f32.mrb[45].mxu1 }
0x13dd   : > { %v4129_v47 = vcombine.low %v4049_v28, %v4051_v52  ;;  %v4130_v3 = vcombine.low %v4120_v42, %v4122_v37 }
0x13df   : > { %v4137_v33 = vrot.slane %v4129_v47, %v6995_v50  ;;  %v4144_v6 = vrot.slane %v4130_v3, %v6995_v50 }
0x13e1   : > { %v4145_v31 = vcombine.low %v4137_v33, %v4144_v6 }
0x13e3   : > { %v4147_v62 = vadd.f32 %v4600_v19, %v4145_v31 }
0x13fb   : > { %v4278_v20 = vpop.f32.mrb[28].mxu0  ;;  %v4349_v27 = vpop.f32.mrb[46].mxu1 }
0x13fc   : > { %v4280_v48 = vpop.f32.mrb[29].mxu0  ;;  %v4351_v1 = vpop.f32.mrb[47].mxu1 }
0x13fd   : > { %v4358_v18 = vcombine.low %v4278_v20, %v4280_v48  ;;  %v4359_v56 = vcombine.low %v4349_v27, %v4351_v1 }
0x13ff   : > { %v4366_v61 = vrot.slane %v4358_v18, %v6995_v50  ;;  %v4373_v41 = vrot.slane %v4359_v56, %v6995_v50 }
0x1401   : > { %v4374_v10 = vcombine.low %v4366_v61, %v4373_v41 }
0x1403   : > { %v4376_v63 = vadd.f32 %v4374_v10, %v4147_v62 }
0x1405   : > { %v4601_v38 = vmul.f32 -1.442695, %v4376_v63  ;;  %v4384_v17 = vrot.slane %v4376_v63, 2  ;;  %v4395_v23 = vrot.slane %v4376_v63, 6  ;;  %v4392_v34 = vrot.slane %v4376_v63, 4 }
0x1407   : > { %6039 = vpow2.f32 %v4601_v38  ;;  %v4602_v36 = vmul.f32 -1.442695, %v4384_v17  ;;  %v4603_v57 = vmul.f32 -1.442695, %v4395_v23 }
0x1409   : > { %6041 = vpow2.f32 %v4602_v36 }
0x140a   : > { %6043 = vpow2.f32 %v4603_v57 }
0x1411   : > { %v6040_v39 = vpop.eup %6039 }
0x1412   : > { %v4380_v12 = vadd.f32 1.0, %v6040_v39 }
0x1413   : > { %v6042_v9 = vpop.eup %6041 }
0x1414   : > { %6045 = vrcp.f32 %v4380_v12  ;;  %v4389_v43 = vadd.f32 1.0, %v6042_v9  ;;  %v6044_v50 = vpop.eup %6043 }
0x1415   : > { %6047 = vtanh.f32 %v4392_v34  ;;  %v4400_v44 = vadd.f32 1.0, %v6044_v50 }
0x1416   : > { %6049 = vrcp.f32 %v4389_v43 }
0x1417   : > { %6051 = vrcp.f32 %v4400_v44 }
0x141e   : > { %v6046_v53 = vpop.eup %6045 }
0x141f   : > { %v6048_v45 = vpop.eup %6047 }
0x1420   : > { %v6050_v32 = vpop.eup %6049  ;;  %v4404_v35 = vmul.f32 %v6048_v45, %v6046_v53 }
0x1421   : > { %v4403_v2 = vmul.f32 %v6050_v32, %v7992_v8  ;;  %v6052_v24 = vpop.eup %6051 }
0x1423   : > { %v4405_v5 = vadd.f32 %v4404_v35, %v4403_v2 }
0x1425   : > { %6053 = vtanh.f32 %v4405_v5  ;;  %4504 = vst [vmem:[#allocation3] sm:$0x3] %v4405_v5 }
0x142f   : > { %v6054_v55 = vpop.eup %6053 }
0x1430   : > { %v4407_v58 = vmul.f32 %v6054_v55, %v6052_v24 }
0x1432   : > { %5183 = vmatmul.mubr.f32.vlgmr.msra.gmra.mrb[30].mxu0 %v4407_v58  ;;  %4503 = vst [vmem:[#allocation2] sm:$0x3] %v4407_v58 }
0x1505   : > { %v4497_v11 = vpop.f32.mrb[30].mxu0 }
0x1506   : > { %v4498_v40 = vadd.f32 %v8010_v25, %v4497_v11  ;;  %v5184_v21 = vpop.f32.mrb[31].mxu0 }
0x1508   : > { %4605 = vst [vmem:[%s6140_s23 + $0x6] sm:$0x3] %v4498_v40 }
0x1509 PF: > { %s20_s13 = sadd.s32 1, %s6061_s13  }
0x150a   : > { %p17_p5 = scmp.ge.s32.totalorder %s20_s13, 4  }
0x150c   :  { %19 = sbr.rel (!%p17_p5) target bundleno = 1 (0x1), region = 100 }

</bundles_post_ra>
